<compile_context>
chip_gen: v7x
topology: tpu7x:2x2x1
jax: 0.10.0
libtpu: 0.0.40
codegen_flags: <defaults>
</compile_context>

<pallas_src>
import functools

import numpy as np
import jax
import jax.numpy as jnp
from jax.experimental import pallas as pl
from jax.experimental.pallas import tpu as pltpu

LEAKY = 0.01      # nn.LeakyReLU default negative_slope
EPS = 1e-5        # InstanceNorm2d / BatchNorm2d default eps
P = 81            # 9x9 board
ROW_BLOCK = 8     # batch rows per grid step (one sublane tile)
LANE = 128


def _rup(x, m):
    return ((x + m - 1) // m) * m


# ------------------------------- fused kernel -------------------------------

def _fused_kernel(x_ref, gm_ref, gmt_ref, a_ref, b1_ref, b_ref, b2_ref,
                  r_ref, rb_ref, s_ref, sb_ref, o_ref):
    """Entire SolverLayer forward for one 8-row batch block, VMEM resident.

    Activation layout: [rows = batch, lanes = flattened features], zero padded
    to 128-lane multiples so every contraction dim is tile aligned.
    """
    dot = functools.partial(jnp.dot, preferred_element_type=jnp.float32)
    x = x_ref[...]                                     # [8, D_IN]  raw x, cols = (c, h, w)

    # InstanceNorm2d: per-(n, c) stats over 81 pixels via matmuls with a constant
    # one-hot channel-grouping matrix (no in-kernel reshape / transpose needed).
    gm = gm_ref[...]
    inv_p = 1.0 / float(P)
    mean = dot(x, gm) * inv_p
    msq = dot(x * x, gm) * inv_p
    rstd = jax.lax.rsqrt(msq - mean * mean + EPS)
    gmt = gmt_ref[...]
    xn = (x - dot(mean, gmt)) * dot(rstd, gmt)

    # All 3 branch Conv2d + BatchNorm + ReLU as ONE matmul (BN scale folded into A).
    y1 = jnp.maximum(dot(xn, a_ref[...]) + b1_ref[...], 0.0)          # [8, D_J1]

    # All 3 branch ConvTranspose2d + BatchNorm + Dropout + ReLU as ONE matmul.
    # TODO(synk): Dropout / BatchNorm reproduced in eval mode only (identity /
    # folded running stats); training-mode behavior is not reproduced.
    cb = jnp.maximum(dot(y1, b_ref[...]) + b2_ref[...], 0.0)          # [8, D_J2] "combined"

    # Reduce: (3x3 pad-1 conv) composed with (1x1 conv) -> one matmul, then LeakyReLU.
    red = dot(cb, r_ref[...]) + rb_ref[...]
    red = jnp.where(red >= 0.0, red, LEAKY * red)

    # Residual skip (1x1 conv / identity, on the un-normalized x) + final LeakyReLU.
    y = red + dot(x, s_ref[...]) + sb_ref[...]
    o_ref[...] = jnp.where(y >= 0.0, y, LEAKY * y)                    # [8, D_OUT]


# ------------------------------ parameter setup ------------------------------

def _uniform(key, shape, bound):
    return jax.random.uniform(key, shape, jnp.float32, -bound, bound)


def _conv_init(key, out_c, in_c, kh, kw):
    k1, k2 = jax.random.split(key)
    bound = 1.0 / float(in_c * kh * kw) ** 0.5
    return _uniform(k1, (out_c, in_c, kh, kw), bound), _uniform(k2, (out_c,), bound)


def _convT_init(key, in_c, out_c, kh, kw):
    k1, k2 = jax.random.split(key)
    bound = 1.0 / float(out_c * kh * kw) ** 0.5
    # PyTorch ConvTranspose2d weight layout: [in_c, out_c, kh, kw]
    return _uniform(k1, (in_c, out_c, kh, kw), bound), _uniform(k2, (out_c,), bound)


def _bn_init(key, c):
    k1, k2, k3, k4 = jax.random.split(key, 4)
    gamma = jax.random.uniform(k1, (c,), jnp.float32, 0.8, 1.2)
    beta = _uniform(k2, (c,), 0.1)
    mean = _uniform(k3, (c,), 0.1)
    var = jax.random.uniform(k4, (c,), jnp.float32, 0.5, 1.5)
    return gamma, beta, mean, var


def make_raw_params(key, in_f, hid_f, out_f):
    """Un-fused parameters mirroring the PyTorch module (eval-mode BN stats)."""
    oc9 = hid_f * 9
    nh = hid_f * 3
    ks = jax.random.split(key, 6)
    raw = {"dims": (in_f, hid_f, out_f)}
    if in_f != out_f:
        w, b = _conv_init(ks[0], out_f, in_f, 1, 1)
        raw["skip"] = (w.reshape(out_f, in_f), b)
    else:
        raw["skip"] = None       # nn.Identity

    def dep(k, kh, kw):
        k1, k2, k3, k4 = jax.random.split(k, 4)
        w1, b1 = _conv_init(k1, oc9, in_f, kh, kw)
        bn1 = _bn_init(k2, oc9)
        wt, bt = _convT_init(k3, oc9, hid_f, kh, kw)
        bn2 = _bn_init(k4, hid_f)
        return dict(w1=w1, b1=b1, bn1=bn1, wt=wt, bt=bt, bn2=bn2)

    raw["hor"] = dep(ks[1], 9, 1)
    raw["ver"] = dep(ks[2], 1, 9)
    raw["quad"] = dep(ks[3], 3, 3)
    w3, b3 = _conv_init(ks[4], nh, nh, 3, 3)
    w4, b4 = _conv_init(ks[5], out_f, nh, 1, 1)
    raw["reduce3"] = (w3, b3)
    raw["reduce1"] = (w4.reshape(out_f, nh), b4)
    return raw


def _fold_bn(bn, conv_bias):
    gamma, beta, mean, var = (np.asarray(t, np.float32) for t in bn)
    s = gamma / np.sqrt(var + EPS)
    return s, s * (np.asarray(conv_bias, np.float32) - mean) + beta


def pack_params(raw):
    """Builds the fused, expanded, lane-padded constants consumed by the kernel."""
    in_f, hid_f, out_f = raw["dims"]
    oc9 = hid_f * 9
    nh = hid_f * 3
    d_in, j1, j2, d_out = in_f * P, 3 * 9 * oc9, P * nh, out_f * P
    D_IN, D_ST = _rup(d_in, LANE), _rup(in_f, LANE)
    D_J1, D_J2, D_OUT = _rup(j1, LANE), _rup(j2, LANE), _rup(d_out, LANE)
    np32 = lambda t: np.asarray(t, np.float32)

    branches = []
    for name in ("hor", "ver", "quad"):
        d = raw[name]
        s1, b1f = _fold_bn(d["bn1"], d["b1"])
        s2, b2f = _fold_bn(d["bn2"], d["bt"])
        branches.append((np32(d["w1"]), s1, b1f, np32(d["wt"]), s2, b2f))

    def sel(bi, h, w):
        # (branch spatial index s, conv-kernel spatial index) for board pixel (h, w)
        if bi == 0:
            return w, (h, 0)                                  # horizontal (9,1)
        if bi == 1:
            return h, (0, w)                                  # vertical (1,9)
        return (h // 3) * 3 + (w // 3), (h % 3, w % 3)        # quadrant (3,3) stride 3

    # Stage 1: all three branch convs (+ folded BN1 scale) as one matrix.
    # Rows = (c, h, w); cols = (branch, s, oc).
    A = np.zeros((d_in, j1), np.float32)
    bias1 = np.zeros((j1,), np.float32)
    for bi, (w1, s1, b1f, _, _, _) in enumerate(branches):
        base = bi * 9 * oc9
        bias1[base:base + 9 * oc9] = np.tile(b1f, 9)
        for h in range(9):
            for w in range(9):
                s, (kh, kw) = sel(bi, h, w)
                r = h * 9 + w
                A[r::P, base + s * oc9: base + (s + 1) * oc9] = \
                    w1[:, :, kh, kw].T * s1[None, :]

    # Stage 2: all three branch transposed convs (+ folded BN2 scale) as one matrix.
    # Rows = (branch, s, ic); cols = (pixel p, [hor|ver|quad] channel).
    B = np.zeros((j1, j2), np.float32)
    bias2 = np.tile(np.concatenate([br[5] for br in branches]), P)
    for bi, (_, _, _, wt, s2, _) in enumerate(branches):
        rbase, cbase = bi * 9 * oc9, bi * hid_f
        for h in range(9):
            for w in range(9):
                s, (kh, kw) = sel(bi, h, w)
                p = h * 9 + w
                B[rbase + s * oc9: rbase + (s + 1) * oc9,
                  p * nh + cbase: p * nh + cbase + hid_f] = wt[:, :, kh, kw] * s2[None, :]

    # Stage 3: Reduce = 1x1 conv o 3x3 pad-1 conv composed into one matrix.
    # Rows = (pixel p_in, combined channel); cols = (out channel o, pixel p_out).
    w3, b3 = np32(raw["reduce3"][0]), np32(raw["reduce3"][1])
    w4, b4 = np32(raw["reduce1"][0]), np32(raw["reduce1"][1])
    wr = np.einsum("om,mcij->ocij", w4, w3)
    R = np.zeros((j2, d_out), np.float32)
    for oh in range(9):
        for ow in range(9):
            po = oh * 9 + ow
            for kh in range(3):
                for kw in range(3):
                    h, w = oh + kh - 1, ow + kw - 1
                    if 0 <= h < 9 and 0 <= w < 9:
                        pi = h * 9 + w
                        R[pi * nh:(pi + 1) * nh, po::P] = wr[:, :, kh, kw].T
    bias_r = np.repeat(b4 + w4 @ b3, P)

    # Skip path: 1x1 conv (or identity) as a block-diagonal matrix.
    if raw["skip"] is None:
        wS, bS = np.eye(out_f, dtype=np.float32), np.zeros((out_f,), np.float32)
    else:
        wS, bS = np32(raw["skip"][0]), np32(raw["skip"][1])
    S = np.einsum("oc,pq->cpoq", wS, np.eye(P, dtype=np.float32)).reshape(d_in, d_out)
    bias_s = np.repeat(bS, P)

    # InstanceNorm channel-grouping one-hot (for per-(n,c) mean/var via matmul).
    G = np.zeros((d_in, in_f), np.float32)
    for c in range(in_f):
        G[c * P:(c + 1) * P, c] = 1.0

    def pad2(a, rows, cols):
        out = np.zeros((rows, cols), np.float32)
        out[:a.shape[0], :a.shape[1]] = a
        return jnp.asarray(out)

    def padrow(v, cols):
        out = np.zeros((1, cols), np.float32)
        out[0, :v.shape[0]] = v
        return jnp.asarray(out)

    packed = dict(
        gm=pad2(G, D_IN, D_ST), gmt=pad2(G.T, D_ST, D_IN),
        a=pad2(A, D_IN, D_J1), b1=padrow(bias1, D_J1),
        b=pad2(B, D_J1, D_J2), b2=padrow(bias2, D_J2),
        r=pad2(R, D_J2, D_OUT), rb=padrow(bias_r, D_OUT),
        s=pad2(S, D_IN, D_OUT), sb=padrow(bias_s, D_OUT),
    )
    meta = dict(in_f=in_f, out_f=out_f, d_in=d_in, D_IN=D_IN, D_OUT=D_OUT)
    return packed, meta


# -------------------------------- forward pass --------------------------------

def solver_layer_forward(packed, meta, x):
    n, c, hh, ww = x.shape
    assert (hh, ww) == (9, 9) and c == meta["in_f"], "SolverLayer requires a 9x9 board"
    d_in, D_IN, D_OUT, out_f = meta["d_in"], meta["D_IN"], meta["D_OUT"], meta["out_f"]
    n_pad = _rup(n, ROW_BLOCK)
    # NCHW -> [batch rows, (c, h, w) lanes], zero padded to the tile-aligned sizes.
    x2 = jnp.pad(x.reshape(n, d_in), ((0, n_pad - n), (0, D_IN - d_in)))

    weight_names = ("gm", "gmt", "a", "b1", "b", "b2", "r", "rb", "s", "sb")
    weights = [packed[k] for k in weight_names]
    w_specs = [pl.BlockSpec(w.shape, lambda i: (0, 0)) for w in weights]

    out = pl.pallas_call(
        _fused_kernel,
        out_shape=jax.ShapeDtypeStruct((n_pad, D_OUT), jnp.float32),
        grid=(n_pad // ROW_BLOCK,),
        in_specs=[pl.BlockSpec((ROW_BLOCK, D_IN), lambda i: (i, 0))] + w_specs,
        out_specs=pl.BlockSpec((ROW_BLOCK, D_OUT), lambda i: (i, 0)),
        compiler_params=pltpu.CompilerParams(
            dimension_semantics=("parallel",),            # batch blocks -> v7x 2 TCs
            vmem_limit_bytes=64 * 1024 * 1024),
    )(x2, *weights)
    # Output columns are (out channel, h, w): a free reshape gives NCHW.
    return out[:n, :out_f * P].reshape(n, out_f, 9, 9)


# --------------------------- plain-JAX reference ---------------------------

def _leaky(x):
    return jnp.where(x >= 0.0, x, LEAKY * x)


def _bn_eval(z, bn, nd):
    gamma, beta, mean, var = bn
    shape = (1, -1) + (1,) * nd
    s = gamma / jnp.sqrt(var + EPS)
    return (z - mean.reshape(shape)) * s.reshape(shape) + beta.reshape(shape)


def reference_forward(raw, x):
    """Direct (non-Pallas) port of the PyTorch module in eval mode."""
    hi = jax.lax.Precision.HIGHEST
    in_f, hid_f, out_f = raw["dims"]
    n = x.shape[0]
    if raw["skip"] is None:
        skip = x
    else:
        wS, bS = raw["skip"]
        skip = jnp.einsum("oc,nchw->nohw", wS, x, precision=hi) + bS[None, :, None, None]
    mu = x.mean(axis=(2, 3), keepdims=True)
    var = ((x - mu) ** 2).mean(axis=(2, 3), keepdims=True)
    xn = (x - mu) * jax.lax.rsqrt(var + EPS)

    def dep(d, mode):
        w1, b1, wt, bt = d["w1"], d["b1"], d["wt"], d["bt"]
        if mode == "hor":
            y = jnp.einsum("och,nchw->now", w1[:, :, :, 0], xn, precision=hi) + b1[None, :, None]
            y = jnp.maximum(_bn_eval(y, d["bn1"], 1), 0.0)
            z = jnp.einsum("ich,niw->nchw", wt[:, :, :, 0], y, precision=hi) + bt[None, :, None, None]
        elif mode == "ver":
            y = jnp.einsum("ocw,nchw->noh", w1[:, :, 0, :], xn, precision=hi) + b1[None, :, None]
            y = jnp.maximum(_bn_eval(y, d["bn1"], 1), 0.0)
            z = jnp.einsum("icw,nih->nchw", wt[:, :, 0, :], y, precision=hi) + bt[None, :, None, None]
        else:
            xr = xn.reshape(n, in_f, 3, 3, 3, 3)
            y = jnp.einsum("ocij,ncxiyj->noxy", w1, xr, precision=hi) + b1[None, :, None, None]
            y = jnp.maximum(_bn_eval(y, d["bn1"], 2), 0.0)
            z = jnp.einsum("icab,nixy->ncxayb", wt, y, precision=hi).reshape(n, hid_f, 9, 9)
            z = z + bt[None, :, None, None]
        return jnp.maximum(_bn_eval(z, d["bn2"], 2), 0.0)   # Dropout: eval-mode identity

    combined = jnp.concatenate(
        [dep(raw["hor"], "hor"), dep(raw["ver"], "ver"), dep(raw["quad"], "quad")], axis=1)
    w3, b3 = raw["reduce3"]
    z = jax.lax.conv_general_dilated(combined, w3, (1, 1), "SAME",
                                     dimension_numbers=("NCHW", "OIHW", "NCHW"),
                                     precision=hi) + b3[None, :, None, None]
    w4, b4 = raw["reduce1"]
    z = jnp.einsum("oc,nchw->nohw", w4, z, precision=hi) + b4[None, :, None, None]
    return _leaky(_leaky(z) + skip)


if __name__ == "__main__":
    key = jax.random.PRNGKey(0)
    k_param, k_x = jax.random.split(key)
    in_f, hid_f, out_f = 4, 4, 8
    N, H, W = 2, 9, 9   # 9x9 board required by the (9,1)/(1,9)/(3,3 stride 3) convs
    raw = make_raw_params(k_param, in_f, hid_f, out_f)
    packed, meta = pack_params(raw)
    x = jax.random.normal(k_x, (N, in_f, H, W), jnp.float32)

    fwd = jax.jit(functools.partial(solver_layer_forward, packed, meta))
    out = fwd(x)
    jax.block_until_ready(out)
    assert out.shape == (N, out_f, H, W) and out.dtype == jnp.float32

    ref = reference_forward(raw, x)
    err = float(jnp.max(jnp.abs(out - ref)))
    assert err < 2e-3, f"kernel/reference mismatch: max abs err = {err}"
    print("KERNEL_OK")
</pallas_src>

<mosaic_0001>
module attributes {stable_mosaic.version = 11 : i64} {
  func.func @_fused_kernel(%arg0: i32, %arg1: memref<8x384xf32, #tpu.memory_space<vmem>>, %arg2: memref<384x128xf32, #tpu.memory_space<vmem>>, %arg3: memref<128x384xf32, #tpu.memory_space<vmem>>, %arg4: memref<384x1024xf32, #tpu.memory_space<vmem>>, %arg5: memref<1x1024xf32, #tpu.memory_space<vmem>>, %arg6: memref<1024x1024xf32, #tpu.memory_space<vmem>>, %arg7: memref<1x1024xf32, #tpu.memory_space<vmem>>, %arg8: memref<1024x768xf32, #tpu.memory_space<vmem>>, %arg9: memref<1x768xf32, #tpu.memory_space<vmem>>, %arg10: memref<384x768xf32, #tpu.memory_space<vmem>>, %arg11: memref<1x768xf32, #tpu.memory_space<vmem>>, %arg12: memref<8x768xf32, #tpu.memory_space<vmem>>) attributes {dimension_semantics = [#tpu.dimension_semantics<parallel>], iteration_bounds = array<i64: 1>, scalar_prefetch = 0 : i64, scratch_operands = 0 : i64, tpu.core_type = #tpu.core_type<tc>, window_params = [{transform_indices = @transform_0, window_bounds = array<i64: 8, 384>}, {pipeline_mode = #tpu.pipeline_mode<synchronous>, transform_indices = @transform_1, window_bounds = array<i64: 384, 128>}, {pipeline_mode = #tpu.pipeline_mode<synchronous>, transform_indices = @transform_2, window_bounds = array<i64: 128, 384>}, {pipeline_mode = #tpu.pipeline_mode<synchronous>, transform_indices = @transform_3, window_bounds = array<i64: 384, 1024>}, {pipeline_mode = #tpu.pipeline_mode<synchronous>, transform_indices = @transform_4, window_bounds = array<i64: 1, 1024>}, {pipeline_mode = #tpu.pipeline_mode<synchronous>, transform_indices = @transform_5, window_bounds = array<i64: 1024, 1024>}, {pipeline_mode = #tpu.pipeline_mode<synchronous>, transform_indices = @transform_6, window_bounds = array<i64: 1, 1024>}, {pipeline_mode = #tpu.pipeline_mode<synchronous>, transform_indices = @transform_7, window_bounds = array<i64: 1024, 768>}, {pipeline_mode = #tpu.pipeline_mode<synchronous>, transform_indices = @transform_8, window_bounds = array<i64: 1, 768>}, {pipeline_mode = #tpu.pipeline_mode<synchronous>, transform_indices = @transform_9, window_bounds = array<i64: 384, 768>}, {pipeline_mode = #tpu.pipeline_mode<synchronous>, transform_indices = @transform_10, window_bounds = array<i64: 1, 768>}, {transform_indices = @transform_11, window_bounds = array<i64: 8, 768>}]} {
    %c0 = arith.constant 0 : index
    %c0_0 = arith.constant 0 : index
    %0 = vector.load %arg1[%c0, %c0_0] : memref<8x384xf32, #tpu.memory_space<vmem>>, vector<8x384xf32>
    %c0_1 = arith.constant 0 : index
    %c0_2 = arith.constant 0 : index
    %1 = vector.load %arg2[%c0_1, %c0_2] : memref<384x128xf32, #tpu.memory_space<vmem>>, vector<384x128xf32>
    %cst = arith.constant dense<0.000000e+00> : vector<8x128xf32>
    %2 = tpu.matmul %0, %1, %cst {dimension_numbers = #tpu.dot_dimension_numbers<[1], [0], [0], [1], [0, 0, 1, 1], [], []>} : vector<8x384xf32>, vector<384x128xf32>, vector<8x128xf32> -> vector<8x128xf32>
    %cst_3 = arith.constant 0.0123456791 : f32
    %3 = vector.broadcast %cst_3 : f32 to vector<8x128xf32>
    %4 = arith.mulf %2, %3 : vector<8x128xf32>
    %5 = arith.mulf %0, %0 : vector<8x384xf32>
    %cst_4 = arith.constant dense<0.000000e+00> : vector<8x128xf32>
    %6 = tpu.matmul %5, %1, %cst_4 {dimension_numbers = #tpu.dot_dimension_numbers<[1], [0], [0], [1], [0, 0, 1, 1], [], []>} : vector<8x384xf32>, vector<384x128xf32>, vector<8x128xf32> -> vector<8x128xf32>
    %cst_5 = arith.constant 0.0123456791 : f32
    %7 = vector.broadcast %cst_5 : f32 to vector<8x128xf32>
    %8 = arith.mulf %6, %7 : vector<8x128xf32>
    %9 = arith.mulf %4, %4 : vector<8x128xf32>
    %10 = arith.subf %8, %9 : vector<8x128xf32>
    %cst_6 = arith.constant 9.99999974E-6 : f32
    %11 = vector.broadcast %cst_6 : f32 to vector<8x128xf32>
    %12 = arith.addf %10, %11 : vector<8x128xf32>
    %13 = math.rsqrt %12 : vector<8x128xf32>
    %c0_7 = arith.constant 0 : index
    %c0_8 = arith.constant 0 : index
    %14 = vector.load %arg3[%c0_7, %c0_8] : memref<128x384xf32, #tpu.memory_space<vmem>>, vector<128x384xf32>
    %cst_9 = arith.constant dense<0.000000e+00> : vector<8x384xf32>
    %15 = tpu.matmul %4, %14, %cst_9 {dimension_numbers = #tpu.dot_dimension_numbers<[1], [0], [0], [1], [0, 0, 1, 1], [], []>} : vector<8x128xf32>, vector<128x384xf32>, vector<8x384xf32> -> vector<8x384xf32>
    %16 = arith.subf %0, %15 : vector<8x384xf32>
    %cst_10 = arith.constant dense<0.000000e+00> : vector<8x384xf32>
    %17 = tpu.matmul %13, %14, %cst_10 {dimension_numbers = #tpu.dot_dimension_numbers<[1], [0], [0], [1], [0, 0, 1, 1], [], []>} : vector<8x128xf32>, vector<128x384xf32>, vector<8x384xf32> -> vector<8x384xf32>
    %18 = arith.mulf %16, %17 : vector<8x384xf32>
    %c0_11 = arith.constant 0 : index
    %c0_12 = arith.constant 0 : index
    %19 = vector.load %arg4[%c0_11, %c0_12] : memref<384x1024xf32, #tpu.memory_space<vmem>>, vector<384x1024xf32>
    %cst_13 = arith.constant dense<0.000000e+00> : vector<8x1024xf32>
    %20 = tpu.matmul %18, %19, %cst_13 {dimension_numbers = #tpu.dot_dimension_numbers<[1], [0], [0], [1], [0, 0, 1, 1], [], []>} : vector<8x384xf32>, vector<384x1024xf32>, vector<8x1024xf32> -> vector<8x1024xf32>
    %c0_14 = arith.constant 0 : index
    %c0_15 = arith.constant 0 : index
    %21 = vector.load %arg5[%c0_14, %c0_15] : memref<1x1024xf32, #tpu.memory_space<vmem>>, vector<1x1024xf32>
    %22 = vector.broadcast %21 : vector<1x1024xf32> to vector<8x1024xf32>
    %23 = arith.addf %20, %22 : vector<8x1024xf32>
    %cst_16 = arith.constant 0.000000e+00 : f32
    %24 = vector.broadcast %cst_16 : f32 to vector<8x1024xf32>
    %25 = arith.maximumf %23, %24 : vector<8x1024xf32>
    %c0_17 = arith.constant 0 : index
    %c0_18 = arith.constant 0 : index
    %26 = vector.load %arg6[%c0_17, %c0_18] : memref<1024x1024xf32, #tpu.memory_space<vmem>>, vector<1024x1024xf32>
    %cst_19 = arith.constant dense<0.000000e+00> : vector<8x1024xf32>
    %27 = tpu.matmul %25, %26, %cst_19 {dimension_numbers = #tpu.dot_dimension_numbers<[1], [0], [0], [1], [0, 0, 1, 1], [], []>} : vector<8x1024xf32>, vector<1024x1024xf32>, vector<8x1024xf32> -> vector<8x1024xf32>
    %c0_20 = arith.constant 0 : index
    %c0_21 = arith.constant 0 : index
    %28 = vector.load %arg7[%c0_20, %c0_21] : memref<1x1024xf32, #tpu.memory_space<vmem>>, vector<1x1024xf32>
    %29 = vector.broadcast %28 : vector<1x1024xf32> to vector<8x1024xf32>
    %30 = arith.addf %27, %29 : vector<8x1024xf32>
    %cst_22 = arith.constant 0.000000e+00 : f32
    %31 = vector.broadcast %cst_22 : f32 to vector<8x1024xf32>
    %32 = arith.maximumf %30, %31 : vector<8x1024xf32>
    %c0_23 = arith.constant 0 : index
    %c0_24 = arith.constant 0 : index
    %33 = vector.load %arg8[%c0_23, %c0_24] : memref<1024x768xf32, #tpu.memory_space<vmem>>, vector<1024x768xf32>
    %cst_25 = arith.constant dense<0.000000e+00> : vector<8x768xf32>
    %34 = tpu.matmul %32, %33, %cst_25 {dimension_numbers = #tpu.dot_dimension_numbers<[1], [0], [0], [1], [0, 0, 1, 1], [], []>} : vector<8x1024xf32>, vector<1024x768xf32>, vector<8x768xf32> -> vector<8x768xf32>
    %c0_26 = arith.constant 0 : index
    %c0_27 = arith.constant 0 : index
    %35 = vector.load %arg9[%c0_26, %c0_27] : memref<1x768xf32, #tpu.memory_space<vmem>>, vector<1x768xf32>
    %36 = vector.broadcast %35 : vector<1x768xf32> to vector<8x768xf32>
    %37 = arith.addf %34, %36 : vector<8x768xf32>
    %cst_28 = arith.constant 0.000000e+00 : f32
    %38 = vector.broadcast %cst_28 : f32 to vector<8x768xf32>
    %39 = arith.cmpf oge, %37, %38 : vector<8x768xf32>
    %cst_29 = arith.constant 0.00999999977 : f32
    %40 = vector.broadcast %cst_29 : f32 to vector<8x768xf32>
    %41 = arith.mulf %40, %37 : vector<8x768xf32>
    %42 = arith.select %39, %37, %41 : vector<8x768xi1>, vector<8x768xf32>
    %c0_30 = arith.constant 0 : index
    %c0_31 = arith.constant 0 : index
    %43 = vector.load %arg10[%c0_30, %c0_31] : memref<384x768xf32, #tpu.memory_space<vmem>>, vector<384x768xf32>
    %cst_32 = arith.constant dense<0.000000e+00> : vector<8x768xf32>
    %44 = tpu.matmul %0, %43, %cst_32 {dimension_numbers = #tpu.dot_dimension_numbers<[1], [0], [0], [1], [0, 0, 1, 1], [], []>} : vector<8x384xf32>, vector<384x768xf32>, vector<8x768xf32> -> vector<8x768xf32>
    %45 = arith.addf %42, %44 : vector<8x768xf32>
    %c0_33 = arith.constant 0 : index
    %c0_34 = arith.constant 0 : index
    %46 = vector.load %arg11[%c0_33, %c0_34] : memref<1x768xf32, #tpu.memory_space<vmem>>, vector<1x768xf32>
    %47 = vector.broadcast %46 : vector<1x768xf32> to vector<8x768xf32>
    %48 = arith.addf %45, %47 : vector<8x768xf32>
    %cst_35 = arith.constant 0.000000e+00 : f32
    %49 = vector.broadcast %cst_35 : f32 to vector<8x768xf32>
    %50 = arith.cmpf oge, %48, %49 : vector<8x768xf32>
    %cst_36 = arith.constant 0.00999999977 : f32
    %51 = vector.broadcast %cst_36 : f32 to vector<8x768xf32>
    %52 = arith.mulf %51, %48 : vector<8x768xf32>
    %53 = arith.select %50, %48, %52 : vector<8x768xi1>, vector<8x768xf32>
    %c0_37 = arith.constant 0 : index
    %c0_38 = arith.constant 0 : index
    %54 = vector.load %arg12[%c0_37, %c0_38] : memref<8x768xf32, #tpu.memory_space<vmem>>, vector<8x768xf32>
    tpu.vector_store %arg12[%c0_37, %c0_38], %53 {strides = array<i32>} : memref<8x768xf32, #tpu.memory_space<vmem>>, vector<8x768xf32>,
    return
  }
  func.func @transform_0(%arg0: i32) -> (i32, i32) {
    %c0_i32 = arith.constant 0 : i32
    %c0_i32_0 = arith.constant 0 : i32
    return %arg0, %c0_i32 : i32, i32
  }
  func.func @transform_1(%arg0: i32) -> (i32, i32) {
    %c0_i32 = arith.constant 0 : i32
    %c0_i32_0 = arith.constant 0 : i32
    %c0_i32_1 = arith.constant 0 : i32
    return %c0_i32, %c0_i32_0 : i32, i32
  }
  func.func @transform_2(%arg0: i32) -> (i32, i32) {
    %c0_i32 = arith.constant 0 : i32
    %c0_i32_0 = arith.constant 0 : i32
    %c0_i32_1 = arith.constant 0 : i32
    return %c0_i32, %c0_i32_0 : i32, i32
  }
  func.func @transform_3(%arg0: i32) -> (i32, i32) {
    %c0_i32 = arith.constant 0 : i32
    %c0_i32_0 = arith.constant 0 : i32
    %c0_i32_1 = arith.constant 0 : i32
    return %c0_i32, %c0_i32_0 : i32, i32
  }
  func.func @transform_4(%arg0: i32) -> (i32, i32) {
    %c0_i32 = arith.constant 0 : i32
    %c0_i32_0 = arith.constant 0 : i32
    %c0_i32_1 = arith.constant 0 : i32
    return %c0_i32, %c0_i32_0 : i32, i32
  }
  func.func @transform_5(%arg0: i32) -> (i32, i32) {
    %c0_i32 = arith.constant 0 : i32
    %c0_i32_0 = arith.constant 0 : i32
    %c0_i32_1 = arith.constant 0 : i32
    return %c0_i32, %c0_i32_0 : i32, i32
  }
  func.func @transform_6(%arg0: i32) -> (i32, i32) {
    %c0_i32 = arith.constant 0 : i32
    %c0_i32_0 = arith.constant 0 : i32
    %c0_i32_1 = arith.constant 0 : i32
    return %c0_i32, %c0_i32_0 : i32, i32
  }
  func.func @transform_7(%arg0: i32) -> (i32, i32) {
    %c0_i32 = arith.constant 0 : i32
    %c0_i32_0 = arith.constant 0 : i32
    %c0_i32_1 = arith.constant 0 : i32
    return %c0_i32, %c0_i32_0 : i32, i32
  }
  func.func @transform_8(%arg0: i32) -> (i32, i32) {
    %c0_i32 = arith.constant 0 : i32
    %c0_i32_0 = arith.constant 0 : i32
    %c0_i32_1 = arith.constant 0 : i32
    return %c0_i32, %c0_i32_0 : i32, i32
  }
  func.func @transform_9(%arg0: i32) -> (i32, i32) {
    %c0_i32 = arith.constant 0 : i32
    %c0_i32_0 = arith.constant 0 : i32
    %c0_i32_1 = arith.constant 0 : i32
    return %c0_i32, %c0_i32_0 : i32, i32
  }
  func.func @transform_10(%arg0: i32) -> (i32, i32) {
    %c0_i32 = arith.constant 0 : i32
    %c0_i32_0 = arith.constant 0 : i32
    %c0_i32_1 = arith.constant 0 : i32
    return %c0_i32, %c0_i32_0 : i32, i32
  }
  func.func @transform_11(%arg0: i32) -> (i32, i32) {
    %c0_i32 = arith.constant 0 : i32
    %c0_i32_0 = arith.constant 0 : i32
    return %arg0, %c0_i32 : i32, i32
  }
}

</mosaic_0001>

<bundles_post_ra>
// kernel: solver_layer_forward.1
= control target key start
LH: loop header
LB: loop body
LE: loop exit
PB: predicated region body
PF: predicated region fallthrough
CT: control target
= control target key end

     0   :  { %16 = vsyncpa [#allocation3], 0  ;;  %s10572_s0 = inlined_call_operand.hbm [shape: f32[8,384], index: 0, kind: input, shape index: {}]   ;;  %s10573_s1 = inlined_call_operand.hbm [shape: f32[384,128], index: 1, kind: input, shape index: {}]   ;;  %s10574_s2 = inlined_call_operand.hbm [shape: f32[128,384], index: 2, kind: input, shape index: {}]   ;;  %s10575_s3 = inlined_call_operand.hbm [shape: f32[384,1024], index: 3, kind: input, shape index: {}]   ;;  %s10576_s4 = inlined_call_operand.hbm [shape: f32[1,1024], index: 4, kind: input, shape index: {}]   ;;  %s10577_s5 = inlined_call_operand.hbm [shape: f32[1024,1024], index: 5, kind: input, shape index: {}]   ;;  %s10578_s6 = inlined_call_operand.hbm [shape: f32[1,1024], index: 6, kind: input, shape index: {}]   ;;  %s10579_s7 = inlined_call_operand.hbm [shape: f32[1024,768], index: 7, kind: input, shape index: {}]   ;;  %s10580_s8 = inlined_call_operand.hbm [shape: f32[1,768], index: 8, kind: input, shape index: {}]   ;;  %s10581_s9 = inlined_call_operand.hbm [shape: f32[384,768], index: 9, kind: input, shape index: {}]   ;;  %s10582_s10 = inlined_call_operand.hbm [shape: f32[1,768], index: 10, kind: input, shape index: {}]   ;;  %s10583_s11 = inlined_call_operand.hbm [shape: f32[8,768], index: 11, kind: output, shape index: {}]  }
   0x1   :  { %17 = vsyncpa [#allocation6], 0 }
   0x2   :  { %18 = vsyncpa [#allocation9], 0 }
   0x3   :  { %19 = vsyncpa [#allocation12], 0 }
   0x4   :  { %20 = vsyncpa [#allocation15], 0 }
   0x5   :  { %21 = vsyncpa [#allocation18], 0 }
   0x6   :  { %22 = vsyncpa [#allocation4], 0  ;;  %s9895_s17 = smov [#allocation5]   ;;  %s9617_s21 = scalar_lea.hbm %s10573_s1, 6144 }
   0x7   :  { %s38_s18 = sshll.u32 %s9895_s17, 4  ;;  %p9618_p0 = scmp.ne.s32.totalorder %s10573_s1, %s9617_s21  ;;  %s39_s18 = int_to_ptr.vmem [resolvable:$true] %s38_s18 }
   0x8   :  { %p9621_p1 = scmp.lt.u32.totalorder %s9617_s21, %s10573_s1 }
   0xa   :  { %p9623_p2 = pnand %p9621_p1, %p9618_p0 }
   0xc   :  { %9626 = shalt.err (!%p9623_p2)
}
   0xd   :  { %s9627_s26 = scalar_lea.vmem %s39_s18, 6144  ;;  %p9632_p4 = scmp.lt.s32.totalorder %s39_s18, %s39_s18 }
   0xe   :  { %p9628_p3 = scmp.ne.s32.totalorder %s39_s18, %s9627_s26  ;;  %p9633_p5 = scmp.lt.s32.totalorder %s9627_s26, %s9627_s26 }
  0x10   :  { %p9634_p6 = por %p9633_p5, %p9632_p4 }
  0x12   :  { %p9635_p7 = pnand %p9634_p6, %p9628_p3 }
  0x14   :  { %9638 = shalt.err (!%p9635_p7)
}
  0x15   :  { %s9896_s27 = smov 128   ;;  %s9897_s28 = smov 8  }
  0x16   :  { %44 = dma.hbm_to_vmem [thread:$0]  %s10573_s1, 6144, %s39_s18, [#allocation6], %s9896_s27, %s9896_s27, %s9897_s28  }
  0x17   :  { %s9898_s12 = smov [#allocation8]   ;;  %s9639_s16 = scalar_lea.hbm %s10575_s3, 49152 }
  0x18   :  { %s62_s13 = sshll.u32 %s9898_s12, 4  ;;  %p9640_p8 = scmp.ne.s32.totalorder %s10575_s3, %s9639_s16  ;;  %s63_s13 = int_to_ptr.vmem [resolvable:$true] %s62_s13 }
  0x19   :  { %p9643_p9 = scmp.lt.u32.totalorder %s9639_s16, %s10575_s3 }
  0x1b   :  { %p9645_p10 = pnand %p9643_p9, %p9640_p8 }
  0x1d   :  { %9648 = shalt.err (!%p9645_p10)
}
  0x1e   :  { %s9649_s22 = scalar_lea.vmem %s63_s13, 49152  ;;  %p9654_p12 = scmp.lt.s32.totalorder %s63_s13, %s63_s13 }
  0x1f   :  { %p9650_p11 = scmp.ne.s32.totalorder %s63_s13, %s9649_s22  ;;  %p9655_p13 = scmp.lt.s32.totalorder %s9649_s22, %s9649_s22 }
  0x21   :  { %p9656_p0 = por %p9655_p13, %p9654_p12 }
  0x23   :  { %p9657_p1 = pnand %p9656_p0, %p9650_p11 }
  0x25   :  { %9660 = shalt.err (!%p9657_p1)
}
  0x26   :  { %s9899_s1 = smov 1024   ;;  %s9900_s18 = smov 64  }
  0x27   :  { %68 = dma.hbm_to_vmem [thread:$0]  %s10575_s3, 49152, %s63_s13, [#allocation9], %s9899_s1, %s9899_s1, %s9900_s18  }
  0x28   :  { %s9901_s25 = smov [#allocation11]   ;;  %s9902_s27 = smov [#allocation14]  }
  0x29   :  { %s84_s26 = sshll.u32 %s9901_s25, 4  ;;  %s106_s28 = sshll.u32 %s9902_s27, 4  ;;  %s85_s26 = int_to_ptr.vmem [resolvable:$true] %s84_s26  ;;  %s10002_s28 = int_to_ptr.vmem [resolvable:$true] %s106_s28 }
  0x2a   :  { %s9661_s12 = scalar_lea.hbm %s10577_s5, 131072 }
  0x2b   :  { %p9662_p2 = scmp.ne.s32.totalorder %s10577_s5, %s9661_s12  ;;  %p9665_p3 = scmp.lt.u32.totalorder %s9661_s12, %s10577_s5 }
  0x2d   :  { %p9667_p4 = pnand %p9665_p3, %p9662_p2 }
  0x2f   :  { %9670 = shalt.err (!%p9667_p4)
}
  0x30   :  { %s9671_s3 = scalar_lea.vmem %s85_s26, 131072  ;;  %p9676_p6 = scmp.lt.s32.totalorder %s85_s26, %s85_s26 }
  0x31   :  { %p9672_p5 = scmp.ne.s32.totalorder %s85_s26, %s9671_s3  ;;  %p9677_p7 = scmp.lt.s32.totalorder %s9671_s3, %s9671_s3 }
  0x33   :  { %p9678_p8 = por %p9677_p7, %p9676_p6 }
  0x35   :  { %p9679_p9 = pnand %p9678_p8, %p9672_p5 }
  0x37   :  { %9682 = shalt.err (!%p9679_p9)
}
  0x38   :  { %90 = dma.hbm_to_vmem [thread:$0]  %s10577_s5, 131072, %s85_s26, [#allocation12], %s9899_s1, %s9899_s1, %s9900_s18  }
  0x39   :  { %s9683_s22 = scalar_lea.hbm %s10579_s7, 98304 }
  0x3a   :  { %p9684_p10 = scmp.ne.s32.totalorder %s10579_s7, %s9683_s22  ;;  %p9687_p11 = scmp.lt.u32.totalorder %s9683_s22, %s10579_s7 }
  0x3c   :  { %p9689_p12 = pnand %p9687_p11, %p9684_p10 }
  0x3e   :  { %9692 = shalt.err (!%p9689_p12)
}
  0x3f   :  { %s9693_s29 = scalar_lea.vmem %s10002_s28, 98304  ;;  %p9698_p0 = scmp.lt.s32.totalorder %s10002_s28, %s10002_s28 }
  0x40   :  { %p9694_p13 = scmp.ne.s32.totalorder %s10002_s28, %s9693_s29  ;;  %p9699_p1 = scmp.lt.s32.totalorder %s9693_s29, %s9693_s29 }
  0x42   :  { %p9700_p2 = por %p9699_p1, %p9698_p0 }
  0x44   :  { %p9701_p3 = pnand %p9700_p2, %p9694_p13 }
  0x46   :  { %9704 = shalt.err (!%p9701_p3)
}
  0x47   :  { %s9903_s5 = smov 768   ;;  %s9904_s1 = smov 48  }
  0x48   :  { %112 = dma.hbm_to_vmem [thread:$0]  %s10579_s7, 98304, %s10002_s28, [#allocation15], %s9903_s5, %s9903_s5, %s9904_s1  }
  0x49   :  { %s9905_s30 = smov [#allocation17]   ;;  %s9906_s14 = smov [#allocation2]  }
  0x4a   :  { %s128_s12 = sshll.u32 %s9905_s30, 4  ;;  %s29_s15 = sshll.u32 %s9906_s14, 4  ;;  %s129_s12 = int_to_ptr.vmem [resolvable:$true] %s128_s12  ;;  %s30_s15 = int_to_ptr.vmem [resolvable:$true] %s29_s15 }
  0x4b   :  { %s9705_s3 = scalar_lea.hbm %s10581_s9, 36864 }
  0x4c   :  { %p9706_p4 = scmp.ne.s32.totalorder %s10581_s9, %s9705_s3  ;;  %p9709_p5 = scmp.lt.u32.totalorder %s9705_s3, %s10581_s9 }
  0x4e   :  { %p9711_p6 = pnand %p9709_p5, %p9706_p4 }
  0x50   :  { %9714 = shalt.err (!%p9711_p6)
}
  0x51   :  { %s9715_s7 = scalar_lea.vmem %s129_s12, 36864  ;;  %p9720_p8 = scmp.lt.s32.totalorder %s129_s12, %s129_s12 }
  0x52   :  { %p9716_p7 = scmp.ne.s32.totalorder %s129_s12, %s9715_s7  ;;  %p9721_p9 = scmp.lt.s32.totalorder %s9715_s7, %s9715_s7 }
  0x54   :  { %p9722_p10 = por %p9721_p9, %p9720_p8 }
  0x56   :  { %p9723_p11 = pnand %p9722_p10, %p9716_p7 }
  0x58   :  { %9726 = shalt.err (!%p9723_p11)
}
  0x59   :  { %134 = dma.hbm_to_vmem [thread:$0]  %s10581_s9, 36864, %s129_s12, [#allocation18], %s9903_s5, %s9903_s5, %s9904_s1  }
  0x5a   :  { %s9727_s25 = scalar_lea.hbm %s10572_s0, 384 }
  0x5b   :  { %p9728_p12 = scmp.ne.s32.totalorder %s10572_s0, %s9727_s25  ;;  %p9731_p13 = scmp.lt.u32.totalorder %s9727_s25, %s10572_s0 }
  0x5d   :  { %p9733_p0 = pnand %p9731_p13, %p9728_p12 }
  0x5f   :  { %9736 = shalt.err (!%p9733_p0)
}
  0x60   :  { %s9737_s30 = scalar_lea.vmem %s30_s15, 384  ;;  %p9742_p2 = scmp.lt.s32.totalorder %s30_s15, %s30_s15 }
  0x61   :  { %p9738_p1 = scmp.ne.s32.totalorder %s30_s15, %s9737_s30  ;;  %p9743_p3 = scmp.lt.s32.totalorder %s9737_s30, %s9737_s30 }
  0x63   :  { %p9744_p4 = por %p9743_p3, %p9742_p2 }
  0x65   :  { %p9745_p5 = pnand %p9744_p4, %p9738_p1 }
  0x67   :  { %9748 = shalt.err (!%p9745_p5)
}
  0x68   :  { %32 = dma.hbm_to_vmem [thread:$0]  %s10572_s0, 384, %s30_s15, [#allocation3]  }
  0x69   :  { %s9907_s1 = smov [#allocation7]   ;;  %s9749_s17 = scalar_lea.hbm %s10574_s2, 6144 }
  0x6a   :  { %s50_s12 = sshll.u32 %s9907_s1, 4  ;;  %p9750_p6 = scmp.ne.s32.totalorder %s10574_s2, %s9749_s17  ;;  %s51_s12 = int_to_ptr.vmem [resolvable:$true] %s50_s12 }
  0x6b   :  { %p9753_p7 = scmp.lt.u32.totalorder %s9749_s17, %s10574_s2 }
  0x6d   :  { %p9755_p8 = pnand %p9753_p7, %p9750_p6 }
  0x6f   :  { %9758 = shalt.err (!%p9755_p8)
}
  0x70   :  { %s9759_s21 = scalar_lea.vmem %s51_s12, 6144  ;;  %p9764_p10 = scmp.lt.s32.totalorder %s51_s12, %s51_s12 }
  0x71   :  { %p9760_p9 = scmp.ne.s32.totalorder %s51_s12, %s9759_s21  ;;  %p9765_p11 = scmp.lt.s32.totalorder %s9759_s21, %s9759_s21 }
  0x73   :  { %p9766_p12 = por %p9765_p11, %p9764_p10 }
  0x75   :  { %p9767_p13 = pnand %p9766_p12, %p9760_p9 }
  0x77   :  { %9770 = shalt.err (!%p9767_p13)
}
  0x78   :  { %s9908_s0 = smov 384   ;;  %s9909_s15 = smov 24  }
  0x79   :  { %56 = dma.hbm_to_vmem [thread:$0]  %s10574_s2, 6144, %s51_s12, [#allocation6], %s9908_s0, %s9908_s0, %s9909_s15  }
  0x7a   :  { %s9910_s22 = smov [#allocation10]   ;;  %s9911_s24 = smov [#allocation13]  }
  0x7b   :  { %s75_s23 = sshll.u32 %s9910_s22, 4  ;;  %s97_s25 = sshll.u32 %s9911_s24, 4  ;;  %s76_s23 = int_to_ptr.vmem [resolvable:$true] %s75_s23  ;;  %s98_s25 = int_to_ptr.vmem [resolvable:$true] %s97_s25 }
  0x7c   :  { %s9771_s18 = scalar_lea.hbm %s10576_s4, 128 }
  0x7d   :  { %p9772_p0 = scmp.ne.s32.totalorder %s10576_s4, %s9771_s18  ;;  %p9775_p1 = scmp.lt.u32.totalorder %s9771_s18, %s10576_s4 }
  0x7f   :  { %p9777_p2 = pnand %p9775_p1, %p9772_p0 }
  0x81   :  { %9780 = shalt.err (!%p9777_p2)
}
  0x82   :  { %s9781_s2 = scalar_lea.vmem %s76_s23, 128  ;;  %p9786_p4 = scmp.lt.s32.totalorder %s76_s23, %s76_s23 }
  0x83   :  { %p9782_p3 = scmp.ne.s32.totalorder %s76_s23, %s9781_s2  ;;  %p9787_p5 = scmp.lt.s32.totalorder %s9781_s2, %s9781_s2 }
  0x85   :  { %p9788_p6 = por %p9787_p5, %p9786_p4 }
  0x87   :  { %p9789_p7 = pnand %p9788_p6, %p9782_p3 }
  0x89   :  { %9792 = shalt.err (!%p9789_p7)
}
  0x8a   :  { %78 = dma.hbm_to_vmem [thread:$0]  %s10576_s4, 128, %s76_s23, [#allocation9]  }
  0x8b   :  { %s9793_s17 = scalar_lea.hbm %s10578_s6, 128 }
  0x8c   :  { %p9794_p8 = scmp.ne.s32.totalorder %s10578_s6, %s9793_s17  ;;  %p9797_p9 = scmp.lt.u32.totalorder %s9793_s17, %s10578_s6 }
  0x8e   :  { %p9799_p10 = pnand %p9797_p9, %p9794_p8 }
  0x90   :  { %9802 = shalt.err (!%p9799_p10)
}
  0x91   :  { %s9803_s21 = scalar_lea.vmem %s98_s25, 128  ;;  %p9808_p12 = scmp.lt.s32.totalorder %s98_s25, %s98_s25 }
  0x92   :  { %p9804_p11 = scmp.ne.s32.totalorder %s98_s25, %s9803_s21  ;;  %p9809_p13 = scmp.lt.s32.totalorder %s9803_s21, %s9803_s21 }
  0x94   :  { %p9810_p0 = por %p9809_p13, %p9808_p12 }
  0x96   :  { %p9811_p1 = pnand %p9810_p0, %p9804_p11 }
  0x98   :  { %9814 = shalt.err (!%p9811_p1)
}
  0x99   :  { %100 = dma.hbm_to_vmem [thread:$0]  %s10578_s6, 128, %s98_s25, [#allocation12]  }
  0x9a   :  { %s9912_s15 = smov [#allocation16]   ;;  %s9913_s28 = smov [#allocation19]  }
  0x9b   :  { %s119_s7 = sshll.u32 %s9912_s15, 4  ;;  %s141_s22 = sshll.u32 %s9913_s28, 4  ;;  %s120_s7 = int_to_ptr.vmem [resolvable:$true] %s119_s7  ;;  %s142_s22 = int_to_ptr.vmem [resolvable:$true] %s141_s22 }
  0x9c   :  { %s9815_s27 = scalar_lea.hbm %s10580_s8, 96 }
  0x9d   :  { %p9816_p2 = scmp.ne.s32.totalorder %s10580_s8, %s9815_s27  ;;  %p9819_p3 = scmp.lt.u32.totalorder %s9815_s27, %s10580_s8 }
  0x9f   :  { %p9821_p4 = pnand %p9819_p3, %p9816_p2 }
  0xa1   :  { %9824 = shalt.err (!%p9821_p4)
}
  0xa2   :  { %s9825_s6 = scalar_lea.vmem %s120_s7, 96  ;;  %p9830_p6 = scmp.lt.s32.totalorder %s120_s7, %s120_s7 }
  0xa3   :  { %p9826_p5 = scmp.ne.s32.totalorder %s120_s7, %s9825_s6  ;;  %p9831_p7 = scmp.lt.s32.totalorder %s9825_s6, %s9825_s6 }
  0xa5   :  { %p9832_p8 = por %p9831_p7, %p9830_p6 }
  0xa7   :  { %p9833_p9 = pnand %p9832_p8, %p9826_p5 }
  0xa9   :  { %9836 = shalt.err (!%p9833_p9)
}
  0xaa   :  { %122 = dma.hbm_to_vmem [thread:$0]  %s10580_s8, 96, %s120_s7, [#allocation15]  }
  0xab   :  { %s9837_s1 = scalar_lea.hbm %s10582_s10, 96 }
  0xac   :  { %p9838_p10 = scmp.ne.s32.totalorder %s10582_s10, %s9837_s1  ;;  %p9841_p11 = scmp.lt.u32.totalorder %s9837_s1, %s10582_s10 }
  0xae   :  { %p9843_p12 = pnand %p9841_p11, %p9838_p10 }
  0xb0   :  { %9846 = shalt.err (!%p9843_p12)
}
  0xb1   :  { %s9847_s3 = scalar_lea.vmem %s142_s22, 96  ;;  %p9852_p0 = scmp.lt.s32.totalorder %s142_s22, %s142_s22 }
  0xb2   :  { %p9848_p13 = scmp.ne.s32.totalorder %s142_s22, %s9847_s3  ;;  %p9853_p1 = scmp.lt.s32.totalorder %s9847_s3, %s9847_s3 }
  0xb4   :  { %p9854_p2 = por %p9853_p1, %p9852_p0 }
  0xb6   :  { %p9855_p3 = pnand %p9854_p2, %p9848_p13 }
  0xb8   :  { %9858 = shalt.err (!%p9855_p3)
}
  0xb9   :  { %144 = dma.hbm_to_vmem [thread:$0]  %s10582_s10, 96, %s142_s22, [#allocation18]  }
  0xba   :  { %9881 = dma.done.wait [#allocation3], 384  }
  0xbb   :  { %9882 = vsyncadd [#allocation3], 4294966912 }
  0xbc   :  { %9883 = dma.done.wait [#allocation6], 12288  }
  0xbd   :  { %9884 = vsyncadd [#allocation6], 4294955008 }
  0xbe   :  { %9885 = dma.done.wait [#allocation9], 49280  }
  0xbf   :  { %9886 = vsyncadd [#allocation9], 4294918016 }
  0xc0   :  { %9887 = dma.done.wait [#allocation12], 131200  }
  0xc1   :  { %9888 = vsyncadd [#allocation12], 4294836096 }
  0xc2   :  { %9889 = dma.done.wait [#allocation15], 98400  }
  0xc3   :  { %9890 = vsyncadd [#allocation15], 4294868896 }
  0xc4   :  { %9891 = dma.done.wait [#allocation18], 36960  }
  0xc5   :  { %9892 = vsyncadd [#allocation18], 4294930336  ;;  %v9914_v0 = vmov 0.0|0.0   ;;  %vm9915_vm0 = vmmov 0   ;;  %v9916_v1 = vmov 0.0   ;;  %v197_v2 = vld [vmem:[#allocation5 + $0x80] sm:$0xff] }
  0xc6   :  { %6848 = vmatprep.subr.bf16.mxu1 %v9914_v0  ;;  %6708 = vmatprep.mubr.msk.f32.mxu1 %vm9915_vm0, %v9916_v1  ;;  %v198_v3 = vld [vmem:[#allocation5 + $0x88] sm:$0xff]  ;;  %v181_v4 = vld [vmem:[#allocation5] sm:$0xff]  ;;  %v199_v11 = vld [vmem:[#allocation5 + $0x90] sm:$0xff]  ;;  %s9917_s10 = smov [#allocation20]  }
  0xc7   :  { %v10120_v5 = vpack.c.bf16 %v198_v3, %v197_v2  ;;  %v182_v6 = vld [vmem:[#allocation5 + $0x8] sm:$0xff]  ;;  %v213_v7 = vld [vmem:[#allocation5 + $0x100] sm:$0xff]  ;;  %v200_v12 = vld [vmem:[#allocation5 + $0x98] sm:$0xff]  ;;  %s6524_s19 = sshll.u32 %s9917_s10, 4  ;;  %s6525_s19 = int_to_ptr.vmem [resolvable:$true] %s6524_s19 }
  0xc8   :  { %v214_v8 = vld [vmem:[#allocation5 + $0x108] sm:$0xff]  ;;  %v10122_v9 = vpack.c.bf16 %v182_v6, %v181_v4  ;;  %v183_v13 = vld [vmem:[#allocation5 + $0x10] sm:$0xff]  ;;  %v10127_v14 = vpack.c.bf16 %v200_v12, %v199_v11  ;;  %v184_v15 = vld [vmem:[#allocation5 + $0x18] sm:$0xff]  ;;  %s9859_s20 = scalar_lea.vmem %s6525_s19, 768  ;;  %p9864_p5 = scmp.lt.s32.totalorder %s6525_s19, %s6525_s19 }
  0xc9   :  { %v10124_v10 = vpack.c.bf16 %v214_v8, %v213_v7  ;;  %6817 = vmatprep.subr.bf16.mxu0 %v10120_v5  ;;  %v215_v16 = vld [vmem:[#allocation5 + $0x110] sm:$0xff]  ;;  %v216_v17 = vld [vmem:[#allocation5 + $0x118] sm:$0xff]  ;;  %v10131_v18 = vpack.c.bf16 %v184_v15, %v183_v13  ;;  %v201_v20 = vld [vmem:[#allocation5 + $0xa0] sm:$0xff]  ;;  %p9860_p4 = scmp.ne.s32.totalorder %s6525_s19, %s9859_s20  ;;  %p9865_p6 = scmp.lt.s32.totalorder %s9859_s20, %s9859_s20 }
  0xca   :  { %6819 = vmatpush3.bf16.msra.mxu0 %v10122_v9  ;;  %v10133_v19 = vpack.c.bf16 %v216_v17, %v215_v16  ;;  %v202_v21 = vld [vmem:[#allocation5 + $0xa8] sm:$0xff]  ;;  %v185_v22 = vld [vmem:[#allocation5 + $0x20] sm:$0xff]  ;;  %v203_v27 = vld [vmem:[#allocation5 + $0xb0] sm:$0xff] }
  0xcb   :  { %6850 = vmatpush3.bf16.msra.mxu1 %v10124_v10  ;;  %6821 = vmatprep.subr.bf16.mxu0 %v10127_v14  ;;  %v10137_v23 = vpack.c.bf16 %v202_v21, %v201_v20  ;;  %v186_v24 = vld [vmem:[#allocation5 + $0x28] sm:$0xff]  ;;  %v217_v25 = vld [vmem:[#allocation5 + $0x120] sm:$0xff]  ;;  %v204_v28 = vld [vmem:[#allocation5 + $0xb8] sm:$0xff]  ;;  %p9866_p7 = por %p9865_p6, %p9864_p5 }
  0xcc   :  { %6851 = vmatprep.subr.bf16.mxu1 %v9914_v0  ;;  %v218_v26 = vld [vmem:[#allocation5 + $0x128] sm:$0xff]  ;;  %v10141_v29 = vpack.c.bf16 %v186_v24, %v185_v22  ;;  %v187_v31 = vld [vmem:[#allocation5 + $0x30] sm:$0xff]  ;;  %v10147_v32 = vpack.c.bf16 %v204_v28, %v203_v27  ;;  %v188_v33 = vld [vmem:[#allocation5 + $0x38] sm:$0xff] }
  0xcd   :  { %v10143_v30 = vpack.c.bf16 %v218_v26, %v217_v25  ;;  %v219_v34 = vld [vmem:[#allocation5 + $0x130] sm:$0xff]  ;;  %v220_v35 = vld [vmem:[#allocation5 + $0x138] sm:$0xff]  ;;  %v205_v36 = vld [vmem:[#allocation5 + $0xc0] sm:$0xff]  ;;  %v10151_v38 = vpack.c.bf16 %v188_v33, %v187_v31  ;;  %p9867_p8 = pnand %p9866_p7, %p9860_p4 }
  0xce   :  { %6823 = vmatpush3.bf16.msra.mxu0 %v10131_v18  ;;  %v206_v37 = vld [vmem:[#allocation5 + $0xc8] sm:$0xff]  ;;  %v10153_v39 = vpack.c.bf16 %v220_v35, %v219_v34  ;;  %v189_v40 = vld [vmem:[#allocation5 + $0x40] sm:$0xff]  ;;  %v207_v45 = vld [vmem:[#allocation5 + $0xd0] sm:$0xff] }
  0xcf   :  { %6853 = vmatpush3.bf16.msra.mxu1 %v10133_v19  ;;  %6825 = vmatprep.subr.bf16.mxu0 %v10137_v23  ;;  %v10157_v41 = vpack.c.bf16 %v206_v37, %v205_v36  ;;  %v190_v42 = vld [vmem:[#allocation5 + $0x48] sm:$0xff]  ;;  %v221_v43 = vld [vmem:[#allocation5 + $0x140] sm:$0xff]  ;;  %v208_v46 = vld [vmem:[#allocation5 + $0xd8] sm:$0xff] }
  0xd0   :  { %6854 = vmatprep.subr.bf16.mxu1 %v9914_v0  ;;  %v222_v44 = vld [vmem:[#allocation5 + $0x148] sm:$0xff]  ;;  %v179_v47 = vld [vmem:[#allocation2 + $0x8] sm:$0xff]  ;;  %v10161_v48 = vpack.c.bf16 %v190_v42, %v189_v40  ;;  %v10167_v51 = vpack.c.bf16 %v208_v46, %v207_v45  ;;  %v192_v52 = vld [vmem:[#allocation5 + $0x58] sm:$0xff] }
  0xd1   :  { %v10163_v49 = vpack.c.bf16 %v222_v44, %v221_v43  ;;  %v191_v50 = vld [vmem:[#allocation5 + $0x50] sm:$0xff]  ;;  %v224_v54 = vld [vmem:[#allocation5 + $0x158] sm:$0xff]  ;;  %v209_v55 = vld [vmem:[#allocation5 + $0xe0] sm:$0xff]  ;;  %293 = vmatprep.mubr.f32.mxu0 %v179_v47  ;;  %v371_v21 = vmul.f32 %v179_v47, %v179_v47 }
  0xd2   :  { %6827 = vmatpush3.bf16.msra.mxu0 %v10141_v29  ;;  %v223_v53 = vld [vmem:[#allocation5 + $0x150] sm:$0xff]  ;;  %v210_v56 = vld [vmem:[#allocation5 + $0xe8] sm:$0xff]  ;;  %v6838_v57 = vpack.c.bf16 %v192_v52, %v191_v50  ;;  %v193_v59 = vld [vmem:[#allocation5 + $0x60] sm:$0xff] }
  0xd3   :  { %6856 = vmatpush3.bf16.msra.mxu1 %v10143_v30  ;;  %6829 = vmatprep.subr.bf16.mxu0 %v10147_v32  ;;  %v6864_v58 = vpack.c.bf16 %v224_v54, %v223_v53  ;;  %v6840_v60 = vpack.c.bf16 %v210_v56, %v209_v55  ;;  %v194_v61 = vld [vmem:[#allocation5 + $0x68] sm:$0xff]  ;;  %v225_v62 = vld [vmem:[#allocation5 + $0x160] sm:$0xff]  ;;  %v211_v2 = vld [vmem:[#allocation5 + $0xf0] sm:$0xff] }
  0xd4   :  { %6857 = vmatprep.subr.bf16.mxu1 %v9914_v0  ;;  %v226_v63 = vld [vmem:[#allocation5 + $0x168] sm:$0xff]  ;;  %v212_v3 = vld [vmem:[#allocation5 + $0xf8] sm:$0xff]  ;;  %v6842_v4 = vpack.c.bf16 %v194_v61, %v193_v59  ;;  %v195_v7 = vld [vmem:[#allocation5 + $0x70] sm:$0xff] }
  0xd5   :  { %v6867_v6 = vpack.c.bf16 %v226_v63, %v225_v62  ;;  %v6844_v8 = vpack.c.bf16 %v212_v3, %v211_v2  ;;  %v196_v11 = vld [vmem:[#allocation5 + $0x78] sm:$0xff]  ;;  %v227_v12 = vld [vmem:[#allocation5 + $0x170] sm:$0xff]  ;;  %v10175_v17 = vld [vmem:[#allocation2] sm:$0xff] }
  0xd6   :  { %6831 = vmatpush3.bf16.msra.mxu0 %v10151_v38  ;;  %v228_v13 = vld [vmem:[#allocation5 + $0x178] sm:$0xff]  ;;  %v6846_v15 = vpack.c.bf16 %v196_v11, %v195_v7  ;;  %v523_v22 = vld [vmem:[#allocation7 + $0x28] sm:$0xff]  ;;  %v528_v24 = vld [vmem:[#allocation7 + $0x50] sm:$0xff]  ;;  %v370_v25 = vmul.f32 %v10175_v17, %v10175_v17 }
  0xd7   :  { %6859 = vmatpush3.bf16.msra.mxu1 %v10153_v39  ;;  %6833 = vmatprep.subr.bf16.mxu0 %v10157_v41  ;;  %v6870_v16 = vpack.c.bf16 %v228_v13, %v227_v12  ;;  %v10177_v20 = vld [vmem:[#allocation2 + $0x10] sm:$0xff]  ;;  %v527_v31 = vld [vmem:[#allocation7 + $0x48] sm:$0xff]  ;;  %v534_v35 = vld [vmem:[#allocation7 + $0x80] sm:$0xff] }
  0xd8   :  { %6860 = vmatprep.subr.bf16.mxu1 %v9914_v0  ;;  %v372_v26 = vmul.f32 %v10177_v20, %v10177_v20  ;;  %v529_v33 = vld [vmem:[#allocation7 + $0x58] sm:$0xff]  ;;  %v531_v34 = vld [vmem:[#allocation7 + $0x68] sm:$0xff]  ;;  %v540_v44 = vld [vmem:[#allocation7 + $0xb0] sm:$0xff] }
  0xd9   :  { %v533_v40 = vld [vmem:[#allocation7 + $0x78] sm:$0xff]  ;;  %v535_v42 = vld [vmem:[#allocation7 + $0x88] sm:$0xff]  ;;  %v536_v47 = vld [vmem:[#allocation7 + $0x90] sm:$0xff] }
  0xda   :  { %6835 = vmatpush3.bf16.msra.mxu0 %v10161_v48  ;;  %v537_v43 = vld [vmem:[#allocation7 + $0x98] sm:$0xff]  ;;  %v538_v50 = vld [vmem:[#allocation7 + $0xa0] sm:$0xff]  ;;  %v543_v52 = vld [vmem:[#allocation7 + $0xc8] sm:$0xff] }
  0xdb   :  { %6862 = vmatpush3.bf16.msra.mxu1 %v10163_v49  ;;  %6837 = vmatprep.subr.bf16.mxu0 %v10167_v51  ;;  %v546_v53 = vld [vmem:[#allocation7 + $0xe0] sm:$0xff]  ;;  %v544_v59 = vld [vmem:[#allocation7 + $0xd0] sm:$0xff]  ;;  %v549_v61 = vld [vmem:[#allocation7 + $0xf8] sm:$0xff] }
  0xdc   :  { %6863 = vmatprep.subr.bf16.mxu1 %v9914_v0  ;;  %v542_v56 = vld [vmem:[#allocation7 + $0xc0] sm:$0xff]  ;;  %v552_v62 = vld [vmem:[#allocation7 + $0x110] sm:$0xff]  ;;  %v555_v13 = vld [vmem:[#allocation7 + $0x128] sm:$0xff] }
  0xdd   :  { %v548_v3 = vld [vmem:[#allocation7 + $0xf0] sm:$0xff]  ;;  %v550_v7 = vld [vmem:[#allocation7 + $0x100] sm:$0xff] }
  0xde   :  { %6839 = vmatpush3.bf16.msra.mxu0 %v6838_v57 }
  0xdf   :  { %6865 = vmatpush3.bf16.msra.mxu1 %v6864_v58  ;;  %6841 = vmatprep.subr.bf16.mxu0 %v6840_v60 }
  0xe0   :  { %6866 = vmatprep.subr.bf16.mxu1 %v9914_v0 }
  0xe2   :  { %6843 = vmatpush3.bf16.msra.mxu0 %v6842_v4 }
  0xe3   :  { %6868 = vmatpush3.bf16.msra.mxu1 %v6867_v6  ;;  %6845 = vmatprep.subr.bf16.mxu0 %v6844_v8 }
  0xe4   :  { %6869 = vmatprep.subr.bf16.mxu1 %v9914_v0 }
  0xe6   :  { %6847 = vmatpush3.bf16.msra.mxu0 %v6846_v15 }
  0xe7   :  { %6871 = vmatpush3.bf16.msra.mxu1 %v6870_v16  ;;  %6873 = vmatprep.subr.bf16.mxu0 %v10120_v5  ;;  %v519_v5 = vld [vmem:[#allocation7 + $0x8] sm:$0xff] }
  0xe8   :  { %6904 = vmatprep.subr.bf16.mxu1 %v9914_v0 }
  0xe9   :  { %294 = vmatmul.mubr.f32.vlgmr.msra.gmra.mrb[0].mxu0 %v10175_v17 }
  0xea   :  { %6709 = vmatmul.mubr.f32.vlgmr.msra.gmra.mrb[0].mxu1 %v10177_v20  ;;  %6875 = vmatpush3.bf16.msra.mxu0 %v10122_v9  ;;  %v522_v9 = vld [vmem:[#allocation7 + $0x20] sm:$0xff] }
  0xeb   :  { %6906 = vmatpush3.bf16.msra.mxu1 %v10124_v10  ;;  %6877 = vmatprep.subr.bf16.mxu0 %v10127_v14  ;;  %v518_v10 = vld [vmem:[#allocation7] sm:$0xff]  ;;  %v10207_v14 = vpack.c.bf16 %v522_v9, %v519_v5  ;;  %v557_v5 = vld [vmem:[#allocation7 + $0x138] sm:$0xff]  ;;  %v556_v9 = vld [vmem:[#allocation7 + $0x130] sm:$0xff] }
  0xec   :  { %6907 = vmatprep.subr.bf16.mxu1 %v9914_v0  ;;  %437 = vmatprep.mubr.f32.mxu0 %v371_v21  ;;  %v554_v21 = vld [vmem:[#allocation7 + $0x120] sm:$0xff] }
  0xed   :  { %6743 = vmatprep.mubr.msk.f32.mxu1 %vm9915_vm0, %v9916_v1 }
  0xee   :  { %6879 = vmatpush3.bf16.msra.mxu0 %v10131_v18  ;;  %v521_v18 = vld [vmem:[#allocation7 + $0x18] sm:$0xff] }
  0xef   :  { %6909 = vmatpush3.bf16.msra.mxu1 %v10133_v19  ;;  %6881 = vmatprep.subr.bf16.mxu0 %v10137_v23  ;;  %v520_v19 = vld [vmem:[#allocation7 + $0x10] sm:$0xff]  ;;  %v525_v23 = vld [vmem:[#allocation7 + $0x38] sm:$0xff]  ;;  %v10213_v27 = vpack.c.bf16 %v521_v18, %v518_v10  ;;  %v10275_v10 = vpack.c.bf16 %v557_v5, %v554_v21  ;;  %v559_v18 = vld [vmem:[#allocation7 + $0x148] sm:$0xff] }
  0xf0   :  { %6910 = vmatprep.subr.bf16.mxu1 %v9914_v0  ;;  %v10215_v28 = vpack.c.bf16 %v523_v22, %v520_v19  ;;  %v6979_v19 = vpack.c.bf16 %v559_v18, %v556_v9  ;;  %v561_v22 = vld [vmem:[#allocation7 + $0x158] sm:$0xff]  ;;  %v886_v21 = vld [vmem:[#allocation8 + $0x100] sm:$0xff]  ;;  %v888_v18 = vld [vmem:[#allocation8 + $0x110] sm:$0xff] }
  0xf1   :  { %v894_v5 = vld [vmem:[#allocation8 + $0x140] sm:$0xff] }
  0xf2   :  { %6883 = vmatpush3.bf16.msra.mxu0 %v10141_v29  ;;  %v524_v29 = vld [vmem:[#allocation7 + $0x30] sm:$0xff] }
  0xf3   :  { %6912 = vmatpush3.bf16.msra.mxu1 %v10143_v30  ;;  %6885 = vmatprep.subr.bf16.mxu0 %v10147_v32  ;;  %v10219_v30 = vpack.c.bf16 %v528_v24, %v525_v23  ;;  %v526_v32 = vld [vmem:[#allocation7 + $0x40] sm:$0xff]  ;;  %v10223_v36 = vpack.c.bf16 %v527_v31, %v524_v29  ;;  %v564_v23 = vld [vmem:[#allocation7 + $0x170] sm:$0xff] }
  0xf4   :  { %6913 = vmatprep.subr.bf16.mxu1 %v9914_v0  ;;  %v10225_v37 = vpack.c.bf16 %v529_v33, %v526_v32  ;;  %v6956_v24 = vpack.c.bf16 %v564_v23, %v561_v22  ;;  %v562_v29 = vld [vmem:[#allocation7 + $0x160] sm:$0xff]  ;;  %v565_v32 = vld [vmem:[#allocation7 + $0x178] sm:$0xff]  ;;  %v903_v22 = vld [vmem:[#allocation8 + $0x188] sm:$0xff] }
  0xf5   :  { %v6982_v33 = vpack.c.bf16 %v565_v32, %v562_v29  ;;  %v911_v23 = vld [vmem:[#allocation8 + $0x1c8] sm:$0xff] }
  0xf6   :  { %6887 = vmatpush3.bf16.msra.mxu0 %v10151_v38  ;;  %v530_v38 = vld [vmem:[#allocation7 + $0x60] sm:$0xff] }
  0xf7   :  { %6915 = vmatpush3.bf16.msra.mxu1 %v10153_v39  ;;  %6889 = vmatprep.subr.bf16.mxu0 %v10157_v41  ;;  %v10229_v39 = vpack.c.bf16 %v534_v35, %v531_v34  ;;  %v532_v41 = vld [vmem:[#allocation7 + $0x70] sm:$0xff]  ;;  %v10236_v45 = vpack.c.bf16 %v533_v40, %v530_v38 }
  0xf8   :  { %6916 = vmatprep.subr.bf16.mxu1 %v9914_v0  ;;  %v10238_v46 = vpack.c.bf16 %v535_v42, %v532_v41 }
  0xfa   :  { %6891 = vmatpush3.bf16.msra.mxu0 %v10161_v48  ;;  %v10242_v48 = vpack.c.bf16 %v540_v44, %v537_v43 }
  0xfb   :  { %6918 = vmatpush3.bf16.msra.mxu1 %v10163_v49  ;;  %6893 = vmatprep.subr.bf16.mxu0 %v10167_v51  ;;  %v539_v49 = vld [vmem:[#allocation7 + $0xa8] sm:$0xff]  ;;  %v541_v51 = vld [vmem:[#allocation7 + $0xb8] sm:$0xff] }
  0xfc   :  { %6919 = vmatprep.subr.bf16.mxu1 %v9914_v0  ;;  %v10246_v54 = vpack.c.bf16 %v539_v49, %v536_v47  ;;  %v10248_v55 = vpack.c.bf16 %v541_v51, %v538_v50 }
  0xfe   :  { %6895 = vmatpush3.bf16.msra.mxu0 %v6838_v57  ;;  %v10252_v57 = vpack.c.bf16 %v546_v53, %v543_v52  ;;  %v854_v53 = vld [vmem:[#allocation8] sm:$0xff] }
  0xff   :  { %6921 = vmatpush3.bf16.msra.mxu1 %v6864_v58  ;;  %6897 = vmatprep.subr.bf16.mxu0 %v6840_v60  ;;  %v545_v58 = vld [vmem:[#allocation7 + $0xd8] sm:$0xff]  ;;  %v547_v60 = vld [vmem:[#allocation7 + $0xe8] sm:$0xff] }
 0x100   :  { %6922 = vmatprep.subr.bf16.mxu1 %v9914_v0  ;;  %v10256_v63 = vpack.c.bf16 %v545_v58, %v542_v56  ;;  %v10258_v2 = vpack.c.bf16 %v547_v60, %v544_v59  ;;  %v864_v56 = vld [vmem:[#allocation8 + $0x50] sm:$0xff]  ;;  %v879_v58 = vld [vmem:[#allocation8 + $0xc8] sm:$0xff]  ;;  %v873_v59 = vld [vmem:[#allocation8 + $0x98] sm:$0xff] }
 0x102   :  { %6899 = vmatpush3.bf16.msra.mxu0 %v6842_v4  ;;  %v10262_v4 = vpack.c.bf16 %v552_v62, %v549_v61  ;;  %v870_v62 = vld [vmem:[#allocation8 + $0x80] sm:$0xff] }
 0x103   :  { %6924 = vmatpush3.bf16.msra.mxu1 %v6867_v6  ;;  %6901 = vmatprep.subr.bf16.mxu0 %v6844_v8  ;;  %v551_v6 = vld [vmem:[#allocation7 + $0x108] sm:$0xff]  ;;  %v553_v8 = vld [vmem:[#allocation7 + $0x118] sm:$0xff] }
 0x104   :  { %6925 = vmatprep.subr.bf16.mxu1 %v9914_v0  ;;  %v10266_v11 = vpack.c.bf16 %v551_v6, %v548_v3  ;;  %v10268_v12 = vpack.c.bf16 %v553_v8, %v550_v7  ;;  %v880_v6 = vld [vmem:[#allocation8 + $0xd0] sm:$0xff]  ;;  %v887_v7 = vld [vmem:[#allocation8 + $0x108] sm:$0xff] }
 0x106   :  { %6903 = vmatpush3.bf16.msra.mxu0 %v6846_v15  ;;  %v558_v15 = vld [vmem:[#allocation7 + $0x140] sm:$0xff] }
 0x107   :  { %6927 = vmatpush3.bf16.msra.mxu1 %v6870_v16  ;;  %6929 = vmatprep.subr.bf16.mxu0 %v10207_v14  ;;  %v6952_v16 = vpack.c.bf16 %v558_v15, %v555_v13  ;;  %v897_v13 = vld [vmem:[#allocation8 + $0x158] sm:$0xff] }
 0x108   :  { %6960 = vmatprep.subr.bf16.mxu1 %v9914_v0 }
 0x109   :  { %438 = vmatmul.mubr.f32.vlgmr.msra.gmra.mrb[2].mxu0 %v370_v25  ;;  %v560_v25 = vld [vmem:[#allocation7 + $0x150] sm:$0xff] }
 0x10a   :  { %6744 = vmatmul.mubr.f32.vlgmr.msra.gmra.mrb[2].mxu1 %v372_v26  ;;  %6931 = vmatpush1.bf16.msra.mxu0 %v10213_v27  ;;  %v563_v26 = vld [vmem:[#allocation7 + $0x168] sm:$0xff] }
 0x10b   :  { %6962 = vmatpush3.bf16.msra.mxu1 %v10215_v28  ;;  %6933 = vmatprep.subr.bf16.mxu0 %v10219_v30  ;;  %v6958_v31 = vpack.c.bf16 %v563_v26, %v560_v25  ;;  %v913_v25 = vld [vmem:[#allocation8 + $0x1d8] sm:$0xff]  ;;  %v7050_v26 = vpack.c.bf16 %v894_v5, %v886_v21  ;;  %v966_v21 = vld [vmem:[#allocation8 + $0x380] sm:$0xff] }
 0x10c   :  { %6963 = vmatprep.subr.bf16.mxu1 %v9914_v0  ;;  %630 = vmatprep.mubr.f32.mxu0 %v9916_v1  ;;  %v974_v5 = vld [vmem:[#allocation8 + $0x3c0] sm:$0xff] }
 0x10d   :  { %6778 = vmatprep.mubr.msk.f32.mxu1 %vm9915_vm0, %v9916_v1 }
 0x10e   :  { %6935 = vmatpush1.bf16.msra.mxu0 %v10223_v36 }
 0x10f   :  { %6965 = vmatpush3.bf16.msra.mxu1 %v10225_v37  ;;  %6937 = vmatprep.subr.bf16.mxu0 %v10229_v39 }
 0x110   :  { %6966 = vmatprep.subr.bf16.mxu1 %v9914_v0 }
 0x112   :  { %6939 = vmatpush1.bf16.msra.mxu0 %v10236_v45 }
 0x113   :  { %6968 = vmatpush3.bf16.msra.mxu1 %v10238_v46  ;;  %6941 = vmatprep.subr.bf16.mxu0 %v10242_v48 }
 0x114   :  { %6969 = vmatprep.subr.bf16.mxu1 %v9914_v0 }
 0x116   :  { %6943 = vmatpush1.bf16.msra.mxu0 %v10246_v54 }
 0x117   :  { %6971 = vmatpush3.bf16.msra.mxu1 %v10248_v55  ;;  %6945 = vmatprep.subr.bf16.mxu0 %v10252_v57 }
 0x118   :  { %6972 = vmatprep.subr.bf16.mxu1 %v9914_v0 }
 0x11a   :  { %6947 = vmatpush1.bf16.msra.mxu0 %v10256_v63 }
 0x11b   :  { %6974 = vmatpush3.bf16.msra.mxu1 %v10258_v2  ;;  %6949 = vmatprep.subr.bf16.mxu0 %v10262_v4 }
 0x11c   :  { %6975 = vmatprep.subr.bf16.mxu1 %v9914_v0 }
 0x11e   :  { %6951 = vmatpush1.bf16.msra.mxu0 %v10266_v11 }
 0x11f   :  { %6977 = vmatpush3.bf16.msra.mxu1 %v10268_v12  ;;  %6953 = vmatprep.subr.bf16.mxu0 %v6952_v16 }
 0x120   :  { %6978 = vmatprep.subr.bf16.mxu1 %v9914_v0 }
 0x122   :  { %6955 = vmatpush1.bf16.msra.mxu0 %v10275_v10 }
 0x123   :  { %6980 = vmatpush3.bf16.msra.mxu1 %v6979_v19  ;;  %6957 = vmatprep.subr.bf16.mxu0 %v6956_v24 }
 0x124   :  { %6981 = vmatprep.subr.bf16.mxu1 %v9914_v0 }
 0x126   :  { %6959 = vmatpush1.bf16.msra.mxu0 %v6958_v31 }
 0x127   :  { %6983 = vmatpush3.bf16.msra.mxu1 %v6982_v33  ;;  %6985 = vmatprep.subr.bf16.mxu0 %v10207_v14  ;;  %v855_v14 = vld [vmem:[#allocation8 + $0x8] sm:$0xff] }
 0x128   :  { %7016 = vmatprep.subr.bf16.mxu1 %v9914_v0 }
 0x1bc   :  { %v6570_v34 = vpop.f32.mrb[0].mxu0 }
 0x1bd   :  { %v365_v35 = vpop.f32.mrb[0].mxu1  ;;  %v6571_v38 = vpop.f32.mrb[1].mxu0 }
 0x1be   :  { %v6710_v40 = vpop.f32.mrb[1].mxu1  ;;  %v6572_v41 = vadd.f32 %v6571_v38, %v6570_v34  ;;  %v910_v34 = vld [vmem:[#allocation8 + $0x1c0] sm:$0xff] }
 0x1bf   :  { %v912_v40 = vld [vmem:[#allocation8 + $0x1d0] sm:$0xff] }
 0x1c0   :  { %v366_v42 = vadd.f32 %v6572_v41, %v365_v35  ;;  %v904_v35 = vld [vmem:[#allocation8 + $0x190] sm:$0xff] }
 0x1c1   :  { %v7150_v41 = vpack.c.bf16 %v912_v40, %v904_v35  ;;  %v992_v35 = vld [vmem:[#allocation8 + $0x450] sm:$0xff]  ;;  %v1007_v40 = vld [vmem:[#allocation8 + $0x4c8] sm:$0xff] }
 0x1c2   :  { %v369_v43 = vmul.f32 0.012345679, %v366_v42  ;;  %v919_v42 = vld [vmem:[#allocation8 + $0x208] sm:$0xff] }
 0x1c4   :  { %631 = vmatmul.mubr.f32.vlgmr.msra.gmra.mrb[4].mxu0 %v369_v43  ;;  %6779 = vmatmul.mubr.f32.vlgmr.msra.gmra.mrb[4].mxu1 %v369_v43  ;;  %v514_v50 = vmul.f32 %v369_v43, %v369_v43  ;;  %v927_v43 = vld [vmem:[#allocation8 + $0x248] sm:$0xff] }
 0x1c5   :  { %6987 = vmatpush1.bf16.msra.mxu0 %v10213_v27  ;;  %7018 = vmatpush3.bf16.msra.mxu1 %v10215_v28  ;;  %v863_v27 = vld [vmem:[#allocation8 + $0x48] sm:$0xff]  ;;  %v857_v28 = vld [vmem:[#allocation8 + $0x18] sm:$0xff] }
 0x1c6   :  { %6989 = vmatprep.subr.bf16.mxu0 %v10219_v30  ;;  %7019 = vmatprep.subr.bf16.mxu1 %v9914_v0  ;;  %v865_v30 = vld [vmem:[#allocation8 + $0x58] sm:$0xff] }
 0x1c7   :  { %774 = vmatprep.mubr.f32.mxu0 %v9916_v1  ;;  %6813 = vmatprep.mubr.msk.f32.mxu1 %vm9915_vm0, %v9916_v1  ;;  %v7136_v47 = vpack.c.bf16 %v865_v30, %v857_v28  ;;  %v929_v28 = vld [vmem:[#allocation8 + $0x258] sm:$0xff]  ;;  %v918_v30 = vld [vmem:[#allocation8 + $0x200] sm:$0xff] }
 0x1c9   :  { %6991 = vmatpush1.bf16.msra.mxu0 %v10223_v36  ;;  %7021 = vmatpush3.bf16.msra.mxu1 %v10225_v37 }
 0x1ca   :  { %6993 = vmatprep.subr.bf16.mxu0 %v10229_v39  ;;  %7022 = vmatprep.subr.bf16.mxu1 %v9914_v0 }
 0x1cd   :  { %6995 = vmatpush1.bf16.msra.mxu0 %v10236_v45  ;;  %7024 = vmatpush3.bf16.msra.mxu1 %v10238_v46  ;;  %v7040_v46 = vpack.c.bf16 %v863_v27, %v855_v14  ;;  %v921_v14 = vld [vmem:[#allocation8 + $0x218] sm:$0xff]  ;;  %v7056_v27 = vpack.c.bf16 %v927_v43, %v919_v42 }
 0x1ce   :  { %6997 = vmatprep.subr.bf16.mxu0 %v10242_v48  ;;  %7025 = vmatprep.subr.bf16.mxu1 %v9914_v0  ;;  %v1009_v42 = vld [vmem:[#allocation8 + $0x4d8] sm:$0xff] }
 0x1d1   :  { %6999 = vmatpush1.bf16.msra.mxu0 %v10246_v54  ;;  %7027 = vmatpush3.bf16.msra.mxu1 %v10248_v55  ;;  %v862_v54 = vld [vmem:[#allocation8 + $0x40] sm:$0xff]  ;;  %v856_v55 = vld [vmem:[#allocation8 + $0x10] sm:$0xff] }
 0x1d2   :  { %7001 = vmatprep.subr.bf16.mxu0 %v10252_v57  ;;  %7028 = vmatprep.subr.bf16.mxu1 %v9914_v0  ;;  %v871_v57 = vld [vmem:[#allocation8 + $0x88] sm:$0xff]  ;;  %v7042_v60 = vpack.c.bf16 %v862_v54, %v854_v53  ;;  %v7138_v61 = vpack.c.bf16 %v864_v56, %v856_v55  ;;  %v934_v53 = vld [vmem:[#allocation8 + $0x280] sm:$0xff]  ;;  %v936_v55 = vld [vmem:[#allocation8 + $0x290] sm:$0xff] }
 0x1d3   :  { %v942_v54 = vld [vmem:[#allocation8 + $0x2c0] sm:$0xff] }
 0x1d4   :  { %v7062_v56 = vpack.c.bf16 %v942_v54, %v934_v53  ;;  %v1016_v53 = vld [vmem:[#allocation8 + $0x510] sm:$0xff] }
 0x1d5   :  { %7003 = vmatpush1.bf16.msra.mxu0 %v10256_v63  ;;  %7030 = vmatpush3.bf16.msra.mxu1 %v10258_v2  ;;  %v878_v63 = vld [vmem:[#allocation8 + $0xc0] sm:$0xff]  ;;  %v7044_v2 = vpack.c.bf16 %v879_v58, %v871_v57  ;;  %v944_v57 = vld [vmem:[#allocation8 + $0x2d0] sm:$0xff]  ;;  %v951_v58 = vld [vmem:[#allocation8 + $0x308] sm:$0xff] }
 0x1d6   :  { %7005 = vmatprep.subr.bf16.mxu0 %v10262_v4  ;;  %7031 = vmatprep.subr.bf16.mxu1 %v9914_v0  ;;  %v872_v4 = vld [vmem:[#allocation8 + $0x90] sm:$0xff]  ;;  %v7046_v15 = vpack.c.bf16 %v878_v63, %v870_v62  ;;  %v961_v62 = vld [vmem:[#allocation8 + $0x358] sm:$0xff]  ;;  %v950_v63 = vld [vmem:[#allocation8 + $0x300] sm:$0xff] }
 0x1d9   :  { %7007 = vmatpush1.bf16.msra.mxu0 %v10266_v11  ;;  %7033 = vmatpush3.bf16.msra.mxu1 %v10268_v12  ;;  %v895_v11 = vld [vmem:[#allocation8 + $0x148] sm:$0xff]  ;;  %v889_v12 = vld [vmem:[#allocation8 + $0x118] sm:$0xff] }
 0x1da   :  { %7009 = vmatprep.subr.bf16.mxu0 %v6952_v16  ;;  %7034 = vmatprep.subr.bf16.mxu1 %v9914_v0  ;;  %v7142_v16 = vpack.c.bf16 %v880_v6, %v872_v4  ;;  %v7048_v9 = vpack.c.bf16 %v895_v11, %v887_v7  ;;  %v952_v4 = vld [vmem:[#allocation8 + $0x310] sm:$0xff]  ;;  %v975_v11 = vld [vmem:[#allocation8 + $0x3c8] sm:$0xff] }
 0x1db   :  { %v960_v6 = vld [vmem:[#allocation8 + $0x350] sm:$0xff] }
 0x1dc   :  { %v6622_v36 = vpop.f32.mrb[2].mxu0 }
 0x1dd   :  { %v509_v37 = vpop.f32.mrb[2].mxu1  ;;  %v6623_v39 = vpop.f32.mrb[3].mxu0  ;;  %7011 = vmatpush1.bf16.msra.mxu0 %v10275_v10  ;;  %7036 = vmatpush3.bf16.msra.mxu1 %v6979_v19  ;;  %v7144_v10 = vpack.c.bf16 %v897_v13, %v889_v12  ;;  %v896_v19 = vld [vmem:[#allocation8 + $0x150] sm:$0xff]  ;;  %v969_v12 = vld [vmem:[#allocation8 + $0x398] sm:$0xff]  ;;  %v7162_v13 = vpack.c.bf16 %v960_v6, %v952_v4  ;;  %v1047_v6 = vld [vmem:[#allocation8 + $0x608] sm:$0xff] }
 0x1de   :  { %v6745_v44 = vpop.f32.mrb[3].mxu1  ;;  %v6624_v45 = vadd.f32 %v6623_v39, %v6622_v36  ;;  %7013 = vmatprep.subr.bf16.mxu0 %v6956_v24  ;;  %7037 = vmatprep.subr.bf16.mxu1 %v9914_v0  ;;  %v881_v0 = vld [vmem:[#allocation8 + $0xd8] sm:$0xff]  ;;  %v7146_v29 = vpack.c.bf16 %v896_v19, %v888_v18  ;;  %v926_v36 = vld [vmem:[#allocation8 + $0x240] sm:$0xff]  ;;  %v976_v18 = vld [vmem:[#allocation8 + $0x3d0] sm:$0xff] }
 0x1df   :  { %v7140_v3 = vpack.c.bf16 %v881_v0, %v873_v59  ;;  %v905_v24 = vld [vmem:[#allocation8 + $0x198] sm:$0xff]  ;;  %v7058_v39 = vpack.c.bf16 %v926_v36, %v918_v30  ;;  %v920_v44 = vld [vmem:[#allocation8 + $0x210] sm:$0xff]  ;;  %v959_v59 = vld [vmem:[#allocation8 + $0x348] sm:$0xff]  ;;  %v7158_v0 = vpack.c.bf16 %v944_v57, %v936_v55 }
 0x1e0   :  { %v510_v48 = vadd.f32 %v6624_v45, %v509_v37  ;;  %v7148_v32 = vpack.c.bf16 %v913_v25, %v905_v24  ;;  %v7152_v37 = vpack.c.bf16 %v929_v28, %v921_v14  ;;  %v928_v45 = vld [vmem:[#allocation8 + $0x250] sm:$0xff]  ;;  %v983_v19 = vld [vmem:[#allocation8 + $0x408] sm:$0xff]  ;;  %v993_v24 = vld [vmem:[#allocation8 + $0x458] sm:$0xff]  ;;  %v7070_v25 = vpack.c.bf16 %v974_v5, %v966_v21 }
 0x1e1   :  { %7015 = vmatpush1.bf16.msra.mxu0 %v6958_v31  ;;  %7039 = vmatpush3.bf16.msra.mxu1 %v6982_v33  ;;  %v7052_v31 = vpack.c.bf16 %v911_v23, %v903_v22  ;;  %v902_v33 = vld [vmem:[#allocation8 + $0x180] sm:$0xff]  ;;  %v991_v22 = vld [vmem:[#allocation8 + $0x448] sm:$0xff]  ;;  %v985_v23 = vld [vmem:[#allocation8 + $0x418] sm:$0xff] }
 0x1e2   :  { %v513_v49 = vmul.f32 0.012345679, %v510_v48  ;;  %7041 = vmatprep.subr.bf16.mxu0 %v7040_v46  ;;  %7137 = vmatprep.subr.bf16.mxu1 %v7136_v47  ;;  %v7054_v38 = vpack.c.bf16 %v910_v34, %v902_v33  ;;  %v935_v46 = vld [vmem:[#allocation8 + $0x288] sm:$0xff]  ;;  %v7154_v47 = vpack.c.bf16 %v928_v45, %v920_v44  ;;  %v984_v33 = vld [vmem:[#allocation8 + $0x410] sm:$0xff]  ;;  %v7168_v34 = vpack.c.bf16 %v993_v24, %v985_v23  ;;  %v998_v28 = vld [vmem:[#allocation8 + $0x480] sm:$0xff] }
 0x1e3   :  { %v943_v48 = vld [vmem:[#allocation8 + $0x2c8] sm:$0xff]  ;;  %v7170_v14 = vpack.c.bf16 %v992_v35, %v984_v33  ;;  %v1006_v30 = vld [vmem:[#allocation8 + $0x4c0] sm:$0xff]  ;;  %v1000_v36 = vld [vmem:[#allocation8 + $0x490] sm:$0xff] }
 0x1e4   :  { %v515_v51 = vsub.f32 %v513_v49, %v514_v50  ;;  %v937_v49 = vld [vmem:[#allocation8 + $0x298] sm:$0xff]  ;;  %v1015_v44 = vld [vmem:[#allocation8 + $0x508] sm:$0xff]  ;;  %v1024_v55 = vld [vmem:[#allocation8 + $0x550] sm:$0xff] }
 0x1e5   :  { %v945_v50 = vld [vmem:[#allocation8 + $0x2d8] sm:$0xff]  ;;  %v1023_v45 = vld [vmem:[#allocation8 + $0x548] sm:$0xff]  ;;  %v1040_v4 = vld [vmem:[#allocation8 + $0x5d0] sm:$0xff] }
 0x1e6   :  { %v516_v52 = vadd.f32 1e-05, %v515_v51  ;;  %v7060_v51 = vpack.c.bf16 %v943_v48, %v935_v46  ;;  %v1017_v46 = vld [vmem:[#allocation8 + $0x518] sm:$0xff]  ;;  %v7078_v48 = vpack.c.bf16 %v1006_v30, %v998_v28  ;;  %v1039_v57 = vld [vmem:[#allocation8 + $0x5c8] sm:$0xff]  ;;  %v1054_v21 = vld [vmem:[#allocation8 + $0x640] sm:$0xff] }
 0x1e7   :  { %v1048_v5 = vld [vmem:[#allocation8 + $0x610] sm:$0xff]  ;;  %v1073_v23 = vld [vmem:[#allocation8 + $0x6d8] sm:$0xff]  ;;  %v1079_v35 = vld [vmem:[#allocation8 + $0x708] sm:$0xff] }
 0x1e8   :  { %9605 = vrsqrt.f32 %v516_v52  ;;  %v7156_v52 = vpack.c.bf16 %v945_v50, %v937_v49  ;;  %v7080_v50 = vpack.c.bf16 %v1023_v45, %v1015_v44  ;;  %v1086_v28 = vld [vmem:[#allocation8 + $0x740] sm:$0xff]  ;;  %v1095_v45 = vld [vmem:[#allocation8 + $0x788] sm:$0xff] }
 0x1f2   :  { %v9606_v8 = vpop.eup %9605 }
 0x1f3   :  { %775 = vmatmul.mubr.f32.vlgmr.msra.gmra.mrb[6].mxu0 %v9606_v8  ;;  %6814 = vmatmul.mubr.f32.vlgmr.msra.gmra.mrb[6].mxu1 %v9606_v8  ;;  %v967_v8 = vld [vmem:[#allocation8 + $0x388] sm:$0xff] }
 0x1f4   :  { %7043 = vmatpush1.bf16.msra.mxu0 %v7042_v60  ;;  %7139 = vmatpush1.bf16.msra.mxu1 %v7138_v61  ;;  %v7064_v60 = vpack.c.bf16 %v959_v59, %v951_v58  ;;  %v953_v61 = vld [vmem:[#allocation8 + $0x318] sm:$0xff] }
 0x1f5   :  { %7045 = vmatprep.subr.bf16.mxu0 %v7044_v2  ;;  %7141 = vmatprep.subr.bf16.mxu1 %v7140_v3  ;;  %v7160_v2 = vpack.c.bf16 %v961_v62, %v953_v61  ;;  %v958_v3 = vld [vmem:[#allocation8 + $0x340] sm:$0xff]  ;;  %v1033_v58 = vld [vmem:[#allocation8 + $0x598] sm:$0xff] }
 0x1f6   :  { %v7066_v7 = vpack.c.bf16 %v958_v3, %v950_v63  ;;  %v1041_v59 = vld [vmem:[#allocation8 + $0x5d8] sm:$0xff]  ;;  %v1030_v62 = vld [vmem:[#allocation8 + $0x580] sm:$0xff] }
 0x1f7   :  { %v1038_v63 = vld [vmem:[#allocation8 + $0x5c0] sm:$0xff]  ;;  %v7180_v3 = vpack.c.bf16 %v1041_v59, %v1033_v58  ;;  %v1119_v58 = vld [vmem:[#allocation8 + $0x848] sm:$0xff]  ;;  %v1113_v59 = vld [vmem:[#allocation8 + $0x818] sm:$0xff] }
 0x1f8   :  { %7047 = vmatpush1.bf16.msra.mxu0 %v7046_v15  ;;  %7143 = vmatpush1.bf16.msra.mxu1 %v7142_v16  ;;  %v7068_v15 = vpack.c.bf16 %v975_v11, %v967_v8  ;;  %v977_v16 = vld [vmem:[#allocation8 + $0x3d8] sm:$0xff] }
 0x1f9   :  { %7049 = vmatprep.subr.bf16.mxu0 %v7048_v9  ;;  %7145 = vmatprep.subr.bf16.mxu1 %v7144_v10  ;;  %v7164_v9 = vpack.c.bf16 %v977_v16, %v969_v12  ;;  %v968_v10 = vld [vmem:[#allocation8 + $0x390] sm:$0xff]  ;;  %v1049_v8 = vld [vmem:[#allocation8 + $0x618] sm:$0xff]  ;;  %v7086_v12 = vpack.c.bf16 %v1038_v63, %v1030_v62  ;;  %v1046_v16 = vld [vmem:[#allocation8 + $0x600] sm:$0xff] }
 0x1fa   :  { %v1057_v11 = vld [vmem:[#allocation8 + $0x658] sm:$0xff]  ;;  %v7090_v24 = vpack.c.bf16 %v1054_v21, %v1046_v16 }
 0x1fc   :  { %7051 = vmatpush1.bf16.msra.mxu0 %v7050_v26  ;;  %7147 = vmatpush1.bf16.msra.mxu1 %v7146_v29  ;;  %v7166_v26 = vpack.c.bf16 %v976_v18, %v968_v10  ;;  %v7072_v29 = vpack.c.bf16 %v991_v22, %v983_v19  ;;  %v1056_v10 = vld [vmem:[#allocation8 + $0x650] sm:$0xff]  ;;  %v1063_v18 = vld [vmem:[#allocation8 + $0x688] sm:$0xff]  ;;  %v1065_v22 = vld [vmem:[#allocation8 + $0x698] sm:$0xff] }
 0x1fd   :  { %7053 = vmatprep.subr.bf16.mxu0 %v7052_v31  ;;  %7149 = vmatprep.subr.bf16.mxu1 %v7148_v32  ;;  %v982_v31 = vld [vmem:[#allocation8 + $0x400] sm:$0xff]  ;;  %v1071_v19 = vld [vmem:[#allocation8 + $0x6c8] sm:$0xff]  ;;  %v7188_v33 = vpack.c.bf16 %v1073_v23, %v1065_v22 }
 0x1fe   :  { %v990_v32 = vld [vmem:[#allocation8 + $0x440] sm:$0xff] }
 0x1ff   :  { %v7074_v43 = vpack.c.bf16 %v990_v32, %v982_v31  ;;  %v1070_v31 = vld [vmem:[#allocation8 + $0x6c0] sm:$0xff]  ;;  %v1064_v32 = vld [vmem:[#allocation8 + $0x690] sm:$0xff] }
 0x200   :  { %7055 = vmatpush1.bf16.msra.mxu0 %v7054_v38  ;;  %7151 = vmatpush1.bf16.msra.mxu1 %v7150_v41  ;;  %v999_v38 = vld [vmem:[#allocation8 + $0x488] sm:$0xff]  ;;  %v1001_v41 = vld [vmem:[#allocation8 + $0x498] sm:$0xff] }
 0x201   :  { %7057 = vmatprep.subr.bf16.mxu0 %v7056_v27  ;;  %7153 = vmatprep.subr.bf16.mxu1 %v7152_v37  ;;  %v7076_v27 = vpack.c.bf16 %v1007_v40, %v999_v38  ;;  %v7172_v37 = vpack.c.bf16 %v1009_v42, %v1001_v41  ;;  %v1087_v38 = vld [vmem:[#allocation8 + $0x748] sm:$0xff]  ;;  %v1081_v40 = vld [vmem:[#allocation8 + $0x718] sm:$0xff] }
 0x202   :  { %v1089_v41 = vld [vmem:[#allocation8 + $0x758] sm:$0xff] }
 0x203   :  { %v7192_v30 = vpack.c.bf16 %v1089_v41, %v1081_v40  ;;  %v1145_v40 = vld [vmem:[#allocation8 + $0x918] sm:$0xff] }
 0x204   :  { %7059 = vmatpush1.bf16.msra.mxu0 %v7058_v39  ;;  %7155 = vmatpush1.bf16.msra.mxu1 %v7154_v47  ;;  %v1008_v39 = vld [vmem:[#allocation8 + $0x4d0] sm:$0xff]  ;;  %v1025_v47 = vld [vmem:[#allocation8 + $0x558] sm:$0xff] }
 0x205   :  { %7061 = vmatprep.subr.bf16.mxu0 %v7060_v51  ;;  %7157 = vmatprep.subr.bf16.mxu1 %v7156_v52  ;;  %v7174_v49 = vpack.c.bf16 %v1008_v39, %v1000_v36  ;;  %v1014_v51 = vld [vmem:[#allocation8 + $0x500] sm:$0xff]  ;;  %v7176_v54 = vpack.c.bf16 %v1025_v47, %v1017_v46  ;;  %v1080_v36 = vld [vmem:[#allocation8 + $0x710] sm:$0xff]  ;;  %v1103_v46 = vld [vmem:[#allocation8 + $0x7c8] sm:$0xff] }
 0x206   :  { %v1022_v52 = vld [vmem:[#allocation8 + $0x540] sm:$0xff]  ;;  %v1097_v47 = vld [vmem:[#allocation8 + $0x798] sm:$0xff] }
 0x207   :  { %v1153_v41 = vld [vmem:[#allocation8 + $0x958] sm:$0xff] }
 0x208   :  { %7063 = vmatpush1.bf16.msra.mxu0 %v7062_v56  ;;  %7159 = vmatpush1.bf16.msra.mxu1 %v7158_v0  ;;  %v1031_v56 = vld [vmem:[#allocation8 + $0x588] sm:$0xff]  ;;  %v7082_v0 = vpack.c.bf16 %v1022_v52, %v1014_v51  ;;  %v1102_v51 = vld [vmem:[#allocation8 + $0x7c0] sm:$0xff] }
 0x209   :  { %7065 = vmatprep.subr.bf16.mxu0 %v7064_v60  ;;  %7161 = vmatprep.subr.bf16.mxu1 %v7160_v2  ;;  %v7178_v60 = vpack.c.bf16 %v1024_v55, %v1016_v53  ;;  %v7084_v61 = vpack.c.bf16 %v1039_v57, %v1031_v56  ;;  %v1032_v2 = vld [vmem:[#allocation8 + $0x590] sm:$0xff]  ;;  %v1111_v57 = vld [vmem:[#allocation8 + $0x808] sm:$0xff] }
 0x20a   :  { %v1104_v55 = vld [vmem:[#allocation8 + $0x7d0] sm:$0xff] }
 0x20c   :  { %7067 = vmatpush1.bf16.msra.mxu0 %v7066_v7  ;;  %7163 = vmatpush1.bf16.msra.mxu1 %v7162_v13  ;;  %v1055_v7 = vld [vmem:[#allocation8 + $0x648] sm:$0xff]  ;;  %v7182_v13 = vpack.c.bf16 %v1040_v4, %v1032_v2  ;;  %v1110_v4 = vld [vmem:[#allocation8 + $0x800] sm:$0xff] }
 0x20d   :  { %7069 = vmatprep.subr.bf16.mxu0 %v7068_v15  ;;  %7165 = vmatprep.subr.bf16.mxu1 %v7164_v9  ;;  %v7088_v15 = vpack.c.bf16 %v1055_v7, %v1047_v6  ;;  %v7184_v9 = vpack.c.bf16 %v1057_v11, %v1049_v8  ;;  %v1118_v6 = vld [vmem:[#allocation8 + $0x840] sm:$0xff]  ;;  %v1112_v11 = vld [vmem:[#allocation8 + $0x810] sm:$0xff] }
 0x210   :  { %7071 = vmatpush1.bf16.msra.mxu0 %v7070_v25  ;;  %7167 = vmatpush1.bf16.msra.mxu1 %v7166_v26  ;;  %v7186_v25 = vpack.c.bf16 %v1056_v10, %v1048_v5  ;;  %v7092_v26 = vpack.c.bf16 %v1071_v19, %v1063_v18  ;;  %v1129_v10 = vld [vmem:[#allocation8 + $0x898] sm:$0xff] }
 0x211   :  { %7073 = vmatprep.subr.bf16.mxu0 %v7072_v29  ;;  %7169 = vmatprep.subr.bf16.mxu1 %v7168_v34  ;;  %v1062_v29 = vld [vmem:[#allocation8 + $0x680] sm:$0xff]  ;;  %v1072_v34 = vld [vmem:[#allocation8 + $0x6d0] sm:$0xff]  ;;  %v1137_v18 = vld [vmem:[#allocation8 + $0x8d8] sm:$0xff] }
 0x212   :  { %v7094_v42 = vpack.c.bf16 %v1070_v31, %v1062_v29  ;;  %v1134_v29 = vld [vmem:[#allocation8 + $0x8c0] sm:$0xff] }
 0x214   :  { %7075 = vmatpush1.bf16.msra.mxu0 %v7074_v43  ;;  %7171 = vmatpush1.bf16.msra.mxu1 %v7170_v14  ;;  %v7190_v43 = vpack.c.bf16 %v1072_v34, %v1064_v32  ;;  %v7096_v14 = vpack.c.bf16 %v1087_v38, %v1079_v35  ;;  %v7204_v32 = vpack.c.bf16 %v1137_v18, %v1129_v10  ;;  %v1136_v34 = vld [vmem:[#allocation8 + $0x8d0] sm:$0xff]  ;;  %v1143_v35 = vld [vmem:[#allocation8 + $0x908] sm:$0xff] }
 0x215   :  { %7077 = vmatprep.subr.bf16.mxu0 %v7076_v27  ;;  %7173 = vmatprep.subr.bf16.mxu1 %v7172_v37  ;;  %v1078_v27 = vld [vmem:[#allocation8 + $0x700] sm:$0xff]  ;;  %v1088_v37 = vld [vmem:[#allocation8 + $0x750] sm:$0xff]  ;;  %v1151_v38 = vld [vmem:[#allocation8 + $0x948] sm:$0xff] }
 0x216   :  { %v7098_v39 = vpack.c.bf16 %v1086_v28, %v1078_v27  ;;  %v7194_v44 = vpack.c.bf16 %v1088_v37, %v1080_v36  ;;  %v1150_v27 = vld [vmem:[#allocation8 + $0x940] sm:$0xff]  ;;  %v7112_v28 = vpack.c.bf16 %v1151_v38, %v1143_v35  ;;  %v1144_v36 = vld [vmem:[#allocation8 + $0x910] sm:$0xff]  ;;  %v1207_v10 = vld [vmem:[#allocation8 + $0xb08] sm:$0xff] }
 0x217   :  { %v1152_v37 = vld [vmem:[#allocation8 + $0x950] sm:$0xff]  ;;  %v1215_v18 = vld [vmem:[#allocation8 + $0xb48] sm:$0xff] }
 0x218   :  { %7079 = vmatpush1.bf16.msra.mxu0 %v7078_v48  ;;  %7175 = vmatpush1.bf16.msra.mxu1 %v7174_v49  ;;  %v7100_v48 = vpack.c.bf16 %v1103_v46, %v1095_v45  ;;  %v1105_v49 = vld [vmem:[#allocation8 + $0x7d8] sm:$0xff]  ;;  %v1223_v35 = vld [vmem:[#allocation8 + $0xb88] sm:$0xff] }
 0x219   :  { %7081 = vmatprep.subr.bf16.mxu0 %v7080_v50  ;;  %7177 = vmatprep.subr.bf16.mxu1 %v7176_v54  ;;  %v1094_v50 = vld [vmem:[#allocation8 + $0x780] sm:$0xff]  ;;  %v7196_v52 = vpack.c.bf16 %v1105_v49, %v1097_v47  ;;  %v1096_v54 = vld [vmem:[#allocation8 + $0x790] sm:$0xff]  ;;  %v1161_v45 = vld [vmem:[#allocation8 + $0x998] sm:$0xff] }
 0x21a   :  { %v7102_v53 = vpack.c.bf16 %v1102_v51, %v1094_v50  ;;  %v7198_v56 = vpack.c.bf16 %v1104_v55, %v1096_v54  ;;  %v1169_v46 = vld [vmem:[#allocation8 + $0x9d8] sm:$0xff]  ;;  %v1158_v49 = vld [vmem:[#allocation8 + $0x980] sm:$0xff]  ;;  %v1168_v54 = vld [vmem:[#allocation8 + $0x9d0] sm:$0xff] }
 0x21b   :  { %v1166_v50 = vld [vmem:[#allocation8 + $0x9c0] sm:$0xff]  ;;  %v1175_v55 = vld [vmem:[#allocation8 + $0xa08] sm:$0xff] }
 0x21c   :  { %7083 = vmatpush1.bf16.msra.mxu0 %v7082_v0  ;;  %7179 = vmatpush1.bf16.msra.mxu1 %v7178_v60  ;;  %v7104_v0 = vpack.c.bf16 %v1119_v58, %v1111_v57  ;;  %v1121_v60 = vld [vmem:[#allocation8 + $0x858] sm:$0xff]  ;;  %v1231_v38 = vld [vmem:[#allocation8 + $0xbc8] sm:$0xff] }
 0x21d   :  { %7085 = vmatprep.subr.bf16.mxu0 %v7084_v61  ;;  %7181 = vmatprep.subr.bf16.mxu1 %v7180_v3  ;;  %v7200_v61 = vpack.c.bf16 %v1121_v60, %v1113_v59  ;;  %v1177_v57 = vld [vmem:[#allocation8 + $0xa18] sm:$0xff]  ;;  %v7118_v59 = vpack.c.bf16 %v1166_v50, %v1158_v49  ;;  %v1174_v60 = vld [vmem:[#allocation8 + $0xa00] sm:$0xff] }
 0x21e   :  { %v1185_v58 = vld [vmem:[#allocation8 + $0xa58] sm:$0xff] }
 0x220   :  { %7087 = vmatpush1.bf16.msra.mxu0 %v7086_v12  ;;  %7183 = vmatpush1.bf16.msra.mxu1 %v7182_v13  ;;  %v1120_v12 = vld [vmem:[#allocation8 + $0x850] sm:$0xff]  ;;  %v1127_v13 = vld [vmem:[#allocation8 + $0x888] sm:$0xff] }
 0x221   :  { %7089 = vmatprep.subr.bf16.mxu0 %v7088_v15  ;;  %7185 = vmatprep.subr.bf16.mxu1 %v7184_v9  ;;  %v9607_v15 = vld [vmem:[#allocation2 + $0x8] sm:$0xff]  ;;  %v1135_v9 = vld [vmem:[#allocation8 + $0x8c8] sm:$0xff] }
 0x222   :  { %v7108_v31 = vpack.c.bf16 %v1135_v9, %v1127_v13  ;;  %v1190_v13 = vld [vmem:[#allocation8 + $0xa80] sm:$0xff]  ;;  %v1200_v9 = vld [vmem:[#allocation8 + $0xad0] sm:$0xff] }
 0x224   :  { %7091 = vmatpush1.bf16.msra.mxu0 %v7090_v24  ;;  %7187 = vmatpush1.bf16.msra.mxu1 %v7186_v25 }
 0x225   :  { %7093 = vmatprep.subr.bf16.mxu0 %v7092_v26  ;;  %7189 = vmatprep.subr.bf16.mxu1 %v7188_v33  ;;  %v1126_v26 = vld [vmem:[#allocation8 + $0x880] sm:$0xff]  ;;  %v1128_v33 = vld [vmem:[#allocation8 + $0x890] sm:$0xff] }
 0x228   :  { %7095 = vmatpush1.bf16.msra.mxu0 %v7094_v42  ;;  %7191 = vmatpush1.bf16.msra.mxu1 %v7190_v43  ;;  %v7110_v42 = vpack.c.bf16 %v1134_v29, %v1126_v26  ;;  %v7206_v43 = vpack.c.bf16 %v1136_v34, %v1128_v33  ;;  %v1206_v26 = vld [vmem:[#allocation8 + $0xb00] sm:$0xff]  ;;  %v1208_v33 = vld [vmem:[#allocation8 + $0xb10] sm:$0xff] }
 0x229   :  { %7097 = vmatprep.subr.bf16.mxu0 %v7096_v14  ;;  %7193 = vmatprep.subr.bf16.mxu1 %v7192_v30  ;;  %v1142_v14 = vld [vmem:[#allocation8 + $0x900] sm:$0xff]  ;;  %v7208_v30 = vpack.c.bf16 %v1153_v41, %v1145_v40  ;;  %v1216_v34 = vld [vmem:[#allocation8 + $0xb50] sm:$0xff]  ;;  %v1225_v40 = vld [vmem:[#allocation8 + $0xb98] sm:$0xff] }
 0x22a   :  { %v7114_v47 = vpack.c.bf16 %v1150_v27, %v1142_v14  ;;  %v1214_v29 = vld [vmem:[#allocation8 + $0xb40] sm:$0xff]  ;;  %v1233_v41 = vld [vmem:[#allocation8 + $0xbd8] sm:$0xff] }
 0x22b   :  { %v1222_v14 = vld [vmem:[#allocation8 + $0xb80] sm:$0xff] }
 0x22c   :  { %7099 = vmatpush1.bf16.msra.mxu0 %v7098_v39  ;;  %7195 = vmatpush1.bf16.msra.mxu1 %v7194_v44  ;;  %v1159_v39 = vld [vmem:[#allocation8 + $0x988] sm:$0xff]  ;;  %v1230_v27 = vld [vmem:[#allocation8 + $0xbc0] sm:$0xff] }
 0x22d   :  { %7101 = vmatprep.subr.bf16.mxu0 %v7100_v48  ;;  %7197 = vmatprep.subr.bf16.mxu1 %v7196_v52  ;;  %v1167_v44 = vld [vmem:[#allocation8 + $0x9c8] sm:$0xff]  ;;  %v7210_v48 = vpack.c.bf16 %v1152_v37, %v1144_v36  ;;  %v7212_v52 = vpack.c.bf16 %v1169_v46, %v1161_v45  ;;  %v1224_v36 = vld [vmem:[#allocation8 + $0xb90] sm:$0xff]  ;;  %v861_v45 = vld [vmem:[#allocation8 + $0x38] sm:$0xff] }
 0x22e   :  { %v7116_v51 = vpack.c.bf16 %v1167_v44, %v1159_v39  ;;  %v1232_v37 = vld [vmem:[#allocation8 + $0xbd0] sm:$0xff]  ;;  %v859_v39 = vld [vmem:[#allocation8 + $0x28] sm:$0xff]  ;;  %v869_v46 = vld [vmem:[#allocation8 + $0x78] sm:$0xff] }
 0x22f   :  { %v867_v44 = vld [vmem:[#allocation8 + $0x68] sm:$0xff]  ;;  %v7328_v50 = vpack.c.bf16 %v869_v46, %v861_v45  ;;  %v949_v45 = vld [vmem:[#allocation8 + $0x2f8] sm:$0xff] }
 0x230   :  { %7103 = vmatpush1.bf16.msra.mxu0 %v7102_v53  ;;  %7199 = vmatpush1.bf16.msra.mxu1 %v7198_v56  ;;  %v1160_v53 = vld [vmem:[#allocation8 + $0x990] sm:$0xff]  ;;  %v1183_v56 = vld [vmem:[#allocation8 + $0xa48] sm:$0xff]  ;;  %v7232_v49 = vpack.c.bf16 %v867_v44, %v859_v39  ;;  %v941_v44 = vld [vmem:[#allocation8 + $0x2b8] sm:$0xff] }
 0x231   :  { %7105 = vmatprep.subr.bf16.mxu0 %v7104_v0  ;;  %7201 = vmatprep.subr.bf16.mxu1 %v7200_v61  ;;  %v7214_v0 = vpack.c.bf16 %v1168_v54, %v1160_v53  ;;  %v1182_v61 = vld [vmem:[#allocation8 + $0xa40] sm:$0xff]  ;;  %v860_v53 = vld [vmem:[#allocation8 + $0x30] sm:$0xff]  ;;  %v947_v39 = vld [vmem:[#allocation8 + $0x2e8] sm:$0xff] }
 0x232   :  { %v868_v54 = vld [vmem:[#allocation8 + $0x70] sm:$0xff] }
 0x297   :  { %v632_v62 = vpop.f32.mrb[4].mxu0  ;;  %v703_v63 = vpop.f32.mrb[4].mxu1 }
 0x298   :  { %v634_v2 = vpop.f32.mrb[5].mxu0  ;;  %v6780_v3 = vpop.f32.mrb[5].mxu1  ;;  %v707_v7 = vsub.f32 %v10175_v17, %v632_v62  ;;  %v709_v8 = vsub.f32 %v10177_v20, %v703_v63  ;;  %v7106_v17 = vpack.c.bf16 %v1118_v6, %v1110_v4  ;;  %v7202_v20 = vpack.c.bf16 %v1120_v12, %v1112_v11  ;;  %v1191_v4 = vld [vmem:[#allocation8 + $0xa88] sm:$0xff] }
 0x299   :  { %v708_v16 = vsub.f32 %v9607_v15, %v634_v2  ;;  %v7120_v62 = vpack.c.bf16 %v1183_v56, %v1175_v55  ;;  %v7216_v63 = vpack.c.bf16 %v1185_v58, %v1177_v57  ;;  %v1176_v2 = vld [vmem:[#allocation8 + $0xa10] sm:$0xff]  ;;  %v1199_v6 = vld [vmem:[#allocation8 + $0xac8] sm:$0xff]  ;;  %v7122_v11 = vpack.c.bf16 %v1182_v61, %v1174_v60  ;;  %v1198_v15 = vld [vmem:[#allocation8 + $0xac0] sm:$0xff] }
 0x29a   :  { %v1184_v3 = vld [vmem:[#allocation8 + $0xa50] sm:$0xff]  ;;  %v875_v55 = vld [vmem:[#allocation8 + $0xa8] sm:$0xff]  ;;  %v877_v57 = vld [vmem:[#allocation8 + $0xb8] sm:$0xff] }
 0x29b   :  { %v7218_v12 = vpack.c.bf16 %v1184_v3, %v1176_v2  ;;  %v883_v56 = vld [vmem:[#allocation8 + $0xe8] sm:$0xff]  ;;  %v885_v58 = vld [vmem:[#allocation8 + $0xf8] sm:$0xff]  ;;  %v874_v60 = vld [vmem:[#allocation8 + $0xa0] sm:$0xff] }
 0x29c   :  { %v882_v61 = vld [vmem:[#allocation8 + $0xe0] sm:$0xff]  ;;  %v7332_v2 = vpack.c.bf16 %v885_v58, %v877_v57  ;;  %v884_v3 = vld [vmem:[#allocation8 + $0xf0] sm:$0xff]  ;;  %v965_v57 = vld [vmem:[#allocation8 + $0x378] sm:$0xff] }
 0x2c6   :  { %v776_v21 = vpop.f32.mrb[6].mxu0  ;;  %v847_v5 = vpop.f32.mrb[6].mxu1 }
 0x2c7   :  { %v10311_v19 = vmul.f32 %v776_v21, %v707_v7  ;;  %v10313_v22 = vmul.f32 %v847_v5, %v709_v8  ;;  %v778_v23 = vpop.f32.mrb[7].mxu0  ;;  %v6815_v24 = vpop.f32.mrb[7].mxu1  ;;  %v1193_v7 = vld [vmem:[#allocation8 + $0xa98] sm:$0xff]  ;;  %v1192_v5 = vld [vmem:[#allocation8 + $0xa90] sm:$0xff] }
 0x2c8   :  { %v10315_v25 = vmul.f32 %v778_v23, %v708_v16  ;;  %v1201_v8 = vld [vmem:[#allocation8 + $0xad8] sm:$0xff]  ;;  %v7124_v16 = vpack.c.bf16 %v1199_v6, %v1191_v4  ;;  %v891_v4 = vld [vmem:[#allocation8 + $0x128] sm:$0xff] }
 0x2c9   :  { %v7220_v21 = vpack.c.bf16 %v1201_v8, %v1193_v7  ;;  %v1209_v23 = vld [vmem:[#allocation8 + $0xb18] sm:$0xff]  ;;  %v899_v6 = vld [vmem:[#allocation8 + $0x168] sm:$0xff] }
 0x2ca   :  { %1344 = vmatprep.mubr.f32.mxu0 %v10315_v25  ;;  %1486 = vmatprep.mubr.f32.mxu1 %v10315_v25  ;;  %v1217_v24 = vld [vmem:[#allocation8 + $0xb58] sm:$0xff] }
 0x2cb   :  { %1345 = vmatmul.mubr.f32.vlgmr.msra.gmra.mrb[8].mxu0 %v10311_v19  ;;  %1487 = vmatmul.mubr.f32.vlgmr.msra.gmra.mrb[8].mxu1 %v10311_v19  ;;  %v893_v7 = vld [vmem:[#allocation8 + $0x138] sm:$0xff] }
 0x2cc   :  { %7107 = vmatpush1.bf16.msra.mxu0 %v7106_v17  ;;  %7203 = vmatpush1.bf16.msra.mxu1 %v7202_v20  ;;  %v7126_v17 = vpack.c.bf16 %v1198_v15, %v1190_v13  ;;  %v7222_v20 = vpack.c.bf16 %v1200_v9, %v1192_v5  ;;  %v901_v8 = vld [vmem:[#allocation8 + $0x178] sm:$0xff]  ;;  %v7240_v13 = vpack.c.bf16 %v899_v6, %v891_v4  ;;  %v890_v15 = vld [vmem:[#allocation8 + $0x120] sm:$0xff]  ;;  %v900_v9 = vld [vmem:[#allocation8 + $0x170] sm:$0xff] }
 0x2cd   :  { %7109 = vmatprep.subr.bf16.mxu0 %v7108_v31  ;;  %7205 = vmatprep.subr.bf16.mxu1 %v7204_v32  ;;  %v7128_v31 = vpack.c.bf16 %v1215_v18, %v1207_v10  ;;  %v7224_v32 = vpack.c.bf16 %v1217_v24, %v1209_v23  ;;  %v7336_v5 = vpack.c.bf16 %v901_v8, %v893_v7  ;;  %v907_v10 = vld [vmem:[#allocation8 + $0x1a8] sm:$0xff]  ;;  %v909_v23 = vld [vmem:[#allocation8 + $0x1b8] sm:$0xff] }
 0x2ce   :  { %1415 = vmatprep.mubr.f32.mxu0 %v9916_v1  ;;  %1557 = vmatprep.mubr.f32.mxu1 %v9916_v1  ;;  %v915_v18 = vld [vmem:[#allocation8 + $0x1e8] sm:$0xff]  ;;  %v917_v24 = vld [vmem:[#allocation8 + $0x1f8] sm:$0xff] }
 0x2cf   :  { %v979_v4 = vld [vmem:[#allocation8 + $0x3e8] sm:$0xff]  ;;  %v973_v6 = vld [vmem:[#allocation8 + $0x3b8] sm:$0xff] }
 0x2d0   :  { %7111 = vmatpush1.bf16.msra.mxu0 %v7110_v42  ;;  %7207 = vmatpush1.bf16.msra.mxu1 %v7206_v43  ;;  %v7130_v42 = vpack.c.bf16 %v1214_v29, %v1206_v26  ;;  %v7226_v43 = vpack.c.bf16 %v1216_v34, %v1208_v33  ;;  %v7244_v26 = vpack.c.bf16 %v915_v18, %v907_v10  ;;  %v914_v29 = vld [vmem:[#allocation8 + $0x1e0] sm:$0xff]  ;;  %v916_v33 = vld [vmem:[#allocation8 + $0x1f0] sm:$0xff]  ;;  %v923_v34 = vld [vmem:[#allocation8 + $0x228] sm:$0xff] }
 0x2d1   :  { %7113 = vmatprep.subr.bf16.mxu0 %v7112_v28  ;;  %7209 = vmatprep.subr.bf16.mxu1 %v7208_v30  ;;  %v7132_v28 = vpack.c.bf16 %v1231_v38, %v1223_v35  ;;  %v7228_v30 = vpack.c.bf16 %v1233_v41, %v1225_v40  ;;  %v931_v35 = vld [vmem:[#allocation8 + $0x268] sm:$0xff]  ;;  %v925_v38 = vld [vmem:[#allocation8 + $0x238] sm:$0xff] }
 0x2d2   :  { %v933_v40 = vld [vmem:[#allocation8 + $0x278] sm:$0xff]  ;;  %v995_v10 = vld [vmem:[#allocation8 + $0x468] sm:$0xff] }
 0x2d3   :  { %v981_v7 = vld [vmem:[#allocation8 + $0x3f8] sm:$0xff] }
 0x2d4   :  { %7115 = vmatpush1.bf16.msra.mxu0 %v7114_v47  ;;  %7211 = vmatpush1.bf16.msra.mxu1 %v7210_v48  ;;  %v7134_v47 = vpack.c.bf16 %v1230_v27, %v1222_v14  ;;  %v7230_v48 = vpack.c.bf16 %v1232_v37, %v1224_v36  ;;  %v922_v14 = vld [vmem:[#allocation8 + $0x220] sm:$0xff]  ;;  %v932_v36 = vld [vmem:[#allocation8 + $0x270] sm:$0xff]  ;;  %v939_v37 = vld [vmem:[#allocation8 + $0x2a8] sm:$0xff] }
 0x2d5   :  { %7117 = vmatprep.subr.bf16.mxu0 %v7116_v51  ;;  %7213 = vmatprep.subr.bf16.mxu1 %v7212_v52  ;;  %v858_v51 = vld [vmem:[#allocation8 + $0x20] sm:$0xff]  ;;  %v989_v18 = vld [vmem:[#allocation8 + $0x438] sm:$0xff] }
 0x2d6   :  { %v866_v52 = vld [vmem:[#allocation8 + $0x60] sm:$0xff] }
 0x2d7   :  { %v930_v27 = vld [vmem:[#allocation8 + $0x260] sm:$0xff] }
 0x2d8   :  { %7119 = vmatpush1.bf16.msra.mxu0 %v7118_v59  ;;  %7215 = vmatpush1.bf16.msra.mxu1 %v7214_v0  ;;  %v7234_v59 = vpack.c.bf16 %v866_v52, %v858_v51  ;;  %v7330_v0 = vpack.c.bf16 %v868_v54, %v860_v53  ;;  %v7250_v46 = vpack.c.bf16 %v930_v27, %v922_v14  ;;  %v940_v51 = vld [vmem:[#allocation8 + $0x2b0] sm:$0xff]  ;;  %v955_v54 = vld [vmem:[#allocation8 + $0x328] sm:$0xff]  ;;  %v1010_v14 = vld [vmem:[#allocation8 + $0x4e0] sm:$0xff] }
 0x2d9   :  { %7121 = vmatprep.subr.bf16.mxu0 %v7120_v62  ;;  %7217 = vmatprep.subr.bf16.mxu1 %v7216_v63  ;;  %v876_v62 = vld [vmem:[#allocation8 + $0xb0] sm:$0xff]  ;;  %v7236_v63 = vpack.c.bf16 %v883_v56, %v875_v55  ;;  %v7348_v52 = vpack.c.bf16 %v949_v45, %v941_v44  ;;  %v963_v55 = vld [vmem:[#allocation8 + $0x368] sm:$0xff]  ;;  %v957_v56 = vld [vmem:[#allocation8 + $0x338] sm:$0xff] }
 0x2da   :  { %v948_v53 = vld [vmem:[#allocation8 + $0x2f0] sm:$0xff]  ;;  %v1029_v44 = vld [vmem:[#allocation8 + $0x578] sm:$0xff] }
 0x2db   :  { %v1004_v27 = vld [vmem:[#allocation8 + $0x4b0] sm:$0xff] }
 0x2dc   :  { %7123 = vmatpush1.bf16.msra.mxu0 %v7122_v11  ;;  %7219 = vmatpush1.bf16.msra.mxu1 %v7218_v12  ;;  %v7238_v11 = vpack.c.bf16 %v882_v61, %v874_v60  ;;  %v7334_v12 = vpack.c.bf16 %v884_v3, %v876_v62  ;;  %v954_v60 = vld [vmem:[#allocation8 + $0x320] sm:$0xff]  ;;  %v956_v62 = vld [vmem:[#allocation8 + $0x330] sm:$0xff]  ;;  %v971_v3 = vld [vmem:[#allocation8 + $0x3a8] sm:$0xff] }
 0x2dd   :  { %7125 = vmatprep.subr.bf16.mxu0 %v7124_v16  ;;  %7221 = vmatprep.subr.bf16.mxu1 %v7220_v21  ;;  %v898_v16 = vld [vmem:[#allocation8 + $0x160] sm:$0xff]  ;;  %v892_v21 = vld [vmem:[#allocation8 + $0x130] sm:$0xff] }
 0x2de   :  { %v962_v61 = vld [vmem:[#allocation8 + $0x360] sm:$0xff] }
 0x2df   :  { %v7258_v8 = vpack.c.bf16 %v962_v61, %v954_v60  ;;  %v1042_v60 = vld [vmem:[#allocation8 + $0x5e0] sm:$0xff]  ;;  %v1036_v61 = vld [vmem:[#allocation8 + $0x5b0] sm:$0xff] }
 0x2e0   :  { %7127 = vmatpush1.bf16.msra.mxu0 %v7126_v17  ;;  %7223 = vmatpush1.bf16.msra.mxu1 %v7222_v20  ;;  %v7242_v17 = vpack.c.bf16 %v898_v16, %v890_v15  ;;  %v7338_v20 = vpack.c.bf16 %v900_v9, %v892_v21  ;;  %v978_v15 = vld [vmem:[#allocation8 + $0x3e0] sm:$0xff]  ;;  %v972_v16 = vld [vmem:[#allocation8 + $0x3b0] sm:$0xff]  ;;  %v7356_v21 = vpack.c.bf16 %v981_v7, %v973_v6  ;;  %v987_v9 = vld [vmem:[#allocation8 + $0x428] sm:$0xff] }
 0x2e1   :  { %7129 = vmatprep.subr.bf16.mxu0 %v7128_v31  ;;  %7225 = vmatprep.subr.bf16.mxu1 %v7224_v32  ;;  %v908_v31 = vld [vmem:[#allocation8 + $0x1b0] sm:$0xff]  ;;  %v7340_v32 = vpack.c.bf16 %v917_v24, %v909_v23  ;;  %v997_v23 = vld [vmem:[#allocation8 + $0x478] sm:$0xff] }
 0x2e2   :  { %v1061_v6 = vld [vmem:[#allocation8 + $0x678] sm:$0xff] }
 0x2e4   :  { %7131 = vmatpush1.bf16.msra.mxu0 %v7130_v42  ;;  %7227 = vmatpush1.bf16.msra.mxu1 %v7226_v43  ;;  %v7342_v42 = vpack.c.bf16 %v916_v33, %v908_v31  ;;  %v7248_v43 = vpack.c.bf16 %v931_v35, %v923_v34  ;;  %v7360_v31 = vpack.c.bf16 %v997_v23, %v989_v18  ;;  %v1003_v33 = vld [vmem:[#allocation8 + $0x4a8] sm:$0xff]  ;;  %v1005_v35 = vld [vmem:[#allocation8 + $0x4b8] sm:$0xff] }
 0x2e5   :  { %7133 = vmatprep.subr.bf16.mxu0 %v7132_v28  ;;  %7229 = vmatprep.subr.bf16.mxu1 %v7228_v30  ;;  %v924_v28 = vld [vmem:[#allocation8 + $0x230] sm:$0xff]  ;;  %v7344_v30 = vpack.c.bf16 %v933_v40, %v925_v38  ;;  %v1011_v34 = vld [vmem:[#allocation8 + $0x4e8] sm:$0xff]  ;;  %v1013_v38 = vld [vmem:[#allocation8 + $0x4f8] sm:$0xff] }
 0x2e6   :  { %v1077_v18 = vld [vmem:[#allocation8 + $0x6f8] sm:$0xff] }
 0x2e8   :  { %7135 = vmatpush1.bf16.msra.mxu0 %v7134_v47  ;;  %7231 = vmatpush1.bf16.msra.mxu1 %v7230_v48  ;;  %v7346_v47 = vpack.c.bf16 %v932_v36, %v924_v28  ;;  %v7252_v48 = vpack.c.bf16 %v947_v39, %v939_v37  ;;  %v7364_v28 = vpack.c.bf16 %v1013_v38, %v1005_v35  ;;  %v1019_v36 = vld [vmem:[#allocation8 + $0x528] sm:$0xff]  ;;  %v1021_v39 = vld [vmem:[#allocation8 + $0x538] sm:$0xff] }
 0x2e9   :  { %7233 = vmatprep.subr.bf16.mxu0 %v7232_v49  ;;  %7329 = vmatprep.subr.bf16.mxu1 %v7328_v50  ;;  %v938_v49 = vld [vmem:[#allocation8 + $0x2a0] sm:$0xff]  ;;  %v1027_v37 = vld [vmem:[#allocation8 + $0x568] sm:$0xff]  ;;  %v1093_v35 = vld [vmem:[#allocation8 + $0x778] sm:$0xff] }
 0x2ea   :  { %v946_v50 = vld [vmem:[#allocation8 + $0x2e0] sm:$0xff] }
 0x2eb   :  { %1416 = vmatmul.mubr.f32.vlgmr.msra.gmra.mrb[8].mxu0 %v10313_v22  ;;  %1558 = vmatmul.mubr.f32.vlgmr.msra.gmra.mrb[8].mxu1 %v10313_v22  ;;  %v7254_v58 = vpack.c.bf16 %v946_v50, %v938_v49  ;;  %v1026_v49 = vld [vmem:[#allocation8 + $0x560] sm:$0xff]  ;;  %v1020_v50 = vld [vmem:[#allocation8 + $0x530] sm:$0xff] }
 0x2ec   :  { %7235 = vmatpush1.bf16.msra.mxu0 %v7234_v59  ;;  %1628 = vmatprep.mubr.f32.mxu0 %v10315_v25  ;;  %v7350_v59 = vpack.c.bf16 %v948_v53, %v940_v51  ;;  %v7368_v51 = vpack.c.bf16 %v1029_v44, %v1021_v39  ;;  %v1035_v53 = vld [vmem:[#allocation8 + $0x5a8] sm:$0xff]  ;;  %v1109_v39 = vld [vmem:[#allocation8 + $0x7f8] sm:$0xff] }
 0x2ed   :  { %7331 = vmatpush1.bf16.msra.mxu1 %v7330_v0  ;;  %1770 = vmatprep.mubr.f32.mxu1 %v10315_v25  ;;  %v906_v25 = vld [vmem:[#allocation8 + $0x1a0] sm:$0xff]  ;;  %v7256_v0 = vpack.c.bf16 %v963_v55, %v955_v54  ;;  %v1043_v54 = vld [vmem:[#allocation8 + $0x5e8] sm:$0xff]  ;;  %v1037_v55 = vld [vmem:[#allocation8 + $0x5b8] sm:$0xff] }
 0x2ee   :  { %7237 = vmatprep.subr.bf16.mxu0 %v7236_v63  ;;  %7333 = vmatprep.subr.bf16.mxu1 %v7332_v2  ;;  %v7246_v41 = vpack.c.bf16 %v914_v29, %v906_v25  ;;  %v7352_v63 = vpack.c.bf16 %v965_v57, %v957_v56  ;;  %v964_v2 = vld [vmem:[#allocation8 + $0x370] sm:$0xff]  ;;  %v994_v25 = vld [vmem:[#allocation8 + $0x460] sm:$0xff]  ;;  %v1045_v56 = vld [vmem:[#allocation8 + $0x5f8] sm:$0xff] }
 0x2ef   :  { %v988_v29 = vld [vmem:[#allocation8 + $0x430] sm:$0xff] }
 0x2f0   :  { %7239 = vmatpush1.bf16.msra.mxu0 %v7238_v11  ;;  %v7354_v11 = vpack.c.bf16 %v964_v2, %v956_v62  ;;  %v7372_v62 = vpack.c.bf16 %v1045_v56, %v1037_v55  ;;  %v1051_v2 = vld [vmem:[#allocation8 + $0x628] sm:$0xff]  ;;  %v1125_v55 = vld [vmem:[#allocation8 + $0x878] sm:$0xff] }
 0x2f1   :  { %7335 = vmatpush1.bf16.msra.mxu1 %v7334_v12  ;;  %7241 = vmatprep.subr.bf16.mxu0 %v7240_v13  ;;  %v7260_v12 = vpack.c.bf16 %v979_v4, %v971_v3  ;;  %v970_v13 = vld [vmem:[#allocation8 + $0x3a0] sm:$0xff]  ;;  %v1059_v3 = vld [vmem:[#allocation8 + $0x668] sm:$0xff]  ;;  %v1053_v4 = vld [vmem:[#allocation8 + $0x638] sm:$0xff] }
 0x2f2   :  { %7337 = vmatprep.subr.bf16.mxu1 %v7336_v5  ;;  %v980_v5 = vld [vmem:[#allocation8 + $0x3f0] sm:$0xff]  ;;  %v7262_v24 = vpack.c.bf16 %v978_v15, %v970_v13  ;;  %v1058_v13 = vld [vmem:[#allocation8 + $0x660] sm:$0xff] }
 0x2f3   :  { %v1052_v15 = vld [vmem:[#allocation8 + $0x630] sm:$0xff] }
 0x2f4   :  { %7243 = vmatpush1.bf16.msra.mxu0 %v7242_v17  ;;  %v7358_v17 = vpack.c.bf16 %v980_v5, %v972_v16  ;;  %v7376_v16 = vpack.c.bf16 %v1061_v6, %v1053_v4  ;;  %v1067_v5 = vld [vmem:[#allocation8 + $0x6a8] sm:$0xff]  ;;  %v1141_v4 = vld [vmem:[#allocation8 + $0x8f8] sm:$0xff] }
 0x2f5   :  { %7339 = vmatpush1.bf16.msra.mxu1 %v7338_v20  ;;  %7245 = vmatprep.subr.bf16.mxu0 %v7244_v26  ;;  %v7264_v20 = vpack.c.bf16 %v995_v10, %v987_v9  ;;  %v986_v26 = vld [vmem:[#allocation8 + $0x420] sm:$0xff]  ;;  %v1075_v9 = vld [vmem:[#allocation8 + $0x6e8] sm:$0xff]  ;;  %v1069_v10 = vld [vmem:[#allocation8 + $0x6b8] sm:$0xff] }
 0x2f6   :  { %7341 = vmatprep.subr.bf16.mxu1 %v7340_v32  ;;  %v996_v32 = vld [vmem:[#allocation8 + $0x470] sm:$0xff]  ;;  %v7266_v40 = vpack.c.bf16 %v994_v25, %v986_v26  ;;  %v1074_v26 = vld [vmem:[#allocation8 + $0x6e0] sm:$0xff] }
 0x2f7   :  { %v1068_v25 = vld [vmem:[#allocation8 + $0x6b0] sm:$0xff] }
 0x2f8   :  { %7247 = vmatpush1.bf16.msra.mxu0 %v7246_v41  ;;  %v7362_v41 = vpack.c.bf16 %v996_v32, %v988_v29  ;;  %v7380_v29 = vpack.c.bf16 %v1077_v18, %v1069_v10  ;;  %v1083_v32 = vld [vmem:[#allocation8 + $0x728] sm:$0xff]  ;;  %v1157_v10 = vld [vmem:[#allocation8 + $0x978] sm:$0xff] }
 0x2f9   :  { %7343 = vmatpush1.bf16.msra.mxu1 %v7342_v42  ;;  %7249 = vmatprep.subr.bf16.mxu0 %v7248_v43  ;;  %v7268_v42 = vpack.c.bf16 %v1011_v34, %v1003_v33  ;;  %v1002_v43 = vld [vmem:[#allocation8 + $0x4a0] sm:$0xff]  ;;  %v1091_v33 = vld [vmem:[#allocation8 + $0x768] sm:$0xff]  ;;  %v1085_v34 = vld [vmem:[#allocation8 + $0x738] sm:$0xff] }
 0x2fa   :  { %7345 = vmatprep.subr.bf16.mxu1 %v7344_v30  ;;  %v1012_v30 = vld [vmem:[#allocation8 + $0x4f0] sm:$0xff]  ;;  %v7270_v45 = vpack.c.bf16 %v1010_v14, %v1002_v43  ;;  %v1090_v43 = vld [vmem:[#allocation8 + $0x760] sm:$0xff] }
 0x2fb   :  { %v1084_v14 = vld [vmem:[#allocation8 + $0x730] sm:$0xff] }
 0x2fc   :  { %7251 = vmatpush1.bf16.msra.mxu0 %v7250_v46  ;;  %v7366_v46 = vpack.c.bf16 %v1012_v30, %v1004_v27  ;;  %v7384_v27 = vpack.c.bf16 %v1093_v35, %v1085_v34  ;;  %v1099_v30 = vld [vmem:[#allocation8 + $0x7a8] sm:$0xff]  ;;  %v1173_v34 = vld [vmem:[#allocation8 + $0x9f8] sm:$0xff] }
 0x2fd   :  { %7347 = vmatpush1.bf16.msra.mxu1 %v7346_v47  ;;  %7253 = vmatprep.subr.bf16.mxu0 %v7252_v48  ;;  %v7272_v47 = vpack.c.bf16 %v1027_v37, %v1019_v36  ;;  %v1018_v48 = vld [vmem:[#allocation8 + $0x520] sm:$0xff]  ;;  %v1107_v36 = vld [vmem:[#allocation8 + $0x7e8] sm:$0xff]  ;;  %v1101_v37 = vld [vmem:[#allocation8 + $0x7b8] sm:$0xff] }
 0x2fe   :  { %7349 = vmatprep.subr.bf16.mxu1 %v7348_v52  ;;  %v1028_v52 = vld [vmem:[#allocation8 + $0x570] sm:$0xff]  ;;  %v7274_v57 = vpack.c.bf16 %v1026_v49, %v1018_v48  ;;  %v1106_v48 = vld [vmem:[#allocation8 + $0x7e0] sm:$0xff] }
 0x2ff   :  { %v1100_v49 = vld [vmem:[#allocation8 + $0x7b0] sm:$0xff] }
 0x300   :  { %7255 = vmatpush1.bf16.msra.mxu0 %v7254_v58  ;;  %v7370_v58 = vpack.c.bf16 %v1028_v52, %v1020_v50  ;;  %v7388_v50 = vpack.c.bf16 %v1109_v39, %v1101_v37  ;;  %v1115_v52 = vld [vmem:[#allocation8 + $0x828] sm:$0xff] }
 0x301   :  { %7351 = vmatpush1.bf16.msra.mxu1 %v7350_v59  ;;  %7257 = vmatprep.subr.bf16.mxu0 %v7256_v0  ;;  %v7276_v59 = vpack.c.bf16 %v1043_v54, %v1035_v53  ;;  %v1034_v0 = vld [vmem:[#allocation8 + $0x5a0] sm:$0xff]  ;;  %v1123_v53 = vld [vmem:[#allocation8 + $0x868] sm:$0xff]  ;;  %v1117_v54 = vld [vmem:[#allocation8 + $0x838] sm:$0xff] }
 0x302   :  { %7353 = vmatprep.subr.bf16.mxu1 %v7352_v63  ;;  %v1044_v63 = vld [vmem:[#allocation8 + $0x5f0] sm:$0xff]  ;;  %v7278_v7 = vpack.c.bf16 %v1042_v60, %v1034_v0  ;;  %v1122_v0 = vld [vmem:[#allocation8 + $0x860] sm:$0xff] }
 0x303   :  { %v1116_v60 = vld [vmem:[#allocation8 + $0x830] sm:$0xff] }
 0x304   :  { %7259 = vmatpush1.bf16.msra.mxu0 %v7258_v8  ;;  %v7374_v8 = vpack.c.bf16 %v1044_v63, %v1036_v61  ;;  %v7392_v61 = vpack.c.bf16 %v1125_v55, %v1117_v54  ;;  %v1131_v63 = vld [vmem:[#allocation8 + $0x8a8] sm:$0xff] }
 0x305   :  { %7355 = vmatpush1.bf16.msra.mxu1 %v7354_v11  ;;  %7261 = vmatprep.subr.bf16.mxu0 %v7260_v12  ;;  %v7280_v11 = vpack.c.bf16 %v1059_v3, %v1051_v2  ;;  %v1050_v12 = vld [vmem:[#allocation8 + $0x620] sm:$0xff]  ;;  %v1139_v2 = vld [vmem:[#allocation8 + $0x8e8] sm:$0xff]  ;;  %v1133_v3 = vld [vmem:[#allocation8 + $0x8b8] sm:$0xff] }
 0x306   :  { %7357 = vmatprep.subr.bf16.mxu1 %v7356_v21  ;;  %v1060_v21 = vld [vmem:[#allocation8 + $0x670] sm:$0xff]  ;;  %v7282_v23 = vpack.c.bf16 %v1058_v13, %v1050_v12  ;;  %v1138_v12 = vld [vmem:[#allocation8 + $0x8e0] sm:$0xff] }
 0x307   :  { %v1132_v13 = vld [vmem:[#allocation8 + $0x8b0] sm:$0xff] }
 0x308   :  { %7263 = vmatpush1.bf16.msra.mxu0 %v7262_v24  ;;  %v7378_v24 = vpack.c.bf16 %v1060_v21, %v1052_v15  ;;  %v7396_v15 = vpack.c.bf16 %v1141_v4, %v1133_v3  ;;  %v1147_v21 = vld [vmem:[#allocation8 + $0x928] sm:$0xff] }
 0x309   :  { %7359 = vmatpush1.bf16.msra.mxu1 %v7358_v17  ;;  %7265 = vmatprep.subr.bf16.mxu0 %v7264_v20  ;;  %v7284_v17 = vpack.c.bf16 %v1075_v9, %v1067_v5  ;;  %v1066_v20 = vld [vmem:[#allocation8 + $0x6a0] sm:$0xff]  ;;  %v1155_v5 = vld [vmem:[#allocation8 + $0x968] sm:$0xff]  ;;  %v1149_v9 = vld [vmem:[#allocation8 + $0x938] sm:$0xff] }
 0x30a   :  { %7361 = vmatprep.subr.bf16.mxu1 %v7360_v31  ;;  %v1076_v31 = vld [vmem:[#allocation8 + $0x6f0] sm:$0xff]  ;;  %v7286_v38 = vpack.c.bf16 %v1074_v26, %v1066_v20  ;;  %v1154_v20 = vld [vmem:[#allocation8 + $0x960] sm:$0xff] }
 0x30b   :  { %v1148_v26 = vld [vmem:[#allocation8 + $0x930] sm:$0xff] }
 0x30c   :  { %7267 = vmatpush1.bf16.msra.mxu0 %v7266_v40  ;;  %v7382_v40 = vpack.c.bf16 %v1076_v31, %v1068_v25  ;;  %v7400_v25 = vpack.c.bf16 %v1157_v10, %v1149_v9  ;;  %v1163_v31 = vld [vmem:[#allocation8 + $0x9a8] sm:$0xff] }
 0x30d   :  { %7363 = vmatpush1.bf16.msra.mxu1 %v7362_v41  ;;  %7269 = vmatprep.subr.bf16.mxu0 %v7268_v42  ;;  %v7288_v41 = vpack.c.bf16 %v1091_v33, %v1083_v32  ;;  %v1082_v42 = vld [vmem:[#allocation8 + $0x720] sm:$0xff]  ;;  %v1171_v32 = vld [vmem:[#allocation8 + $0x9e8] sm:$0xff]  ;;  %v1165_v33 = vld [vmem:[#allocation8 + $0x9b8] sm:$0xff] }
 0x30e   :  { %7365 = vmatprep.subr.bf16.mxu1 %v7364_v28  ;;  %v1092_v28 = vld [vmem:[#allocation8 + $0x770] sm:$0xff]  ;;  %v7290_v44 = vpack.c.bf16 %v1090_v43, %v1082_v42  ;;  %v7404_v43 = vpack.c.bf16 %v1173_v34, %v1165_v33 }
 0x30f   :  { %v1164_v42 = vld [vmem:[#allocation8 + $0x9b0] sm:$0xff] }
 0x310   :  { %7271 = vmatpush1.bf16.msra.mxu0 %v7270_v45  ;;  %v7386_v45 = vpack.c.bf16 %v1092_v28, %v1084_v14  ;;  %v1172_v14 = vld [vmem:[#allocation8 + $0x9f0] sm:$0xff]  ;;  %v1187_v28 = vld [vmem:[#allocation8 + $0xa68] sm:$0xff] }
 0x311   :  { %7367 = vmatpush1.bf16.msra.mxu1 %v7366_v46  ;;  %7273 = vmatprep.subr.bf16.mxu0 %v7272_v47  ;;  %v7292_v46 = vpack.c.bf16 %v1107_v36, %v1099_v30  ;;  %v1098_v47 = vld [vmem:[#allocation8 + $0x7a0] sm:$0xff]  ;;  %v1181_v30 = vld [vmem:[#allocation8 + $0xa38] sm:$0xff]  ;;  %v7406_v39 = vpack.c.bf16 %v1172_v14, %v1164_v42  ;;  %v1881_v14 = vld [vmem:[#allocation11 + $0xc8] sm:$0xff] }
 0x312   :  { %7369 = vmatprep.subr.bf16.mxu1 %v7368_v51  ;;  %v1108_v51 = vld [vmem:[#allocation8 + $0x7f0] sm:$0xff]  ;;  %v7294_v56 = vpack.c.bf16 %v1106_v48, %v1098_v47  ;;  %v1189_v36 = vld [vmem:[#allocation8 + $0xa78] sm:$0xff] }
 0x313   :  { %v1180_v47 = vld [vmem:[#allocation8 + $0xa30] sm:$0xff]  ;;  %v7408_v48 = vpack.c.bf16 %v1189_v36, %v1181_v30  ;;  %v1866_v42 = vld [vmem:[#allocation11 + $0x50] sm:$0xff] }
 0x314   :  { %7275 = vmatpush1.bf16.msra.mxu0 %v7274_v57  ;;  %v7390_v57 = vpack.c.bf16 %v1108_v51, %v1100_v49  ;;  %v1188_v49 = vld [vmem:[#allocation8 + $0xa70] sm:$0xff]  ;;  %v1203_v51 = vld [vmem:[#allocation8 + $0xae8] sm:$0xff] }
 0x315   :  { %7371 = vmatpush1.bf16.msra.mxu1 %v7370_v58  ;;  %7277 = vmatprep.subr.bf16.mxu0 %v7276_v59  ;;  %v7296_v58 = vpack.c.bf16 %v1123_v53, %v1115_v52  ;;  %v1114_v59 = vld [vmem:[#allocation8 + $0x820] sm:$0xff]  ;;  %v1197_v52 = vld [vmem:[#allocation8 + $0xab8] sm:$0xff]  ;;  %v7410_v55 = vpack.c.bf16 %v1188_v49, %v1180_v47  ;;  %v1897_v49 = vld [vmem:[#allocation11 + $0x148] sm:$0xff] }
 0x316   :  { %7373 = vmatprep.subr.bf16.mxu1 %v7372_v62  ;;  %v1124_v62 = vld [vmem:[#allocation8 + $0x870] sm:$0xff]  ;;  %v7298_v6 = vpack.c.bf16 %v1122_v0, %v1114_v59  ;;  %v1205_v53 = vld [vmem:[#allocation8 + $0xaf8] sm:$0xff] }
 0x317   :  { %v1196_v59 = vld [vmem:[#allocation8 + $0xab0] sm:$0xff]  ;;  %v7412_v0 = vpack.c.bf16 %v1205_v53, %v1197_v52  ;;  %v1882_v47 = vld [vmem:[#allocation11 + $0xd0] sm:$0xff] }
 0x318   :  { %7279 = vmatpush1.bf16.msra.mxu0 %v7278_v7  ;;  %v7394_v7 = vpack.c.bf16 %v1124_v62, %v1116_v60  ;;  %v1204_v60 = vld [vmem:[#allocation8 + $0xaf0] sm:$0xff]  ;;  %v1219_v62 = vld [vmem:[#allocation8 + $0xb68] sm:$0xff] }
 0x319   :  { %7375 = vmatpush1.bf16.msra.mxu1 %v7374_v8  ;;  %7281 = vmatprep.subr.bf16.mxu0 %v7280_v11  ;;  %v7300_v8 = vpack.c.bf16 %v1139_v2, %v1131_v63  ;;  %v1130_v11 = vld [vmem:[#allocation8 + $0x8a0] sm:$0xff]  ;;  %v1213_v63 = vld [vmem:[#allocation8 + $0xb38] sm:$0xff]  ;;  %v7414_v4 = vpack.c.bf16 %v1204_v60, %v1196_v59  ;;  %v1913_v60 = vld [vmem:[#allocation11 + $0x1c8] sm:$0xff] }
 0x31a   :  { %7377 = vmatprep.subr.bf16.mxu1 %v7376_v16  ;;  %v1140_v16 = vld [vmem:[#allocation8 + $0x8f0] sm:$0xff]  ;;  %v7302_v18 = vpack.c.bf16 %v1138_v12, %v1130_v11  ;;  %v1221_v2 = vld [vmem:[#allocation8 + $0xb78] sm:$0xff] }
 0x31b   :  { %v1212_v11 = vld [vmem:[#allocation8 + $0xb30] sm:$0xff]  ;;  %v7416_v12 = vpack.c.bf16 %v1221_v2, %v1213_v63  ;;  %v1898_v59 = vld [vmem:[#allocation11 + $0x150] sm:$0xff] }
 0x31c   :  { %7283 = vmatpush1.bf16.msra.mxu0 %v7282_v23  ;;  %v7398_v23 = vpack.c.bf16 %v1140_v16, %v1132_v13  ;;  %v1220_v13 = vld [vmem:[#allocation8 + $0xb70] sm:$0xff]  ;;  %v1235_v16 = vld [vmem:[#allocation8 + $0xbe8] sm:$0xff] }
 0x31d   :  { %7379 = vmatpush1.bf16.msra.mxu1 %v7378_v24  ;;  %7285 = vmatprep.subr.bf16.mxu0 %v7284_v17  ;;  %v7304_v24 = vpack.c.bf16 %v1155_v5, %v1147_v21  ;;  %v1146_v17 = vld [vmem:[#allocation8 + $0x920] sm:$0xff]  ;;  %v1229_v21 = vld [vmem:[#allocation8 + $0xbb8] sm:$0xff]  ;;  %v7418_v10 = vpack.c.bf16 %v1220_v13, %v1212_v11  ;;  %v1921_v11 = vld [vmem:[#allocation11 + $0x208] sm:$0xff] }
 0x31e   :  { %7381 = vmatprep.subr.bf16.mxu1 %v7380_v29  ;;  %v1156_v29 = vld [vmem:[#allocation8 + $0x970] sm:$0xff]  ;;  %v1237_v5 = vld [vmem:[#allocation8 + $0xbf8] sm:$0xff]  ;;  %v1923_v13 = vld [vmem:[#allocation11 + $0x218] sm:$0xff] }
 0x31f   :  { %v7402_v35 = vpack.c.bf16 %v1156_v29, %v1148_v26  ;;  %v1236_v26 = vld [vmem:[#allocation8 + $0xbf0] sm:$0xff] }
 0x320   :  { %7287 = vmatpush1.bf16.msra.mxu0 %v7286_v38  ;;  %v7308_v38 = vpack.c.bf16 %v1171_v32, %v1163_v31  ;;  %v1865_v29 = vld [vmem:[#allocation11 + $0x48] sm:$0xff]  ;;  %v1859_v31 = vld [vmem:[#allocation11 + $0x18] sm:$0xff] }
 0x321   :  { %7383 = vmatpush1.bf16.msra.mxu1 %v7382_v40  ;;  %7289 = vmatprep.subr.bf16.mxu0 %v7288_v41  ;;  %v1162_v40 = vld [vmem:[#allocation8 + $0x9a0] sm:$0xff] }
 0x322   :  { %7385 = vmatprep.subr.bf16.mxu1 %v7384_v27  ;;  %v1170_v41 = vld [vmem:[#allocation8 + $0x9e0] sm:$0xff]  ;;  %v1179_v27 = vld [vmem:[#allocation8 + $0xa28] sm:$0xff] }
 0x323   :  { %v7310_v37 = vpack.c.bf16 %v1170_v41, %v1162_v40  ;;  %v1867_v32 = vld [vmem:[#allocation11 + $0x58] sm:$0xff]  ;;  %v1858_v40 = vld [vmem:[#allocation11 + $0x10] sm:$0xff] }
 0x324   :  { %7291 = vmatpush1.bf16.msra.mxu0 %v7290_v44  ;;  %v7312_v44 = vpack.c.bf16 %v1187_v28, %v1179_v27  ;;  %v7680_v41 = vpack.c.bf16 %v1867_v32, %v1859_v31  ;;  %v1875_v27 = vld [vmem:[#allocation11 + $0x98] sm:$0xff]  ;;  %v7682_v36 = vpack.c.bf16 %v1866_v42, %v1858_v40  ;;  %v1953_v40 = vld [vmem:[#allocation11 + $0x308] sm:$0xff] }
 0x325   :  { %7387 = vmatpush1.bf16.msra.mxu1 %v7386_v45  ;;  %7293 = vmatprep.subr.bf16.mxu0 %v7292_v46  ;;  %v1178_v45 = vld [vmem:[#allocation8 + $0xa20] sm:$0xff] }
 0x326   :  { %7389 = vmatprep.subr.bf16.mxu1 %v7388_v50  ;;  %v1186_v46 = vld [vmem:[#allocation8 + $0xa60] sm:$0xff]  ;;  %v1195_v50 = vld [vmem:[#allocation8 + $0xaa8] sm:$0xff] }
 0x327   :  { %v7314_v54 = vpack.c.bf16 %v1186_v46, %v1178_v45  ;;  %v1883_v28 = vld [vmem:[#allocation11 + $0xd8] sm:$0xff]  ;;  %v1874_v45 = vld [vmem:[#allocation11 + $0x90] sm:$0xff] }
 0x328   :  { %7295 = vmatpush1.bf16.msra.mxu0 %v7294_v56  ;;  %v7316_v56 = vpack.c.bf16 %v1203_v51, %v1195_v50  ;;  %v7684_v46 = vpack.c.bf16 %v1883_v28, %v1875_v27  ;;  %v1891_v50 = vld [vmem:[#allocation11 + $0x118] sm:$0xff]  ;;  %v7686_v53 = vpack.c.bf16 %v1882_v47, %v1874_v45  ;;  %v1969_v45 = vld [vmem:[#allocation11 + $0x388] sm:$0xff] }
 0x329   :  { %7391 = vmatpush1.bf16.msra.mxu1 %v7390_v57  ;;  %7297 = vmatprep.subr.bf16.mxu0 %v7296_v58  ;;  %v1194_v57 = vld [vmem:[#allocation8 + $0xaa0] sm:$0xff] }
 0x32a   :  { %7393 = vmatprep.subr.bf16.mxu1 %v7392_v61  ;;  %v1202_v58 = vld [vmem:[#allocation8 + $0xae0] sm:$0xff]  ;;  %v1211_v61 = vld [vmem:[#allocation8 + $0xb28] sm:$0xff] }
 0x32b   :  { %1629 = vmatmul.mubr.f32.vlgmr.msra.gmra.mrb[10].mxu0 %v10311_v19  ;;  %v7318_v3 = vpack.c.bf16 %v1202_v58, %v1194_v57  ;;  %v1899_v51 = vld [vmem:[#allocation11 + $0x158] sm:$0xff]  ;;  %v1890_v57 = vld [vmem:[#allocation11 + $0x110] sm:$0xff] }
 0x32c   :  { %1771 = vmatmul.mubr.f32.vlgmr.msra.gmra.mrb[10].mxu1 %v10311_v19  ;;  %7299 = vmatpush1.bf16.msra.mxu0 %v7298_v6  ;;  %v7306_v19 = vpack.c.bf16 %v1154_v20, %v1146_v17  ;;  %v7320_v6 = vpack.c.bf16 %v1219_v62, %v1211_v61  ;;  %v1228_v17 = vld [vmem:[#allocation8 + $0xbb0] sm:$0xff]  ;;  %v7420_v20 = vpack.c.bf16 %v1237_v5, %v1229_v21  ;;  %v1907_v61 = vld [vmem:[#allocation11 + $0x198] sm:$0xff] }
 0x32d   :  { %7395 = vmatpush1.bf16.msra.mxu1 %v7394_v7  ;;  %7301 = vmatprep.subr.bf16.mxu0 %v7300_v8  ;;  %v1210_v7 = vld [vmem:[#allocation8 + $0xb20] sm:$0xff]  ;;  %v7422_v34 = vpack.c.bf16 %v1236_v26, %v1228_v17  ;;  %v7688_v58 = vpack.c.bf16 %v1899_v51, %v1891_v50  ;;  %v1937_v17 = vld [vmem:[#allocation11 + $0x288] sm:$0xff] }
 0x32e   :  { %7397 = vmatprep.subr.bf16.mxu1 %v7396_v15  ;;  %1699 = vmatprep.mubr.f32.mxu0 %v9916_v1  ;;  %v1218_v8 = vld [vmem:[#allocation8 + $0xb60] sm:$0xff]  ;;  %v1227_v15 = vld [vmem:[#allocation8 + $0xba8] sm:$0xff] }
 0x32f   :  { %1841 = vmatprep.mubr.f32.mxu1 %v9916_v1  ;;  %v7322_v9 = vpack.c.bf16 %v1218_v8, %v1210_v7  ;;  %v1915_v62 = vld [vmem:[#allocation11 + $0x1d8] sm:$0xff]  ;;  %v1914_v8 = vld [vmem:[#allocation11 + $0x1d0] sm:$0xff] }
 0x330   :  { %7303 = vmatpush1.bf16.msra.mxu0 %v7302_v18  ;;  %v7324_v18 = vpack.c.bf16 %v1235_v16, %v1227_v15  ;;  %v7692_v7 = vpack.c.bf16 %v1915_v62, %v1907_v61  ;;  %v1931_v15 = vld [vmem:[#allocation11 + $0x258] sm:$0xff] }
 0x331   :  { %7399 = vmatpush1.bf16.msra.mxu1 %v7398_v23  ;;  %7305 = vmatprep.subr.bf16.mxu0 %v7304_v24  ;;  %v1226_v23 = vld [vmem:[#allocation8 + $0xba0] sm:$0xff] }
 0x332   :  { %7401 = vmatprep.subr.bf16.mxu1 %v7400_v25  ;;  %v1234_v24 = vld [vmem:[#allocation8 + $0xbe0] sm:$0xff]  ;;  %v1857_v25 = vld [vmem:[#allocation11 + $0x8] sm:$0xff] }
 0x333   :  { %v7326_v33 = vpack.c.bf16 %v1234_v24, %v1226_v23  ;;  %v7696_v23 = vpack.c.bf16 %v1931_v15, %v1923_v13  ;;  %v1930_v24 = vld [vmem:[#allocation11 + $0x250] sm:$0xff]  ;;  %v1939_v26 = vld [vmem:[#allocation11 + $0x298] sm:$0xff] }
 0x334   :  { %7307 = vmatpush1.bf16.msra.mxu0 %v7306_v19  ;;  %v7424_v19 = vpack.c.bf16 %v1865_v29, %v1857_v25  ;;  %v1947_v25 = vld [vmem:[#allocation11 + $0x2d8] sm:$0xff] }
 0x335   :  { %7403 = vmatpush1.bf16.msra.mxu1 %v7402_v35  ;;  %7309 = vmatprep.subr.bf16.mxu0 %v7308_v38  ;;  %v1856_v35 = vld [vmem:[#allocation11] sm:$0xff]  ;;  %v1955_v42 = vld [vmem:[#allocation11 + $0x318] sm:$0xff] }
 0x336   :  { %7405 = vmatprep.subr.bf16.mxu1 %v7404_v43  ;;  %v1864_v38 = vld [vmem:[#allocation11 + $0x40] sm:$0xff]  ;;  %v1873_v43 = vld [vmem:[#allocation11 + $0x88] sm:$0xff]  ;;  %v1971_v47 = vld [vmem:[#allocation11 + $0x398] sm:$0xff] }
 0x337   :  { %v7426_v30 = vpack.c.bf16 %v1864_v38, %v1856_v35  ;;  %v7700_v35 = vpack.c.bf16 %v1947_v25, %v1939_v26  ;;  %v1946_v38 = vld [vmem:[#allocation11 + $0x2d0] sm:$0xff] }
 0x338   :  { %7311 = vmatpush1.bf16.msra.mxu0 %v7310_v37  ;;  %v7428_v37 = vpack.c.bf16 %v1881_v14, %v1873_v43  ;;  %v1963_v43 = vld [vmem:[#allocation11 + $0x358] sm:$0xff] }
 0x339   :  { %7407 = vmatpush1.bf16.msra.mxu1 %v7406_v39  ;;  %7313 = vmatprep.subr.bf16.mxu0 %v7312_v44  ;;  %v1872_v39 = vld [vmem:[#allocation11 + $0x80] sm:$0xff] }
 0x33a   :  { %7409 = vmatprep.subr.bf16.mxu1 %v7408_v48  ;;  %v1880_v44 = vld [vmem:[#allocation11 + $0xc0] sm:$0xff]  ;;  %v1889_v48 = vld [vmem:[#allocation11 + $0x108] sm:$0xff] }
 0x33b   :  { %v7430_v52 = vpack.c.bf16 %v1880_v44, %v1872_v39  ;;  %v7704_v39 = vpack.c.bf16 %v1963_v43, %v1955_v42  ;;  %v1962_v44 = vld [vmem:[#allocation11 + $0x350] sm:$0xff] }
 0x33c   :  { %7315 = vmatpush1.bf16.msra.mxu0 %v7314_v54  ;;  %v7432_v54 = vpack.c.bf16 %v1897_v49, %v1889_v48  ;;  %v1979_v48 = vld [vmem:[#allocation11 + $0x3d8] sm:$0xff] }
 0x33d   :  { %7411 = vmatpush1.bf16.msra.mxu1 %v7410_v55  ;;  %7317 = vmatprep.subr.bf16.mxu0 %v7316_v56  ;;  %v1888_v55 = vld [vmem:[#allocation11 + $0x100] sm:$0xff] }
 0x33e   :  { %7413 = vmatprep.subr.bf16.mxu1 %v7412_v0  ;;  %v1896_v56 = vld [vmem:[#allocation11 + $0x140] sm:$0xff]  ;;  %v1905_v0 = vld [vmem:[#allocation11 + $0x188] sm:$0xff] }
 0x33f   :  { %v7434_v63 = vpack.c.bf16 %v1896_v56, %v1888_v55  ;;  %v7436_v2 = vpack.c.bf16 %v1913_v60, %v1905_v0  ;;  %v7708_v55 = vpack.c.bf16 %v1979_v48, %v1971_v47  ;;  %v1978_v56 = vld [vmem:[#allocation11 + $0x3d0] sm:$0xff]  ;;  %v1995_v0 = vld [vmem:[#allocation11 + $0x458] sm:$0xff] }
 0x340   :  { %7319 = vmatpush1.bf16.msra.mxu0 %v7318_v3  ;;  %v1904_v3 = vld [vmem:[#allocation11 + $0x180] sm:$0xff] }
 0x341   :  { %7415 = vmatpush1.bf16.msra.mxu1 %v7414_v4  ;;  %7321 = vmatprep.subr.bf16.mxu0 %v7320_v6  ;;  %v1912_v4 = vld [vmem:[#allocation11 + $0x1c0] sm:$0xff]  ;;  %v1906_v6 = vld [vmem:[#allocation11 + $0x190] sm:$0xff] }
 0x342   :  { %7417 = vmatprep.subr.bf16.mxu1 %v7416_v12  ;;  %v1929_v12 = vld [vmem:[#allocation11 + $0x248] sm:$0xff]  ;;  %v7438_v16 = vpack.c.bf16 %v1912_v4, %v1904_v3  ;;  %v7694_v21 = vpack.c.bf16 %v1914_v8, %v1906_v6  ;;  %v1994_v4 = vld [vmem:[#allocation11 + $0x450] sm:$0xff]  ;;  %v2003_v8 = vld [vmem:[#allocation11 + $0x498] sm:$0xff] }
 0x343   :  { %v7440_v5 = vpack.c.bf16 %v1929_v12, %v1921_v11  ;;  %v2001_v6 = vld [vmem:[#allocation11 + $0x488] sm:$0xff]  ;;  %v2011_v11 = vld [vmem:[#allocation11 + $0x4d8] sm:$0xff] }
 0x344   :  { %7323 = vmatpush1.bf16.msra.mxu0 %v7322_v9  ;;  %v1920_v9 = vld [vmem:[#allocation11 + $0x200] sm:$0xff] }
 0x345   :  { %7419 = vmatpush1.bf16.msra.mxu1 %v7418_v10  ;;  %7325 = vmatprep.subr.bf16.mxu0 %v7324_v18  ;;  %v1928_v10 = vld [vmem:[#allocation11 + $0x240] sm:$0xff]  ;;  %v1922_v18 = vld [vmem:[#allocation11 + $0x210] sm:$0xff] }
 0x346   :  { %7421 = vmatprep.subr.bf16.mxu1 %v7420_v20  ;;  %v1945_v20 = vld [vmem:[#allocation11 + $0x2c8] sm:$0xff]  ;;  %v7442_v29 = vpack.c.bf16 %v1928_v10, %v1920_v9  ;;  %v7698_v31 = vpack.c.bf16 %v1930_v24, %v1922_v18  ;;  %v7716_v9 = vpack.c.bf16 %v2011_v11, %v2003_v8  ;;  %v2010_v10 = vld [vmem:[#allocation11 + $0x4d0] sm:$0xff]  ;;  %v2019_v24 = vld [vmem:[#allocation11 + $0x518] sm:$0xff] }
 0x347   :  { %v7444_v32 = vpack.c.bf16 %v1945_v20, %v1937_v17  ;;  %v2017_v18 = vld [vmem:[#allocation11 + $0x508] sm:$0xff]  ;;  %v2027_v17 = vld [vmem:[#allocation11 + $0x558] sm:$0xff] }
 0x348   :  { %7327 = vmatpush1.bf16.msra.mxu0 %v7326_v33  ;;  %v1936_v33 = vld [vmem:[#allocation11 + $0x280] sm:$0xff] }
 0x349   :  { %7423 = vmatpush1.bf16.msra.mxu1 %v7422_v34  ;;  %7425 = vmatprep.subr.bf16.mxu0 %v7424_v19  ;;  %v1944_v34 = vld [vmem:[#allocation11 + $0x2c0] sm:$0xff]  ;;  %v1938_v19 = vld [vmem:[#allocation11 + $0x290] sm:$0xff] }
 0x34a   :  { %7681 = vmatprep.subr.bf16.mxu1 %v7680_v41  ;;  %v1961_v41 = vld [vmem:[#allocation11 + $0x348] sm:$0xff]  ;;  %v7446_v14 = vpack.c.bf16 %v1944_v34, %v1936_v33  ;;  %v7702_v27 = vpack.c.bf16 %v1946_v38, %v1938_v19  ;;  %v7720_v33 = vpack.c.bf16 %v2027_v17, %v2019_v24  ;;  %v2026_v34 = vld [vmem:[#allocation11 + $0x550] sm:$0xff]  ;;  %v2035_v38 = vld [vmem:[#allocation11 + $0x598] sm:$0xff] }
 0x34b   :  { %1700 = vmatmul.mubr.f32.vlgmr.msra.gmra.mrb[10].mxu0 %v10313_v22  ;;  %v7448_v28 = vpack.c.bf16 %v1961_v41, %v1953_v40  ;;  %v2033_v19 = vld [vmem:[#allocation11 + $0x588] sm:$0xff]  ;;  %v2043_v40 = vld [vmem:[#allocation11 + $0x5d8] sm:$0xff] }
 0x34c   :  { %1842 = vmatmul.mubr.f32.vlgmr.msra.gmra.mrb[10].mxu1 %v10313_v22  ;;  %7427 = vmatpush1.bf16.msra.mxu0 %v7426_v30  ;;  %v7690_v22 = vpack.c.bf16 %v1898_v59, %v1890_v57  ;;  %v1952_v30 = vld [vmem:[#allocation11 + $0x300] sm:$0xff]  ;;  %v1985_v57 = vld [vmem:[#allocation11 + $0x408] sm:$0xff]  ;;  %v1987_v59 = vld [vmem:[#allocation11 + $0x418] sm:$0xff] }
 0x34d   :  { %7683 = vmatpush1.bf16.msra.mxu1 %v7682_v36  ;;  %7429 = vmatprep.subr.bf16.mxu0 %v7428_v37  ;;  %v1960_v36 = vld [vmem:[#allocation11 + $0x340] sm:$0xff]  ;;  %v1954_v37 = vld [vmem:[#allocation11 + $0x310] sm:$0xff]  ;;  %v7712_v3 = vpack.c.bf16 %v1995_v0, %v1987_v59 }
 0x34e   :  { %7685 = vmatprep.subr.bf16.mxu1 %v7684_v46  ;;  %v1977_v46 = vld [vmem:[#allocation11 + $0x3c8] sm:$0xff]  ;;  %v7450_v49 = vpack.c.bf16 %v1960_v36, %v1952_v30  ;;  %v7706_v50 = vpack.c.bf16 %v1962_v44, %v1954_v37  ;;  %v7724_v30 = vpack.c.bf16 %v2043_v40, %v2035_v38  ;;  %v2042_v36 = vld [vmem:[#allocation11 + $0x5d0] sm:$0xff]  ;;  %v2051_v44 = vld [vmem:[#allocation11 + $0x618] sm:$0xff] }
 0x34f   :  { %v7452_v51 = vpack.c.bf16 %v1977_v46, %v1969_v45  ;;  %v2049_v37 = vld [vmem:[#allocation11 + $0x608] sm:$0xff]  ;;  %v2059_v45 = vld [vmem:[#allocation11 + $0x658] sm:$0xff] }
 0x350   :  { %7431 = vmatpush1.bf16.msra.mxu0 %v7430_v52  ;;  %v1968_v52 = vld [vmem:[#allocation11 + $0x380] sm:$0xff] }
 0x351   :  { %7687 = vmatpush1.bf16.msra.mxu1 %v7686_v53  ;;  %7433 = vmatprep.subr.bf16.mxu0 %v7432_v54  ;;  %v1976_v53 = vld [vmem:[#allocation11 + $0x3c0] sm:$0xff]  ;;  %v1970_v54 = vld [vmem:[#allocation11 + $0x390] sm:$0xff] }
 0x352   :  { %7689 = vmatprep.subr.bf16.mxu1 %v7688_v58  ;;  %v1993_v58 = vld [vmem:[#allocation11 + $0x448] sm:$0xff]  ;;  %v7454_v60 = vpack.c.bf16 %v1976_v53, %v1968_v52  ;;  %v7710_v61 = vpack.c.bf16 %v1978_v56, %v1970_v54  ;;  %v7728_v52 = vpack.c.bf16 %v2059_v45, %v2051_v44  ;;  %v2058_v53 = vld [vmem:[#allocation11 + $0x650] sm:$0xff]  ;;  %v2067_v56 = vld [vmem:[#allocation11 + $0x698] sm:$0xff] }
 0x353   :  { %v7456_v62 = vpack.c.bf16 %v1993_v58, %v1985_v57  ;;  %v2065_v54 = vld [vmem:[#allocation11 + $0x688] sm:$0xff]  ;;  %v2075_v57 = vld [vmem:[#allocation11 + $0x6d8] sm:$0xff] }
 0x354   :  { %7435 = vmatpush1.bf16.msra.mxu0 %v7434_v63  ;;  %v1984_v63 = vld [vmem:[#allocation11 + $0x400] sm:$0xff] }
 0x355   :  { %7691 = vmatpush1.bf16.msra.mxu1 %v7690_v22  ;;  %7437 = vmatprep.subr.bf16.mxu0 %v7436_v2  ;;  %v1992_v22 = vld [vmem:[#allocation11 + $0x440] sm:$0xff]  ;;  %v1986_v2 = vld [vmem:[#allocation11 + $0x410] sm:$0xff] }
 0x356   :  { %7693 = vmatprep.subr.bf16.mxu1 %v7692_v7  ;;  %v2009_v7 = vld [vmem:[#allocation11 + $0x4c8] sm:$0xff]  ;;  %v7458_v12 = vpack.c.bf16 %v1992_v22, %v1984_v63  ;;  %v7714_v13 = vpack.c.bf16 %v1994_v4, %v1986_v2  ;;  %v7732_v63 = vpack.c.bf16 %v2075_v57, %v2067_v56  ;;  %v2074_v22 = vld [vmem:[#allocation11 + $0x6d0] sm:$0xff]  ;;  %v2083_v4 = vld [vmem:[#allocation11 + $0x718] sm:$0xff] }
 0x357   :  { %v7460_v15 = vpack.c.bf16 %v2009_v7, %v2001_v6  ;;  %v2081_v2 = vld [vmem:[#allocation11 + $0x708] sm:$0xff]  ;;  %v2091_v6 = vld [vmem:[#allocation11 + $0x758] sm:$0xff] }
 0x358   :  { %7439 = vmatpush1.bf16.msra.mxu0 %v7438_v16  ;;  %v2000_v16 = vld [vmem:[#allocation11 + $0x480] sm:$0xff]  ;;  %v2137_v56 = vld [vmem:[#allocation11 + $0x8c8] sm:$0xff]  ;;  %v2131_v57 = vld [vmem:[#allocation11 + $0x898] sm:$0xff] }
 0x359   :  { %7695 = vmatpush1.bf16.msra.mxu1 %v7694_v21  ;;  %7441 = vmatprep.subr.bf16.mxu0 %v7440_v5  ;;  %v2008_v21 = vld [vmem:[#allocation11 + $0x4c0] sm:$0xff]  ;;  %v2002_v5 = vld [vmem:[#allocation11 + $0x490] sm:$0xff] }
 0x35a   :  { %7697 = vmatprep.subr.bf16.mxu1 %v7696_v23  ;;  %v2025_v23 = vld [vmem:[#allocation11 + $0x548] sm:$0xff]  ;;  %v7462_v20 = vpack.c.bf16 %v2008_v21, %v2000_v16  ;;  %v7718_v26 = vpack.c.bf16 %v2010_v10, %v2002_v5  ;;  %v7736_v16 = vpack.c.bf16 %v2091_v6, %v2083_v4  ;;  %v2090_v21 = vld [vmem:[#allocation11 + $0x750] sm:$0xff]  ;;  %v2099_v10 = vld [vmem:[#allocation11 + $0x798] sm:$0xff] }
 0x35b   :  { %v7464_v25 = vpack.c.bf16 %v2025_v23, %v2017_v18  ;;  %v2097_v5 = vld [vmem:[#allocation11 + $0x788] sm:$0xff]  ;;  %v2107_v18 = vld [vmem:[#allocation11 + $0x7d8] sm:$0xff] }
 0x35c   :  { %7443 = vmatpush1.bf16.msra.mxu0 %v7442_v29  ;;  %v2016_v29 = vld [vmem:[#allocation11 + $0x500] sm:$0xff] }
 0x35d   :  { %7699 = vmatpush1.bf16.msra.mxu1 %v7698_v31  ;;  %7445 = vmatprep.subr.bf16.mxu0 %v7444_v32  ;;  %v2024_v31 = vld [vmem:[#allocation11 + $0x540] sm:$0xff]  ;;  %v2018_v32 = vld [vmem:[#allocation11 + $0x510] sm:$0xff] }
 0x35e   :  { %7701 = vmatprep.subr.bf16.mxu1 %v7700_v35  ;;  %v2041_v35 = vld [vmem:[#allocation11 + $0x5c8] sm:$0xff]  ;;  %v7466_v41 = vpack.c.bf16 %v2024_v31, %v2016_v29  ;;  %v7722_v42 = vpack.c.bf16 %v2026_v34, %v2018_v32  ;;  %v7740_v29 = vpack.c.bf16 %v2107_v18, %v2099_v10  ;;  %v2106_v31 = vld [vmem:[#allocation11 + $0x7d0] sm:$0xff]  ;;  %v2115_v34 = vld [vmem:[#allocation11 + $0x818] sm:$0xff] }
 0x35f   :  { %v7468_v43 = vpack.c.bf16 %v2041_v35, %v2033_v19  ;;  %v2113_v32 = vld [vmem:[#allocation11 + $0x808] sm:$0xff]  ;;  %v2123_v19 = vld [vmem:[#allocation11 + $0x858] sm:$0xff]  ;;  %v2146_v10 = vld [vmem:[#allocation11 + $0x910] sm:$0xff] }
 0x360   :  { %7447 = vmatpush1.bf16.msra.mxu0 %v7446_v14  ;;  %v2032_v14 = vld [vmem:[#allocation11 + $0x580] sm:$0xff]  ;;  %v2154_v18 = vld [vmem:[#allocation11 + $0x950] sm:$0xff] }
 0x361   :  { %7703 = vmatpush1.bf16.msra.mxu1 %v7702_v27  ;;  %7449 = vmatprep.subr.bf16.mxu0 %v7448_v28  ;;  %v2040_v27 = vld [vmem:[#allocation11 + $0x5c0] sm:$0xff]  ;;  %v2034_v28 = vld [vmem:[#allocation11 + $0x590] sm:$0xff] }
 0x362   :  { %7705 = vmatprep.subr.bf16.mxu1 %v7704_v39  ;;  %v2057_v39 = vld [vmem:[#allocation11 + $0x648] sm:$0xff]  ;;  %v7470_v46 = vpack.c.bf16 %v2040_v27, %v2032_v14  ;;  %v7726_v47 = vpack.c.bf16 %v2042_v36, %v2034_v28  ;;  %v10338_v27 = vld [vmem:[#allocation10] sm:$0xff] }
 0x363   :  { %v7472_v48 = vpack.c.bf16 %v2057_v39, %v2049_v37 }
 0x364   :  { %7451 = vmatpush1.bf16.msra.mxu0 %v7450_v49  ;;  %v2048_v49 = vld [vmem:[#allocation11 + $0x600] sm:$0xff] }
 0x365   :  { %7707 = vmatpush1.bf16.msra.mxu1 %v7706_v50  ;;  %7453 = vmatprep.subr.bf16.mxu0 %v7452_v51  ;;  %v2056_v50 = vld [vmem:[#allocation11 + $0x640] sm:$0xff]  ;;  %v2050_v51 = vld [vmem:[#allocation11 + $0x610] sm:$0xff] }
 0x366   :  { %7709 = vmatprep.subr.bf16.mxu1 %v7708_v55  ;;  %v2073_v55 = vld [vmem:[#allocation11 + $0x6c8] sm:$0xff]  ;;  %v7474_v58 = vpack.c.bf16 %v2056_v50, %v2048_v49  ;;  %v7730_v59 = vpack.c.bf16 %v2058_v53, %v2050_v51  ;;  %v2120_v50 = vld [vmem:[#allocation11 + $0x840] sm:$0xff]  ;;  %v2114_v51 = vld [vmem:[#allocation11 + $0x810] sm:$0xff] }
 0x367   :  { %v7476_v0 = vpack.c.bf16 %v2073_v55, %v2065_v54  ;;  %v2129_v54 = vld [vmem:[#allocation11 + $0x888] sm:$0xff] }
 0x368   :  { %7455 = vmatpush1.bf16.msra.mxu0 %v7454_v60  ;;  %v2064_v60 = vld [vmem:[#allocation11 + $0x680] sm:$0xff]  ;;  %v7492_v4 = vpack.c.bf16 %v2137_v56, %v2129_v54 }
 0x369   :  { %7711 = vmatpush1.bf16.msra.mxu1 %v7710_v61  ;;  %7457 = vmatprep.subr.bf16.mxu0 %v7456_v62  ;;  %v2072_v61 = vld [vmem:[#allocation11 + $0x6c0] sm:$0xff]  ;;  %v2066_v62 = vld [vmem:[#allocation11 + $0x690] sm:$0xff] }
 0x36a   :  { %7713 = vmatprep.subr.bf16.mxu1 %v7712_v3  ;;  %v2089_v3 = vld [vmem:[#allocation11 + $0x748] sm:$0xff]  ;;  %v7478_v7 = vpack.c.bf16 %v2072_v61, %v2064_v60  ;;  %v7734_v8 = vpack.c.bf16 %v2074_v22, %v2066_v62  ;;  %v2128_v61 = vld [vmem:[#allocation11 + $0x880] sm:$0xff]  ;;  %v2130_v22 = vld [vmem:[#allocation11 + $0x890] sm:$0xff] }
 0x36b   :  { %v7480_v11 = vpack.c.bf16 %v2089_v3, %v2081_v2  ;;  %v2136_v62 = vld [vmem:[#allocation11 + $0x8c0] sm:$0xff]  ;;  %v2138_v2 = vld [vmem:[#allocation11 + $0x8d0] sm:$0xff]  ;;  %v2145_v3 = vld [vmem:[#allocation11 + $0x908] sm:$0xff] }
 0x36c   :  { %7459 = vmatpush1.bf16.msra.mxu0 %v7458_v12  ;;  %v2080_v12 = vld [vmem:[#allocation11 + $0x700] sm:$0xff] }
 0x36d   :  { %7715 = vmatpush1.bf16.msra.mxu1 %v7714_v13  ;;  %7461 = vmatprep.subr.bf16.mxu0 %v7460_v15  ;;  %v2088_v13 = vld [vmem:[#allocation11 + $0x740] sm:$0xff]  ;;  %v2082_v15 = vld [vmem:[#allocation11 + $0x710] sm:$0xff] }
 0x36e   :  { %7717 = vmatprep.subr.bf16.mxu1 %v7716_v9  ;;  %v2105_v9 = vld [vmem:[#allocation11 + $0x7c8] sm:$0xff]  ;;  %v7482_v23 = vpack.c.bf16 %v2088_v13, %v2080_v12  ;;  %v7738_v24 = vpack.c.bf16 %v2090_v21, %v2082_v15  ;;  %v7494_v13 = vpack.c.bf16 %v2136_v62, %v2128_v61  ;;  %v7750_v15 = vpack.c.bf16 %v2138_v2, %v2130_v22  ;;  %v2152_v21 = vld [vmem:[#allocation11 + $0x940] sm:$0xff]  ;;  %v2211_v22 = vld [vmem:[#allocation11 + $0xb18] sm:$0xff] }
 0x36f   :  { %v7484_v17 = vpack.c.bf16 %v2105_v9, %v2097_v5  ;;  %v2200_v56 = vld [vmem:[#allocation11 + $0xac0] sm:$0xff]  ;;  %v2209_v61 = vld [vmem:[#allocation11 + $0xb08] sm:$0xff]  ;;  %v2219_v2 = vld [vmem:[#allocation11 + $0xb58] sm:$0xff] }
 0x370   :  { %7463 = vmatpush1.bf16.msra.mxu0 %v7462_v20  ;;  %v2096_v20 = vld [vmem:[#allocation11 + $0x780] sm:$0xff]  ;;  %v2217_v62 = vld [vmem:[#allocation11 + $0xb48] sm:$0xff] }
 0x371   :  { %7719 = vmatpush1.bf16.msra.mxu1 %v7718_v26  ;;  %7465 = vmatprep.subr.bf16.mxu0 %v7464_v25  ;;  %v2104_v26 = vld [vmem:[#allocation11 + $0x7c0] sm:$0xff]  ;;  %v2098_v25 = vld [vmem:[#allocation11 + $0x790] sm:$0xff] }
 0x372   :  { %7721 = vmatprep.subr.bf16.mxu1 %v7720_v33  ;;  %v2121_v33 = vld [vmem:[#allocation11 + $0x848] sm:$0xff]  ;;  %v7486_v35 = vpack.c.bf16 %v2104_v26, %v2096_v20  ;;  %v7742_v38 = vpack.c.bf16 %v2106_v31, %v2098_v25  ;;  %v2171_v20 = vld [vmem:[#allocation11 + $0x9d8] sm:$0xff]  ;;  %v7754_v25 = vpack.c.bf16 %v2154_v18, %v2146_v10  ;;  %v2168_v31 = vld [vmem:[#allocation11 + $0x9c0] sm:$0xff] }
 0x373   :  { %v7488_v40 = vpack.c.bf16 %v2121_v33, %v2113_v32 }
 0x374   :  { %7467 = vmatpush1.bf16.msra.mxu0 %v7466_v41  ;;  %v7744_v41 = vpack.c.bf16 %v2123_v19, %v2115_v34  ;;  %v2162_v34 = vld [vmem:[#allocation11 + $0x990] sm:$0xff] }
 0x375   :  { %7723 = vmatpush1.bf16.msra.mxu1 %v7722_v42  ;;  %7469 = vmatprep.subr.bf16.mxu0 %v7468_v43  ;;  %v1240_v42 = vlaneseq  ;;  %v2170_v19 = vld [vmem:[#allocation11 + $0x9d0] sm:$0xff] }
 0x376   :  { %7725 = vmatprep.subr.bf16.mxu1 %v7724_v30 }
 0x377   :  { %v10333_v43 = vshrl.u32 %v1240_v42, 7 }
 0x378   :  { %7471 = vmatpush1.bf16.msra.mxu0 %v7470_v46  ;;  %v2112_v46 = vld [vmem:[#allocation11 + $0x800] sm:$0xff] }
 0x379   :  { %7727 = vmatpush1.bf16.msra.mxu1 %v7726_v47  ;;  %7473 = vmatprep.subr.bf16.mxu0 %v7472_v48  ;;  %v10336_v14 = vsub.s32 0, %v10333_v43  ;;  %v10341_v28 = vsub.s32 1, %v10333_v43  ;;  %v10344_v30 = vsub.s32 3, %v10333_v43 }
 0x37a   :  { %7729 = vmatprep.subr.bf16.mxu1 %v7728_v52  ;;  %v2122_v52 = vld [vmem:[#allocation11 + $0x850] sm:$0xff] }
 0x37b   :  { %v1243_v36 = vrot.slane %v10338_v27, %v10336_v14  ;;  %v1247_v37 = vrot.slane %v10338_v27, %v10341_v28  ;;  %v1255_v39 = vrot.slane %v10338_v27, %v10344_v30  ;;  %v7746_v60 = vpack.c.bf16 %v2122_v52, %v2114_v51  ;;  %v2195_v51 = vld [vmem:[#allocation11 + $0xa98] sm:$0xff] }
 0x37c   :  { %7475 = vmatpush1.bf16.msra.mxu0 %v7474_v58  ;;  %v2139_v58 = vld [vmem:[#allocation11 + $0x8d8] sm:$0xff] }
 0x37d   :  { %7731 = vmatpush1.bf16.msra.mxu1 %v7730_v59  ;;  %7477 = vmatprep.subr.bf16.mxu0 %v7476_v0  ;;  %v7490_v0 = vpack.c.bf16 %v2120_v50, %v2112_v46  ;;  %v7748_v6 = vpack.c.bf16 %v2139_v58, %v2131_v57  ;;  %v2201_v50 = vld [vmem:[#allocation11 + $0xac8] sm:$0xff]  ;;  %v2203_v52 = vld [vmem:[#allocation11 + $0xad8] sm:$0xff] }
 0x37e   :  { %7733 = vmatprep.subr.bf16.mxu1 %v7732_v63  ;;  %v7764_v58 = vpack.c.bf16 %v2203_v52, %v2195_v51 }
 0x380   :  { %7479 = vmatpush1.bf16.msra.mxu0 %v7478_v7  ;;  %v2153_v7 = vld [vmem:[#allocation11 + $0x948] sm:$0xff] }
 0x381   :  { %7735 = vmatpush1.bf16.msra.mxu1 %v7734_v8  ;;  %7481 = vmatprep.subr.bf16.mxu0 %v7480_v11  ;;  %v2147_v8 = vld [vmem:[#allocation11 + $0x918] sm:$0xff]  ;;  %v7496_v5 = vpack.c.bf16 %v2153_v7, %v2145_v3  ;;  %v2216_v7 = vld [vmem:[#allocation11 + $0xb40] sm:$0xff] }
 0x382   :  { %7737 = vmatprep.subr.bf16.mxu1 %v7736_v16  ;;  %v2155_v11 = vld [vmem:[#allocation11 + $0x958] sm:$0xff]  ;;  %v2144_v16 = vld [vmem:[#allocation11 + $0x900] sm:$0xff] }
 0x383   :  { %v7752_v9 = vpack.c.bf16 %v2155_v11, %v2147_v8  ;;  %v7498_v26 = vpack.c.bf16 %v2152_v21, %v2144_v16  ;;  %v7512_v8 = vpack.c.bf16 %v2217_v62, %v2209_v61  ;;  %v7768_v11 = vpack.c.bf16 %v2219_v2, %v2211_v22  ;;  %v2225_v16 = vld [vmem:[#allocation11 + $0xb88] sm:$0xff]  ;;  %v2272_v61 = vld [vmem:[#allocation11 + $0xd00] sm:$0xff] }
 0x384   :  { %7483 = vmatpush1.bf16.msra.mxu0 %v7482_v23  ;;  %v2161_v23 = vld [vmem:[#allocation11 + $0x988] sm:$0xff]  ;;  %v2280_v62 = vld [vmem:[#allocation11 + $0xd40] sm:$0xff] }
 0x385   :  { %7739 = vmatpush1.bf16.msra.mxu1 %v7738_v24  ;;  %7485 = vmatprep.subr.bf16.mxu0 %v7484_v17  ;;  %v2169_v24 = vld [vmem:[#allocation11 + $0x9c8] sm:$0xff]  ;;  %v2163_v17 = vld [vmem:[#allocation11 + $0x998] sm:$0xff] }
 0x386   :  { %7741 = vmatprep.subr.bf16.mxu1 %v7740_v29  ;;  %v2160_v29 = vld [vmem:[#allocation11 + $0x980] sm:$0xff]  ;;  %v7500_v32 = vpack.c.bf16 %v2169_v24, %v2161_v23  ;;  %v7756_v33 = vpack.c.bf16 %v2171_v20, %v2163_v17  ;;  %v2233_v21 = vld [vmem:[#allocation11 + $0xbc8] sm:$0xff] }
 0x387   :  { %v7502_v42 = vpack.c.bf16 %v2168_v31, %v2160_v29  ;;  %v2224_v23 = vld [vmem:[#allocation11 + $0xb80] sm:$0xff]  ;;  %v7516_v17 = vpack.c.bf16 %v2233_v21, %v2225_v16  ;;  %v2241_v29 = vld [vmem:[#allocation11 + $0xc08] sm:$0xff] }
 0x388   :  { %7487 = vmatpush1.bf16.msra.mxu0 %v7486_v35  ;;  %v2177_v35 = vld [vmem:[#allocation11 + $0xa08] sm:$0xff]  ;;  %v2232_v24 = vld [vmem:[#allocation11 + $0xbc0] sm:$0xff] }
 0x389   :  { %7743 = vmatpush1.bf16.msra.mxu1 %v7742_v38  ;;  %7489 = vmatprep.subr.bf16.mxu0 %v7488_v40  ;;  %v2185_v38 = vld [vmem:[#allocation11 + $0xa48] sm:$0xff]  ;;  %v2179_v40 = vld [vmem:[#allocation11 + $0xa18] sm:$0xff]  ;;  %v2288_v16 = vld [vmem:[#allocation11 + $0xd80] sm:$0xff] }
 0x38a   :  { %7745 = vmatprep.subr.bf16.mxu1 %v7744_v41  ;;  %v2187_v41 = vld [vmem:[#allocation11 + $0xa58] sm:$0xff]  ;;  %v2249_v31 = vld [vmem:[#allocation11 + $0xc48] sm:$0xff]  ;;  %v2296_v21 = vld [vmem:[#allocation11 + $0xdc0] sm:$0xff] }
 0x38b   :  { %v7760_v46 = vpack.c.bf16 %v2187_v41, %v2179_v40  ;;  %v7520_v40 = vpack.c.bf16 %v2249_v31, %v2241_v29  ;;  %v2304_v29 = vld [vmem:[#allocation11 + $0xe00] sm:$0xff] }
 0x38c   :  { %v2312_v31 = vld [vmem:[#allocation11 + $0xe40] sm:$0xff] }
 0x3be   :  { %v1417_v44 = vpop.f32.mrb[8].mxu0  ;;  %v10352_v45 = vpop.f32.mrb[8].mxu1 }
 0x3bf   :  { %v9504_v47 = vadd.f32 %v1417_v44, %v1243_v36  ;;  %v1419_v48 = vpop.f32.mrb[9].mxu0  ;;  %v1561_v49 = vpop.f32.mrb[9].mxu1  ;;  %v7758_v36 = vpack.c.bf16 %v2170_v19, %v2162_v34  ;;  %v7504_v44 = vpack.c.bf16 %v2185_v38, %v2177_v35  ;;  %v7518_v34 = vpack.c.bf16 %v2232_v24, %v2224_v23  ;;  %v2240_v35 = vld [vmem:[#allocation11 + $0xc00] sm:$0xff]  ;;  %v2305_v23 = vld [vmem:[#allocation11 + $0xe08] sm:$0xff] }
 0x3c0   :  { %v9505_v53 = vadd.f32 %v1419_v48, %v1247_v37  ;;  %v9507_v55 = vadd.f32 %v1561_v49, %v1255_v39  ;;  %v2176_v37 = vld [vmem:[#allocation11 + $0xa00] sm:$0xff]  ;;  %v2186_v48 = vld [vmem:[#allocation11 + $0xa50] sm:$0xff]  ;;  %v2193_v49 = vld [vmem:[#allocation11 + $0xa88] sm:$0xff] }
 0x3c1   :  { %v10356_v63 = vmax.f32 %v9504_v47, 0.0  ;;  %v2184_v39 = vld [vmem:[#allocation11 + $0xa40] sm:$0xff]  ;;  %v2178_v47 = vld [vmem:[#allocation11 + $0xa10] sm:$0xff]  ;;  %v7508_v57 = vpack.c.bf16 %v2201_v50, %v2193_v49  ;;  %v2313_v24 = vld [vmem:[#allocation11 + $0xe48] sm:$0xff] }
 0x3c2   :  { %v10354_v59 = vmax.f32 %v9505_v53, 0.0  ;;  %v10360_v12 = vmax.f32 %v9507_v55, 0.0  ;;  %v7506_v53 = vpack.c.bf16 %v2184_v39, %v2176_v37  ;;  %v7762_v54 = vpack.c.bf16 %v2186_v48, %v2178_v47  ;;  %v2192_v55 = vld [vmem:[#allocation11 + $0xa80] sm:$0xff]  ;;  %v2257_v37 = vld [vmem:[#allocation11 + $0xc88] sm:$0xff] }
 0x3c3   :  { %v7510_v3 = vpack.c.bf16 %v2200_v56, %v2192_v55  ;;  %v2248_v38 = vld [vmem:[#allocation11 + $0xc40] sm:$0xff]  ;;  %v2265_v39 = vld [vmem:[#allocation11 + $0xcc8] sm:$0xff] }
 0x3c4   :  { %2986 = vmatprep.mubr.f32.mxu0 %v10354_v59  ;;  %3270 = vmatprep.mubr.f32.mxu1 %v10354_v59  ;;  %v7522_v47 = vpack.c.bf16 %v2248_v38, %v2240_v35  ;;  %v2256_v49 = vld [vmem:[#allocation11 + $0xc80] sm:$0xff]  ;;  %v7524_v51 = vpack.c.bf16 %v2265_v39, %v2257_v37  ;;  %v2273_v55 = vld [vmem:[#allocation11 + $0xd08] sm:$0xff] }
 0x3c5   :  { %2987 = vmatmul.mubr.f32.vlgmr.msra.gmra.mrb[12].mxu0 %v10356_v63  ;;  %3271 = vmatmul.mubr.f32.vlgmr.msra.gmra.mrb[12].mxu1 %v10356_v63  ;;  %v2264_v50 = vld [vmem:[#allocation11 + $0xcc0] sm:$0xff]  ;;  %v2281_v56 = vld [vmem:[#allocation11 + $0xd48] sm:$0xff] }
 0x3c6   :  { %7491 = vmatpush1.bf16.msra.mxu0 %v7490_v0  ;;  %7747 = vmatpush1.bf16.msra.mxu1 %v7746_v60  ;;  %v2194_v0 = vld [vmem:[#allocation11 + $0xa90] sm:$0xff]  ;;  %v7528_v22 = vpack.c.bf16 %v2281_v56, %v2273_v55  ;;  %v2321_v35 = vld [vmem:[#allocation11 + $0xe88] sm:$0xff]  ;;  %v2320_v37 = vld [vmem:[#allocation11 + $0xe80] sm:$0xff] }
 0x3c7   :  { %3057 = vmatprep.mubr.f32.mxu0 %v10360_v12  ;;  %3341 = vmatprep.mubr.f32.mxu1 %v10360_v12  ;;  %v2202_v60 = vld [vmem:[#allocation11 + $0xad0] sm:$0xff]  ;;  %v2329_v38 = vld [vmem:[#allocation11 + $0xec8] sm:$0xff]  ;;  %v2328_v39 = vld [vmem:[#allocation11 + $0xec0] sm:$0xff] }
 0x3c8   :  { %7493 = vmatprep.subr.bf16.mxu0 %v7492_v4  ;;  %7749 = vmatprep.subr.bf16.mxu1 %v7748_v6  ;;  %v7766_v4 = vpack.c.bf16 %v2202_v60, %v2194_v0  ;;  %v2208_v6 = vld [vmem:[#allocation11 + $0xb00] sm:$0xff]  ;;  %v7526_v0 = vpack.c.bf16 %v2264_v50, %v2256_v49  ;;  %v2337_v49 = vld [vmem:[#allocation11 + $0xf08] sm:$0xff] }
 0x3c9   :  { %v7514_v10 = vpack.c.bf16 %v2216_v7, %v2208_v6  ;;  %v2289_v6 = vld [vmem:[#allocation11 + $0xd88] sm:$0xff]  ;;  %v2336_v55 = vld [vmem:[#allocation11 + $0xf00] sm:$0xff] }
 0x3ca   :  { %7495 = vmatpush1.bf16.msra.mxu0 %v7494_v13  ;;  %7751 = vmatpush1.bf16.msra.mxu1 %v7750_v15  ;;  %v2210_v13 = vld [vmem:[#allocation11 + $0xb10] sm:$0xff]  ;;  %v2297_v7 = vld [vmem:[#allocation11 + $0xdc8] sm:$0xff]  ;;  %v2344_v56 = vld [vmem:[#allocation11 + $0xf40] sm:$0xff] }
 0x3cb   :  { %7497 = vmatprep.subr.bf16.mxu0 %v7496_v5  ;;  %7753 = vmatprep.subr.bf16.mxu1 %v7752_v9  ;;  %v2218_v15 = vld [vmem:[#allocation11 + $0xb50] sm:$0xff]  ;;  %v2227_v5 = vld [vmem:[#allocation11 + $0xb98] sm:$0xff]  ;;  %v2345_v50 = vld [vmem:[#allocation11 + $0xf48] sm:$0xff] }
 0x3cc   :  { %v2235_v9 = vld [vmem:[#allocation11 + $0xbd8] sm:$0xff]  ;;  %v7770_v18 = vpack.c.bf16 %v2218_v15, %v2210_v13  ;;  %v7530_v13 = vpack.c.bf16 %v2280_v62, %v2272_v61  ;;  %v2346_v61 = vld [vmem:[#allocation11 + $0xf50] sm:$0xff]  ;;  %v2353_v62 = vld [vmem:[#allocation11 + $0xf88] sm:$0xff] }
 0x3cd   :  { %v7772_v20 = vpack.c.bf16 %v2235_v9, %v2227_v5  ;;  %v7532_v5 = vpack.c.bf16 %v2297_v7, %v2289_v6  ;;  %v2352_v7 = vld [vmem:[#allocation11 + $0xf80] sm:$0xff] }
 0x3ce   :  { %7499 = vmatpush1.bf16.msra.mxu0 %v7498_v26  ;;  %7755 = vmatpush1.bf16.msra.mxu1 %v7754_v25  ;;  %v2226_v26 = vld [vmem:[#allocation11 + $0xb90] sm:$0xff] }
 0x3cf   :  { %7501 = vmatprep.subr.bf16.mxu0 %v7500_v32  ;;  %7757 = vmatprep.subr.bf16.mxu1 %v7756_v33  ;;  %v2234_v25 = vld [vmem:[#allocation11 + $0xbd0] sm:$0xff]  ;;  %v2243_v32 = vld [vmem:[#allocation11 + $0xc18] sm:$0xff] }
 0x3d0   :  { %v2251_v33 = vld [vmem:[#allocation11 + $0xc58] sm:$0xff]  ;;  %v7774_v19 = vpack.c.bf16 %v2234_v25, %v2226_v26  ;;  %v7534_v26 = vpack.c.bf16 %v2296_v21, %v2288_v16  ;;  %v2354_v16 = vld [vmem:[#allocation11 + $0xf90] sm:$0xff] }
 0x3d1   :  { %v7776_v41 = vpack.c.bf16 %v2251_v33, %v2243_v32  ;;  %v7536_v32 = vpack.c.bf16 %v2313_v24, %v2305_v23  ;;  %v2362_v21 = vld [vmem:[#allocation11 + $0xfd0] sm:$0xff] }
 0x3d2   :  { %7503 = vmatpush1.bf16.msra.mxu0 %v7502_v42  ;;  %7759 = vmatpush1.bf16.msra.mxu1 %v7758_v36  ;;  %v2242_v42 = vld [vmem:[#allocation11 + $0xc10] sm:$0xff]  ;;  %v7806_v24 = vpack.c.bf16 %v2362_v21, %v2354_v16  ;;  %v2435_v16 = vld [vmem:[#allocation11 + $0x1218] sm:$0xff] }
 0x3d3   :  { %7505 = vmatprep.subr.bf16.mxu0 %v7504_v44  ;;  %7761 = vmatprep.subr.bf16.mxu1 %v7760_v46  ;;  %v2250_v36 = vld [vmem:[#allocation11 + $0xc50] sm:$0xff]  ;;  %v2259_v44 = vld [vmem:[#allocation11 + $0xc98] sm:$0xff] }
 0x3d4   :  { %v2267_v46 = vld [vmem:[#allocation11 + $0xcd8] sm:$0xff]  ;;  %v7778_v48 = vpack.c.bf16 %v2250_v36, %v2242_v42  ;;  %v7538_v42 = vpack.c.bf16 %v2312_v31, %v2304_v29  ;;  %v2370_v31 = vld [vmem:[#allocation11 + $0x1010] sm:$0xff] }
 0x3d5   :  { %v7780_v52 = vpack.c.bf16 %v2267_v46, %v2259_v44  ;;  %v7540_v44 = vpack.c.bf16 %v2329_v38, %v2321_v35  ;;  %v2395_v35 = vld [vmem:[#allocation11 + $0x10d8] sm:$0xff] }
 0x3d6   :  { %7507 = vmatpush1.bf16.msra.mxu0 %v7506_v53  ;;  %7763 = vmatpush1.bf16.msra.mxu1 %v7762_v54  ;;  %v2258_v53 = vld [vmem:[#allocation11 + $0xc90] sm:$0xff]  ;;  %v2443_v21 = vld [vmem:[#allocation11 + $0x1258] sm:$0xff] }
 0x3d7   :  { %7509 = vmatprep.subr.bf16.mxu0 %v7508_v57  ;;  %7765 = vmatprep.subr.bf16.mxu1 %v7764_v58  ;;  %v2266_v54 = vld [vmem:[#allocation11 + $0xcd0] sm:$0xff]  ;;  %v2275_v57 = vld [vmem:[#allocation11 + $0xd18] sm:$0xff] }
 0x3d8   :  { %v2283_v58 = vld [vmem:[#allocation11 + $0xd58] sm:$0xff]  ;;  %v7782_v60 = vpack.c.bf16 %v2266_v54, %v2258_v53  ;;  %v7542_v53 = vpack.c.bf16 %v2328_v39, %v2320_v37  ;;  %v2386_v39 = vld [vmem:[#allocation11 + $0x1090] sm:$0xff] }
 0x3d9   :  { %v7784_v2 = vpack.c.bf16 %v2283_v58, %v2275_v57  ;;  %v10367_v57 = vsub.s32 2, %v10333_v43  ;;  %v7544_v58 = vpack.c.bf16 %v2345_v50, %v2337_v49  ;;  %v2411_v49 = vld [vmem:[#allocation11 + $0x1158] sm:$0xff] }
 0x3da   :  { %7511 = vmatpush1.bf16.msra.mxu0 %v7510_v3  ;;  %7767 = vmatpush1.bf16.msra.mxu1 %v7766_v4  ;;  %v2274_v3 = vld [vmem:[#allocation11 + $0xd10] sm:$0xff] }
 0x3db   :  { %7513 = vmatprep.subr.bf16.mxu0 %v7512_v8  ;;  %7769 = vmatprep.subr.bf16.mxu1 %v7768_v11  ;;  %v2282_v4 = vld [vmem:[#allocation11 + $0xd50] sm:$0xff]  ;;  %v2291_v8 = vld [vmem:[#allocation11 + $0xd98] sm:$0xff] }
 0x3dc   :  { %v2299_v11 = vld [vmem:[#allocation11 + $0xdd8] sm:$0xff]  ;;  %v7786_v15 = vpack.c.bf16 %v2282_v4, %v2274_v3  ;;  %v7546_v4 = vpack.c.bf16 %v2344_v56, %v2336_v55  ;;  %v2402_v56 = vld [vmem:[#allocation11 + $0x1110] sm:$0xff] }
 0x3dd   :  { %v7788_v9 = vpack.c.bf16 %v2299_v11, %v2291_v8  ;;  %v2363_v3 = vld [vmem:[#allocation11 + $0xfd8] sm:$0xff]  ;;  %v2360_v8 = vld [vmem:[#allocation11 + $0xfc0] sm:$0xff]  ;;  %v1251_v11 = vrot.slane %v10338_v27, %v10367_v57 }
 0x3de   :  { %7515 = vmatpush1.bf16.msra.mxu0 %v7514_v10  ;;  %7771 = vmatpush1.bf16.msra.mxu1 %v7770_v18  ;;  %v2290_v10 = vld [vmem:[#allocation11 + $0xd90] sm:$0xff]  ;;  %v7550_v23 = vpack.c.bf16 %v2360_v8, %v2352_v7 }
 0x3df   :  { %7517 = vmatprep.subr.bf16.mxu0 %v7516_v17  ;;  %7773 = vmatprep.subr.bf16.mxu1 %v7772_v20  ;;  %v2298_v18 = vld [vmem:[#allocation11 + $0xdd0] sm:$0xff]  ;;  %v2307_v17 = vld [vmem:[#allocation11 + $0xe18] sm:$0xff] }
 0x3e0   :  { %v2315_v20 = vld [vmem:[#allocation11 + $0xe58] sm:$0xff]  ;;  %v7790_v25 = vpack.c.bf16 %v2298_v18, %v2290_v10  ;;  %v2418_v8 = vld [vmem:[#allocation11 + $0x1190] sm:$0xff] }
 0x3e1   :  { %v7792_v33 = vpack.c.bf16 %v2315_v20, %v2307_v17  ;;  %v2371_v10 = vld [vmem:[#allocation11 + $0x1018] sm:$0xff]  ;;  %v2368_v17 = vld [vmem:[#allocation11 + $0x1000] sm:$0xff] }
 0x3e2   :  { %7519 = vmatpush1.bf16.msra.mxu0 %v7518_v34  ;;  %7775 = vmatpush1.bf16.msra.mxu1 %v7774_v19  ;;  %v2306_v34 = vld [vmem:[#allocation11 + $0xe10] sm:$0xff]  ;;  %v2379_v18 = vld [vmem:[#allocation11 + $0x1058] sm:$0xff]  ;;  %v2376_v20 = vld [vmem:[#allocation11 + $0x1040] sm:$0xff] }
 0x3e3   :  { %7521 = vmatprep.subr.bf16.mxu0 %v7520_v40  ;;  %7777 = vmatprep.subr.bf16.mxu1 %v7776_v41  ;;  %v2314_v19 = vld [vmem:[#allocation11 + $0xe50] sm:$0xff]  ;;  %v2323_v40 = vld [vmem:[#allocation11 + $0xe98] sm:$0xff]  ;;  %v7808_v29 = vpack.c.bf16 %v2379_v18, %v2371_v10  ;;  %v7554_v38 = vpack.c.bf16 %v2376_v20, %v2368_v17  ;;  %v2432_v10 = vld [vmem:[#allocation11 + $0x1200] sm:$0xff] }
 0x3e4   :  { %v2331_v41 = vld [vmem:[#allocation11 + $0xed8] sm:$0xff]  ;;  %v7794_v36 = vpack.c.bf16 %v2314_v19, %v2306_v34  ;;  %v2393_v34 = vld [vmem:[#allocation11 + $0x10c8] sm:$0xff]  ;;  %v2440_v18 = vld [vmem:[#allocation11 + $0x1240] sm:$0xff] }
 0x3e5   :  { %v7796_v46 = vpack.c.bf16 %v2331_v41, %v2323_v40  ;;  %v2387_v19 = vld [vmem:[#allocation11 + $0x1098] sm:$0xff]  ;;  %v2384_v41 = vld [vmem:[#allocation11 + $0x1080] sm:$0xff]  ;;  %v2434_v17 = vld [vmem:[#allocation11 + $0x1210] sm:$0xff] }
 0x3e6   :  { %7523 = vmatpush1.bf16.msra.mxu0 %v7522_v47  ;;  %7779 = vmatpush1.bf16.msra.mxu1 %v7778_v48  ;;  %v2322_v47 = vld [vmem:[#allocation11 + $0xe90] sm:$0xff]  ;;  %v7812_v37 = vpack.c.bf16 %v2395_v35, %v2387_v19  ;;  %v2456_v19 = vld [vmem:[#allocation11 + $0x12c0] sm:$0xff] }
 0x3e7   :  { %7525 = vmatprep.subr.bf16.mxu0 %v7524_v51  ;;  %7781 = vmatprep.subr.bf16.mxu1 %v7780_v52  ;;  %v2330_v48 = vld [vmem:[#allocation11 + $0xed0] sm:$0xff]  ;;  %v2339_v51 = vld [vmem:[#allocation11 + $0xf18] sm:$0xff] }
 0x3e8   :  { %v2347_v52 = vld [vmem:[#allocation11 + $0xf58] sm:$0xff]  ;;  %v7798_v54 = vpack.c.bf16 %v2330_v48, %v2322_v47  ;;  %v2409_v47 = vld [vmem:[#allocation11 + $0x1148] sm:$0xff]  ;;  %v2442_v20 = vld [vmem:[#allocation11 + $0x1250] sm:$0xff] }
 0x3e9   :  { %v2403_v48 = vld [vmem:[#allocation11 + $0x1118] sm:$0xff] }
 0x3ea   :  { %7527 = vmatpush1.bf16.msra.mxu0 %v7526_v0  ;;  %7783 = vmatpush1.bf16.msra.mxu1 %v7782_v60  ;;  %v7800_v0 = vpack.c.bf16 %v2347_v52, %v2339_v51  ;;  %v2338_v60 = vld [vmem:[#allocation11 + $0xf10] sm:$0xff]  ;;  %v2400_v52 = vld [vmem:[#allocation11 + $0x1100] sm:$0xff]  ;;  %v7816_v55 = vpack.c.bf16 %v2411_v49, %v2403_v48 }
 0x3eb   :  { %7529 = vmatprep.subr.bf16.mxu0 %v7528_v22  ;;  %7785 = vmatprep.subr.bf16.mxu1 %v7784_v2  ;;  %v2361_v22 = vld [vmem:[#allocation11 + $0xfc8] sm:$0xff]  ;;  %v2355_v2 = vld [vmem:[#allocation11 + $0xf98] sm:$0xff]  ;;  %v7802_v6 = vpack.c.bf16 %v2346_v61, %v2338_v60  ;;  %v2472_v48 = vld [vmem:[#allocation11 + $0x1340] sm:$0xff] }
 0x3ec   :  { %v2425_v60 = vld [vmem:[#allocation11 + $0x11c8] sm:$0xff]  ;;  %v2419_v61 = vld [vmem:[#allocation11 + $0x1198] sm:$0xff] }
 0x3ee   :  { %7531 = vmatpush1.bf16.msra.mxu0 %v7530_v13  ;;  %7787 = vmatpush1.bf16.msra.mxu1 %v7786_v15  ;;  %v7548_v13 = vpack.c.bf16 %v2361_v22, %v2353_v62  ;;  %v7804_v15 = vpack.c.bf16 %v2363_v3, %v2355_v2  ;;  %v2427_v62 = vld [vmem:[#allocation11 + $0x11d8] sm:$0xff]  ;;  %v2416_v3 = vld [vmem:[#allocation11 + $0x1180] sm:$0xff] }
 0x3ef   :  { %7533 = vmatprep.subr.bf16.mxu0 %v7532_v5  ;;  %7789 = vmatprep.subr.bf16.mxu1 %v7788_v9  ;;  %v2369_v5 = vld [vmem:[#allocation11 + $0x1008] sm:$0xff]  ;;  %v7820_v7 = vpack.c.bf16 %v2427_v62, %v2419_v61  ;;  %v2480_v61 = vld [vmem:[#allocation11 + $0x1380] sm:$0xff] }
 0x3f0   :  { %v2377_v9 = vld [vmem:[#allocation11 + $0x1048] sm:$0xff]  ;;  %v2488_v62 = vld [vmem:[#allocation11 + $0x13c0] sm:$0xff] }
 0x3f2   :  { %7535 = vmatpush1.bf16.msra.mxu0 %v7534_v26  ;;  %7791 = vmatpush1.bf16.msra.mxu1 %v7790_v25  ;;  %v9506_v26 = vadd.f32 %v10352_v45, %v1251_v11  ;;  %v7552_v25 = vpack.c.bf16 %v2377_v9, %v2369_v5  ;;  %v2426_v11 = vld [vmem:[#allocation11 + $0x11d0] sm:$0xff] }
 0x3f3   :  { %7537 = vmatprep.subr.bf16.mxu0 %v7536_v32  ;;  %7793 = vmatprep.subr.bf16.mxu1 %v7792_v33  ;;  %v2378_v32 = vld [vmem:[#allocation11 + $0x1050] sm:$0xff]  ;;  %v2385_v33 = vld [vmem:[#allocation11 + $0x1088] sm:$0xff]  ;;  %v7822_v9 = vpack.c.bf16 %v2426_v11, %v2418_v8  ;;  %v2499_v11 = vld [vmem:[#allocation11 + $0x1418] sm:$0xff] }
 0x3f4   :  { %v7810_v40 = vpack.c.bf16 %v2378_v32, %v2370_v31  ;;  %v7556_v45 = vpack.c.bf16 %v2393_v34, %v2385_v33  ;;  %v2459_v31 = vld [vmem:[#allocation11 + $0x12d8] sm:$0xff]  ;;  %v7570_v32 = vpack.c.bf16 %v2440_v18, %v2432_v10  ;;  %v7826_v33 = vpack.c.bf16 %v2442_v20, %v2434_v17  ;;  %v2448_v34 = vld [vmem:[#allocation11 + $0x1280] sm:$0xff]  ;;  %v2505_v8 = vld [vmem:[#allocation11 + $0x1448] sm:$0xff] }
 0x3f5   :  { %v2498_v17 = vld [vmem:[#allocation11 + $0x1410] sm:$0xff]  ;;  %v2513_v20 = vld [vmem:[#allocation11 + $0x1488] sm:$0xff] }
 0x3f6   :  { %7539 = vmatpush1.bf16.msra.mxu0 %v7538_v42  ;;  %7795 = vmatpush1.bf16.msra.mxu1 %v7794_v36  ;;  %v2392_v42 = vld [vmem:[#allocation11 + $0x10c0] sm:$0xff]  ;;  %v10372_v36 = vmax.f32 %v9506_v26, 0.0  ;;  %v2449_v26 = vld [vmem:[#allocation11 + $0x1288] sm:$0xff] }
 0x3f7   :  { %7541 = vmatprep.subr.bf16.mxu0 %v7540_v44  ;;  %7797 = vmatprep.subr.bf16.mxu1 %v7796_v46  ;;  %v2394_v44 = vld [vmem:[#allocation11 + $0x10d0] sm:$0xff]  ;;  %v2401_v46 = vld [vmem:[#allocation11 + $0x1108] sm:$0xff]  ;;  %v7558_v50 = vpack.c.bf16 %v2392_v42, %v2384_v41 }
 0x3f8   :  { %v7814_v51 = vpack.c.bf16 %v2394_v44, %v2386_v39  ;;  %v2458_v41 = vld [vmem:[#allocation11 + $0x12d0] sm:$0xff]  ;;  %v2465_v42 = vld [vmem:[#allocation11 + $0x1308] sm:$0xff]  ;;  %v2475_v39 = vld [vmem:[#allocation11 + $0x1358] sm:$0xff]  ;;  %v7574_v44 = vpack.c.bf16 %v2456_v19, %v2448_v34 }
 0x3fa   :  { %7543 = vmatpush1.bf16.msra.mxu0 %v7542_v53  ;;  %7799 = vmatpush1.bf16.msra.mxu1 %v7798_v54  ;;  %v2408_v53 = vld [vmem:[#allocation11 + $0x1140] sm:$0xff]  ;;  %v7560_v54 = vpack.c.bf16 %v2409_v47, %v2401_v46 }
 0x3fb   :  { %7545 = vmatprep.subr.bf16.mxu0 %v7544_v58  ;;  %7801 = vmatprep.subr.bf16.mxu1 %v7800_v0  ;;  %v2410_v58 = vld [vmem:[#allocation11 + $0x1150] sm:$0xff]  ;;  %v2417_v0 = vld [vmem:[#allocation11 + $0x1188] sm:$0xff]  ;;  %v7562_v22 = vpack.c.bf16 %v2408_v53, %v2400_v52  ;;  %v2464_v47 = vld [vmem:[#allocation11 + $0x1300] sm:$0xff] }
 0x3fc   :  { %v7818_v2 = vpack.c.bf16 %v2410_v58, %v2402_v56  ;;  %v2474_v52 = vld [vmem:[#allocation11 + $0x1350] sm:$0xff]  ;;  %v2481_v53 = vld [vmem:[#allocation11 + $0x1388] sm:$0xff]  ;;  %v2483_v56 = vld [vmem:[#allocation11 + $0x1398] sm:$0xff] }
 0x3fd   :  { %v2491_v58 = vld [vmem:[#allocation11 + $0x13d8] sm:$0xff] }
 0x3fe   :  { %7547 = vmatpush1.bf16.msra.mxu0 %v7546_v4  ;;  %7803 = vmatpush1.bf16.msra.mxu1 %v7802_v6  ;;  %v2424_v4 = vld [vmem:[#allocation11 + $0x11c0] sm:$0xff]  ;;  %v7564_v6 = vpack.c.bf16 %v2425_v60, %v2417_v0  ;;  %v7578_v0 = vpack.c.bf16 %v2472_v48, %v2464_v47 }
 0x3ff   :  { %7549 = vmatprep.subr.bf16.mxu0 %v7548_v13  ;;  %7805 = vmatprep.subr.bf16.mxu1 %v7804_v15  ;;  %v2433_v13 = vld [vmem:[#allocation11 + $0x1208] sm:$0xff]  ;;  %v7566_v5 = vpack.c.bf16 %v2424_v4, %v2416_v3  ;;  %v2482_v3 = vld [vmem:[#allocation11 + $0x1390] sm:$0xff] }
 0x400   :  { %v2441_v15 = vld [vmem:[#allocation11 + $0x1248] sm:$0xff]  ;;  %v2490_v4 = vld [vmem:[#allocation11 + $0x13d0] sm:$0xff] }
 0x402   :  { %7551 = vmatpush1.bf16.msra.mxu0 %v7550_v23  ;;  %7807 = vmatpush1.bf16.msra.mxu1 %v7806_v24  ;;  %v7568_v23 = vpack.c.bf16 %v2441_v15, %v2433_v13  ;;  %v7824_v24 = vpack.c.bf16 %v2443_v21, %v2435_v16  ;;  %v2507_v13 = vld [vmem:[#allocation11 + $0x1458] sm:$0xff]  ;;  %v7582_v16 = vpack.c.bf16 %v2488_v62, %v2480_v61 }
 0x403   :  { %7553 = vmatprep.subr.bf16.mxu0 %v7552_v25  ;;  %7809 = vmatprep.subr.bf16.mxu1 %v7808_v29  ;;  %v2457_v25 = vld [vmem:[#allocation11 + $0x12c8] sm:$0xff]  ;;  %v2451_v29 = vld [vmem:[#allocation11 + $0x1298] sm:$0xff]  ;;  %v7838_v21 = vpack.c.bf16 %v2490_v4, %v2482_v3 }
 0x404   :  { %v7572_v35 = vpack.c.bf16 %v2457_v25, %v2449_v26 }
 0x405   :  { %3058 = vmatmul.mubr.f32.vlgmr.msra.gmra.mrb[12].mxu0 %v10372_v36  ;;  %3342 = vmatmul.mubr.f32.vlgmr.msra.gmra.mrb[12].mxu1 %v10372_v36 }
 0x406   :  { %7555 = vmatpush1.bf16.msra.mxu0 %v7554_v38  ;;  %7811 = vmatpush1.bf16.msra.mxu1 %v7810_v40  ;;  %v7828_v38 = vpack.c.bf16 %v2459_v31, %v2451_v29  ;;  %v2450_v40 = vld [vmem:[#allocation11 + $0x1290] sm:$0xff]  ;;  %v2521_v29 = vld [vmem:[#allocation11 + $0x14c8] sm:$0xff]  ;;  %v2515_v31 = vld [vmem:[#allocation11 + $0x1498] sm:$0xff] }
 0x407   :  { %7557 = vmatprep.subr.bf16.mxu0 %v7556_v45  ;;  %7813 = vmatprep.subr.bf16.mxu1 %v7812_v37  ;;  %v2473_v45 = vld [vmem:[#allocation11 + $0x1348] sm:$0xff]  ;;  %v2467_v37 = vld [vmem:[#allocation11 + $0x1318] sm:$0xff]  ;;  %v7830_v46 = vpack.c.bf16 %v2458_v41, %v2450_v40  ;;  %v7588_v40 = vpack.c.bf16 %v2521_v29, %v2513_v20 }
 0x408   :  { %v7576_v49 = vpack.c.bf16 %v2473_v45, %v2465_v42  ;;  %v2514_v42 = vld [vmem:[#allocation11 + $0x1490] sm:$0xff]  ;;  %v2577_v20 = vld [vmem:[#allocation11 + $0x1688] sm:$0xff]  ;;  %v2579_v29 = vld [vmem:[#allocation11 + $0x1698] sm:$0xff] }
 0x409   :  { %v2522_v45 = vld [vmem:[#allocation11 + $0x14d0] sm:$0xff] }
 0x40a   :  { %7559 = vmatpush1.bf16.msra.mxu0 %v7558_v50  ;;  %7815 = vmatpush1.bf16.msra.mxu1 %v7814_v51  ;;  %v7832_v50 = vpack.c.bf16 %v2475_v39, %v2467_v37  ;;  %v2466_v51 = vld [vmem:[#allocation11 + $0x1310] sm:$0xff]  ;;  %v2529_v37 = vld [vmem:[#allocation11 + $0x1508] sm:$0xff]  ;;  %v7846_v48 = vpack.c.bf16 %v2522_v45, %v2514_v42 }
 0x40b   :  { %7561 = vmatprep.subr.bf16.mxu0 %v7560_v54  ;;  %7817 = vmatprep.subr.bf16.mxu1 %v7816_v55  ;;  %v10377_v54 = vsub.s32 5, %v10333_v43  ;;  %v2489_v55 = vld [vmem:[#allocation11 + $0x13c8] sm:$0xff]  ;;  %v7834_v60 = vpack.c.bf16 %v2474_v52, %v2466_v51  ;;  %v2586_v42 = vld [vmem:[#allocation11 + $0x16d0] sm:$0xff] }
 0x40c   :  { %v2537_v39 = vld [vmem:[#allocation11 + $0x1548] sm:$0xff] }
 0x40d   :  { %v7592_v51 = vpack.c.bf16 %v2537_v39, %v2529_v37  ;;  %v2593_v45 = vld [vmem:[#allocation11 + $0x1708] sm:$0xff]  ;;  %v2595_v39 = vld [vmem:[#allocation11 + $0x1718] sm:$0xff] }
 0x40e   :  { %7563 = vmatpush1.bf16.msra.mxu0 %v7562_v22  ;;  %7819 = vmatpush1.bf16.msra.mxu1 %v7818_v2  ;;  %v7580_v22 = vpack.c.bf16 %v2489_v55, %v2481_v53  ;;  %v7836_v2 = vpack.c.bf16 %v2491_v58, %v2483_v56  ;;  %v2530_v53 = vld [vmem:[#allocation11 + $0x1510] sm:$0xff]  ;;  %v2545_v56 = vld [vmem:[#allocation11 + $0x1588] sm:$0xff] }
 0x40f   :  { %7565 = vmatprep.subr.bf16.mxu0 %v7564_v6  ;;  %7821 = vmatprep.subr.bf16.mxu1 %v7820_v7  ;;  %v2497_v6 = vld [vmem:[#allocation11 + $0x1408] sm:$0xff]  ;;  %v1263_v7 = vrot.slane %v10338_v27, %v10377_v54  ;;  %v2506_v27 = vld [vmem:[#allocation11 + $0x1450] sm:$0xff] }
 0x410   :  { %v7842_v19 = vpack.c.bf16 %v2506_v27, %v2498_v17  ;;  %v2538_v55 = vld [vmem:[#allocation11 + $0x1550] sm:$0xff]  ;;  %v2553_v58 = vld [vmem:[#allocation11 + $0x15c8] sm:$0xff] }
 0x411   :  { %v7850_v62 = vpack.c.bf16 %v2538_v55, %v2530_v53  ;;  %v7596_v3 = vpack.c.bf16 %v2553_v58, %v2545_v56  ;;  %v2562_v17 = vld [vmem:[#allocation11 + $0x1610] sm:$0xff]  ;;  %v2601_v37 = vld [vmem:[#allocation11 + $0x1748] sm:$0xff]  ;;  %v1270_v58 = vsub.s32 7, %v10333_v43 }
 0x412   :  { %7567 = vmatpush1.bf16.msra.mxu0 %v7566_v5  ;;  %7823 = vmatpush1.bf16.msra.mxu1 %v7822_v9  ;;  %v2496_v5 = vld [vmem:[#allocation11 + $0x1400] sm:$0xff]  ;;  %v2570_v27 = vld [vmem:[#allocation11 + $0x1650] sm:$0xff]  ;;  %v2609_v56 = vld [vmem:[#allocation11 + $0x1788] sm:$0xff] }
 0x413   :  { %7569 = vmatprep.subr.bf16.mxu0 %v7568_v23  ;;  %7825 = vmatprep.subr.bf16.mxu1 %v7824_v24  ;;  %v2504_v9 = vld [vmem:[#allocation11 + $0x1440] sm:$0xff]  ;;  %v7584_v23 = vpack.c.bf16 %v2505_v8, %v2497_v6  ;;  %v7840_v24 = vpack.c.bf16 %v2507_v13, %v2499_v11  ;;  %v2546_v6 = vld [vmem:[#allocation11 + $0x1590] sm:$0xff]  ;;  %v2561_v8 = vld [vmem:[#allocation11 + $0x1608] sm:$0xff] }
 0x414   :  { %v7586_v34 = vpack.c.bf16 %v2504_v9, %v2496_v5  ;;  %v2569_v11 = vld [vmem:[#allocation11 + $0x1648] sm:$0xff]  ;;  %v2563_v13 = vld [vmem:[#allocation11 + $0x1618] sm:$0xff]  ;;  %v2560_v9 = vld [vmem:[#allocation11 + $0x1600] sm:$0xff] }
 0x415   :  { %v2594_v53 = vld [vmem:[#allocation11 + $0x1710] sm:$0xff] }
 0x416   :  { %7571 = vmatpush1.bf16.msra.mxu0 %v7570_v32  ;;  %7827 = vmatpush1.bf16.msra.mxu1 %v7826_v33  ;;  %v2523_v32 = vld [vmem:[#allocation11 + $0x14d8] sm:$0xff]  ;;  %v2602_v55 = vld [vmem:[#allocation11 + $0x1750] sm:$0xff] }
 0x417   :  { %7573 = vmatprep.subr.bf16.mxu0 %v7572_v35  ;;  %7829 = vmatprep.subr.bf16.mxu1 %v7828_v38  ;;  %v2512_v35 = vld [vmem:[#allocation11 + $0x1480] sm:$0xff]  ;;  %v7844_v41 = vpack.c.bf16 %v2523_v32, %v2515_v31  ;;  %v2587_v31 = vld [vmem:[#allocation11 + $0x16d8] sm:$0xff] }
 0x418   :  { %v2520_v38 = vld [vmem:[#allocation11 + $0x14c0] sm:$0xff] }
 0x419   :  { %v7590_v47 = vpack.c.bf16 %v2520_v38, %v2512_v35  ;;  %v2584_v35 = vld [vmem:[#allocation11 + $0x16c0] sm:$0xff] }
 0x41a   :  { %7575 = vmatpush1.bf16.msra.mxu0 %v7574_v44  ;;  %7831 = vmatpush1.bf16.msra.mxu1 %v7830_v46  ;;  %v2531_v44 = vld [vmem:[#allocation11 + $0x1518] sm:$0xff] }
 0x41b   :  { %7577 = vmatprep.subr.bf16.mxu0 %v7576_v49  ;;  %7833 = vmatprep.subr.bf16.mxu1 %v7832_v50  ;;  %v2539_v46 = vld [vmem:[#allocation11 + $0x1558] sm:$0xff]  ;;  %v2528_v49 = vld [vmem:[#allocation11 + $0x1500] sm:$0xff] }
 0x41c   :  { %v2536_v50 = vld [vmem:[#allocation11 + $0x1540] sm:$0xff]  ;;  %v7848_v52 = vpack.c.bf16 %v2539_v46, %v2531_v44  ;;  %v2603_v44 = vld [vmem:[#allocation11 + $0x1758] sm:$0xff] }
 0x41d   :  { %v7594_v61 = vpack.c.bf16 %v2536_v50, %v2528_v49  ;;  %v2600_v49 = vld [vmem:[#allocation11 + $0x1740] sm:$0xff]  ;;  %v10392_v50 = vsub.s32 4, %v10333_v43 }
 0x41e   :  { %7579 = vmatpush1.bf16.msra.mxu0 %v7578_v0  ;;  %7835 = vmatpush1.bf16.msra.mxu1 %v7834_v60  ;;  %v10381_v15 = vpop.f32.mrb[10].mxu0  ;;  %v2547_v0 = vld [vmem:[#allocation11 + $0x1598] sm:$0xff] }
 0x41f   :  { %v10383_v10 = vpop.f32.mrb[10].mxu1  ;;  %v1703_v18 = vpop.f32.mrb[11].mxu0  ;;  %7581 = vmatprep.subr.bf16.mxu0 %v7580_v22  ;;  %7837 = vmatprep.subr.bf16.mxu1 %v7836_v2  ;;  %v2555_v60 = vld [vmem:[#allocation11 + $0x15d8] sm:$0xff]  ;;  %v2544_v22 = vld [vmem:[#allocation11 + $0x1580] sm:$0xff] }
 0x420   :  { %v9509_v26 = vadd.f32 %v1703_v18, %v1263_v7  ;;  %v10385_v25 = vpop.f32.mrb[11].mxu1  ;;  %v2552_v2 = vld [vmem:[#allocation11 + $0x15c0] sm:$0xff]  ;;  %v7852_v4 = vpack.c.bf16 %v2555_v60, %v2547_v0  ;;  %v2554_v7 = vld [vmem:[#allocation11 + $0x15d0] sm:$0xff]  ;;  %v2617_v0 = vld [vmem:[#allocation11 + $0x17c8] sm:$0xff] }
 0x421   :  { %v7854_v5 = vpack.c.bf16 %v2554_v7, %v2546_v6  ;;  %v2568_v18 = vld [vmem:[#allocation11 + $0x1640] sm:$0xff]  ;;  %v2611_v60 = vld [vmem:[#allocation11 + $0x1798] sm:$0xff]  ;;  %v7612_v7 = vpack.c.bf16 %v2617_v0, %v2609_v56 }
 0x422   :  { %v10387_v33 = vmax.f32 %v9509_v26, 0.0  ;;  %7583 = vmatpush1.bf16.msra.mxu0 %v7582_v16  ;;  %7839 = vmatpush1.bf16.msra.mxu1 %v7838_v21  ;;  %v2571_v16 = vld [vmem:[#allocation11 + $0x1658] sm:$0xff]  ;;  %v7598_v21 = vpack.c.bf16 %v2552_v2, %v2544_v22  ;;  %v2585_v26 = vld [vmem:[#allocation11 + $0x16c8] sm:$0xff]  ;;  %v7602_v32 = vpack.c.bf16 %v2568_v18, %v2560_v9  ;;  %v7866_v22 = vpack.c.bf16 %v2602_v55, %v2594_v53  ;;  %v2608_v2 = vld [vmem:[#allocation11 + $0x1780] sm:$0xff] }
 0x423   :  { %7585 = vmatprep.subr.bf16.mxu0 %v7584_v23  ;;  %7841 = vmatprep.subr.bf16.mxu1 %v7840_v24  ;;  %v7600_v23 = vpack.c.bf16 %v2569_v11, %v2561_v8  ;;  %v7856_v24 = vpack.c.bf16 %v2571_v16, %v2563_v13  ;;  %v7604_v38 = vpack.c.bf16 %v2585_v26, %v2577_v20  ;;  %v2610_v11 = vld [vmem:[#allocation11 + $0x1790] sm:$0xff]  ;;  %v2625_v16 = vld [vmem:[#allocation11 + $0x1808] sm:$0xff]  ;;  %v2627_v9 = vld [vmem:[#allocation11 + $0x1818] sm:$0xff] }
 0x424   :  { %3128 = vmatprep.mubr.f32.mxu0 %v10387_v33  ;;  %3412 = vmatprep.mubr.f32.mxu1 %v10387_v33  ;;  %v2618_v13 = vld [vmem:[#allocation11 + $0x17d0] sm:$0xff]  ;;  %v2635_v18 = vld [vmem:[#allocation11 + $0x1858] sm:$0xff]  ;;  %v2624_v26 = vld [vmem:[#allocation11 + $0x1800] sm:$0xff] }
 0x425   :  { %v7872_v20 = vpack.c.bf16 %v2635_v18, %v2627_v9  ;;  %v2656_v0 = vld [vmem:[#allocation11 + $0x1900] sm:$0xff]  ;;  %v2682_v18 = vld [vmem:[#allocation11 + $0x19d0] sm:$0xff] }
 0x426   :  { %7587 = vmatpush1.bf16.msra.mxu0 %v7586_v34  ;;  %7843 = vmatpush1.bf16.msra.mxu1 %v7842_v19  ;;  %v7858_v34 = vpack.c.bf16 %v2570_v27, %v2562_v17  ;;  %v2576_v19 = vld [vmem:[#allocation11 + $0x1680] sm:$0xff] }
 0x427   :  { %7589 = vmatprep.subr.bf16.mxu0 %v7588_v40  ;;  %7845 = vmatprep.subr.bf16.mxu1 %v7844_v41  ;;  %v7860_v40 = vpack.c.bf16 %v2587_v31, %v2579_v29  ;;  %v2578_v41 = vld [vmem:[#allocation11 + $0x1690] sm:$0xff]  ;;  %v7606_v46 = vpack.c.bf16 %v2584_v35, %v2576_v19  ;;  %v2632_v29 = vld [vmem:[#allocation11 + $0x1840] sm:$0xff]  ;;  %v2641_v19 = vld [vmem:[#allocation11 + $0x1888] sm:$0xff] }
 0x428   :  { %v2649_v35 = vld [vmem:[#allocation11 + $0x18c8] sm:$0xff] }
 0x42a   :  { %7591 = vmatpush1.bf16.msra.mxu0 %v7590_v47  ;;  %7847 = vmatpush1.bf16.msra.mxu1 %v7846_v48  ;;  %v7862_v47 = vpack.c.bf16 %v2586_v42, %v2578_v41  ;;  %v2592_v48 = vld [vmem:[#allocation11 + $0x1700] sm:$0xff]  ;;  %v7618_v41 = vpack.c.bf16 %v2632_v29, %v2624_v26 }
 0x42b   :  { %7593 = vmatprep.subr.bf16.mxu0 %v7592_v51  ;;  %7849 = vmatprep.subr.bf16.mxu1 %v7848_v52  ;;  %v7608_v51 = vpack.c.bf16 %v2601_v37, %v2593_v45  ;;  %v7864_v52 = vpack.c.bf16 %v2603_v44, %v2595_v39  ;;  %v2640_v45 = vld [vmem:[#allocation11 + $0x1880] sm:$0xff]  ;;  %v2642_v39 = vld [vmem:[#allocation11 + $0x1890] sm:$0xff] }
 0x42c   :  { %v2648_v37 = vld [vmem:[#allocation11 + $0x18c0] sm:$0xff] }
 0x42d   :  { %v7622_v53 = vpack.c.bf16 %v2648_v37, %v2640_v45 }
 0x42e   :  { %7595 = vmatpush1.bf16.msra.mxu0 %v7594_v61  ;;  %7851 = vmatpush1.bf16.msra.mxu1 %v7850_v62  ;;  %v2619_v61 = vld [vmem:[#allocation11 + $0x17d8] sm:$0xff]  ;;  %v7610_v62 = vpack.c.bf16 %v2600_v49, %v2592_v48  ;;  %v2657_v48 = vld [vmem:[#allocation11 + $0x1908] sm:$0xff] }
 0x42f   :  { %7597 = vmatprep.subr.bf16.mxu0 %v7596_v3  ;;  %7853 = vmatprep.subr.bf16.mxu1 %v7852_v4  ;;  %v2616_v3 = vld [vmem:[#allocation11 + $0x17c0] sm:$0xff]  ;;  %v10395_v4 = vld [vmem:[#allocation10] sm:$0xff]  ;;  %v7868_v8 = vpack.c.bf16 %v2619_v61, %v2611_v60  ;;  %v2665_v49 = vld [vmem:[#allocation11 + $0x1948] sm:$0xff] }
 0x430   :  { %v1259_v6 = vrot.slane %v10395_v4, %v10392_v50  ;;  %v7624_v56 = vpack.c.bf16 %v2665_v49, %v2657_v48  ;;  %v2664_v60 = vld [vmem:[#allocation11 + $0x1940] sm:$0xff]  ;;  %v2658_v61 = vld [vmem:[#allocation11 + $0x1910] sm:$0xff] }
 0x431   :  { %v2714_v49 = vld [vmem:[#allocation11 + $0x1ad0] sm:$0xff] }
 0x432   :  { %7599 = vmatpush1.bf16.msra.mxu0 %v7598_v21  ;;  %7855 = vmatpush1.bf16.msra.mxu1 %v7854_v5  ;;  %v1271_v21 = vrot.slane %v10395_v4, %v1270_v58  ;;  %v2633_v5 = vld [vmem:[#allocation11 + $0x1848] sm:$0xff]  ;;  %v9508_v17 = vadd.f32 %v10381_v15, %v1259_v6  ;;  %v2675_v6 = vld [vmem:[#allocation11 + $0x1998] sm:$0xff] }
 0x433   :  { %7601 = vmatprep.subr.bf16.mxu0 %v7600_v23  ;;  %7857 = vmatprep.subr.bf16.mxu1 %v7856_v24  ;;  %v7614_v23 = vpack.c.bf16 %v2616_v3, %v2608_v2  ;;  %v7870_v24 = vpack.c.bf16 %v2618_v13, %v2610_v11  ;;  %v7616_v27 = vpack.c.bf16 %v2633_v5, %v2625_v16  ;;  %v2673_v2 = vld [vmem:[#allocation11 + $0x1988] sm:$0xff]  ;;  %v2672_v16 = vld [vmem:[#allocation11 + $0x1980] sm:$0xff]  ;;  %v2674_v5 = vld [vmem:[#allocation11 + $0x1990] sm:$0xff] }
 0x434   :  { %v9511_v31 = vadd.f32 %v10385_v25, %v1271_v21  ;;  %v10404_v42 = vmax.f32 %v9508_v17, 0.0  ;;  %v7620_v25 = vpack.c.bf16 %v2649_v35, %v2641_v19  ;;  %v2681_v3 = vld [vmem:[#allocation11 + $0x19c8] sm:$0xff]  ;;  %v2680_v21 = vld [vmem:[#allocation11 + $0x19c0] sm:$0xff]  ;;  %v2691_v17 = vld [vmem:[#allocation11 + $0x1a18] sm:$0xff]  ;;  %v7886_v26 = vpack.c.bf16 %v2682_v18, %v2674_v5 }
 0x435   :  { %v7628_v13 = vpack.c.bf16 %v2681_v3, %v2673_v2  ;;  %v2698_v35 = vld [vmem:[#allocation11 + $0x1a50] sm:$0xff]  ;;  %v2736_v5 = vld [vmem:[#allocation11 + $0x1b80] sm:$0xff] }
 0x436   :  { %7603 = vmatpush1.bf16.msra.mxu0 %v7602_v32  ;;  %7859 = vmatpush1.bf16.msra.mxu1 %v7858_v34  ;;  %v2626_v32 = vld [vmem:[#allocation11 + $0x1810] sm:$0xff]  ;;  %v10406_v44 = vmax.f32 %v9511_v31, 0.0  ;;  %v2688_v31 = vld [vmem:[#allocation11 + $0x1a00] sm:$0xff] }
 0x437   :  { %7605 = vmatprep.subr.bf16.mxu0 %v7604_v38  ;;  %7861 = vmatprep.subr.bf16.mxu1 %v7860_v40  ;;  %v2634_v34 = vld [vmem:[#allocation11 + $0x1850] sm:$0xff]  ;;  %v2643_v38 = vld [vmem:[#allocation11 + $0x1898] sm:$0xff] }
 0x438   :  { %v2651_v40 = vld [vmem:[#allocation11 + $0x18d8] sm:$0xff]  ;;  %v7874_v15 = vpack.c.bf16 %v2634_v34, %v2626_v32  ;;  %v2696_v32 = vld [vmem:[#allocation11 + $0x1a40] sm:$0xff]  ;;  %v2690_v34 = vld [vmem:[#allocation11 + $0x1a10] sm:$0xff] }
 0x439   :  { %v7634_v45 = vpack.c.bf16 %v2696_v32, %v2688_v31  ;;  %v7890_v37 = vpack.c.bf16 %v2698_v35, %v2690_v34  ;;  %v2730_v3 = vld [vmem:[#allocation11 + $0x1b50] sm:$0xff]  ;;  %v2752_v34 = vld [vmem:[#allocation11 + $0x1c00] sm:$0xff] }
 0x43a   :  { %7607 = vmatpush1.bf16.msra.mxu0 %v7606_v46  ;;  %7863 = vmatpush1.bf16.msra.mxu1 %v7862_v47  ;;  %v7876_v46 = vpack.c.bf16 %v2651_v40, %v2643_v38  ;;  %v2650_v47 = vld [vmem:[#allocation11 + $0x18d0] sm:$0xff]  ;;  %v2705_v38 = vld [vmem:[#allocation11 + $0x1a88] sm:$0xff] }
 0x43b   :  { %7609 = vmatprep.subr.bf16.mxu0 %v7608_v51  ;;  %7865 = vmatprep.subr.bf16.mxu1 %v7864_v52  ;;  %v2659_v51 = vld [vmem:[#allocation11 + $0x1918] sm:$0xff]  ;;  %v7878_v55 = vpack.c.bf16 %v2650_v47, %v2642_v39  ;;  %v2713_v40 = vld [vmem:[#allocation11 + $0x1ac8] sm:$0xff]  ;;  %v2706_v47 = vld [vmem:[#allocation11 + $0x1a90] sm:$0xff] }
 0x43c   :  { %v2667_v52 = vld [vmem:[#allocation11 + $0x1958] sm:$0xff]  ;;  %v7636_v39 = vpack.c.bf16 %v2713_v40, %v2705_v38  ;;  %v2738_v18 = vld [vmem:[#allocation11 + $0x1b90] sm:$0xff] }
 0x43d   :  { %v2754_v35 = vld [vmem:[#allocation11 + $0x1c10] sm:$0xff] }
 0x43e   :  { %7611 = vmatpush1.bf16.msra.mxu0 %v7610_v62  ;;  %7867 = vmatpush1.bf16.msra.mxu1 %v7866_v22  ;;  %v7880_v62 = vpack.c.bf16 %v2667_v52, %v2659_v51  ;;  %v2666_v22 = vld [vmem:[#allocation11 + $0x1950] sm:$0xff]  ;;  %v2721_v51 = vld [vmem:[#allocation11 + $0x1b08] sm:$0xff] }
 0x43f   :  { %7613 = vmatprep.subr.bf16.mxu0 %v7612_v7  ;;  %7869 = vmatprep.subr.bf16.mxu1 %v7868_v8  ;;  %v2683_v7 = vld [vmem:[#allocation11 + $0x19d8] sm:$0xff]  ;;  %v7626_v8 = vpack.c.bf16 %v2664_v60, %v2656_v0  ;;  %v7882_v11 = vpack.c.bf16 %v2666_v22, %v2658_v61  ;;  %v2729_v52 = vld [vmem:[#allocation11 + $0x1b48] sm:$0xff]  ;;  %v7894_v0 = vpack.c.bf16 %v2714_v49, %v2706_v47  ;;  %v2720_v61 = vld [vmem:[#allocation11 + $0x1b00] sm:$0xff] }
 0x440   :  { %v7884_v9 = vpack.c.bf16 %v2683_v7, %v2675_v6  ;;  %v7640_v60 = vpack.c.bf16 %v2729_v52, %v2721_v51  ;;  %v2722_v22 = vld [vmem:[#allocation11 + $0x1b10] sm:$0xff]  ;;  %v2737_v6 = vld [vmem:[#allocation11 + $0x1b88] sm:$0xff]  ;;  %v2768_v47 = vld [vmem:[#allocation11 + $0x1c80] sm:$0xff] }
 0x441   :  { %v2745_v7 = vld [vmem:[#allocation11 + $0x1bc8] sm:$0xff]  ;;  %v2762_v40 = vld [vmem:[#allocation11 + $0x1c50] sm:$0xff] }
 0x442   :  { %7615 = vmatpush1.bf16.msra.mxu0 %v7614_v23  ;;  %7871 = vmatpush1.bf16.msra.mxu1 %v7870_v24  ;;  %v2689_v23 = vld [vmem:[#allocation11 + $0x1a08] sm:$0xff]  ;;  %v2770_v49 = vld [vmem:[#allocation11 + $0x1c90] sm:$0xff] }
 0x443   :  { %7617 = vmatprep.subr.bf16.mxu0 %v7616_v27  ;;  %7873 = vmatprep.subr.bf16.mxu1 %v7872_v20  ;;  %v2697_v24 = vld [vmem:[#allocation11 + $0x1a48] sm:$0xff]  ;;  %v2699_v27 = vld [vmem:[#allocation11 + $0x1a58] sm:$0xff]  ;;  %v7630_v20 = vpack.c.bf16 %v2680_v21, %v2672_v16  ;;  %v7898_v16 = vpack.c.bf16 %v2730_v3, %v2722_v22  ;;  %v7644_v21 = vpack.c.bf16 %v2745_v7, %v2737_v6  ;;  %v2778_v52 = vld [vmem:[#allocation11 + $0x1cd0] sm:$0xff] }
 0x444   :  { %v7632_v29 = vpack.c.bf16 %v2697_v24, %v2689_v23  ;;  %v7888_v19 = vpack.c.bf16 %v2699_v27, %v2691_v17  ;;  %v2746_v24 = vld [vmem:[#allocation11 + $0x1bd0] sm:$0xff]  ;;  %v2753_v17 = vld [vmem:[#allocation11 + $0x1c08] sm:$0xff]  ;;  %v2784_v22 = vld [vmem:[#allocation11 + $0x1d00] sm:$0xff] }
 0x445   :  { %3129 = vmatmul.mubr.f32.vlgmr.msra.gmra.mrb[12].mxu0 %v10404_v42  ;;  %3413 = vmatmul.mubr.f32.vlgmr.msra.gmra.mrb[12].mxu1 %v10404_v42  ;;  %v2761_v27 = vld [vmem:[#allocation11 + $0x1c48] sm:$0xff]  ;;  %v7902_v31 = vpack.c.bf16 %v2746_v24, %v2738_v18  ;;  %v2786_v3 = vld [vmem:[#allocation11 + $0x1d10] sm:$0xff]  ;;  %v2800_v18 = vld [vmem:[#allocation11 + $0x1d80] sm:$0xff] }
 0x446   :  { %7619 = vmatpush1.bf16.msra.mxu0 %v7618_v41  ;;  %3199 = vmatprep.mubr.f32.mxu0 %v10406_v44  ;;  %v2707_v41 = vld [vmem:[#allocation11 + $0x1a98] sm:$0xff]  ;;  %v7648_v32 = vpack.c.bf16 %v2761_v27, %v2753_v17  ;;  %v2794_v7 = vld [vmem:[#allocation11 + $0x1d50] sm:$0xff] }
 0x447   :  { %7875 = vmatpush1.bf16.msra.mxu1 %v7874_v15  ;;  %3483 = vmatprep.mubr.f32.mxu1 %v10406_v44  ;;  %v2715_v15 = vld [vmem:[#allocation11 + $0x1ad8] sm:$0xff]  ;;  %v2802_v24 = vld [vmem:[#allocation11 + $0x1d90] sm:$0xff] }
 0x448   :  { %7621 = vmatprep.subr.bf16.mxu0 %v7620_v25  ;;  %7877 = vmatprep.subr.bf16.mxu1 %v7876_v46  ;;  %v2704_v25 = vld [vmem:[#allocation11 + $0x1a80] sm:$0xff]  ;;  %v7892_v48 = vpack.c.bf16 %v2715_v15, %v2707_v41  ;;  %v2769_v41 = vld [vmem:[#allocation11 + $0x1c88] sm:$0xff]  ;;  %v2810_v27 = vld [vmem:[#allocation11 + $0x1dd0] sm:$0xff] }
 0x449   :  { %v2712_v46 = vld [vmem:[#allocation11 + $0x1ac0] sm:$0xff]  ;;  %v2777_v15 = vld [vmem:[#allocation11 + $0x1cc8] sm:$0xff] }
 0x44a   :  { %7623 = vmatpush1.bf16.msra.mxu0 %v7622_v53  ;;  %v2723_v53 = vld [vmem:[#allocation11 + $0x1b18] sm:$0xff] }
 0x44b   :  { %7879 = vmatpush1.bf16.msra.mxu1 %v7878_v55  ;;  %7625 = vmatprep.subr.bf16.mxu0 %v7624_v56  ;;  %v2731_v55 = vld [vmem:[#allocation11 + $0x1b58] sm:$0xff]  ;;  %v7638_v56 = vpack.c.bf16 %v2712_v46, %v2704_v25  ;;  %v7906_v25 = vpack.c.bf16 %v2762_v40, %v2754_v35  ;;  %v7652_v46 = vpack.c.bf16 %v2777_v15, %v2769_v41  ;;  %v2816_v35 = vld [vmem:[#allocation11 + $0x1e00] sm:$0xff]  ;;  %v2818_v40 = vld [vmem:[#allocation11 + $0x1e10] sm:$0xff] }
 0x44c   :  { %7881 = vmatprep.subr.bf16.mxu1 %v7880_v62  ;;  %v2728_v62 = vld [vmem:[#allocation11 + $0x1b40] sm:$0xff]  ;;  %v7896_v2 = vpack.c.bf16 %v2731_v55, %v2723_v53  ;;  %v2785_v53 = vld [vmem:[#allocation11 + $0x1d08] sm:$0xff]  ;;  %v2826_v15 = vld [vmem:[#allocation11 + $0x1e50] sm:$0xff] }
 0x44d   :  { %v2793_v55 = vld [vmem:[#allocation11 + $0x1d48] sm:$0xff] }
 0x44e   :  { %7627 = vmatpush1.bf16.msra.mxu0 %v7626_v8  ;;  %v2739_v8 = vld [vmem:[#allocation11 + $0x1b98] sm:$0xff] }
 0x44f   :  { %7883 = vmatpush1.bf16.msra.mxu1 %v7882_v11  ;;  %7629 = vmatprep.subr.bf16.mxu0 %v7628_v13  ;;  %v2747_v11 = vld [vmem:[#allocation11 + $0x1bd8] sm:$0xff]  ;;  %v7642_v13 = vpack.c.bf16 %v2728_v62, %v2720_v61  ;;  %v7910_v61 = vpack.c.bf16 %v2778_v52, %v2770_v49  ;;  %v7656_v62 = vpack.c.bf16 %v2793_v55, %v2785_v53  ;;  %v2832_v49 = vld [vmem:[#allocation11 + $0x1e80] sm:$0xff]  ;;  %v2834_v52 = vld [vmem:[#allocation11 + $0x1e90] sm:$0xff] }
 0x450   :  { %7885 = vmatprep.subr.bf16.mxu1 %v7884_v9  ;;  %v2744_v9 = vld [vmem:[#allocation11 + $0x1bc0] sm:$0xff]  ;;  %v7900_v23 = vpack.c.bf16 %v2747_v11, %v2739_v8  ;;  %v2801_v8 = vld [vmem:[#allocation11 + $0x1d88] sm:$0xff]  ;;  %v2842_v55 = vld [vmem:[#allocation11 + $0x1ed0] sm:$0xff] }
 0x451   :  { %v2809_v11 = vld [vmem:[#allocation11 + $0x1dc8] sm:$0xff] }
 0x452   :  { %7631 = vmatpush1.bf16.msra.mxu0 %v7630_v20  ;;  %v2755_v20 = vld [vmem:[#allocation11 + $0x1c18] sm:$0xff] }
 0x453   :  { %7887 = vmatpush1.bf16.msra.mxu1 %v7886_v26  ;;  %7633 = vmatprep.subr.bf16.mxu0 %v7632_v29  ;;  %v2763_v26 = vld [vmem:[#allocation11 + $0x1c58] sm:$0xff]  ;;  %v7646_v29 = vpack.c.bf16 %v2744_v9, %v2736_v5  ;;  %v7914_v5 = vpack.c.bf16 %v2794_v7, %v2786_v3  ;;  %v7660_v9 = vpack.c.bf16 %v2809_v11, %v2801_v8  ;;  %v2856_v7 = vld [vmem:[#allocation11 + $0x1f40] sm:$0xff]  ;;  %v2850_v8 = vld [vmem:[#allocation11 + $0x1f10] sm:$0xff] }
 0x454   :  { %7889 = vmatprep.subr.bf16.mxu1 %v7888_v19  ;;  %v2760_v19 = vld [vmem:[#allocation11 + $0x1c40] sm:$0xff]  ;;  %v7904_v38 = vpack.c.bf16 %v2763_v26, %v2755_v20  ;;  %v2817_v20 = vld [vmem:[#allocation11 + $0x1e08] sm:$0xff] }
 0x455   :  { %v2825_v26 = vld [vmem:[#allocation11 + $0x1e48] sm:$0xff] }
 0x456   :  { %7635 = vmatpush1.bf16.msra.mxu0 %v7634_v45  ;;  %v2771_v45 = vld [vmem:[#allocation11 + $0x1c98] sm:$0xff] }
 0x457   :  { %7891 = vmatpush1.bf16.msra.mxu1 %v7890_v37  ;;  %7637 = vmatprep.subr.bf16.mxu0 %v7636_v39  ;;  %v2779_v37 = vld [vmem:[#allocation11 + $0x1cd8] sm:$0xff]  ;;  %v7650_v39 = vpack.c.bf16 %v2760_v19, %v2752_v34  ;;  %v7918_v34 = vpack.c.bf16 %v2810_v27, %v2802_v24  ;;  %v7664_v19 = vpack.c.bf16 %v2825_v26, %v2817_v20  ;;  %v2864_v27 = vld [vmem:[#allocation11 + $0x1f80] sm:$0xff]  ;;  %v2866_v26 = vld [vmem:[#allocation11 + $0x1f90] sm:$0xff] }
 0x458   :  { %7893 = vmatprep.subr.bf16.mxu1 %v7892_v48  ;;  %v2776_v48 = vld [vmem:[#allocation11 + $0x1cc0] sm:$0xff]  ;;  %v7908_v51 = vpack.c.bf16 %v2779_v37, %v2771_v45  ;;  %v2833_v45 = vld [vmem:[#allocation11 + $0x1e88] sm:$0xff] }
 0x459   :  { %v2841_v37 = vld [vmem:[#allocation11 + $0x1ec8] sm:$0xff]  ;;  %v2872_v20 = vld [vmem:[#allocation11 + $0x1fc0] sm:$0xff] }
 0x45a   :  { %7639 = vmatpush1.bf16.msra.mxu0 %v7638_v56  ;;  %v2787_v56 = vld [vmem:[#allocation11 + $0x1d18] sm:$0xff] }
 0x45b   :  { %7895 = vmatpush1.bf16.msra.mxu1 %v7894_v0  ;;  %7641 = vmatprep.subr.bf16.mxu0 %v7640_v60  ;;  %v2795_v0 = vld [vmem:[#allocation11 + $0x1d58] sm:$0xff]  ;;  %v7654_v60 = vpack.c.bf16 %v2776_v48, %v2768_v47  ;;  %v7922_v47 = vpack.c.bf16 %v2826_v15, %v2818_v40  ;;  %v7668_v48 = vpack.c.bf16 %v2841_v37, %v2833_v45  ;;  %v1860_v15 = vld [vmem:[#allocation11 + $0x20] sm:$0xff] }
 0x45c   :  { %7897 = vmatprep.subr.bf16.mxu1 %v7896_v2  ;;  %v2792_v2 = vld [vmem:[#allocation11 + $0x1d40] sm:$0xff]  ;;  %v7912_v6 = vpack.c.bf16 %v2795_v0, %v2787_v56  ;;  %v2849_v56 = vld [vmem:[#allocation11 + $0x1f08] sm:$0xff] }
 0x45d   :  { %v2857_v0 = vld [vmem:[#allocation11 + $0x1f48] sm:$0xff]  ;;  %v1868_v45 = vld [vmem:[#allocation11 + $0x60] sm:$0xff] }
 0x45e   :  { %7643 = vmatpush1.bf16.msra.mxu0 %v7642_v13  ;;  %v2803_v13 = vld [vmem:[#allocation11 + $0x1d98] sm:$0xff]  ;;  %v7672_v3 = vpack.c.bf16 %v2857_v0, %v2849_v56  ;;  %v1878_v56 = vld [vmem:[#allocation11 + $0xb0] sm:$0xff] }
 0x45f   :  { %7899 = vmatpush1.bf16.msra.mxu1 %v7898_v16  ;;  %7645 = vmatprep.subr.bf16.mxu0 %v7644_v21  ;;  %v2811_v16 = vld [vmem:[#allocation11 + $0x1dd8] sm:$0xff]  ;;  %v7658_v21 = vpack.c.bf16 %v2792_v2, %v2784_v22  ;;  %v1266_v22 = vsub.s32 6, %v10333_v43  ;;  %v7926_v2 = vpack.c.bf16 %v2842_v55, %v2834_v52  ;;  %v1884_v55 = vld [vmem:[#allocation11 + $0xe0] sm:$0xff] }
 0x460   :  { %7901 = vmatprep.subr.bf16.mxu1 %v7900_v23  ;;  %v2808_v23 = vld [vmem:[#allocation11 + $0x1dc0] sm:$0xff]  ;;  %v7916_v17 = vpack.c.bf16 %v2811_v16, %v2803_v13  ;;  %v2858_v13 = vld [vmem:[#allocation11 + $0x1f50] sm:$0xff]  ;;  %v2865_v16 = vld [vmem:[#allocation11 + $0x1f88] sm:$0xff] }
 0x461   :  { %v7930_v24 = vpack.c.bf16 %v2858_v13, %v2850_v8  ;;  %v1892_v13 = vld [vmem:[#allocation11 + $0x120] sm:$0xff] }
 0x462   :  { %7647 = vmatpush1.bf16.msra.mxu0 %v7646_v29  ;;  %v2819_v29 = vld [vmem:[#allocation11 + $0x1e18] sm:$0xff] }
 0x463   :  { %7903 = vmatpush1.bf16.msra.mxu1 %v7902_v31  ;;  %7649 = vmatprep.subr.bf16.mxu0 %v7648_v32  ;;  %v2827_v31 = vld [vmem:[#allocation11 + $0x1e58] sm:$0xff]  ;;  %v7662_v32 = vpack.c.bf16 %v2808_v23, %v2800_v18  ;;  %v1267_v23 = vrot.slane %v10395_v4, %v1266_v22 }
 0x464   :  { %7905 = vmatprep.subr.bf16.mxu1 %v7904_v38  ;;  %v2824_v38 = vld [vmem:[#allocation11 + $0x1e40] sm:$0xff]  ;;  %v7920_v41 = vpack.c.bf16 %v2827_v31, %v2819_v29  ;;  %v2874_v31 = vld [vmem:[#allocation11 + $0x1fd0] sm:$0xff] }
 0x465   :  { %v9510_v40 = vadd.f32 %v10383_v10, %v1267_v23  ;;  %v7934_v4 = vpack.c.bf16 %v2874_v31, %v2866_v26  ;;  %v1917_v23 = vld [vmem:[#allocation11 + $0x1e8] sm:$0xff]  ;;  %v1916_v31 = vld [vmem:[#allocation11 + $0x1e0] sm:$0xff] }
 0x466   :  { %7651 = vmatpush1.bf16.msra.mxu0 %v7650_v39  ;;  %v2835_v39 = vld [vmem:[#allocation11 + $0x1e98] sm:$0xff] }
 0x467   :  { %7907 = vmatpush1.bf16.msra.mxu1 %v7906_v25  ;;  %7653 = vmatprep.subr.bf16.mxu0 %v7652_v46  ;;  %v2843_v25 = vld [vmem:[#allocation11 + $0x1ed8] sm:$0xff]  ;;  %v7666_v46 = vpack.c.bf16 %v2824_v38, %v2816_v35  ;;  %v7678_v38 = vpack.c.bf16 %v2872_v20, %v2864_v27  ;;  %v10417_v52 = vmax.f32 %v9510_v40, 0.0 }
 0x468   :  { %7909 = vmatprep.subr.bf16.mxu1 %v7908_v51  ;;  %v2840_v51 = vld [vmem:[#allocation11 + $0x1ec0] sm:$0xff]  ;;  %v7924_v53 = vpack.c.bf16 %v2843_v25, %v2835_v39  ;;  %v1871_v35 = vld [vmem:[#allocation11 + $0x78] sm:$0xff]  ;;  %v1862_v39 = vld [vmem:[#allocation11 + $0x30] sm:$0xff] }
 0x469   :  { %v1870_v25 = vld [vmem:[#allocation11 + $0x70] sm:$0xff]  ;;  %v1935_v40 = vld [vmem:[#allocation11 + $0x278] sm:$0xff] }
 0x46a   :  { %7655 = vmatpush1.bf16.msra.mxu0 %v7654_v60  ;;  %v2851_v60 = vld [vmem:[#allocation11 + $0x1f18] sm:$0xff]  ;;  %v8194_v10 = vpack.c.bf16 %v1870_v25, %v1862_v39  ;;  %v1926_v39 = vld [vmem:[#allocation11 + $0x230] sm:$0xff] }
 0x46b   :  { %7911 = vmatpush1.bf16.msra.mxu1 %v7910_v61  ;;  %7657 = vmatprep.subr.bf16.mxu0 %v7656_v62  ;;  %v2859_v61 = vld [vmem:[#allocation11 + $0x1f58] sm:$0xff]  ;;  %v7670_v62 = vpack.c.bf16 %v2840_v51, %v2832_v49 }
 0x46c   :  { %7913 = vmatprep.subr.bf16.mxu1 %v7912_v6  ;;  %v2848_v6 = vld [vmem:[#allocation11 + $0x1f00] sm:$0xff]  ;;  %v7928_v11 = vpack.c.bf16 %v2859_v61, %v2851_v60  ;;  %v1879_v49 = vld [vmem:[#allocation11 + $0xb8] sm:$0xff]  ;;  %v1886_v60 = vld [vmem:[#allocation11 + $0xf0] sm:$0xff] }
 0x46d   :  { %v7674_v18 = vpack.c.bf16 %v2856_v7, %v2848_v6  ;;  %v1887_v51 = vld [vmem:[#allocation11 + $0xf8] sm:$0xff]  ;;  %v1893_v61 = vld [vmem:[#allocation11 + $0x128] sm:$0xff]  ;;  %v8198_v8 = vpack.c.bf16 %v1886_v60, %v1878_v56  ;;  %v1940_v56 = vld [vmem:[#allocation11 + $0x2a0] sm:$0xff] }
 0x46e   :  { %7659 = vmatpush1.bf16.msra.mxu0 %v7658_v21  ;;  %v2873_v21 = vld [vmem:[#allocation11 + $0x1fc8] sm:$0xff]  ;;  %v1903_v6 = vld [vmem:[#allocation11 + $0x178] sm:$0xff]  ;;  %v1942_v60 = vld [vmem:[#allocation11 + $0x2b0] sm:$0xff] }
 0x46f   :  { %7915 = vmatpush1.bf16.msra.mxu1 %v7914_v5  ;;  %7661 = vmatprep.subr.bf16.mxu0 %v7660_v9  ;;  %v2867_v5 = vld [vmem:[#allocation11 + $0x1f98] sm:$0xff] }
 0x470   :  { %7917 = vmatprep.subr.bf16.mxu1 %v7916_v17  ;;  %v2875_v9 = vld [vmem:[#allocation11 + $0x1fd8] sm:$0xff]  ;;  %v7676_v17 = vpack.c.bf16 %v2873_v21, %v2865_v16  ;;  %v1900_v16 = vld [vmem:[#allocation11 + $0x160] sm:$0xff]  ;;  %v1894_v21 = vld [vmem:[#allocation11 + $0x130] sm:$0xff] }
 0x471   :  { %v7932_v29 = vpack.c.bf16 %v2875_v9, %v2867_v5  ;;  %v1902_v9 = vld [vmem:[#allocation11 + $0x170] sm:$0xff]  ;;  %v7946_v27 = vpack.c.bf16 %v1900_v16, %v1892_v13  ;;  %v1956_v16 = vld [vmem:[#allocation11 + $0x320] sm:$0xff] }
 0x472   :  { %7663 = vmatpush1.bf16.msra.mxu0 %v7662_v32  ;;  %v1861_v32 = vld [vmem:[#allocation11 + $0x28] sm:$0xff]  ;;  %v8202_v20 = vpack.c.bf16 %v1902_v9, %v1894_v21  ;;  %v1964_v21 = vld [vmem:[#allocation11 + $0x360] sm:$0xff] }
 0x473   :  { %7919 = vmatpush1.bf16.msra.mxu1 %v7918_v34  ;;  %7665 = vmatprep.subr.bf16.mxu0 %v7664_v19  ;;  %v1869_v34 = vld [vmem:[#allocation11 + $0x68] sm:$0xff]  ;;  %v1863_v19 = vld [vmem:[#allocation11 + $0x38] sm:$0xff] }
 0x474   :  { %7921 = vmatprep.subr.bf16.mxu1 %v7920_v41  ;;  %v7936_v41 = vpack.c.bf16 %v1869_v34, %v1861_v32  ;;  %v8192_v37 = vpack.c.bf16 %v1871_v35, %v1863_v19  ;;  %v1910_v32 = vld [vmem:[#allocation11 + $0x1b0] sm:$0xff]  ;;  %v1925_v19 = vld [vmem:[#allocation11 + $0x228] sm:$0xff] }
 0x475   :  { %v1933_v35 = vld [vmem:[#allocation11 + $0x268] sm:$0xff] }
 0x476   :  { %7667 = vmatpush1.bf16.msra.mxu0 %v7666_v46  ;;  %v1877_v46 = vld [vmem:[#allocation11 + $0xa8] sm:$0xff] }
 0x477   :  { %7923 = vmatpush1.bf16.msra.mxu1 %v7922_v47  ;;  %7669 = vmatprep.subr.bf16.mxu0 %v7668_v48  ;;  %v1885_v47 = vld [vmem:[#allocation11 + $0xe8] sm:$0xff]  ;;  %v7938_v48 = vpack.c.bf16 %v1868_v45, %v1860_v15  ;;  %v7952_v15 = vpack.c.bf16 %v1933_v35, %v1925_v19  ;;  %v1924_v45 = vld [vmem:[#allocation11 + $0x220] sm:$0xff]  ;;  %v1982_v19 = vld [vmem:[#allocation11 + $0x3f0] sm:$0xff] }
 0x478   :  { %7925 = vmatprep.subr.bf16.mxu1 %v7924_v53  ;;  %v1876_v53 = vld [vmem:[#allocation11 + $0xa0] sm:$0xff]  ;;  %v7940_v0 = vpack.c.bf16 %v1885_v47, %v1877_v46  ;;  %v1934_v46 = vld [vmem:[#allocation11 + $0x270] sm:$0xff]  ;;  %v1941_v47 = vld [vmem:[#allocation11 + $0x2a8] sm:$0xff] }
 0x479   :  { %v7942_v7 = vpack.c.bf16 %v1884_v55, %v1876_v53  ;;  %v8210_v53 = vpack.c.bf16 %v1934_v46, %v1926_v39  ;;  %v1989_v35 = vld [vmem:[#allocation11 + $0x428] sm:$0xff]  ;;  %v1996_v39 = vld [vmem:[#allocation11 + $0x460] sm:$0xff] }
 0x47a   :  { %7671 = vmatpush1.bf16.msra.mxu0 %v7670_v62  ;;  %v1901_v62 = vld [vmem:[#allocation11 + $0x168] sm:$0xff] }
 0x47b   :  { %7927 = vmatpush1.bf16.msra.mxu1 %v7926_v2  ;;  %7673 = vmatprep.subr.bf16.mxu0 %v7672_v3  ;;  %v8196_v2 = vpack.c.bf16 %v1887_v51, %v1879_v49  ;;  %v1895_v3 = vld [vmem:[#allocation11 + $0x138] sm:$0xff] }
 0x47c   :  { %7929 = vmatprep.subr.bf16.mxu1 %v7928_v11  ;;  %v7944_v11 = vpack.c.bf16 %v1901_v62, %v1893_v61  ;;  %v8200_v5 = vpack.c.bf16 %v1903_v6, %v1895_v3  ;;  %v1943_v49 = vld [vmem:[#allocation11 + $0x2b8] sm:$0xff]  ;;  %v1950_v62 = vld [vmem:[#allocation11 + $0x2f0] sm:$0xff]  ;;  %v1965_v3 = vld [vmem:[#allocation11 + $0x368] sm:$0xff] }
 0x47d   :  { %v1951_v51 = vld [vmem:[#allocation11 + $0x2f8] sm:$0xff] }
 0x47e   :  { %7675 = vmatpush1.bf16.msra.mxu0 %v7674_v18  ;;  %v1909_v18 = vld [vmem:[#allocation11 + $0x1a8] sm:$0xff]  ;;  %v8212_v61 = vpack.c.bf16 %v1951_v51, %v1943_v49  ;;  %v1959_v6 = vld [vmem:[#allocation11 + $0x338] sm:$0xff] }
 0x47f   :  { %7931 = vmatpush1.bf16.msra.mxu1 %v7930_v24  ;;  %7677 = vmatprep.subr.bf16.mxu0 %v7676_v17  ;;  %v1911_v24 = vld [vmem:[#allocation11 + $0x1b8] sm:$0xff]  ;;  %v7948_v26 = vpack.c.bf16 %v1917_v23, %v1909_v18  ;;  %v1966_v18 = vld [vmem:[#allocation11 + $0x370] sm:$0xff]  ;;  %v1973_v23 = vld [vmem:[#allocation11 + $0x3a8] sm:$0xff] }
 0x480   :  { %7933 = vmatprep.subr.bf16.mxu1 %v7932_v29  ;;  %v1919_v17 = vld [vmem:[#allocation11 + $0x1f8] sm:$0xff]  ;;  %v1908_v29 = vld [vmem:[#allocation11 + $0x1a0] sm:$0xff]  ;;  %v2013_v49 = vld [vmem:[#allocation11 + $0x4e8] sm:$0xff] }
 0x481   :  { %v8204_v34 = vpack.c.bf16 %v1919_v17, %v1911_v24  ;;  %v1981_v24 = vld [vmem:[#allocation11 + $0x3e8] sm:$0xff]  ;;  %v1975_v17 = vld [vmem:[#allocation11 + $0x3b8] sm:$0xff] }
 0x482   :  { %7679 = vmatpush1.bf16.msra.mxu0 %v7678_v38  ;;  %v1927_v38 = vld [vmem:[#allocation11 + $0x238] sm:$0xff] }
 0x483   :  { %7935 = vmatpush1.bf16.msra.mxu1 %v7934_v4  ;;  %7937 = vmatprep.subr.bf16.mxu0 %v7936_v41  ;;  %v7950_v4 = vpack.c.bf16 %v1916_v31, %v1908_v29  ;;  %v8208_v25 = vpack.c.bf16 %v1935_v40, %v1927_v38  ;;  %v7964_v29 = vpack.c.bf16 %v1981_v24, %v1973_v23  ;;  %v1972_v31 = vld [vmem:[#allocation11 + $0x3a0] sm:$0xff]  ;;  %v1997_v38 = vld [vmem:[#allocation11 + $0x468] sm:$0xff]  ;;  %v1991_v40 = vld [vmem:[#allocation11 + $0x438] sm:$0xff] }
 0x484   :  { %8193 = vmatprep.subr.bf16.mxu1 %v8192_v37  ;;  %v1932_v37 = vld [vmem:[#allocation11 + $0x260] sm:$0xff]  ;;  %v2007_v51 = vld [vmem:[#allocation11 + $0x4b8] sm:$0xff]  ;;  %v2030_v23 = vld [vmem:[#allocation11 + $0x570] sm:$0xff] }
 0x485   :  { %3200 = vmatmul.mubr.f32.vlgmr.msra.gmra.mrb[12].mxu0 %v10417_v52  ;;  %v2037_v24 = vld [vmem:[#allocation11 + $0x5a8] sm:$0xff] }
 0x486   :  { %3484 = vmatmul.mubr.f32.vlgmr.msra.gmra.mrb[12].mxu1 %v10417_v52  ;;  %7939 = vmatpush1.bf16.msra.mxu0 %v7938_v48  ;;  %v1949_v48 = vld [vmem:[#allocation11 + $0x2e8] sm:$0xff] }
 0x487   :  { %3554 = vmatprep.mubr.f32.mxu0 %v10354_v59  ;;  %8195 = vmatpush1.bf16.msra.mxu1 %v8194_v10  ;;  %v7954_v10 = vpack.c.bf16 %v1932_v37, %v1924_v45  ;;  %v7956_v55 = vpack.c.bf16 %v1949_v48, %v1941_v47  ;;  %v7968_v45 = vpack.c.bf16 %v1997_v38, %v1989_v35  ;;  %v1988_v37 = vld [vmem:[#allocation11 + $0x420] sm:$0xff]  ;;  %v1998_v47 = vld [vmem:[#allocation11 + $0x470] sm:$0xff]  ;;  %v2005_v48 = vld [vmem:[#allocation11 + $0x4a8] sm:$0xff] }
 0x488   :  { %3838 = vmatprep.mubr.f32.mxu1 %v10354_v59  ;;  %7941 = vmatprep.subr.bf16.mxu0 %v7940_v0  ;;  %v1918_v59 = vld [vmem:[#allocation11 + $0x1f0] sm:$0xff]  ;;  %v1948_v0 = vld [vmem:[#allocation11 + $0x2e0] sm:$0xff]  ;;  %v2053_v38 = vld [vmem:[#allocation11 + $0x628] sm:$0xff] }
 0x489   :  { %8197 = vmatprep.subr.bf16.mxu1 %v8196_v2  ;;  %v8206_v41 = vpack.c.bf16 %v1918_v59, %v1910_v32  ;;  %v1957_v2 = vld [vmem:[#allocation11 + $0x328] sm:$0xff]  ;;  %v1980_v32 = vld [vmem:[#allocation11 + $0x3e0] sm:$0xff]  ;;  %v2046_v35 = vld [vmem:[#allocation11 + $0x5f0] sm:$0xff] }
 0x48a   :  { %7943 = vmatpush1.bf16.msra.mxu0 %v7942_v7  ;;  %v1967_v7 = vld [vmem:[#allocation11 + $0x378] sm:$0xff]  ;;  %v7960_v13 = vpack.c.bf16 %v1965_v3, %v1957_v2  ;;  %v2014_v2 = vld [vmem:[#allocation11 + $0x4f0] sm:$0xff]  ;;  %v2021_v3 = vld [vmem:[#allocation11 + $0x528] sm:$0xff] }
 0x48b   :  { %8199 = vmatpush1.bf16.msra.mxu1 %v8198_v8  ;;  %7945 = vmatprep.subr.bf16.mxu0 %v7944_v11  ;;  %v7958_v8 = vpack.c.bf16 %v1948_v0, %v1940_v56  ;;  %v8214_v11 = vpack.c.bf16 %v1950_v62, %v1942_v60  ;;  %v8216_v9 = vpack.c.bf16 %v1967_v7, %v1959_v6  ;;  %v2004_v0 = vld [vmem:[#allocation11 + $0x4a0] sm:$0xff]  ;;  %v2029_v6 = vld [vmem:[#allocation11 + $0x568] sm:$0xff]  ;;  %v2023_v7 = vld [vmem:[#allocation11 + $0x538] sm:$0xff] }
 0x48c   :  { %8201 = vmatprep.subr.bf16.mxu1 %v8200_v5  ;;  %v1958_v5 = vld [vmem:[#allocation11 + $0x330] sm:$0xff]  ;;  %v7972_v56 = vpack.c.bf16 %v2013_v49, %v2005_v48  ;;  %v2012_v60 = vld [vmem:[#allocation11 + $0x4e0] sm:$0xff]  ;;  %v2069_v49 = vld [vmem:[#allocation11 + $0x6a8] sm:$0xff] }
 0x48d   :  { %v2062_v48 = vld [vmem:[#allocation11 + $0x670] sm:$0xff] }
 0x48e   :  { %7947 = vmatpush1.bf16.msra.mxu0 %v7946_v27  ;;  %v1983_v27 = vld [vmem:[#allocation11 + $0x3f8] sm:$0xff] }
 0x48f   :  { %8203 = vmatpush1.bf16.msra.mxu1 %v8202_v20  ;;  %7949 = vmatprep.subr.bf16.mxu0 %v7948_v26  ;;  %v7962_v20 = vpack.c.bf16 %v1964_v21, %v1956_v16  ;;  %v8218_v26 = vpack.c.bf16 %v1966_v18, %v1958_v5  ;;  %v8220_v59 = vpack.c.bf16 %v1983_v27, %v1975_v17  ;;  %v2020_v21 = vld [vmem:[#allocation11 + $0x520] sm:$0xff]  ;;  %v2045_v17 = vld [vmem:[#allocation11 + $0x5e8] sm:$0xff]  ;;  %v2039_v27 = vld [vmem:[#allocation11 + $0x5b8] sm:$0xff] }
 0x490   :  { %8205 = vmatprep.subr.bf16.mxu1 %v8204_v34  ;;  %v1974_v34 = vld [vmem:[#allocation11 + $0x3b0] sm:$0xff]  ;;  %v7976_v16 = vpack.c.bf16 %v2029_v6, %v2021_v3  ;;  %v2028_v5 = vld [vmem:[#allocation11 + $0x560] sm:$0xff]  ;;  %v2085_v6 = vld [vmem:[#allocation11 + $0x728] sm:$0xff] }
 0x491   :  { %v2078_v3 = vld [vmem:[#allocation11 + $0x6f0] sm:$0xff] }
 0x492   :  { %7951 = vmatpush1.bf16.msra.mxu0 %v7950_v4  ;;  %v1999_v4 = vld [vmem:[#allocation11 + $0x478] sm:$0xff] }
 0x493   :  { %8207 = vmatpush1.bf16.msra.mxu1 %v8206_v41  ;;  %7953 = vmatprep.subr.bf16.mxu0 %v7952_v15  ;;  %v7966_v41 = vpack.c.bf16 %v1980_v32, %v1972_v31  ;;  %v8222_v15 = vpack.c.bf16 %v1982_v19, %v1974_v34  ;;  %v8224_v46 = vpack.c.bf16 %v1999_v4, %v1991_v40  ;;  %v2036_v32 = vld [vmem:[#allocation11 + $0x5a0] sm:$0xff]  ;;  %v2061_v40 = vld [vmem:[#allocation11 + $0x668] sm:$0xff]  ;;  %v2055_v4 = vld [vmem:[#allocation11 + $0x638] sm:$0xff] }
 0x494   :  { %8209 = vmatprep.subr.bf16.mxu1 %v8208_v25  ;;  %v1990_v25 = vld [vmem:[#allocation11 + $0x430] sm:$0xff]  ;;  %v7980_v31 = vpack.c.bf16 %v2045_v17, %v2037_v24  ;;  %v2044_v34 = vld [vmem:[#allocation11 + $0x5e0] sm:$0xff]  ;;  %v2101_v17 = vld [vmem:[#allocation11 + $0x7a8] sm:$0xff] }
 0x495   :  { %v2094_v24 = vld [vmem:[#allocation11 + $0x770] sm:$0xff] }
 0x496   :  { %7955 = vmatpush1.bf16.msra.mxu0 %v7954_v10  ;;  %v2015_v10 = vld [vmem:[#allocation11 + $0x4f8] sm:$0xff] }
 0x497   :  { %8211 = vmatpush1.bf16.msra.mxu1 %v8210_v53  ;;  %7957 = vmatprep.subr.bf16.mxu0 %v7956_v55  ;;  %v7970_v53 = vpack.c.bf16 %v1996_v39, %v1988_v37  ;;  %v8226_v55 = vpack.c.bf16 %v1998_v47, %v1990_v25  ;;  %v8228_v62 = vpack.c.bf16 %v2015_v10, %v2007_v51  ;;  %v2052_v39 = vld [vmem:[#allocation11 + $0x620] sm:$0xff]  ;;  %v2077_v51 = vld [vmem:[#allocation11 + $0x6e8] sm:$0xff]  ;;  %v2071_v10 = vld [vmem:[#allocation11 + $0x6b8] sm:$0xff] }
 0x498   :  { %8213 = vmatprep.subr.bf16.mxu1 %v8212_v61  ;;  %v2006_v61 = vld [vmem:[#allocation11 + $0x4b0] sm:$0xff]  ;;  %v7984_v37 = vpack.c.bf16 %v2061_v40, %v2053_v38  ;;  %v2060_v25 = vld [vmem:[#allocation11 + $0x660] sm:$0xff]  ;;  %v2117_v40 = vld [vmem:[#allocation11 + $0x828] sm:$0xff] }
 0x499   :  { %v2110_v38 = vld [vmem:[#allocation11 + $0x7f0] sm:$0xff] }
 0x49a   :  { %7959 = vmatpush1.bf16.msra.mxu0 %v7958_v8  ;;  %v2031_v8 = vld [vmem:[#allocation11 + $0x578] sm:$0xff] }
 0x49b   :  { %8215 = vmatpush1.bf16.msra.mxu1 %v8214_v11  ;;  %7961 = vmatprep.subr.bf16.mxu0 %v7960_v13  ;;  %v7974_v11 = vpack.c.bf16 %v2012_v60, %v2004_v0  ;;  %v8230_v13 = vpack.c.bf16 %v2014_v2, %v2006_v61  ;;  %v8232_v18 = vpack.c.bf16 %v2031_v8, %v2023_v7  ;;  %v2068_v60 = vld [vmem:[#allocation11 + $0x6a0] sm:$0xff]  ;;  %v2093_v7 = vld [vmem:[#allocation11 + $0x768] sm:$0xff]  ;;  %v2087_v8 = vld [vmem:[#allocation11 + $0x738] sm:$0xff] }
 0x49c   :  { %8217 = vmatprep.subr.bf16.mxu1 %v8216_v9  ;;  %v2022_v9 = vld [vmem:[#allocation11 + $0x530] sm:$0xff]  ;;  %v7988_v0 = vpack.c.bf16 %v2077_v51, %v2069_v49  ;;  %v2076_v61 = vld [vmem:[#allocation11 + $0x6e0] sm:$0xff]  ;;  %v2133_v51 = vld [vmem:[#allocation11 + $0x8a8] sm:$0xff] }
 0x49d   :  { %v2126_v49 = vld [vmem:[#allocation11 + $0x870] sm:$0xff] }
 0x49e   :  { %7963 = vmatpush1.bf16.msra.mxu0 %v7962_v20  ;;  %v2047_v20 = vld [vmem:[#allocation11 + $0x5f8] sm:$0xff] }
 0x49f   :  { %8219 = vmatpush1.bf16.msra.mxu1 %v8218_v26  ;;  %7965 = vmatprep.subr.bf16.mxu0 %v7964_v29  ;;  %v7978_v26 = vpack.c.bf16 %v2028_v5, %v2020_v21  ;;  %v8234_v29 = vpack.c.bf16 %v2030_v23, %v2022_v9  ;;  %v8236_v19 = vpack.c.bf16 %v2047_v20, %v2039_v27  ;;  %v2084_v5 = vld [vmem:[#allocation11 + $0x720] sm:$0xff]  ;;  %v2109_v27 = vld [vmem:[#allocation11 + $0x7e8] sm:$0xff]  ;;  %v2103_v20 = vld [vmem:[#allocation11 + $0x7b8] sm:$0xff] }
 0x4a0   :  { %8221 = vmatprep.subr.bf16.mxu1 %v8220_v59  ;;  %v2038_v59 = vld [vmem:[#allocation11 + $0x5b0] sm:$0xff]  ;;  %v7992_v21 = vpack.c.bf16 %v2093_v7, %v2085_v6  ;;  %v2092_v9 = vld [vmem:[#allocation11 + $0x760] sm:$0xff]  ;;  %v2149_v6 = vld [vmem:[#allocation11 + $0x928] sm:$0xff] }
 0x4a1   :  { %v2157_v7 = vld [vmem:[#allocation11 + $0x968] sm:$0xff] }
 0x4a2   :  { %7967 = vmatpush1.bf16.msra.mxu0 %v7966_v41  ;;  %v2063_v41 = vld [vmem:[#allocation11 + $0x678] sm:$0xff] }
 0x4a3   :  { %8223 = vmatpush1.bf16.msra.mxu1 %v8222_v15  ;;  %7969 = vmatprep.subr.bf16.mxu0 %v7968_v45  ;;  %v7982_v15 = vpack.c.bf16 %v2044_v34, %v2036_v32  ;;  %v8238_v45 = vpack.c.bf16 %v2046_v35, %v2038_v59  ;;  %v8240_v47 = vpack.c.bf16 %v2063_v41, %v2055_v4  ;;  %v2100_v34 = vld [vmem:[#allocation11 + $0x7a0] sm:$0xff]  ;;  %v2125_v4 = vld [vmem:[#allocation11 + $0x868] sm:$0xff]  ;;  %v2119_v41 = vld [vmem:[#allocation11 + $0x838] sm:$0xff] }
 0x4a4   :  { %8225 = vmatprep.subr.bf16.mxu1 %v8224_v46  ;;  %v2054_v46 = vld [vmem:[#allocation11 + $0x630] sm:$0xff]  ;;  %v7996_v32 = vpack.c.bf16 %v2109_v27, %v2101_v17  ;;  %v2108_v59 = vld [vmem:[#allocation11 + $0x7e0] sm:$0xff]  ;;  %v2165_v27 = vld [vmem:[#allocation11 + $0x9a8] sm:$0xff] }
 0x4a5   :  { %v2158_v17 = vld [vmem:[#allocation11 + $0x970] sm:$0xff] }
 0x4a6   :  { %7971 = vmatpush1.bf16.msra.mxu0 %v7970_v53  ;;  %v2079_v53 = vld [vmem:[#allocation11 + $0x6f8] sm:$0xff] }
 0x4a7   :  { %8227 = vmatpush1.bf16.msra.mxu1 %v8226_v55  ;;  %7973 = vmatprep.subr.bf16.mxu0 %v7972_v56  ;;  %v7986_v55 = vpack.c.bf16 %v2060_v25, %v2052_v39  ;;  %v8242_v56 = vpack.c.bf16 %v2062_v48, %v2054_v46  ;;  %v8244_v2 = vpack.c.bf16 %v2079_v53, %v2071_v10  ;;  %v2116_v25 = vld [vmem:[#allocation11 + $0x820] sm:$0xff]  ;;  %v2118_v48 = vld [vmem:[#allocation11 + $0x830] sm:$0xff]  ;;  %v2141_v10 = vld [vmem:[#allocation11 + $0x8e8] sm:$0xff] }
 0x4a8   :  { %8229 = vmatprep.subr.bf16.mxu1 %v8228_v62  ;;  %v2070_v62 = vld [vmem:[#allocation11 + $0x6b0] sm:$0xff]  ;;  %v8000_v39 = vpack.c.bf16 %v2125_v4, %v2117_v40  ;;  %v2124_v46 = vld [vmem:[#allocation11 + $0x860] sm:$0xff]  ;;  %v2189_v40 = vld [vmem:[#allocation11 + $0xa68] sm:$0xff] }
 0x4a9   :  { %v8002_v53 = vpack.c.bf16 %v2124_v46, %v2116_v25  ;;  %v2183_v4 = vld [vmem:[#allocation11 + $0xa38] sm:$0xff]  ;;  %v2188_v25 = vld [vmem:[#allocation11 + $0xa60] sm:$0xff]  ;;  %v2182_v46 = vld [vmem:[#allocation11 + $0xa30] sm:$0xff] }
 0x4aa   :  { %7975 = vmatpush1.bf16.msra.mxu0 %v7974_v11  ;;  %v2095_v11 = vld [vmem:[#allocation11 + $0x778] sm:$0xff] }
 0x4ab   :  { %8231 = vmatpush1.bf16.msra.mxu1 %v8230_v13  ;;  %7977 = vmatprep.subr.bf16.mxu0 %v7976_v16  ;;  %v7990_v13 = vpack.c.bf16 %v2076_v61, %v2068_v60  ;;  %v8246_v16 = vpack.c.bf16 %v2078_v3, %v2070_v62  ;;  %v8248_v23 = vpack.c.bf16 %v2095_v11, %v2087_v8  ;;  %v2132_v60 = vld [vmem:[#allocation11 + $0x8a0] sm:$0xff]  ;;  %v2134_v62 = vld [vmem:[#allocation11 + $0x8b0] sm:$0xff]  ;;  %v2151_v11 = vld [vmem:[#allocation11 + $0x938] sm:$0xff] }
 0x4ac   :  { %8233 = vmatprep.subr.bf16.mxu1 %v8232_v18  ;;  %v2086_v18 = vld [vmem:[#allocation11 + $0x730] sm:$0xff]  ;;  %v2140_v61 = vld [vmem:[#allocation11 + $0x8e0] sm:$0xff] }
 0x4ad   :  { %v2142_v3 = vld [vmem:[#allocation11 + $0x8f0] sm:$0xff] }
 0x4ae   :  { %7979 = vmatpush1.bf16.msra.mxu0 %v7978_v26  ;;  %v2111_v26 = vld [vmem:[#allocation11 + $0x7f8] sm:$0xff] }
 0x4af   :  { %8235 = vmatpush1.bf16.msra.mxu1 %v8234_v29  ;;  %7981 = vmatprep.subr.bf16.mxu0 %v7980_v31  ;;  %v7994_v29 = vpack.c.bf16 %v2092_v9, %v2084_v5  ;;  %v8250_v31 = vpack.c.bf16 %v2094_v24, %v2086_v18  ;;  %v8252_v35 = vpack.c.bf16 %v2111_v26, %v2103_v20  ;;  %v2148_v9 = vld [vmem:[#allocation11 + $0x920] sm:$0xff]  ;;  %v2173_v20 = vld [vmem:[#allocation11 + $0x9e8] sm:$0xff]  ;;  %v2167_v26 = vld [vmem:[#allocation11 + $0x9b8] sm:$0xff] }
 0x4b0   :  { %8237 = vmatprep.subr.bf16.mxu1 %v8236_v19  ;;  %v2102_v19 = vld [vmem:[#allocation11 + $0x7b0] sm:$0xff]  ;;  %v8008_v5 = vpack.c.bf16 %v2157_v7, %v2149_v6  ;;  %v2156_v18 = vld [vmem:[#allocation11 + $0x960] sm:$0xff]  ;;  %v2213_v6 = vld [vmem:[#allocation11 + $0xb28] sm:$0xff] }
 0x4b1   :  { %v2221_v7 = vld [vmem:[#allocation11 + $0xb68] sm:$0xff] }
 0x4b2   :  { %7983 = vmatpush1.bf16.msra.mxu0 %v7982_v15  ;;  %v2127_v15 = vld [vmem:[#allocation11 + $0x878] sm:$0xff] }
 0x4b3   :  { %8239 = vmatpush1.bf16.msra.mxu1 %v8238_v45  ;;  %7985 = vmatprep.subr.bf16.mxu0 %v7984_v37  ;;  %v7998_v45 = vpack.c.bf16 %v2108_v59, %v2100_v34  ;;  %v8254_v37 = vpack.c.bf16 %v2110_v38, %v2102_v19  ;;  %v2164_v34 = vld [vmem:[#allocation11 + $0x9a0] sm:$0xff]  ;;  %v2166_v19 = vld [vmem:[#allocation11 + $0x9b0] sm:$0xff]  ;;  %v2181_v38 = vld [vmem:[#allocation11 + $0xa28] sm:$0xff] }
 0x4b4   :  { %8241 = vmatprep.subr.bf16.mxu1 %v8240_v47  ;;  %v8256_v47 = vpack.c.bf16 %v2127_v15, %v2119_v41  ;;  %v2172_v59 = vld [vmem:[#allocation11 + $0x9e0] sm:$0xff]  ;;  %v2191_v41 = vld [vmem:[#allocation11 + $0xa78] sm:$0xff] }
 0x4b5   :  { %v8014_v15 = vpack.c.bf16 %v2172_v59, %v2164_v34  ;;  %v2236_v34 = vld [vmem:[#allocation11 + $0xbe0] sm:$0xff]  ;;  %v2230_v59 = vld [vmem:[#allocation11 + $0xbb0] sm:$0xff] }
 0x4b6   :  { %7987 = vmatpush1.bf16.msra.mxu0 %v7986_v55  ;;  %v2135_v55 = vld [vmem:[#allocation11 + $0x8b8] sm:$0xff] }
 0x4b7   :  { %8243 = vmatpush1.bf16.msra.mxu1 %v8242_v56  ;;  %7989 = vmatprep.subr.bf16.mxu0 %v7988_v0  ;;  %v2143_v56 = vld [vmem:[#allocation11 + $0x8f8] sm:$0xff]  ;;  %v8258_v0 = vpack.c.bf16 %v2126_v49, %v2118_v48  ;;  %v2190_v48 = vld [vmem:[#allocation11 + $0xa70] sm:$0xff]  ;;  %v2197_v49 = vld [vmem:[#allocation11 + $0xaa8] sm:$0xff] }
 0x4b8   :  { %8245 = vmatprep.subr.bf16.mxu1 %v8244_v2  ;;  %v8004_v2 = vpack.c.bf16 %v2141_v10, %v2133_v51  ;;  %v8260_v8 = vpack.c.bf16 %v2143_v56, %v2135_v55  ;;  %v2205_v51 = vld [vmem:[#allocation11 + $0xae8] sm:$0xff]  ;;  %v2199_v10 = vld [vmem:[#allocation11 + $0xab8] sm:$0xff]  ;;  %v8274_v56 = vpack.c.bf16 %v2190_v48, %v2182_v46 }
 0x4b9   :  { %v2261_v48 = vld [vmem:[#allocation11 + $0xca8] sm:$0xff] }
 0x4ba   :  { %7991 = vmatpush1.bf16.msra.mxu0 %v7990_v13  ;;  %v2159_v13 = vld [vmem:[#allocation11 + $0x978] sm:$0xff] }
 0x4bb   :  { %8247 = vmatpush1.bf16.msra.mxu1 %v8246_v16  ;;  %7993 = vmatprep.subr.bf16.mxu0 %v7992_v21  ;;  %v8006_v16 = vpack.c.bf16 %v2140_v61, %v2132_v60  ;;  %v8262_v21 = vpack.c.bf16 %v2142_v3, %v2134_v62  ;;  %v8264_v24 = vpack.c.bf16 %v2159_v13, %v2151_v11  ;;  %v2196_v60 = vld [vmem:[#allocation11 + $0xaa0] sm:$0xff]  ;;  %v2198_v62 = vld [vmem:[#allocation11 + $0xab0] sm:$0xff]  ;;  %v2223_v11 = vld [vmem:[#allocation11 + $0xb78] sm:$0xff] }
 0x4bc   :  { %8249 = vmatprep.subr.bf16.mxu1 %v8248_v23  ;;  %v2150_v23 = vld [vmem:[#allocation11 + $0x930] sm:$0xff]  ;;  %v2204_v61 = vld [vmem:[#allocation11 + $0xae0] sm:$0xff] }
 0x4bd   :  { %v2206_v3 = vld [vmem:[#allocation11 + $0xaf0] sm:$0xff]  ;;  %v8022_v13 = vpack.c.bf16 %v2204_v61, %v2196_v60  ;;  %v2268_v60 = vld [vmem:[#allocation11 + $0xce0] sm:$0xff] }
 0x4be   :  { %7995 = vmatpush1.bf16.msra.mxu0 %v7994_v29  ;;  %v8010_v29 = vpack.c.bf16 %v2156_v18, %v2148_v9  ;;  %v2220_v9 = vld [vmem:[#allocation11 + $0xb60] sm:$0xff]  ;;  %v2214_v18 = vld [vmem:[#allocation11 + $0xb30] sm:$0xff] }
 0x4bf   :  { %8251 = vmatpush1.bf16.msra.mxu1 %v8250_v31  ;;  %7997 = vmatprep.subr.bf16.mxu0 %v7996_v32  ;;  %v8266_v31 = vpack.c.bf16 %v2158_v17, %v2150_v23  ;;  %v8012_v32 = vpack.c.bf16 %v2173_v20, %v2165_v27  ;;  %v2229_v17 = vld [vmem:[#allocation11 + $0xba8] sm:$0xff]  ;;  %v2231_v20 = vld [vmem:[#allocation11 + $0xbb8] sm:$0xff]  ;;  %v2262_v61 = vld [vmem:[#allocation11 + $0xcb0] sm:$0xff] }
 0x4c0   :  { %8253 = vmatprep.subr.bf16.mxu1 %v8252_v35  ;;  %v2237_v27 = vld [vmem:[#allocation11 + $0xbe8] sm:$0xff] }
 0x4c2   :  { %7999 = vmatpush1.bf16.msra.mxu0 %v7998_v45 }
 0x4c3   :  { %8255 = vmatpush1.bf16.msra.mxu1 %v8254_v37  ;;  %8001 = vmatprep.subr.bf16.mxu0 %v8000_v39  ;;  %v8016_v37 = vpack.c.bf16 %v2189_v40, %v2181_v38  ;;  %v2180_v39 = vld [vmem:[#allocation11 + $0xa20] sm:$0xff]  ;;  %v2253_v38 = vld [vmem:[#allocation11 + $0xc68] sm:$0xff]  ;;  %v2247_v40 = vld [vmem:[#allocation11 + $0xc38] sm:$0xff] }
 0x4c4   :  { %8257 = vmatprep.subr.bf16.mxu1 %v8256_v47  ;;  %v8272_v47 = vpack.c.bf16 %v2191_v41, %v2183_v4  ;;  %v8018_v55 = vpack.c.bf16 %v2188_v25, %v2180_v39  ;;  %v2255_v4 = vld [vmem:[#allocation11 + $0xc78] sm:$0xff]  ;;  %v2252_v39 = vld [vmem:[#allocation11 + $0xc60] sm:$0xff]  ;;  %v2246_v25 = vld [vmem:[#allocation11 + $0xc30] sm:$0xff] }
 0x4c5   :  { %3555 = vmatmul.mubr.f32.vlgmr.msra.gmra.mrb[14].mxu0 %v10356_v63  ;;  %v8288_v46 = vpack.c.bf16 %v2255_v4, %v2247_v40  ;;  %v2319_v40 = vld [vmem:[#allocation11 + $0xe78] sm:$0xff] }
 0x4c6   :  { %3839 = vmatmul.mubr.f32.vlgmr.msra.gmra.mrb[14].mxu1 %v10356_v63  ;;  %8003 = vmatpush1.bf16.msra.mxu0 %v8002_v53  ;;  %v2175_v63 = vld [vmem:[#allocation11 + $0x9f8] sm:$0xff] }
 0x4c7   :  { %3625 = vmatprep.mubr.f32.mxu0 %v10360_v12  ;;  %8259 = vmatpush1.bf16.msra.mxu1 %v8258_v0  ;;  %v8268_v35 = vpack.c.bf16 %v2175_v63, %v2167_v26  ;;  %v2207_v53 = vld [vmem:[#allocation11 + $0xaf8] sm:$0xff]  ;;  %v8020_v0 = vpack.c.bf16 %v2205_v51, %v2197_v49  ;;  %v2269_v49 = vld [vmem:[#allocation11 + $0xce8] sm:$0xff] }
 0x4c8   :  { %3909 = vmatprep.mubr.f32.mxu1 %v10360_v12  ;;  %8005 = vmatprep.subr.bf16.mxu0 %v8004_v2  ;;  %v2174_v12 = vld [vmem:[#allocation11 + $0x9f0] sm:$0xff]  ;;  %v8276_v2 = vpack.c.bf16 %v2207_v53, %v2199_v10  ;;  %v2239_v26 = vld [vmem:[#allocation11 + $0xbf8] sm:$0xff] }
 0x4c9   :  { %8261 = vmatprep.subr.bf16.mxu1 %v8260_v8  ;;  %v8270_v45 = vpack.c.bf16 %v2174_v12, %v2166_v19  ;;  %v2215_v8 = vld [vmem:[#allocation11 + $0xb38] sm:$0xff]  ;;  %v8284_v19 = vpack.c.bf16 %v2239_v26, %v2231_v20  ;;  %v2245_v12 = vld [vmem:[#allocation11 + $0xc28] sm:$0xff] }
 0x4ca   :  { %8007 = vmatpush1.bf16.msra.mxu0 %v8006_v16  ;;  %v8278_v16 = vpack.c.bf16 %v2206_v3, %v2198_v62  ;;  %v8280_v23 = vpack.c.bf16 %v2223_v11, %v2215_v8  ;;  %v2263_v51 = vld [vmem:[#allocation11 + $0xcb8] sm:$0xff]  ;;  %v2277_v3 = vld [vmem:[#allocation11 + $0xd28] sm:$0xff] }
 0x4cb   :  { %8263 = vmatpush1.bf16.msra.mxu1 %v8262_v21  ;;  %8009 = vmatprep.subr.bf16.mxu0 %v8008_v5  ;;  %v8024_v21 = vpack.c.bf16 %v2221_v7, %v2213_v6  ;;  %v2212_v5 = vld [vmem:[#allocation11 + $0xb20] sm:$0xff]  ;;  %v2271_v10 = vld [vmem:[#allocation11 + $0xcf8] sm:$0xff]  ;;  %v2285_v6 = vld [vmem:[#allocation11 + $0xd68] sm:$0xff] }
 0x4cc   :  { %8265 = vmatprep.subr.bf16.mxu1 %v8264_v24  ;;  %v2222_v24 = vld [vmem:[#allocation11 + $0xb70] sm:$0xff]  ;;  %v8026_v63 = vpack.c.bf16 %v2220_v9, %v2212_v5  ;;  %v8292_v62 = vpack.c.bf16 %v2271_v10, %v2263_v51  ;;  %v2279_v7 = vld [vmem:[#allocation11 + $0xd38] sm:$0xff]  ;;  %v2284_v5 = vld [vmem:[#allocation11 + $0xd60] sm:$0xff] }
 0x4cd   :  { %v2287_v8 = vld [vmem:[#allocation11 + $0xd78] sm:$0xff]  ;;  %v2278_v9 = vld [vmem:[#allocation11 + $0xd30] sm:$0xff] }
 0x4ce   :  { %8011 = vmatpush1.bf16.msra.mxu0 %v8010_v29  ;;  %v8282_v29 = vpack.c.bf16 %v2222_v24, %v2214_v18  ;;  %v8296_v18 = vpack.c.bf16 %v2287_v8, %v2279_v7  ;;  %v2293_v24 = vld [vmem:[#allocation11 + $0xda8] sm:$0xff]  ;;  %v2303_v20 = vld [vmem:[#allocation11 + $0xdf8] sm:$0xff] }
 0x4cf   :  { %8267 = vmatpush1.bf16.msra.mxu1 %v8266_v31  ;;  %8013 = vmatprep.subr.bf16.mxu0 %v8012_v32  ;;  %v8028_v31 = vpack.c.bf16 %v2237_v27, %v2229_v17  ;;  %v2228_v32 = vld [vmem:[#allocation11 + $0xba0] sm:$0xff]  ;;  %v2301_v17 = vld [vmem:[#allocation11 + $0xde8] sm:$0xff]  ;;  %v2295_v27 = vld [vmem:[#allocation11 + $0xdb8] sm:$0xff] }
 0x4d0   :  { %8269 = vmatprep.subr.bf16.mxu1 %v8268_v35  ;;  %v2238_v35 = vld [vmem:[#allocation11 + $0xbf0] sm:$0xff]  ;;  %v8030_v41 = vpack.c.bf16 %v2236_v34, %v2228_v32  ;;  %v2300_v32 = vld [vmem:[#allocation11 + $0xde0] sm:$0xff]  ;;  %v2335_v51 = vld [vmem:[#allocation11 + $0xef8] sm:$0xff] }
 0x4d1   :  { %v2294_v34 = vld [vmem:[#allocation11 + $0xdb0] sm:$0xff]  ;;  %v2351_v7 = vld [vmem:[#allocation11 + $0xf78] sm:$0xff] }
 0x4d2   :  { %8015 = vmatpush1.bf16.msra.mxu0 %v8014_v15  ;;  %v8286_v15 = vpack.c.bf16 %v2238_v35, %v2230_v59  ;;  %v8300_v59 = vpack.c.bf16 %v2303_v20, %v2295_v27  ;;  %v2309_v35 = vld [vmem:[#allocation11 + $0xe28] sm:$0xff]  ;;  %v2367_v27 = vld [vmem:[#allocation11 + $0xff8] sm:$0xff] }
 0x4d3   :  { %8271 = vmatpush1.bf16.msra.mxu1 %v8270_v45  ;;  %8017 = vmatprep.subr.bf16.mxu0 %v8016_v37  ;;  %v8032_v45 = vpack.c.bf16 %v2253_v38, %v2245_v12  ;;  %v2244_v37 = vld [vmem:[#allocation11 + $0xc20] sm:$0xff]  ;;  %v2317_v12 = vld [vmem:[#allocation11 + $0xe68] sm:$0xff]  ;;  %v2311_v38 = vld [vmem:[#allocation11 + $0xe38] sm:$0xff] }
 0x4d4   :  { %8273 = vmatprep.subr.bf16.mxu1 %v8272_v47  ;;  %v2254_v47 = vld [vmem:[#allocation11 + $0xc70] sm:$0xff]  ;;  %v8034_v53 = vpack.c.bf16 %v2252_v39, %v2244_v37  ;;  %v2316_v37 = vld [vmem:[#allocation11 + $0xe60] sm:$0xff] }
 0x4d5   :  { %v2310_v39 = vld [vmem:[#allocation11 + $0xe30] sm:$0xff] }
 0x4d6   :  { %8019 = vmatpush1.bf16.msra.mxu0 %v8018_v55  ;;  %v8290_v55 = vpack.c.bf16 %v2254_v47, %v2246_v25  ;;  %v8304_v25 = vpack.c.bf16 %v2319_v40, %v2311_v38  ;;  %v2325_v47 = vld [vmem:[#allocation11 + $0xea8] sm:$0xff]  ;;  %v2383_v38 = vld [vmem:[#allocation11 + $0x1078] sm:$0xff] }
 0x4d7   :  { %8275 = vmatpush1.bf16.msra.mxu1 %v8274_v56  ;;  %8021 = vmatprep.subr.bf16.mxu0 %v8020_v0  ;;  %v8036_v56 = vpack.c.bf16 %v2269_v49, %v2261_v48  ;;  %v2260_v0 = vld [vmem:[#allocation11 + $0xca0] sm:$0xff]  ;;  %v2333_v48 = vld [vmem:[#allocation11 + $0xee8] sm:$0xff]  ;;  %v2327_v49 = vld [vmem:[#allocation11 + $0xeb8] sm:$0xff] }
 0x4d8   :  { %8277 = vmatprep.subr.bf16.mxu1 %v8276_v2  ;;  %v2270_v2 = vld [vmem:[#allocation11 + $0xcf0] sm:$0xff]  ;;  %v8038_v11 = vpack.c.bf16 %v2268_v60, %v2260_v0  ;;  %v2332_v0 = vld [vmem:[#allocation11 + $0xee0] sm:$0xff] }
 0x4d9   :  { %v2326_v60 = vld [vmem:[#allocation11 + $0xeb0] sm:$0xff] }
 0x4da   :  { %8023 = vmatpush1.bf16.msra.mxu0 %v8022_v13  ;;  %v8294_v13 = vpack.c.bf16 %v2270_v2, %v2262_v61  ;;  %v8308_v61 = vpack.c.bf16 %v2335_v51, %v2327_v49  ;;  %v2341_v2 = vld [vmem:[#allocation11 + $0xf28] sm:$0xff]  ;;  %v2391_v49 = vld [vmem:[#allocation11 + $0x10b8] sm:$0xff] }
 0x4db   :  { %8279 = vmatpush1.bf16.msra.mxu1 %v8278_v16  ;;  %8025 = vmatprep.subr.bf16.mxu0 %v8024_v21  ;;  %v8040_v16 = vpack.c.bf16 %v2285_v6, %v2277_v3  ;;  %v2276_v21 = vld [vmem:[#allocation11 + $0xd20] sm:$0xff]  ;;  %v2349_v3 = vld [vmem:[#allocation11 + $0xf68] sm:$0xff]  ;;  %v2343_v6 = vld [vmem:[#allocation11 + $0xf38] sm:$0xff] }
 0x4dc   :  { %8281 = vmatprep.subr.bf16.mxu1 %v8280_v23  ;;  %v2286_v23 = vld [vmem:[#allocation11 + $0xd70] sm:$0xff]  ;;  %v8042_v26 = vpack.c.bf16 %v2284_v5, %v2276_v21  ;;  %v2348_v21 = vld [vmem:[#allocation11 + $0xf60] sm:$0xff]  ;;  %v2399_v51 = vld [vmem:[#allocation11 + $0x10f8] sm:$0xff] }
 0x4dd   :  { %v2342_v5 = vld [vmem:[#allocation11 + $0xf30] sm:$0xff] }
 0x4de   :  { %8027 = vmatpush1.bf16.msra.mxu0 %v8026_v63  ;;  %v8298_v63 = vpack.c.bf16 %v2286_v23, %v2278_v9  ;;  %v8312_v9 = vpack.c.bf16 %v2351_v7, %v2343_v6  ;;  %v2357_v23 = vld [vmem:[#allocation11 + $0xfa8] sm:$0xff]  ;;  %v2415_v6 = vld [vmem:[#allocation11 + $0x1178] sm:$0xff] }
 0x4df   :  { %8283 = vmatpush1.bf16.msra.mxu1 %v8282_v29  ;;  %8029 = vmatprep.subr.bf16.mxu0 %v8028_v31  ;;  %v8044_v29 = vpack.c.bf16 %v2301_v17, %v2293_v24  ;;  %v2292_v31 = vld [vmem:[#allocation11 + $0xda0] sm:$0xff]  ;;  %v2365_v24 = vld [vmem:[#allocation11 + $0xfe8] sm:$0xff]  ;;  %v2359_v17 = vld [vmem:[#allocation11 + $0xfb8] sm:$0xff] }
 0x4e0   :  { %8285 = vmatprep.subr.bf16.mxu1 %v8284_v19  ;;  %v2302_v19 = vld [vmem:[#allocation11 + $0xdf0] sm:$0xff]  ;;  %v8046_v4 = vpack.c.bf16 %v2300_v32, %v2292_v31  ;;  %v2364_v31 = vld [vmem:[#allocation11 + $0xfe0] sm:$0xff] }
 0x4e1   :  { %v2358_v32 = vld [vmem:[#allocation11 + $0xfb0] sm:$0xff] }
 0x4e2   :  { %8031 = vmatpush1.bf16.msra.mxu0 %v8030_v41  ;;  %v8302_v41 = vpack.c.bf16 %v2302_v19, %v2294_v34  ;;  %v8316_v34 = vpack.c.bf16 %v2367_v27, %v2359_v17  ;;  %v2373_v19 = vld [vmem:[#allocation11 + $0x1028] sm:$0xff] }
 0x4e3   :  { %8287 = vmatpush1.bf16.msra.mxu1 %v8286_v15  ;;  %8033 = vmatprep.subr.bf16.mxu0 %v8032_v45  ;;  %v8048_v15 = vpack.c.bf16 %v2317_v12, %v2309_v35  ;;  %v2308_v45 = vld [vmem:[#allocation11 + $0xe20] sm:$0xff]  ;;  %v2381_v35 = vld [vmem:[#allocation11 + $0x1068] sm:$0xff]  ;;  %v2375_v12 = vld [vmem:[#allocation11 + $0x1038] sm:$0xff] }
 0x4e4   :  { %8289 = vmatprep.subr.bf16.mxu1 %v8288_v46  ;;  %v2318_v46 = vld [vmem:[#allocation11 + $0xe70] sm:$0xff]  ;;  %v8050_v10 = vpack.c.bf16 %v2316_v37, %v2308_v45  ;;  %v2380_v45 = vld [vmem:[#allocation11 + $0x1060] sm:$0xff]  ;;  %v8320_v37 = vpack.c.bf16 %v2383_v38, %v2375_v12 }
 0x4e6   :  { %8035 = vmatpush1.bf16.msra.mxu0 %v8034_v53  ;;  %v8306_v53 = vpack.c.bf16 %v2318_v46, %v2310_v39  ;;  %v2374_v39 = vld [vmem:[#allocation11 + $0x1030] sm:$0xff]  ;;  %v2389_v46 = vld [vmem:[#allocation11 + $0x10a8] sm:$0xff] }
 0x4e7   :  { %8291 = vmatpush1.bf16.msra.mxu1 %v8290_v55  ;;  %8037 = vmatprep.subr.bf16.mxu0 %v8036_v56  ;;  %v8052_v55 = vpack.c.bf16 %v2333_v48, %v2325_v47  ;;  %v2324_v56 = vld [vmem:[#allocation11 + $0xea0] sm:$0xff]  ;;  %v2397_v47 = vld [vmem:[#allocation11 + $0x10e8] sm:$0xff] }
 0x4e8   :  { %8293 = vmatprep.subr.bf16.mxu1 %v8292_v62  ;;  %v2334_v62 = vld [vmem:[#allocation11 + $0xef0] sm:$0xff]  ;;  %v8054_v8 = vpack.c.bf16 %v2332_v0, %v2324_v56  ;;  %v8068_v0 = vpack.c.bf16 %v2397_v47, %v2389_v46  ;;  %v2463_v46 = vld [vmem:[#allocation11 + $0x12f8] sm:$0xff] }
 0x4e9   :  { %v2390_v56 = vld [vmem:[#allocation11 + $0x10b0] sm:$0xff] }
 0x4ea   :  { %8039 = vmatpush1.bf16.msra.mxu0 %v8038_v11  ;;  %v8310_v11 = vpack.c.bf16 %v2334_v62, %v2326_v60  ;;  %v2398_v60 = vld [vmem:[#allocation11 + $0x10f0] sm:$0xff]  ;;  %v2413_v62 = vld [vmem:[#allocation11 + $0x1168] sm:$0xff] }
 0x4eb   :  { %8295 = vmatpush1.bf16.msra.mxu1 %v8294_v13  ;;  %8041 = vmatprep.subr.bf16.mxu0 %v8040_v16  ;;  %v8056_v13 = vpack.c.bf16 %v2349_v3, %v2341_v2  ;;  %v2340_v16 = vld [vmem:[#allocation11 + $0xf20] sm:$0xff]  ;;  %v8324_v2 = vpack.c.bf16 %v2399_v51, %v2391_v49  ;;  %v2407_v3 = vld [vmem:[#allocation11 + $0x1138] sm:$0xff] }
 0x4ec   :  { %8297 = vmatprep.subr.bf16.mxu1 %v8296_v18  ;;  %v2350_v18 = vld [vmem:[#allocation11 + $0xf70] sm:$0xff]  ;;  %v8058_v20 = vpack.c.bf16 %v2348_v21, %v2340_v16  ;;  %v2412_v16 = vld [vmem:[#allocation11 + $0x1160] sm:$0xff] }
 0x4ed   :  { %v2406_v21 = vld [vmem:[#allocation11 + $0x1130] sm:$0xff]  ;;  %v2452_v51 = vld [vmem:[#allocation11 + $0x12a0] sm:$0xff] }
 0x4ee   :  { %8043 = vmatpush1.bf16.msra.mxu0 %v8042_v26  ;;  %v8314_v26 = vpack.c.bf16 %v2350_v18, %v2342_v5  ;;  %v8328_v5 = vpack.c.bf16 %v2415_v6, %v2407_v3  ;;  %v2421_v18 = vld [vmem:[#allocation11 + $0x11a8] sm:$0xff] }
 0x4ef   :  { %8299 = vmatpush1.bf16.msra.mxu1 %v8298_v63  ;;  %8045 = vmatprep.subr.bf16.mxu0 %v8044_v29  ;;  %v8060_v63 = vpack.c.bf16 %v2365_v24, %v2357_v23  ;;  %v2356_v29 = vld [vmem:[#allocation11 + $0xfa0] sm:$0xff]  ;;  %v2429_v23 = vld [vmem:[#allocation11 + $0x11e8] sm:$0xff]  ;;  %v2423_v24 = vld [vmem:[#allocation11 + $0x11b8] sm:$0xff] }
 0x4f0   :  { %8301 = vmatprep.subr.bf16.mxu1 %v8300_v59  ;;  %v2366_v59 = vld [vmem:[#allocation11 + $0xff0] sm:$0xff]  ;;  %v8062_v40 = vpack.c.bf16 %v2364_v31, %v2356_v29 }
 0x4f1   :  { %v2422_v29 = vld [vmem:[#allocation11 + $0x11b0] sm:$0xff] }
 0x4f2   :  { %8047 = vmatpush1.bf16.msra.mxu0 %v8046_v4  ;;  %v8318_v4 = vpack.c.bf16 %v2366_v59, %v2358_v32  ;;  %v2437_v32 = vld [vmem:[#allocation11 + $0x1228] sm:$0xff]  ;;  %v2439_v59 = vld [vmem:[#allocation11 + $0x1238] sm:$0xff] }
 0x4f3   :  { %8303 = vmatpush1.bf16.msra.mxu1 %v8302_v41  ;;  %8049 = vmatprep.subr.bf16.mxu0 %v8048_v15  ;;  %v8064_v41 = vpack.c.bf16 %v2381_v35, %v2373_v19  ;;  %v2372_v15 = vld [vmem:[#allocation11 + $0x1020] sm:$0xff]  ;;  %v2447_v19 = vld [vmem:[#allocation11 + $0x1278] sm:$0xff] }
 0x4f4   :  { %8305 = vmatprep.subr.bf16.mxu1 %v8304_v25  ;;  %v2382_v25 = vld [vmem:[#allocation11 + $0x1070] sm:$0xff]  ;;  %v8066_v48 = vpack.c.bf16 %v2380_v45, %v2372_v15  ;;  %v8336_v15 = vpack.c.bf16 %v2447_v19, %v2439_v59 }
 0x4f5   :  { %v2446_v45 = vld [vmem:[#allocation11 + $0x1270] sm:$0xff] }
 0x4f6   :  { %8051 = vmatpush1.bf16.msra.mxu0 %v8050_v10  ;;  %v8322_v10 = vpack.c.bf16 %v2382_v25, %v2374_v39  ;;  %v2461_v39 = vld [vmem:[#allocation11 + $0x12e8] sm:$0xff]  ;;  %v2455_v25 = vld [vmem:[#allocation11 + $0x12b8] sm:$0xff] }
 0x4f7   :  { %8307 = vmatpush1.bf16.msra.mxu1 %v8306_v53  ;;  %8053 = vmatprep.subr.bf16.mxu0 %v8052_v55  ;;  %v2388_v53 = vld [vmem:[#allocation11 + $0x10a0] sm:$0xff] }
 0x4f8   :  { %8309 = vmatprep.subr.bf16.mxu1 %v8308_v61  ;;  %v2396_v55 = vld [vmem:[#allocation11 + $0x10e0] sm:$0xff]  ;;  %v2405_v61 = vld [vmem:[#allocation11 + $0x1128] sm:$0xff] }
 0x4f9   :  { %v8070_v7 = vpack.c.bf16 %v2396_v55, %v2388_v53  ;;  %v2454_v53 = vld [vmem:[#allocation11 + $0x12b0] sm:$0xff]  ;;  %v8340_v55 = vpack.c.bf16 %v2463_v46, %v2455_v25 }
 0x4fa   :  { %8055 = vmatpush1.bf16.msra.mxu0 %v8054_v8  ;;  %v8326_v8 = vpack.c.bf16 %v2398_v60, %v2390_v56  ;;  %v2462_v56 = vld [vmem:[#allocation11 + $0x12f0] sm:$0xff]  ;;  %v2477_v60 = vld [vmem:[#allocation11 + $0x1368] sm:$0xff] }
 0x4fb   :  { %8311 = vmatpush1.bf16.msra.mxu1 %v8310_v11  ;;  %8057 = vmatprep.subr.bf16.mxu0 %v8056_v13  ;;  %v8072_v11 = vpack.c.bf16 %v2413_v62, %v2405_v61  ;;  %v2404_v13 = vld [vmem:[#allocation11 + $0x1120] sm:$0xff]  ;;  %v2471_v61 = vld [vmem:[#allocation11 + $0x1338] sm:$0xff]  ;;  %v8342_v3 = vpack.c.bf16 %v2462_v56, %v2454_v53  ;;  %v2533_v53 = vld [vmem:[#allocation11 + $0x1528] sm:$0xff] }
 0x4fc   :  { %8313 = vmatprep.subr.bf16.mxu1 %v8312_v9  ;;  %v2414_v9 = vld [vmem:[#allocation11 + $0x1170] sm:$0xff]  ;;  %v8074_v17 = vpack.c.bf16 %v2412_v16, %v2404_v13  ;;  %v2479_v62 = vld [vmem:[#allocation11 + $0x1378] sm:$0xff] }
 0x4fd   :  { %v8330_v27 = vpack.c.bf16 %v2414_v9, %v2406_v21  ;;  %v8344_v13 = vpack.c.bf16 %v2479_v62, %v2471_v61  ;;  %v2478_v16 = vld [vmem:[#allocation11 + $0x1370] sm:$0xff]  ;;  %v2485_v21 = vld [vmem:[#allocation11 + $0x13a8] sm:$0xff]  ;;  %v2487_v9 = vld [vmem:[#allocation11 + $0x13b8] sm:$0xff] }
 0x4fe   :  { %8059 = vmatpush1.bf16.msra.mxu0 %v8058_v20  ;;  %v8076_v20 = vpack.c.bf16 %v2429_v23, %v2421_v18  ;;  %v2495_v18 = vld [vmem:[#allocation11 + $0x13f8] sm:$0xff] }
 0x4ff   :  { %8315 = vmatpush1.bf16.msra.mxu1 %v8314_v26  ;;  %8061 = vmatprep.subr.bf16.mxu0 %v8060_v63  ;;  %v2420_v26 = vld [vmem:[#allocation11 + $0x11a0] sm:$0xff]  ;;  %v2535_v56 = vld [vmem:[#allocation11 + $0x1538] sm:$0xff] }
 0x500   :  { %8317 = vmatprep.subr.bf16.mxu1 %v8316_v34  ;;  %v2428_v63 = vld [vmem:[#allocation11 + $0x11e0] sm:$0xff]  ;;  %v2445_v34 = vld [vmem:[#allocation11 + $0x1268] sm:$0xff] }
 0x501   :  { %v8078_v35 = vpack.c.bf16 %v2428_v63, %v2420_v26  ;;  %v8080_v38 = vpack.c.bf16 %v2445_v34, %v2437_v32  ;;  %v8348_v26 = vpack.c.bf16 %v2495_v18, %v2487_v9  ;;  %v2494_v63 = vld [vmem:[#allocation11 + $0x13f0] sm:$0xff]  ;;  %v2511_v32 = vld [vmem:[#allocation11 + $0x1478] sm:$0xff] }
 0x502   :  { %8063 = vmatpush1.bf16.msra.mxu0 %v8062_v40  ;;  %v2436_v40 = vld [vmem:[#allocation11 + $0x1220] sm:$0xff] }
 0x503   :  { %8319 = vmatpush1.bf16.msra.mxu1 %v8318_v4  ;;  %8065 = vmatprep.subr.bf16.mxu0 %v8064_v41  ;;  %v2444_v4 = vld [vmem:[#allocation11 + $0x1260] sm:$0xff]  ;;  %v2438_v41 = vld [vmem:[#allocation11 + $0x1230] sm:$0xff] }
 0x504   :  { %8321 = vmatprep.subr.bf16.mxu1 %v8320_v37  ;;  %v2453_v37 = vld [vmem:[#allocation11 + $0x12a8] sm:$0xff]  ;;  %v8082_v47 = vpack.c.bf16 %v2444_v4, %v2436_v40  ;;  %v2510_v4 = vld [vmem:[#allocation11 + $0x1470] sm:$0xff] }
 0x505   :  { %3626 = vmatmul.mubr.f32.vlgmr.msra.gmra.mrb[14].mxu0 %v10372_v36  ;;  %v8084_v49 = vpack.c.bf16 %v2461_v39, %v2453_v37  ;;  %v2527_v37 = vld [vmem:[#allocation11 + $0x14f8] sm:$0xff] }
 0x506   :  { %3910 = vmatmul.mubr.f32.vlgmr.msra.gmra.mrb[14].mxu1 %v10372_v36  ;;  %8067 = vmatpush1.bf16.msra.mxu0 %v8066_v48  ;;  %v2431_v36 = vld [vmem:[#allocation11 + $0x11f8] sm:$0xff]  ;;  %v8338_v48 = vpack.c.bf16 %v2446_v45, %v2438_v41  ;;  %v2517_v41 = vld [vmem:[#allocation11 + $0x14a8] sm:$0xff] }
 0x507   :  { %3696 = vmatprep.mubr.f32.mxu0 %v10387_v33  ;;  %8323 = vmatpush1.bf16.msra.mxu1 %v8322_v10  ;;  %v8332_v31 = vpack.c.bf16 %v2431_v36, %v2423_v24  ;;  %v2460_v10 = vld [vmem:[#allocation11 + $0x12e0] sm:$0xff]  ;;  %v2519_v45 = vld [vmem:[#allocation11 + $0x14b8] sm:$0xff] }
 0x508   :  { %3980 = vmatprep.mubr.f32.mxu1 %v10387_v33  ;;  %8069 = vmatprep.subr.bf16.mxu0 %v8068_v0  ;;  %v2430_v33 = vld [vmem:[#allocation11 + $0x11f0] sm:$0xff]  ;;  %v2469_v0 = vld [vmem:[#allocation11 + $0x1328] sm:$0xff] }
 0x509   :  { %8325 = vmatprep.subr.bf16.mxu1 %v8324_v2  ;;  %v8334_v12 = vpack.c.bf16 %v2430_v33, %v2422_v29  ;;  %v8086_v2 = vpack.c.bf16 %v2460_v10, %v2452_v51  ;;  %v8088_v6 = vpack.c.bf16 %v2477_v60, %v2469_v0  ;;  %v2501_v29 = vld [vmem:[#allocation11 + $0x1428] sm:$0xff]  ;;  %v2503_v33 = vld [vmem:[#allocation11 + $0x1438] sm:$0xff]  ;;  %v8356_v51 = vpack.c.bf16 %v2527_v37, %v2519_v45  ;;  %v2526_v10 = vld [vmem:[#allocation11 + $0x14f0] sm:$0xff] }
 0x50a   :  { %8071 = vmatpush1.bf16.msra.mxu0 %v8070_v7  ;;  %v2468_v7 = vld [vmem:[#allocation11 + $0x1320] sm:$0xff]  ;;  %v8352_v40 = vpack.c.bf16 %v2511_v32, %v2503_v33  ;;  %v2543_v0 = vld [vmem:[#allocation11 + $0x1578] sm:$0xff] }
 0x50b   :  { %8327 = vmatpush1.bf16.msra.mxu1 %v8326_v8  ;;  %8073 = vmatprep.subr.bf16.mxu0 %v8072_v11  ;;  %v2476_v8 = vld [vmem:[#allocation11 + $0x1360] sm:$0xff]  ;;  %v2470_v11 = vld [vmem:[#allocation11 + $0x1330] sm:$0xff] }
 0x50c   :  { %8329 = vmatprep.subr.bf16.mxu1 %v8328_v5  ;;  %v2493_v5 = vld [vmem:[#allocation11 + $0x13e8] sm:$0xff]  ;;  %v8090_v23 = vpack.c.bf16 %v2476_v8, %v2468_v7  ;;  %v8346_v24 = vpack.c.bf16 %v2478_v16, %v2470_v11  ;;  %v8360_v7 = vpack.c.bf16 %v2543_v0, %v2535_v56  ;;  %v2542_v8 = vld [vmem:[#allocation11 + $0x1570] sm:$0xff]  ;;  %v2551_v16 = vld [vmem:[#allocation11 + $0x15b8] sm:$0xff] }
 0x50d   :  { %v8092_v36 = vpack.c.bf16 %v2493_v5, %v2485_v21  ;;  %v2549_v11 = vld [vmem:[#allocation11 + $0x15a8] sm:$0xff]  ;;  %v2559_v21 = vld [vmem:[#allocation11 + $0x15f8] sm:$0xff] }
 0x50e   :  { %8075 = vmatpush1.bf16.msra.mxu0 %v8074_v17  ;;  %v2484_v17 = vld [vmem:[#allocation11 + $0x13a0] sm:$0xff] }
 0x50f   :  { %8331 = vmatpush1.bf16.msra.mxu1 %v8330_v27  ;;  %8077 = vmatprep.subr.bf16.mxu0 %v8076_v20  ;;  %v2492_v27 = vld [vmem:[#allocation11 + $0x13e0] sm:$0xff]  ;;  %v2486_v20 = vld [vmem:[#allocation11 + $0x13b0] sm:$0xff] }
 0x510   :  { %8333 = vmatprep.subr.bf16.mxu1 %v8332_v31  ;;  %v2509_v31 = vld [vmem:[#allocation11 + $0x1468] sm:$0xff]  ;;  %v8094_v34 = vpack.c.bf16 %v2492_v27, %v2484_v17  ;;  %v8350_v59 = vpack.c.bf16 %v2494_v63, %v2486_v20  ;;  %v8364_v17 = vpack.c.bf16 %v2559_v21, %v2551_v16  ;;  %v2558_v27 = vld [vmem:[#allocation11 + $0x15f0] sm:$0xff]  ;;  %v2567_v63 = vld [vmem:[#allocation11 + $0x1638] sm:$0xff] }
 0x511   :  { %v8096_v19 = vpack.c.bf16 %v2509_v31, %v2501_v29  ;;  %v2565_v20 = vld [vmem:[#allocation11 + $0x1628] sm:$0xff]  ;;  %v2575_v29 = vld [vmem:[#allocation11 + $0x1678] sm:$0xff] }
 0x512   :  { %8079 = vmatpush1.bf16.msra.mxu0 %v8078_v35  ;;  %v2500_v35 = vld [vmem:[#allocation11 + $0x1420] sm:$0xff] }
 0x513   :  { %8335 = vmatpush1.bf16.msra.mxu1 %v8334_v12  ;;  %8081 = vmatprep.subr.bf16.mxu0 %v8080_v38  ;;  %v2508_v12 = vld [vmem:[#allocation11 + $0x1460] sm:$0xff]  ;;  %v2502_v38 = vld [vmem:[#allocation11 + $0x1430] sm:$0xff] }
 0x514   :  { %8337 = vmatprep.subr.bf16.mxu1 %v8336_v15  ;;  %v2525_v15 = vld [vmem:[#allocation11 + $0x14e8] sm:$0xff]  ;;  %v8098_v39 = vpack.c.bf16 %v2508_v12, %v2500_v35  ;;  %v8354_v25 = vpack.c.bf16 %v2510_v4, %v2502_v38  ;;  %v8368_v35 = vpack.c.bf16 %v2575_v29, %v2567_v63  ;;  %v2574_v12 = vld [vmem:[#allocation11 + $0x1670] sm:$0xff]  ;;  %v2583_v4 = vld [vmem:[#allocation11 + $0x16b8] sm:$0xff] }
 0x515   :  { %v8100_v46 = vpack.c.bf16 %v2525_v15, %v2517_v41  ;;  %v2581_v38 = vld [vmem:[#allocation11 + $0x16a8] sm:$0xff]  ;;  %v2591_v41 = vld [vmem:[#allocation11 + $0x16f8] sm:$0xff] }
 0x516   :  { %8083 = vmatpush1.bf16.msra.mxu0 %v8082_v47  ;;  %v2516_v47 = vld [vmem:[#allocation11 + $0x14a0] sm:$0xff] }
 0x517   :  { %8339 = vmatpush1.bf16.msra.mxu1 %v8338_v48  ;;  %8085 = vmatprep.subr.bf16.mxu0 %v8084_v49  ;;  %v2524_v48 = vld [vmem:[#allocation11 + $0x14e0] sm:$0xff]  ;;  %v2518_v49 = vld [vmem:[#allocation11 + $0x14b0] sm:$0xff] }
 0x518   :  { %8341 = vmatprep.subr.bf16.mxu1 %v8340_v55  ;;  %v2541_v55 = vld [vmem:[#allocation11 + $0x1568] sm:$0xff]  ;;  %v8102_v60 = vpack.c.bf16 %v2524_v48, %v2516_v47  ;;  %v8358_v61 = vpack.c.bf16 %v2526_v10, %v2518_v49  ;;  %v8372_v47 = vpack.c.bf16 %v2591_v41, %v2583_v4  ;;  %v2590_v48 = vld [vmem:[#allocation11 + $0x16f0] sm:$0xff]  ;;  %v2599_v10 = vld [vmem:[#allocation11 + $0x1738] sm:$0xff] }
 0x519   :  { %v8104_v62 = vpack.c.bf16 %v2541_v55, %v2533_v53  ;;  %v2597_v49 = vld [vmem:[#allocation11 + $0x1728] sm:$0xff]  ;;  %v2607_v53 = vld [vmem:[#allocation11 + $0x1778] sm:$0xff]  ;;  %v2644_v41 = vld [vmem:[#allocation11 + $0x18a0] sm:$0xff] }
 0x51a   :  { %8087 = vmatpush1.bf16.msra.mxu0 %v8086_v2  ;;  %v2532_v2 = vld [vmem:[#allocation11 + $0x1520] sm:$0xff] }
 0x51b   :  { %8343 = vmatpush1.bf16.msra.mxu1 %v8342_v3  ;;  %8089 = vmatprep.subr.bf16.mxu0 %v8088_v6  ;;  %v2540_v3 = vld [vmem:[#allocation11 + $0x1560] sm:$0xff]  ;;  %v2534_v6 = vld [vmem:[#allocation11 + $0x1530] sm:$0xff] }
 0x51c   :  { %8345 = vmatprep.subr.bf16.mxu1 %v8344_v13  ;;  %v2557_v13 = vld [vmem:[#allocation11 + $0x15e8] sm:$0xff]  ;;  %v8106_v5 = vpack.c.bf16 %v2540_v3, %v2532_v2  ;;  %v8362_v9 = vpack.c.bf16 %v2542_v8, %v2534_v6  ;;  %v8376_v2 = vpack.c.bf16 %v2607_v53, %v2599_v10  ;;  %v2606_v3 = vld [vmem:[#allocation11 + $0x1770] sm:$0xff]  ;;  %v2615_v8 = vld [vmem:[#allocation11 + $0x17b8] sm:$0xff] }
 0x51d   :  { %v8108_v18 = vpack.c.bf16 %v2557_v13, %v2549_v11  ;;  %v2613_v6 = vld [vmem:[#allocation11 + $0x17a8] sm:$0xff]  ;;  %v2623_v11 = vld [vmem:[#allocation11 + $0x17f8] sm:$0xff] }
 0x51e   :  { %8091 = vmatpush1.bf16.msra.mxu0 %v8090_v23  ;;  %v2548_v23 = vld [vmem:[#allocation11 + $0x15a0] sm:$0xff] }
 0x51f   :  { %8347 = vmatpush1.bf16.msra.mxu1 %v8346_v24  ;;  %8093 = vmatprep.subr.bf16.mxu0 %v8092_v36  ;;  %v2556_v24 = vld [vmem:[#allocation11 + $0x15e0] sm:$0xff]  ;;  %v2550_v36 = vld [vmem:[#allocation11 + $0x15b0] sm:$0xff] }
 0x520   :  { %8349 = vmatprep.subr.bf16.mxu1 %v8348_v26  ;;  %v2573_v26 = vld [vmem:[#allocation11 + $0x1668] sm:$0xff]  ;;  %v8110_v31 = vpack.c.bf16 %v2556_v24, %v2548_v23  ;;  %v8366_v33 = vpack.c.bf16 %v2558_v27, %v2550_v36  ;;  %v8380_v23 = vpack.c.bf16 %v2623_v11, %v2615_v8  ;;  %v2622_v24 = vld [vmem:[#allocation11 + $0x17f0] sm:$0xff]  ;;  %v2631_v27 = vld [vmem:[#allocation11 + $0x1838] sm:$0xff] }
 0x521   :  { %v8112_v32 = vpack.c.bf16 %v2573_v26, %v2565_v20  ;;  %v2629_v36 = vld [vmem:[#allocation11 + $0x1828] sm:$0xff]  ;;  %v2639_v20 = vld [vmem:[#allocation11 + $0x1878] sm:$0xff]  ;;  %v2676_v11 = vld [vmem:[#allocation11 + $0x19a0] sm:$0xff] }
 0x522   :  { %8095 = vmatpush1.bf16.msra.mxu0 %v8094_v34  ;;  %v2564_v34 = vld [vmem:[#allocation11 + $0x1620] sm:$0xff] }
 0x523   :  { %8351 = vmatpush1.bf16.msra.mxu1 %v8350_v59  ;;  %8097 = vmatprep.subr.bf16.mxu0 %v8096_v19  ;;  %v2572_v59 = vld [vmem:[#allocation11 + $0x1660] sm:$0xff]  ;;  %v2566_v19 = vld [vmem:[#allocation11 + $0x1630] sm:$0xff] }
 0x524   :  { %8353 = vmatprep.subr.bf16.mxu1 %v8352_v40  ;;  %v2589_v40 = vld [vmem:[#allocation11 + $0x16e8] sm:$0xff]  ;;  %v8114_v15 = vpack.c.bf16 %v2572_v59, %v2564_v34  ;;  %v8370_v45 = vpack.c.bf16 %v2574_v12, %v2566_v19  ;;  %v2630_v34 = vld [vmem:[#allocation11 + $0x1830] sm:$0xff] }
 0x525   :  { %v8116_v37 = vpack.c.bf16 %v2589_v40, %v2581_v38  ;;  %v2638_v59 = vld [vmem:[#allocation11 + $0x1870] sm:$0xff]  ;;  %v2645_v19 = vld [vmem:[#allocation11 + $0x18a8] sm:$0xff]  ;;  %v2647_v38 = vld [vmem:[#allocation11 + $0x18b8] sm:$0xff] }
 0x526   :  { %8099 = vmatpush1.bf16.msra.mxu0 %v8098_v39  ;;  %v2580_v39 = vld [vmem:[#allocation11 + $0x16a0] sm:$0xff]  ;;  %v2655_v40 = vld [vmem:[#allocation11 + $0x18f8] sm:$0xff]  ;;  %v8386_v4 = vpack.c.bf16 %v2638_v59, %v2630_v34 }
 0x527   :  { %8355 = vmatpush1.bf16.msra.mxu1 %v8354_v25  ;;  %8101 = vmatprep.subr.bf16.mxu0 %v8100_v46  ;;  %v2588_v25 = vld [vmem:[#allocation11 + $0x16e0] sm:$0xff]  ;;  %v2582_v46 = vld [vmem:[#allocation11 + $0x16b0] sm:$0xff]  ;;  %v2719_v34 = vld [vmem:[#allocation11 + $0x1af8] sm:$0xff] }
 0x528   :  { %8357 = vmatprep.subr.bf16.mxu1 %v8356_v51  ;;  %v2605_v51 = vld [vmem:[#allocation11 + $0x1768] sm:$0xff]  ;;  %v8118_v55 = vpack.c.bf16 %v2588_v25, %v2580_v39  ;;  %v8374_v56 = vpack.c.bf16 %v2590_v48, %v2582_v46  ;;  %v2654_v39 = vld [vmem:[#allocation11 + $0x18f0] sm:$0xff]  ;;  %v2663_v48 = vld [vmem:[#allocation11 + $0x1938] sm:$0xff] }
 0x529   :  { %v8120_v0 = vpack.c.bf16 %v2605_v51, %v2597_v49  ;;  %v2661_v25 = vld [vmem:[#allocation11 + $0x1928] sm:$0xff]  ;;  %v2671_v49 = vld [vmem:[#allocation11 + $0x1978] sm:$0xff] }
 0x52a   :  { %8103 = vmatpush1.bf16.msra.mxu0 %v8102_v60  ;;  %v2596_v60 = vld [vmem:[#allocation11 + $0x1720] sm:$0xff]  ;;  %v2669_v46 = vld [vmem:[#allocation11 + $0x1968] sm:$0xff] }
 0x52b   :  { %8359 = vmatpush1.bf16.msra.mxu1 %v8358_v61  ;;  %8105 = vmatprep.subr.bf16.mxu0 %v8104_v62  ;;  %v2604_v61 = vld [vmem:[#allocation11 + $0x1760] sm:$0xff]  ;;  %v2598_v62 = vld [vmem:[#allocation11 + $0x1730] sm:$0xff]  ;;  %v8136_v53 = vpack.c.bf16 %v2669_v46, %v2661_v25 }
 0x52c   :  { %8361 = vmatprep.subr.bf16.mxu1 %v8360_v7  ;;  %v2621_v7 = vld [vmem:[#allocation11 + $0x17e8] sm:$0xff]  ;;  %v8122_v13 = vpack.c.bf16 %v2604_v61, %v2596_v60  ;;  %v8378_v16 = vpack.c.bf16 %v2606_v3, %v2598_v62  ;;  %v8392_v60 = vpack.c.bf16 %v2671_v49, %v2663_v48  ;;  %v2670_v61 = vld [vmem:[#allocation11 + $0x1970] sm:$0xff]  ;;  %v2679_v3 = vld [vmem:[#allocation11 + $0x19b8] sm:$0xff] }
 0x52d   :  { %v8124_v21 = vpack.c.bf16 %v2621_v7, %v2613_v6  ;;  %v2677_v62 = vld [vmem:[#allocation11 + $0x19a8] sm:$0xff]  ;;  %v2724_v48 = vld [vmem:[#allocation11 + $0x1b20] sm:$0xff] }
 0x52e   :  { %8107 = vmatpush1.bf16.msra.mxu0 %v8106_v5  ;;  %v2612_v5 = vld [vmem:[#allocation11 + $0x17a0] sm:$0xff] }
 0x52f   :  { %8363 = vmatpush1.bf16.msra.mxu1 %v8362_v9  ;;  %8109 = vmatprep.subr.bf16.mxu0 %v8108_v18  ;;  %v2620_v9 = vld [vmem:[#allocation11 + $0x17e0] sm:$0xff]  ;;  %v2614_v18 = vld [vmem:[#allocation11 + $0x17b0] sm:$0xff] }
 0x530   :  { %8365 = vmatprep.subr.bf16.mxu1 %v8364_v17  ;;  %v2637_v17 = vld [vmem:[#allocation11 + $0x1868] sm:$0xff]  ;;  %v8126_v26 = vpack.c.bf16 %v2620_v9, %v2612_v5  ;;  %v8382_v63 = vpack.c.bf16 %v2622_v24, %v2614_v18  ;;  %v2695_v18 = vld [vmem:[#allocation11 + $0x1a38] sm:$0xff]  ;;  %v2732_v49 = vld [vmem:[#allocation11 + $0x1b60] sm:$0xff] }
 0x531   :  { %v8128_v29 = vpack.c.bf16 %v2637_v17, %v2629_v36  ;;  %v2693_v5 = vld [vmem:[#allocation11 + $0x1a28] sm:$0xff] }
 0x532   :  { %8111 = vmatpush1.bf16.msra.mxu0 %v8110_v31  ;;  %v2628_v31 = vld [vmem:[#allocation11 + $0x1820] sm:$0xff]  ;;  %v2701_v9 = vld [vmem:[#allocation11 + $0x1a68] sm:$0xff] }
 0x533   :  { %8367 = vmatpush1.bf16.msra.mxu1 %v8366_v33  ;;  %8113 = vmatprep.subr.bf16.mxu0 %v8112_v32  ;;  %v2636_v33 = vld [vmem:[#allocation11 + $0x1860] sm:$0xff]  ;;  %v8384_v32 = vpack.c.bf16 %v2639_v20, %v2631_v27  ;;  %v8144_v17 = vpack.c.bf16 %v2701_v9, %v2693_v5  ;;  %v2765_v5 = vld [vmem:[#allocation11 + $0x1c68] sm:$0xff]  ;;  %v2759_v9 = vld [vmem:[#allocation11 + $0x1c38] sm:$0xff] }
 0x534   :  { %8369 = vmatprep.subr.bf16.mxu1 %v8368_v35  ;;  %v2653_v35 = vld [vmem:[#allocation11 + $0x18e8] sm:$0xff]  ;;  %v8130_v12 = vpack.c.bf16 %v2636_v33, %v2628_v31  ;;  %v2692_v27 = vld [vmem:[#allocation11 + $0x1a20] sm:$0xff] }
 0x535   :  { %v2700_v20 = vld [vmem:[#allocation11 + $0x1a60] sm:$0xff]  ;;  %v2709_v31 = vld [vmem:[#allocation11 + $0x1aa8] sm:$0xff] }
 0x536   :  { %8115 = vmatpush1.bf16.msra.mxu0 %v8114_v15  ;;  %v2652_v15 = vld [vmem:[#allocation11 + $0x18e0] sm:$0xff]  ;;  %v2717_v33 = vld [vmem:[#allocation11 + $0x1ae8] sm:$0xff]  ;;  %v8146_v59 = vpack.c.bf16 %v2700_v20, %v2692_v27  ;;  %v2758_v20 = vld [vmem:[#allocation11 + $0x1c30] sm:$0xff] }
 0x537   :  { %8371 = vmatpush1.bf16.msra.mxu1 %v8370_v45  ;;  %8117 = vmatprep.subr.bf16.mxu0 %v8116_v37  ;;  %v2646_v45 = vld [vmem:[#allocation11 + $0x18b0] sm:$0xff]  ;;  %v8132_v37 = vpack.c.bf16 %v2653_v35, %v2645_v19  ;;  %v8134_v51 = vpack.c.bf16 %v2652_v15, %v2644_v41  ;;  %v8148_v35 = vpack.c.bf16 %v2717_v33, %v2709_v31  ;;  %v2725_v15 = vld [vmem:[#allocation11 + $0x1b28] sm:$0xff]  ;;  %v2764_v27 = vld [vmem:[#allocation11 + $0x1c60] sm:$0xff] }
 0x538   :  { %8373 = vmatprep.subr.bf16.mxu1 %v8372_v47  ;;  %v8388_v47 = vpack.c.bf16 %v2655_v40, %v2647_v38  ;;  %v8390_v10 = vpack.c.bf16 %v2654_v39, %v2646_v45  ;;  %v2716_v38 = vld [vmem:[#allocation11 + $0x1ae0] sm:$0xff]  ;;  %v2710_v40 = vld [vmem:[#allocation11 + $0x1ab0] sm:$0xff]  ;;  %v2733_v45 = vld [vmem:[#allocation11 + $0x1b68] sm:$0xff] }
 0x539   :  { %v2718_v41 = vld [vmem:[#allocation11 + $0x1af0] sm:$0xff]  ;;  %v2735_v39 = vld [vmem:[#allocation11 + $0x1b78] sm:$0xff]  ;;  %v2781_v31 = vld [vmem:[#allocation11 + $0x1ce8] sm:$0xff] }
 0x53a   :  { %8119 = vmatpush1.bf16.msra.mxu0 %v8118_v55  ;;  %v2660_v55 = vld [vmem:[#allocation11 + $0x1920] sm:$0xff]  ;;  %v8406_v46 = vpack.c.bf16 %v2718_v41, %v2710_v40  ;;  %v2775_v33 = vld [vmem:[#allocation11 + $0x1cb8] sm:$0xff]  ;;  %v2789_v41 = vld [vmem:[#allocation11 + $0x1d28] sm:$0xff] }
 0x53b   :  { %8375 = vmatpush1.bf16.msra.mxu1 %v8374_v56  ;;  %8121 = vmatprep.subr.bf16.mxu0 %v8120_v0  ;;  %v2668_v56 = vld [vmem:[#allocation11 + $0x1960] sm:$0xff]  ;;  %v2662_v0 = vld [vmem:[#allocation11 + $0x1930] sm:$0xff] }
 0x53c   :  { %8377 = vmatprep.subr.bf16.mxu1 %v8376_v2  ;;  %v2685_v2 = vld [vmem:[#allocation11 + $0x19e8] sm:$0xff]  ;;  %v8138_v6 = vpack.c.bf16 %v2668_v56, %v2660_v55  ;;  %v8394_v7 = vpack.c.bf16 %v2670_v61, %v2662_v0  ;;  %v2734_v55 = vld [vmem:[#allocation11 + $0x1b70] sm:$0xff] }
 0x53d   :  { %v8140_v8 = vpack.c.bf16 %v2685_v2, %v2677_v62  ;;  %v2741_v56 = vld [vmem:[#allocation11 + $0x1ba8] sm:$0xff]  ;;  %v2743_v62 = vld [vmem:[#allocation11 + $0x1bb8] sm:$0xff] }
 0x53e   :  { %8123 = vmatpush1.bf16.msra.mxu0 %v8122_v13  ;;  %v2684_v13 = vld [vmem:[#allocation11 + $0x19e0] sm:$0xff]  ;;  %v2749_v0 = vld [vmem:[#allocation11 + $0x1be8] sm:$0xff]  ;;  %v2751_v2 = vld [vmem:[#allocation11 + $0x1bf8] sm:$0xff] }
 0x53f   :  { %8379 = vmatpush1.bf16.msra.mxu1 %v8378_v16  ;;  %8125 = vmatprep.subr.bf16.mxu0 %v8124_v21  ;;  %v2678_v16 = vld [vmem:[#allocation11 + $0x19b0] sm:$0xff]  ;;  %v8142_v24 = vpack.c.bf16 %v2684_v13, %v2676_v11  ;;  %v2748_v11 = vld [vmem:[#allocation11 + $0x1be0] sm:$0xff] }
 0x540   :  { %8381 = vmatprep.subr.bf16.mxu1 %v8380_v23  ;;  %v2703_v23 = vld [vmem:[#allocation11 + $0x1a78] sm:$0xff]  ;;  %v2742_v13 = vld [vmem:[#allocation11 + $0x1bb0] sm:$0xff] }
 0x542   :  { %8127 = vmatpush1.bf16.msra.mxu0 %v8126_v26  ;;  %v2694_v26 = vld [vmem:[#allocation11 + $0x1a30] sm:$0xff] }
 0x543   :  { %8383 = vmatpush1.bf16.msra.mxu1 %v8382_v63  ;;  %8129 = vmatprep.subr.bf16.mxu0 %v8128_v29  ;;  %v8400_v63 = vpack.c.bf16 %v2703_v23, %v2695_v18  ;;  %v2702_v29 = vld [vmem:[#allocation11 + $0x1a70] sm:$0xff]  ;;  %v2767_v18 = vld [vmem:[#allocation11 + $0x1c78] sm:$0xff] }
 0x544   :  { %8385 = vmatprep.subr.bf16.mxu1 %v8384_v32  ;;  %v2711_v32 = vld [vmem:[#allocation11 + $0x1ab8] sm:$0xff]  ;;  %v8402_v19 = vpack.c.bf16 %v2702_v29, %v2694_v26  ;;  %v8416_v26 = vpack.c.bf16 %v2767_v18, %v2759_v9  ;;  %v2773_v29 = vld [vmem:[#allocation11 + $0x1ca8] sm:$0xff] }
 0x545   :  { %3697 = vmatmul.mubr.f32.vlgmr.msra.gmra.mrb[14].mxu0 %v10404_v42  ;;  %v2831_v9 = vld [vmem:[#allocation11 + $0x1e78] sm:$0xff] }
 0x546   :  { %3981 = vmatmul.mubr.f32.vlgmr.msra.gmra.mrb[14].mxu1 %v10404_v42  ;;  %8131 = vmatpush1.bf16.msra.mxu0 %v8130_v12  ;;  %v2687_v42 = vld [vmem:[#allocation11 + $0x19f8] sm:$0xff]  ;;  %v2708_v12 = vld [vmem:[#allocation11 + $0x1aa0] sm:$0xff] }
 0x547   :  { %3767 = vmatprep.mubr.f32.mxu0 %v10406_v44  ;;  %8387 = vmatpush1.bf16.msra.mxu1 %v8386_v4  ;;  %v8396_v21 = vpack.c.bf16 %v2687_v42, %v2679_v3  ;;  %v8404_v4 = vpack.c.bf16 %v2719_v34, %v2711_v32  ;;  %v8150_v25 = vpack.c.bf16 %v2716_v38, %v2708_v12  ;;  %v2783_v32 = vld [vmem:[#allocation11 + $0x1cf8] sm:$0xff]  ;;  %v2780_v12 = vld [vmem:[#allocation11 + $0x1ce0] sm:$0xff]  ;;  %v2774_v38 = vld [vmem:[#allocation11 + $0x1cb0] sm:$0xff] }
 0x548   :  { %4051 = vmatprep.mubr.f32.mxu1 %v10406_v44  ;;  %8133 = vmatprep.subr.bf16.mxu0 %v8132_v37  ;;  %v2686_v44 = vld [vmem:[#allocation11 + $0x19f0] sm:$0xff]  ;;  %v2727_v37 = vld [vmem:[#allocation11 + $0x1b38] sm:$0xff]  ;;  %v8154_v42 = vpack.c.bf16 %v2732_v49, %v2724_v48  ;;  %v8420_v40 = vpack.c.bf16 %v2783_v32, %v2775_v33  ;;  %v2796_v48 = vld [vmem:[#allocation11 + $0x1d60] sm:$0xff] }
 0x549   :  { %8389 = vmatprep.subr.bf16.mxu1 %v8388_v47  ;;  %v8398_v36 = vpack.c.bf16 %v2686_v44, %v2678_v16  ;;  %v8152_v47 = vpack.c.bf16 %v2733_v45, %v2725_v15  ;;  %v8412_v16 = vpack.c.bf16 %v2751_v2, %v2743_v62  ;;  %v2757_v44 = vld [vmem:[#allocation11 + $0x1c28] sm:$0xff]  ;;  %v2791_v45 = vld [vmem:[#allocation11 + $0x1d38] sm:$0xff]  ;;  %v2790_v49 = vld [vmem:[#allocation11 + $0x1d30] sm:$0xff] }
 0x54a   :  { %8135 = vmatpush1.bf16.msra.mxu0 %v8134_v51  ;;  %v2726_v51 = vld [vmem:[#allocation11 + $0x1b30] sm:$0xff]  ;;  %v2797_v15 = vld [vmem:[#allocation11 + $0x1d68] sm:$0xff]  ;;  %v2815_v62 = vld [vmem:[#allocation11 + $0x1df8] sm:$0xff] }
 0x54b   :  { %8391 = vmatpush1.bf16.msra.mxu1 %v8390_v10  ;;  %8137 = vmatprep.subr.bf16.mxu0 %v8136_v53  ;;  %v8408_v53 = vpack.c.bf16 %v2735_v39, %v2727_v37  ;;  %v2799_v37 = vld [vmem:[#allocation11 + $0x1d78] sm:$0xff] }
 0x54c   :  { %8393 = vmatprep.subr.bf16.mxu1 %v8392_v60  ;;  %v2847_v33 = vld [vmem:[#allocation11 + $0x1ef8] sm:$0xff] }
 0x54e   :  { %8139 = vmatpush1.bf16.msra.mxu0 %v8138_v6  ;;  %v8410_v6 = vpack.c.bf16 %v2734_v55, %v2726_v51  ;;  %v8424_v51 = vpack.c.bf16 %v2799_v37, %v2791_v45  ;;  %v2805_v55 = vld [vmem:[#allocation11 + $0x1da8] sm:$0xff]  ;;  %v2863_v45 = vld [vmem:[#allocation11 + $0x1f78] sm:$0xff] }
 0x54f   :  { %8395 = vmatpush1.bf16.msra.mxu1 %v8394_v7  ;;  %8141 = vmatprep.subr.bf16.mxu0 %v8140_v8  ;;  %v8156_v7 = vpack.c.bf16 %v2749_v0, %v2741_v56  ;;  %v2740_v8 = vld [vmem:[#allocation11 + $0x1ba0] sm:$0xff]  ;;  %v2813_v56 = vld [vmem:[#allocation11 + $0x1de8] sm:$0xff]  ;;  %v2807_v0 = vld [vmem:[#allocation11 + $0x1db8] sm:$0xff] }
 0x550   :  { %8397 = vmatprep.subr.bf16.mxu1 %v8396_v21  ;;  %v2750_v21 = vld [vmem:[#allocation11 + $0x1bf0] sm:$0xff]  ;;  %v8158_v23 = vpack.c.bf16 %v2748_v11, %v2740_v8  ;;  %v2812_v8 = vld [vmem:[#allocation11 + $0x1de0] sm:$0xff] }
 0x551   :  { %v2806_v11 = vld [vmem:[#allocation11 + $0x1db0] sm:$0xff] }
 0x552   :  { %8143 = vmatpush1.bf16.msra.mxu0 %v8142_v24  ;;  %v8414_v24 = vpack.c.bf16 %v2750_v21, %v2742_v13  ;;  %v8428_v13 = vpack.c.bf16 %v2815_v62, %v2807_v0  ;;  %v2821_v21 = vld [vmem:[#allocation11 + $0x1e28] sm:$0xff]  ;;  %v2879_v0 = vld [vmem:[#allocation11 + $0x1ff8] sm:$0xff]  ;;  %v10443_v62 = vld [vmem:[#allocation13] sm:$0xff] }
 0x553   :  { %8399 = vmatpush1.bf16.msra.mxu1 %v8398_v36  ;;  %8145 = vmatprep.subr.bf16.mxu0 %v8144_v17  ;;  %v8160_v36 = vpack.c.bf16 %v2765_v5, %v2757_v44  ;;  %v2756_v17 = vld [vmem:[#allocation11 + $0x1c20] sm:$0xff]  ;;  %v2829_v44 = vld [vmem:[#allocation11 + $0x1e68] sm:$0xff]  ;;  %v2823_v5 = vld [vmem:[#allocation11 + $0x1e38] sm:$0xff] }
 0x554   :  { %8401 = vmatprep.subr.bf16.mxu1 %v8400_v63  ;;  %v2766_v63 = vld [vmem:[#allocation11 + $0x1c70] sm:$0xff]  ;;  %v8162_v34 = vpack.c.bf16 %v2764_v27, %v2756_v17  ;;  %v2828_v17 = vld [vmem:[#allocation11 + $0x1e60] sm:$0xff] }
 0x555   :  { %v2822_v27 = vld [vmem:[#allocation11 + $0x1e30] sm:$0xff] }
 0x556   :  { %8147 = vmatpush1.bf16.msra.mxu0 %v8146_v59  ;;  %v8418_v59 = vpack.c.bf16 %v2766_v63, %v2758_v20  ;;  %v8432_v20 = vpack.c.bf16 %v2831_v9, %v2823_v5  ;;  %v2837_v63 = vld [vmem:[#allocation11 + $0x1ea8] sm:$0xff]  ;;  %v2889_v5 = vrot.slane %v10443_v62, %v10341_v28  ;;  %v4069_v9 = vld [vmem:[#allocation14 + $0x18] sm:$0xff] }
 0x557   :  { %8403 = vmatpush1.bf16.msra.mxu1 %v8402_v19  ;;  %8149 = vmatprep.subr.bf16.mxu0 %v8148_v35  ;;  %v8164_v19 = vpack.c.bf16 %v2781_v31, %v2773_v29  ;;  %v2772_v35 = vld [vmem:[#allocation11 + $0x1ca0] sm:$0xff]  ;;  %v2845_v29 = vld [vmem:[#allocation11 + $0x1ee8] sm:$0xff]  ;;  %v2839_v31 = vld [vmem:[#allocation11 + $0x1eb8] sm:$0xff] }
 0x558   :  { %v10435_v10 = vpop.f32.mrb[12].mxu0  ;;  %8405 = vmatprep.subr.bf16.mxu1 %v8404_v4  ;;  %v2782_v4 = vld [vmem:[#allocation11 + $0x1cf0] sm:$0xff]  ;;  %v8166_v39 = vpack.c.bf16 %v2780_v12, %v2772_v35  ;;  %v2844_v35 = vld [vmem:[#allocation11 + $0x1ee0] sm:$0xff] }
 0x559   :  { %v10437_v60 = vpop.f32.mrb[12].mxu1  ;;  %v10439_v61 = vpop.f32.mrb[13].mxu0  ;;  %v2838_v12 = vld [vmem:[#allocation11 + $0x1eb0] sm:$0xff] }
 0x55a   :  { %v10441_v3 = vpop.f32.mrb[13].mxu1  ;;  %8151 = vmatpush1.bf16.msra.mxu0 %v8150_v25  ;;  %v8422_v25 = vpack.c.bf16 %v2782_v4, %v2774_v38  ;;  %v8436_v38 = vpack.c.bf16 %v2847_v33, %v2839_v31  ;;  %v2853_v4 = vld [vmem:[#allocation11 + $0x1f28] sm:$0xff]  ;;  %v4079_v31 = vld [vmem:[#allocation14 + $0x68] sm:$0xff]  ;;  %v4085_v33 = vld [vmem:[#allocation14 + $0x98] sm:$0xff] }
 0x55b   :  { %8407 = vmatpush1.bf16.msra.mxu1 %v8406_v46  ;;  %8153 = vmatprep.subr.bf16.mxu0 %v8152_v47  ;;  %v8168_v46 = vpack.c.bf16 %v2797_v15, %v2789_v41  ;;  %v2788_v47 = vld [vmem:[#allocation11 + $0x1d20] sm:$0xff]  ;;  %v2861_v41 = vld [vmem:[#allocation11 + $0x1f68] sm:$0xff]  ;;  %v2855_v15 = vld [vmem:[#allocation11 + $0x1f38] sm:$0xff] }
 0x55c   :  { %8409 = vmatprep.subr.bf16.mxu1 %v8408_v53  ;;  %v2798_v53 = vld [vmem:[#allocation11 + $0x1d70] sm:$0xff]  ;;  %v8170_v2 = vpack.c.bf16 %v2796_v48, %v2788_v47  ;;  %v2860_v47 = vld [vmem:[#allocation11 + $0x1f60] sm:$0xff] }
 0x55d   :  { %v2854_v48 = vld [vmem:[#allocation11 + $0x1f30] sm:$0xff] }
 0x55e   :  { %8155 = vmatpush1.bf16.msra.mxu0 %v8154_v42  ;;  %v8426_v42 = vpack.c.bf16 %v2798_v53, %v2790_v49  ;;  %v8440_v49 = vpack.c.bf16 %v2863_v45, %v2855_v15  ;;  %v2869_v53 = vld [vmem:[#allocation11 + $0x1fa8] sm:$0xff]  ;;  %v4097_v15 = vld [vmem:[#allocation14 + $0xf8] sm:$0xff] }
 0x55f   :  { %8411 = vmatpush1.bf16.msra.mxu1 %v8410_v6  ;;  %8157 = vmatprep.subr.bf16.mxu0 %v8156_v7  ;;  %v8172_v6 = vpack.c.bf16 %v2813_v56, %v2805_v55  ;;  %v2804_v7 = vld [vmem:[#allocation11 + $0x1da0] sm:$0xff]  ;;  %v2877_v55 = vld [vmem:[#allocation11 + $0x1fe8] sm:$0xff]  ;;  %v2871_v56 = vld [vmem:[#allocation11 + $0x1fb8] sm:$0xff] }
 0x560   :  { %8413 = vmatprep.subr.bf16.mxu1 %v8412_v16  ;;  %v2814_v16 = vld [vmem:[#allocation11 + $0x1df0] sm:$0xff]  ;;  %v8174_v18 = vpack.c.bf16 %v2812_v8, %v2804_v7  ;;  %v2868_v7 = vld [vmem:[#allocation11 + $0x1fa0] sm:$0xff] }
 0x561   :  { %v2876_v8 = vld [vmem:[#allocation11 + $0x1fe0] sm:$0xff] }
 0x562   :  { %8159 = vmatpush1.bf16.msra.mxu0 %v8158_v23  ;;  %v8430_v23 = vpack.c.bf16 %v2814_v16, %v2806_v11  ;;  %v2870_v11 = vld [vmem:[#allocation11 + $0x1fb0] sm:$0xff] }
 0x563   :  { %8415 = vmatpush1.bf16.msra.mxu1 %v8414_v24  ;;  %8161 = vmatprep.subr.bf16.mxu0 %v8160_v36  ;;  %v8176_v24 = vpack.c.bf16 %v2829_v44, %v2821_v21  ;;  %v2820_v36 = vld [vmem:[#allocation11 + $0x1e20] sm:$0xff]  ;;  %v2878_v16 = vld [vmem:[#allocation11 + $0x1ff0] sm:$0xff] }
 0x564   :  { %8417 = vmatprep.subr.bf16.mxu1 %v8416_v26  ;;  %v2830_v26 = vld [vmem:[#allocation11 + $0x1e70] sm:$0xff]  ;;  %v8178_v32 = vpack.c.bf16 %v2828_v17, %v2820_v36  ;;  %v4073_v44 = vld [vmem:[#allocation14 + $0x38] sm:$0xff]  ;;  %v4066_v17 = vld [vmem:[#allocation14] sm:$0xff] }
 0x565   :  { %v4067_v21 = vld [vmem:[#allocation14 + $0x8] sm:$0xff] }
 0x566   :  { %8163 = vmatpush1.bf16.msra.mxu0 %v8162_v34  ;;  %v8434_v34 = vpack.c.bf16 %v2830_v26, %v2822_v27  ;;  %v8448_v36 = vpack.c.bf16 %v4073_v44, %v4067_v21  ;;  %v4072_v27 = vld [vmem:[#allocation14 + $0x30] sm:$0xff]  ;;  %v4110_v21 = vld [vmem:[#allocation14 + $0x160] sm:$0xff]  ;;  %v4115_v44 = vld [vmem:[#allocation14 + $0x188] sm:$0xff] }
 0x567   :  { %8419 = vmatpush1.bf16.msra.mxu1 %v8418_v59  ;;  %8165 = vmatprep.subr.bf16.mxu0 %v8164_v19  ;;  %v8180_v59 = vpack.c.bf16 %v2845_v29, %v2837_v63  ;;  %v2836_v19 = vld [vmem:[#allocation11 + $0x1ea0] sm:$0xff]  ;;  %v4068_v26 = vld [vmem:[#allocation14 + $0x10] sm:$0xff]  ;;  %v4074_v63 = vld [vmem:[#allocation14 + $0x40] sm:$0xff]  ;;  %v9513_v29 = vadd.f32 %v10439_v61, %v2889_v5 }
 0x568   :  { %8421 = vmatprep.subr.bf16.mxu1 %v8420_v40  ;;  %v2846_v40 = vld [vmem:[#allocation11 + $0x1ef0] sm:$0xff]  ;;  %v8182_v37 = vpack.c.bf16 %v2844_v35, %v2836_v19  ;;  %v8706_v19 = vpack.c.bf16 %v4074_v63, %v4068_v26  ;;  %v4078_v35 = vld [vmem:[#allocation14 + $0x60] sm:$0xff]  ;;  %v4121_v5 = vld [vmem:[#allocation14 + $0x1b8] sm:$0xff] }
 0x569   :  { %v10448_v45 = vmax.f32 %v9513_v29, 0.0  ;;  %v4122_v63 = vld [vmem:[#allocation14 + $0x1c0] sm:$0xff]  ;;  %v4127_v29 = vld [vmem:[#allocation14 + $0x1e8] sm:$0xff] }
 0x56a   :  { %8167 = vmatpush1.bf16.msra.mxu0 %v8166_v39  ;;  %v8438_v39 = vpack.c.bf16 %v2846_v40, %v2838_v12  ;;  %v4084_v12 = vld [vmem:[#allocation14 + $0x90] sm:$0xff]  ;;  %v8452_v40 = vpack.c.bf16 %v4085_v33, %v4079_v31  ;;  %v4133_v31 = vld [vmem:[#allocation14 + $0x218] sm:$0xff] }
 0x56b   :  { %8423 = vmatpush1.bf16.msra.mxu1 %v8422_v25  ;;  %8169 = vmatprep.subr.bf16.mxu0 %v8168_v46  ;;  %v8184_v25 = vpack.c.bf16 %v2861_v41, %v2853_v4  ;;  %v2852_v46 = vld [vmem:[#allocation11 + $0x1f20] sm:$0xff]  ;;  %v4086_v4 = vld [vmem:[#allocation14 + $0xa0] sm:$0xff]  ;;  %v4091_v41 = vld [vmem:[#allocation14 + $0xc8] sm:$0xff] }
 0x56c   :  { %8425 = vmatprep.subr.bf16.mxu1 %v8424_v51  ;;  %v2862_v51 = vld [vmem:[#allocation11 + $0x1f70] sm:$0xff]  ;;  %v4129_v33 = vld [vmem:[#allocation14 + $0x1f8] sm:$0xff] }
 0x56e   :  { %8171 = vmatpush1.bf16.msra.mxu0 %v8170_v2  ;;  %v8186_v2 = vpack.c.bf16 %v2860_v47, %v2852_v46  ;;  %v8456_v47 = vpack.c.bf16 %v4097_v15, %v4091_v41  ;;  %v4139_v41 = vld [vmem:[#allocation14 + $0x248] sm:$0xff]  ;;  %v4145_v15 = vld [vmem:[#allocation14 + $0x278] sm:$0xff] }
 0x56f   :  { %8427 = vmatpush1.bf16.msra.mxu1 %v8426_v42  ;;  %8173 = vmatprep.subr.bf16.mxu0 %v8172_v6  ;;  %v8442_v42 = vpack.c.bf16 %v2862_v51, %v2854_v48  ;;  %v8188_v6 = vpack.c.bf16 %v2877_v55, %v2869_v53  ;;  %v4090_v48 = vld [vmem:[#allocation14 + $0xc0] sm:$0xff]  ;;  %v4092_v51 = vld [vmem:[#allocation14 + $0xd0] sm:$0xff] }
 0x570   :  { %8429 = vmatprep.subr.bf16.mxu1 %v8428_v13  ;;  %v8444_v13 = vpack.c.bf16 %v2879_v0, %v2871_v56  ;;  %v4098_v55 = vld [vmem:[#allocation14 + $0x100] sm:$0xff]  ;;  %v4103_v56 = vld [vmem:[#allocation14 + $0x128] sm:$0xff]  ;;  %v4109_v0 = vld [vmem:[#allocation14 + $0x158] sm:$0xff] }
 0x572   :  { %8175 = vmatpush1.bf16.msra.mxu0 %v8174_v18  ;;  %v4075_v18 = vld [vmem:[#allocation14 + $0x48] sm:$0xff] }
 0x573   :  { %8431 = vmatpush1.bf16.msra.mxu1 %v8430_v23  ;;  %8177 = vmatprep.subr.bf16.mxu0 %v8176_v24  ;;  %v8190_v23 = vpack.c.bf16 %v2876_v8, %v2868_v7  ;;  %v8446_v24 = vpack.c.bf16 %v2878_v16, %v2870_v11  ;;  %v8460_v7 = vpack.c.bf16 %v4109_v0, %v4103_v56  ;;  %v4102_v8 = vld [vmem:[#allocation14 + $0x120] sm:$0xff]  ;;  %v4108_v11 = vld [vmem:[#allocation14 + $0x150] sm:$0xff]  ;;  %v4157_v56 = vld [vmem:[#allocation14 + $0x2d8] sm:$0xff] }
 0x574   :  { %8433 = vmatprep.subr.bf16.mxu1 %v8432_v20  ;;  %v8704_v20 = vpack.c.bf16 %v4075_v18, %v4069_v9  ;;  %v4117_v9 = vld [vmem:[#allocation14 + $0x198] sm:$0xff]  ;;  %v4123_v18 = vld [vmem:[#allocation14 + $0x1c8] sm:$0xff] }
 0x575   :  { %v8720_v26 = vpack.c.bf16 %v4123_v18, %v4117_v9  ;;  %v4153_v0 = vld [vmem:[#allocation14 + $0x2b8] sm:$0xff]  ;;  %v4171_v9 = vld [vmem:[#allocation14 + $0x348] sm:$0xff] }
 0x576   :  { %8179 = vmatpush1.bf16.msra.mxu0 %v8178_v32  ;;  %v8450_v32 = vpack.c.bf16 %v4072_v27, %v4066_v17  ;;  %v4114_v17 = vld [vmem:[#allocation14 + $0x180] sm:$0xff]  ;;  %v4120_v27 = vld [vmem:[#allocation14 + $0x1b0] sm:$0xff] }
 0x577   :  { %8435 = vmatpush1.bf16.msra.mxu1 %v8434_v34  ;;  %8181 = vmatprep.subr.bf16.mxu0 %v8180_v59  ;;  %v4081_v34 = vld [vmem:[#allocation14 + $0x78] sm:$0xff]  ;;  %v4087_v59 = vld [vmem:[#allocation14 + $0xa8] sm:$0xff] }
 0x578   :  { %8437 = vmatprep.subr.bf16.mxu1 %v8436_v38  ;;  %v4080_v38 = vld [vmem:[#allocation14 + $0x70] sm:$0xff]  ;;  %v8708_v61 = vpack.c.bf16 %v4087_v59, %v4081_v34  ;;  %v8466_v34 = vpack.c.bf16 %v4120_v27, %v4114_v17 }
 0x579   :  { %v8710_v46 = vpack.c.bf16 %v4086_v4, %v4080_v38  ;;  %v4128_v38 = vld [vmem:[#allocation14 + $0x1f0] sm:$0xff]  ;;  %v4134_v4 = vld [vmem:[#allocation14 + $0x220] sm:$0xff] }
 0x57a   :  { %8183 = vmatpush1.bf16.msra.mxu0 %v8182_v37  ;;  %v4093_v37 = vld [vmem:[#allocation14 + $0xd8] sm:$0xff]  ;;  %v4168_v17 = vld [vmem:[#allocation14 + $0x330] sm:$0xff] }
 0x57b   :  { %8439 = vmatpush1.bf16.msra.mxu1 %v8438_v39  ;;  %8185 = vmatprep.subr.bf16.mxu0 %v8184_v25  ;;  %v4099_v39 = vld [vmem:[#allocation14 + $0x108] sm:$0xff]  ;;  %v8454_v25 = vpack.c.bf16 %v4084_v12, %v4078_v35  ;;  %v4126_v35 = vld [vmem:[#allocation14 + $0x1e0] sm:$0xff]  ;;  %v4132_v12 = vld [vmem:[#allocation14 + $0x210] sm:$0xff] }
 0x57c   :  { %8441 = vmatprep.subr.bf16.mxu1 %v8440_v49  ;;  %v4096_v49 = vld [vmem:[#allocation14 + $0xf0] sm:$0xff]  ;;  %v8712_v53 = vpack.c.bf16 %v4099_v39, %v4093_v37  ;;  %v4147_v37 = vld [vmem:[#allocation14 + $0x288] sm:$0xff]  ;;  %v8470_v39 = vpack.c.bf16 %v4132_v12, %v4126_v35 }
 0x57d   :  { %v4164_v27 = vld [vmem:[#allocation14 + $0x310] sm:$0xff] }
 0x57e   :  { %8187 = vmatpush1.bf16.msra.mxu0 %v8186_v2  ;;  %v4105_v2 = vld [vmem:[#allocation14 + $0x138] sm:$0xff]  ;;  %v4180_v35 = vld [vmem:[#allocation14 + $0x390] sm:$0xff] }
 0x57f   :  { %8443 = vmatpush1.bf16.msra.mxu1 %v8442_v42  ;;  %8189 = vmatprep.subr.bf16.mxu0 %v8188_v6  ;;  %v8458_v42 = vpack.c.bf16 %v4096_v49, %v4090_v48  ;;  %v8714_v6 = vpack.c.bf16 %v4098_v55, %v4092_v51  ;;  %v4144_v48 = vld [vmem:[#allocation14 + $0x270] sm:$0xff]  ;;  %v4151_v55 = vld [vmem:[#allocation14 + $0x2a8] sm:$0xff] }
 0x580   :  { %8445 = vmatprep.subr.bf16.mxu1 %v8444_v13  ;;  %v4104_v13 = vld [vmem:[#allocation14 + $0x130] sm:$0xff] }
 0x581   :  { %v4140_v49 = vld [vmem:[#allocation14 + $0x250] sm:$0xff] }
 0x582   :  { %8191 = vmatpush1.bf16.msra.mxu0 %v8190_v23  ;;  %v8462_v23 = vpack.c.bf16 %v4108_v11, %v4102_v8  ;;  %v4156_v8 = vld [vmem:[#allocation14 + $0x2d0] sm:$0xff] }
 0x583   :  { %8447 = vmatpush1.bf16.msra.mxu1 %v8446_v24  ;;  %8449 = vmatprep.subr.bf16.mxu0 %v8448_v36  ;;  %v8718_v24 = vpack.c.bf16 %v4110_v21, %v4104_v13  ;;  %v8464_v36 = vpack.c.bf16 %v4121_v5, %v4115_v44  ;;  %v4152_v11 = vld [vmem:[#allocation14 + $0x2b0] sm:$0xff]  ;;  %v4163_v21 = vld [vmem:[#allocation14 + $0x308] sm:$0xff]  ;;  %v4169_v44 = vld [vmem:[#allocation14 + $0x338] sm:$0xff] }
 0x584   :  { %8705 = vmatprep.subr.bf16.mxu1 %v8704_v20  ;;  %v4116_v20 = vld [vmem:[#allocation14 + $0x190] sm:$0xff]  ;;  %v4165_v5 = vld [vmem:[#allocation14 + $0x318] sm:$0xff] }
 0x585   :  { %3768 = vmatmul.mubr.f32.vlgmr.msra.gmra.mrb[14].mxu0 %v10417_v52  ;;  %v8722_v59 = vpack.c.bf16 %v4122_v63, %v4116_v20  ;;  %v8736_v20 = vpack.c.bf16 %v4171_v9, %v4165_v5  ;;  %v4175_v63 = vld [vmem:[#allocation14 + $0x368] sm:$0xff]  ;;  %v4176_v12 = vld [vmem:[#allocation14 + $0x370] sm:$0xff] }
 0x586   :  { %4052 = vmatmul.mubr.f32.vlgmr.msra.gmra.mrb[14].mxu1 %v10417_v52  ;;  %8451 = vmatpush1.bf16.msra.mxu0 %v8450_v32  ;;  %v4111_v52 = vld [vmem:[#allocation14 + $0x168] sm:$0xff] }
 0x587   :  { %4930 = vmatprep.mubr.f32.mxu0 %v10448_v45  ;;  %8707 = vmatpush1.bf16.msra.mxu1 %v8706_v19  ;;  %v8716_v16 = vpack.c.bf16 %v4111_v52, %v4105_v2  ;;  %v4135_v32 = vld [vmem:[#allocation14 + $0x228] sm:$0xff]  ;;  %v8468_v19 = vpack.c.bf16 %v4133_v31, %v4127_v29  ;;  %v4181_v29 = vld [vmem:[#allocation14 + $0x398] sm:$0xff] }
 0x588   :  { %5214 = vmatprep.mubr.f32.mxu1 %v10448_v45  ;;  %8453 = vmatprep.subr.bf16.mxu0 %v8452_v40  ;;  %v8724_v40 = vpack.c.bf16 %v4135_v32, %v4129_v33  ;;  %v4159_v2 = vld [vmem:[#allocation14 + $0x2e8] sm:$0xff]  ;;  %v4177_v31 = vld [vmem:[#allocation14 + $0x378] sm:$0xff] }
 0x589   :  { %8709 = vmatprep.subr.bf16.mxu1 %v8708_v61  ;;  %v4141_v61 = vld [vmem:[#allocation14 + $0x258] sm:$0xff]  ;;  %v8732_v13 = vpack.c.bf16 %v4159_v2, %v4153_v0  ;;  %v4183_v33 = vld [vmem:[#allocation14 + $0x3a8] sm:$0xff] }
 0x58a   :  { %8455 = vmatpush1.bf16.msra.mxu0 %v8454_v25  ;;  %v8726_v25 = vpack.c.bf16 %v4134_v4, %v4128_v38  ;;  %v8728_v51 = vpack.c.bf16 %v4147_v37, %v4141_v61  ;;  %v8740_v38 = vpack.c.bf16 %v4183_v33, %v4177_v31  ;;  %v4187_v4 = vld [vmem:[#allocation14 + $0x3c8] sm:$0xff] }
 0x58b   :  { %8711 = vmatpush1.bf16.msra.mxu1 %v8710_v46  ;;  %8457 = vmatprep.subr.bf16.mxu0 %v8456_v47  ;;  %v8472_v46 = vpack.c.bf16 %v4145_v15, %v4139_v41  ;;  %v4138_v47 = vld [vmem:[#allocation14 + $0x240] sm:$0xff]  ;;  %v4193_v41 = vld [vmem:[#allocation14 + $0x3f8] sm:$0xff]  ;;  %v4195_v61 = vld [vmem:[#allocation14 + $0x408] sm:$0xff] }
 0x58c   :  { %8713 = vmatprep.subr.bf16.mxu1 %v8712_v53  ;;  %v4146_v53 = vld [vmem:[#allocation14 + $0x280] sm:$0xff]  ;;  %v8474_v52 = vpack.c.bf16 %v4144_v48, %v4138_v47  ;;  %v4189_v15 = vld [vmem:[#allocation14 + $0x3d8] sm:$0xff]  ;;  %v4192_v47 = vld [vmem:[#allocation14 + $0x3f0] sm:$0xff] }
 0x58d   :  { %v4188_v48 = vld [vmem:[#allocation14 + $0x3d0] sm:$0xff]  ;;  %v4207_v0 = vld [vmem:[#allocation14 + $0x468] sm:$0xff] }
 0x58e   :  { %8459 = vmatpush1.bf16.msra.mxu0 %v8458_v42  ;;  %v8730_v42 = vpack.c.bf16 %v4146_v53, %v4140_v49  ;;  %v8744_v49 = vpack.c.bf16 %v4195_v61, %v4189_v15  ;;  %v4199_v53 = vld [vmem:[#allocation14 + $0x428] sm:$0xff] }
 0x58f   :  { %8715 = vmatpush1.bf16.msra.mxu1 %v8714_v6  ;;  %8461 = vmatprep.subr.bf16.mxu0 %v8460_v7  ;;  %v8476_v6 = vpack.c.bf16 %v4157_v56, %v4151_v55  ;;  %v4150_v7 = vld [vmem:[#allocation14 + $0x2a0] sm:$0xff]  ;;  %v4205_v55 = vld [vmem:[#allocation14 + $0x458] sm:$0xff]  ;;  %v4219_v5 = vld [vmem:[#allocation14 + $0x4c8] sm:$0xff] }
 0x590   :  { %8717 = vmatprep.subr.bf16.mxu1 %v8716_v16  ;;  %v4158_v16 = vld [vmem:[#allocation14 + $0x2e0] sm:$0xff]  ;;  %v8478_v18 = vpack.c.bf16 %v4156_v8, %v4150_v7  ;;  %v4201_v56 = vld [vmem:[#allocation14 + $0x438] sm:$0xff]  ;;  %v4204_v7 = vld [vmem:[#allocation14 + $0x450] sm:$0xff] }
 0x591   :  { %v4200_v8 = vld [vmem:[#allocation14 + $0x430] sm:$0xff]  ;;  %v4231_v31 = vld [vmem:[#allocation14 + $0x528] sm:$0xff] }
 0x592   :  { %8463 = vmatpush1.bf16.msra.mxu0 %v8462_v23  ;;  %v8734_v23 = vpack.c.bf16 %v4158_v16, %v4152_v11  ;;  %v8748_v11 = vpack.c.bf16 %v4207_v0, %v4201_v56  ;;  %v4211_v16 = vld [vmem:[#allocation14 + $0x488] sm:$0xff] }
 0x593   :  { %8719 = vmatpush1.bf16.msra.mxu1 %v8718_v24  ;;  %8465 = vmatprep.subr.bf16.mxu0 %v8464_v36  ;;  %v8480_v24 = vpack.c.bf16 %v4169_v44, %v4163_v21  ;;  %v4162_v36 = vld [vmem:[#allocation14 + $0x300] sm:$0xff]  ;;  %v4217_v21 = vld [vmem:[#allocation14 + $0x4b8] sm:$0xff]  ;;  %v4243_v15 = vld [vmem:[#allocation14 + $0x588] sm:$0xff] }
 0x594   :  { %8721 = vmatprep.subr.bf16.mxu1 %v8720_v26  ;;  %v4170_v26 = vld [vmem:[#allocation14 + $0x340] sm:$0xff]  ;;  %v8482_v32 = vpack.c.bf16 %v4168_v17, %v4162_v36  ;;  %v4213_v44 = vld [vmem:[#allocation14 + $0x498] sm:$0xff]  ;;  %v4216_v36 = vld [vmem:[#allocation14 + $0x4b0] sm:$0xff] }
 0x595   :  { %v4212_v17 = vld [vmem:[#allocation14 + $0x490] sm:$0xff]  ;;  %v4255_v56 = vld [vmem:[#allocation14 + $0x5e8] sm:$0xff] }
 0x596   :  { %8467 = vmatpush1.bf16.msra.mxu0 %v8466_v34  ;;  %v8738_v34 = vpack.c.bf16 %v4170_v26, %v4164_v27  ;;  %v8752_v27 = vpack.c.bf16 %v4219_v5, %v4213_v44  ;;  %v4223_v26 = vld [vmem:[#allocation14 + $0x4e8] sm:$0xff]  ;;  %v2897_v44 = vrot.slane %v10443_v62, %v10344_v30  ;;  %v4261_v5 = vld [vmem:[#allocation14 + $0x618] sm:$0xff] }
 0x597   :  { %8723 = vmatpush1.bf16.msra.mxu1 %v8722_v59  ;;  %8469 = vmatprep.subr.bf16.mxu0 %v8468_v19  ;;  %v8484_v59 = vpack.c.bf16 %v4181_v29, %v4175_v63  ;;  %v4174_v19 = vld [vmem:[#allocation14 + $0x360] sm:$0xff]  ;;  %v4229_v63 = vld [vmem:[#allocation14 + $0x518] sm:$0xff] }
 0x598   :  { %8725 = vmatprep.subr.bf16.mxu1 %v8724_v40  ;;  %v4182_v40 = vld [vmem:[#allocation14 + $0x3a0] sm:$0xff]  ;;  %v8486_v37 = vpack.c.bf16 %v4180_v35, %v4174_v19  ;;  %v4225_v29 = vld [vmem:[#allocation14 + $0x4f8] sm:$0xff]  ;;  %v4228_v19 = vld [vmem:[#allocation14 + $0x510] sm:$0xff] }
 0x599   :  { %v4224_v35 = vld [vmem:[#allocation14 + $0x4f0] sm:$0xff] }
 0x59a   :  { %8471 = vmatpush1.bf16.msra.mxu0 %v8470_v39  ;;  %v8742_v39 = vpack.c.bf16 %v4182_v40, %v4176_v12  ;;  %v8756_v12 = vpack.c.bf16 %v4231_v31, %v4225_v29  ;;  %v4235_v40 = vld [vmem:[#allocation14 + $0x548] sm:$0xff]  ;;  %v9515_v29 = vadd.f32 %v10441_v3, %v2897_v44  ;;  %v4313_v44 = vld [vmem:[#allocation14 + $0x7b8] sm:$0xff] }
 0x59b   :  { %8727 = vmatpush1.bf16.msra.mxu1 %v8726_v25  ;;  %8473 = vmatprep.subr.bf16.mxu0 %v8472_v46  ;;  %v8488_v25 = vpack.c.bf16 %v4193_v41, %v4187_v4  ;;  %v4186_v46 = vld [vmem:[#allocation14 + $0x3c0] sm:$0xff]  ;;  %v4241_v4 = vld [vmem:[#allocation14 + $0x578] sm:$0xff]  ;;  %v4271_v31 = vld [vmem:[#allocation14 + $0x668] sm:$0xff] }
 0x59c   :  { %8729 = vmatprep.subr.bf16.mxu1 %v8728_v51  ;;  %v4194_v51 = vld [vmem:[#allocation14 + $0x400] sm:$0xff]  ;;  %v8490_v2 = vpack.c.bf16 %v4192_v47, %v4186_v46  ;;  %v4237_v41 = vld [vmem:[#allocation14 + $0x558] sm:$0xff]  ;;  %v4240_v46 = vld [vmem:[#allocation14 + $0x570] sm:$0xff]  ;;  %v10462_v3 = vmax.f32 %v9515_v29, 0.0 }
 0x59d   :  { %v4236_v47 = vld [vmem:[#allocation14 + $0x550] sm:$0xff]  ;;  %v4325_v29 = vld [vmem:[#allocation14 + $0x818] sm:$0xff] }
 0x59e   :  { %8475 = vmatpush1.bf16.msra.mxu0 %v8474_v52  ;;  %v8746_v52 = vpack.c.bf16 %v4194_v51, %v4188_v48  ;;  %v8760_v48 = vpack.c.bf16 %v4243_v15, %v4237_v41  ;;  %v4247_v51 = vld [vmem:[#allocation14 + $0x5a8] sm:$0xff]  ;;  %v4289_v41 = vld [vmem:[#allocation14 + $0x6f8] sm:$0xff] }
 0x59f   :  { %8731 = vmatpush1.bf16.msra.mxu1 %v8730_v42  ;;  %8477 = vmatprep.subr.bf16.mxu0 %v8476_v6  ;;  %v8492_v42 = vpack.c.bf16 %v4205_v55, %v4199_v53  ;;  %v4198_v6 = vld [vmem:[#allocation14 + $0x420] sm:$0xff]  ;;  %v4253_v53 = vld [vmem:[#allocation14 + $0x5d8] sm:$0xff] }
 0x5a0   :  { %8733 = vmatprep.subr.bf16.mxu1 %v8732_v13  ;;  %v4206_v13 = vld [vmem:[#allocation14 + $0x460] sm:$0xff]  ;;  %v8494_v9 = vpack.c.bf16 %v4204_v7, %v4198_v6  ;;  %v4249_v55 = vld [vmem:[#allocation14 + $0x5b8] sm:$0xff]  ;;  %v4252_v7 = vld [vmem:[#allocation14 + $0x5d0] sm:$0xff] }
 0x5a1   :  { %v4246_v6 = vld [vmem:[#allocation14 + $0x5a0] sm:$0xff] }
 0x5a2   :  { %8479 = vmatpush1.bf16.msra.mxu0 %v8478_v18  ;;  %v8750_v18 = vpack.c.bf16 %v4206_v13, %v4200_v8  ;;  %v4248_v8 = vld [vmem:[#allocation14 + $0x5b0] sm:$0xff]  ;;  %v4254_v13 = vld [vmem:[#allocation14 + $0x5e0] sm:$0xff] }
 0x5a3   :  { %8735 = vmatpush1.bf16.msra.mxu1 %v8734_v23  ;;  %8481 = vmatprep.subr.bf16.mxu0 %v8480_v24  ;;  %v8496_v23 = vpack.c.bf16 %v4217_v21, %v4211_v16  ;;  %v4210_v24 = vld [vmem:[#allocation14 + $0x480] sm:$0xff]  ;;  %v4259_v16 = vld [vmem:[#allocation14 + $0x608] sm:$0xff]  ;;  %v4265_v21 = vld [vmem:[#allocation14 + $0x638] sm:$0xff] }
 0x5a4   :  { %8737 = vmatprep.subr.bf16.mxu1 %v8736_v20  ;;  %v4218_v20 = vld [vmem:[#allocation14 + $0x4c0] sm:$0xff]  ;;  %v8498_v33 = vpack.c.bf16 %v4216_v36, %v4210_v24  ;;  %v8766_v24 = vpack.c.bf16 %v4254_v13, %v4248_v8  ;;  %v8512_v36 = vpack.c.bf16 %v4265_v21, %v4259_v16  ;;  %v4300_v8 = vld [vmem:[#allocation14 + $0x750] sm:$0xff]  ;;  %v4307_v21 = vld [vmem:[#allocation14 + $0x788] sm:$0xff] }
 0x5a5   :  { %v4302_v16 = vld [vmem:[#allocation14 + $0x760] sm:$0xff] }
 0x5a6   :  { %8483 = vmatpush1.bf16.msra.mxu0 %v8482_v32  ;;  %v8754_v32 = vpack.c.bf16 %v4218_v20, %v4212_v17  ;;  %v4258_v17 = vld [vmem:[#allocation14 + $0x600] sm:$0xff] }
 0x5a7   :  { %8739 = vmatpush1.bf16.msra.mxu1 %v8738_v34  ;;  %8485 = vmatprep.subr.bf16.mxu0 %v8484_v59  ;;  %v8500_v34 = vpack.c.bf16 %v4229_v63, %v4223_v26  ;;  %v4222_v59 = vld [vmem:[#allocation14 + $0x4e0] sm:$0xff]  ;;  %v4260_v26 = vld [vmem:[#allocation14 + $0x610] sm:$0xff] }
 0x5a8   :  { %8741 = vmatprep.subr.bf16.mxu1 %v8740_v38  ;;  %v4230_v38 = vld [vmem:[#allocation14 + $0x520] sm:$0xff]  ;;  %v8502_v61 = vpack.c.bf16 %v4228_v19, %v4222_v59 }
 0x5a9   :  { %v4266_v63 = vld [vmem:[#allocation14 + $0x640] sm:$0xff] }
 0x5aa   :  { %8487 = vmatpush1.bf16.msra.mxu0 %v8486_v37  ;;  %v8758_v37 = vpack.c.bf16 %v4230_v38, %v4224_v35  ;;  %v4270_v19 = vld [vmem:[#allocation14 + $0x660] sm:$0xff]  ;;  %v4276_v35 = vld [vmem:[#allocation14 + $0x690] sm:$0xff] }
 0x5ab   :  { %8743 = vmatpush1.bf16.msra.mxu1 %v8742_v39  ;;  %8489 = vmatprep.subr.bf16.mxu0 %v8488_v25  ;;  %v8504_v39 = vpack.c.bf16 %v4241_v4, %v4235_v40  ;;  %v4234_v25 = vld [vmem:[#allocation14 + $0x540] sm:$0xff]  ;;  %v4283_v4 = vld [vmem:[#allocation14 + $0x6c8] sm:$0xff] }
 0x5ac   :  { %8745 = vmatprep.subr.bf16.mxu1 %v8744_v49  ;;  %v4242_v49 = vld [vmem:[#allocation14 + $0x580] sm:$0xff]  ;;  %v8506_v0 = vpack.c.bf16 %v4240_v46, %v4234_v25  ;;  %v8520_v46 = vpack.c.bf16 %v4289_v41, %v4283_v4  ;;  %v4337_v4 = vld [vmem:[#allocation14 + $0x878] sm:$0xff] }
 0x5ad   :  { %v4278_v40 = vld [vmem:[#allocation14 + $0x6a0] sm:$0xff]  ;;  %v4333_v41 = vld [vmem:[#allocation14 + $0x858] sm:$0xff] }
 0x5ae   :  { %8491 = vmatpush1.bf16.msra.mxu0 %v8490_v2  ;;  %v2885_v2 = vrot.slane %v10443_v62, %v10336_v14  ;;  %v4277_v62 = vld [vmem:[#allocation14 + $0x698] sm:$0xff] }
 0x5af   :  { %8747 = vmatpush1.bf16.msra.mxu1 %v8746_v52  ;;  %8493 = vmatprep.subr.bf16.mxu0 %v8492_v42  ;;  %v8762_v52 = vpack.c.bf16 %v4242_v49, %v4236_v47  ;;  %v8508_v42 = vpack.c.bf16 %v4253_v53, %v4247_v51  ;;  %v8516_v38 = vpack.c.bf16 %v4277_v62, %v4271_v31  ;;  %v4282_v47 = vld [vmem:[#allocation14 + $0x6c0] sm:$0xff]  ;;  %v4284_v49 = vld [vmem:[#allocation14 + $0x6d0] sm:$0xff]  ;;  %v4321_v31 = vld [vmem:[#allocation14 + $0x7f8] sm:$0xff] }
 0x5b0   :  { %8749 = vmatprep.subr.bf16.mxu1 %v8748_v11  ;;  %v8764_v11 = vpack.c.bf16 %v4255_v56, %v4249_v55  ;;  %v4290_v53 = vld [vmem:[#allocation14 + $0x700] sm:$0xff]  ;;  %v4295_v55 = vld [vmem:[#allocation14 + $0x728] sm:$0xff]  ;;  %v4301_v56 = vld [vmem:[#allocation14 + $0x758] sm:$0xff] }
 0x5b1   :  { %v4327_v62 = vld [vmem:[#allocation14 + $0x828] sm:$0xff] }
 0x5b2   :  { %8495 = vmatpush1.bf16.msra.mxu0 %v8494_v9  ;;  %v4267_v9 = vld [vmem:[#allocation14 + $0x648] sm:$0xff] }
 0x5b3   :  { %8751 = vmatpush1.bf16.msra.mxu1 %v8750_v18  ;;  %8497 = vmatprep.subr.bf16.mxu0 %v8496_v23  ;;  %v8510_v18 = vpack.c.bf16 %v4252_v7, %v4246_v6  ;;  %v9512_v23 = vadd.f32 %v10435_v10, %v2885_v2  ;;  %v8768_v20 = vpack.c.bf16 %v4267_v9, %v4261_v5  ;;  %v4303_v2 = vld [vmem:[#allocation14 + $0x768] sm:$0xff]  ;;  %v4294_v7 = vld [vmem:[#allocation14 + $0x720] sm:$0xff]  ;;  %v4309_v5 = vld [vmem:[#allocation14 + $0x798] sm:$0xff] }
 0x5b4   :  { %8753 = vmatprep.subr.bf16.mxu1 %v8752_v27  ;;  %v4264_v27 = vld [vmem:[#allocation14 + $0x630] sm:$0xff]  ;;  %v8770_v10 = vpack.c.bf16 %v4266_v63, %v4260_v26  ;;  %v8524_v6 = vpack.c.bf16 %v4301_v56, %v4295_v55  ;;  %v4315_v9 = vld [vmem:[#allocation14 + $0x7c8] sm:$0xff]  ;;  %v4314_v26 = vld [vmem:[#allocation14 + $0x7c0] sm:$0xff] }
 0x5b5   :  { %v10460_v59 = vmax.f32 %v9512_v23, 0.0  ;;  %v4319_v63 = vld [vmem:[#allocation14 + $0x7e8] sm:$0xff]  ;;  %v4345_v55 = vld [vmem:[#allocation14 + $0x8b8] sm:$0xff] }
 0x5b6   :  { %8499 = vmatpush1.bf16.msra.mxu0 %v8498_v33  ;;  %v8514_v33 = vpack.c.bf16 %v4264_v27, %v4258_v17  ;;  %v4312_v17 = vld [vmem:[#allocation14 + $0x7b0] sm:$0xff]  ;;  %v4351_v56 = vld [vmem:[#allocation14 + $0x8e8] sm:$0xff] }
 0x5b7   :  { %8755 = vmatpush1.bf16.msra.mxu1 %v8754_v32  ;;  %8501 = vmatprep.subr.bf16.mxu0 %v8500_v34  ;;  %v4273_v32 = vld [vmem:[#allocation14 + $0x678] sm:$0xff]  ;;  %v4279_v34 = vld [vmem:[#allocation14 + $0x6a8] sm:$0xff]  ;;  %v4308_v27 = vld [vmem:[#allocation14 + $0x790] sm:$0xff] }
 0x5b8   :  { %8757 = vmatprep.subr.bf16.mxu1 %v8756_v12  ;;  %v4272_v12 = vld [vmem:[#allocation14 + $0x670] sm:$0xff]  ;;  %v8772_v15 = vpack.c.bf16 %v4279_v34, %v4273_v32  ;;  %v8786_v32 = vpack.c.bf16 %v4314_v26, %v4308_v27  ;;  %v8532_v34 = vpack.c.bf16 %v4325_v29, %v4319_v63  ;;  %v4362_v27 = vld [vmem:[#allocation14 + $0x940] sm:$0xff]  ;;  %v4373_v26 = vld [vmem:[#allocation14 + $0x998] sm:$0xff] }
 0x5b9   :  { %v8774_v25 = vpack.c.bf16 %v4278_v40, %v4272_v12  ;;  %v8788_v12 = vpack.c.bf16 %v4327_v62, %v4321_v31  ;;  %v4331_v40 = vld [vmem:[#allocation14 + $0x848] sm:$0xff]  ;;  %v4369_v63 = vld [vmem:[#allocation14 + $0x978] sm:$0xff] }
 0x5ba   :  { %8503 = vmatpush1.bf16.msra.mxu0 %v8502_v61  ;;  %v4285_v61 = vld [vmem:[#allocation14 + $0x6d8] sm:$0xff]  ;;  %v4375_v29 = vld [vmem:[#allocation14 + $0x9a8] sm:$0xff] }
 0x5bb   :  { %8759 = vmatpush1.bf16.msra.mxu1 %v8758_v37  ;;  %8505 = vmatprep.subr.bf16.mxu0 %v8504_v39  ;;  %v4291_v37 = vld [vmem:[#allocation14 + $0x708] sm:$0xff]  ;;  %v8518_v39 = vpack.c.bf16 %v4276_v35, %v4270_v19  ;;  %v4324_v19 = vld [vmem:[#allocation14 + $0x810] sm:$0xff] }
 0x5bc   :  { %8761 = vmatprep.subr.bf16.mxu1 %v8760_v48  ;;  %v4288_v48 = vld [vmem:[#allocation14 + $0x6f0] sm:$0xff]  ;;  %v8776_v51 = vpack.c.bf16 %v4291_v37, %v4285_v61 }
 0x5bd   :  { %v4320_v35 = vld [vmem:[#allocation14 + $0x7f0] sm:$0xff] }
 0x5be   :  { %8507 = vmatpush1.bf16.msra.mxu0 %v8506_v0  ;;  %v4297_v0 = vld [vmem:[#allocation14 + $0x738] sm:$0xff] }
 0x5bf   :  { %8763 = vmatpush1.bf16.msra.mxu1 %v8762_v52  ;;  %8509 = vmatprep.subr.bf16.mxu0 %v8508_v42  ;;  %v8522_v52 = vpack.c.bf16 %v4288_v48, %v4282_v47  ;;  %v8778_v42 = vpack.c.bf16 %v4290_v53, %v4284_v49  ;;  %v8780_v13 = vpack.c.bf16 %v4303_v2, %v4297_v0  ;;  %v4332_v47 = vld [vmem:[#allocation14 + $0x850] sm:$0xff]  ;;  %v4338_v49 = vld [vmem:[#allocation14 + $0x880] sm:$0xff]  ;;  %v4349_v53 = vld [vmem:[#allocation14 + $0x8d8] sm:$0xff] }
 0x5c0   :  { %8765 = vmatprep.subr.bf16.mxu1 %v8764_v11  ;;  %v4296_v11 = vld [vmem:[#allocation14 + $0x730] sm:$0xff]  ;;  %v8794_v2 = vpack.c.bf16 %v4338_v49, %v4332_v47  ;;  %v4386_v47 = vld [vmem:[#allocation14 + $0xa00] sm:$0xff]  ;;  %v4397_v49 = vld [vmem:[#allocation14 + $0xa58] sm:$0xff] }
 0x5c1   :  { %v8782_v23 = vpack.c.bf16 %v4302_v16, %v4296_v11  ;;  %v4350_v11 = vld [vmem:[#allocation14 + $0x8e0] sm:$0xff]  ;;  %v4361_v16 = vld [vmem:[#allocation14 + $0x938] sm:$0xff] }
 0x5c2   :  { %8511 = vmatpush1.bf16.msra.mxu0 %v8510_v18  ;;  %v8526_v18 = vpack.c.bf16 %v4300_v8, %v4294_v7  ;;  %v4344_v7 = vld [vmem:[#allocation14 + $0x8b0] sm:$0xff]  ;;  %v8796_v8 = vpack.c.bf16 %v4351_v56, %v4345_v55 }
 0x5c3   :  { %8767 = vmatpush1.bf16.msra.mxu1 %v8766_v24  ;;  %8513 = vmatprep.subr.bf16.mxu0 %v8512_v36  ;;  %v8528_v24 = vpack.c.bf16 %v4313_v44, %v4307_v21  ;;  %v4306_v36 = vld [vmem:[#allocation14 + $0x780] sm:$0xff]  ;;  %v4357_v21 = vld [vmem:[#allocation14 + $0x918] sm:$0xff]  ;;  %v4363_v44 = vld [vmem:[#allocation14 + $0x948] sm:$0xff] }
 0x5c4   :  { %8769 = vmatprep.subr.bf16.mxu1 %v8768_v20  ;;  %v8784_v20 = vpack.c.bf16 %v4315_v9, %v4309_v5  ;;  %v8798_v9 = vpack.c.bf16 %v4350_v11, %v4344_v7  ;;  %v4398_v7 = vld [vmem:[#allocation14 + $0xa60] sm:$0xff]  ;;  %v4409_v11 = vld [vmem:[#allocation14 + $0xab8] sm:$0xff] }
 0x5c5   :  { %4931 = vmatmul.mubr.f32.vlgmr.msra.gmra.mrb[16].mxu0 %v10460_v59 }
 0x5c6   :  { %5215 = vmatmul.mubr.f32.vlgmr.msra.gmra.mrb[16].mxu1 %v10460_v59  ;;  %8515 = vmatpush1.bf16.msra.mxu0 %v8514_v33  ;;  %v8530_v33 = vpack.c.bf16 %v4312_v17, %v4306_v36  ;;  %v4356_v36 = vld [vmem:[#allocation14 + $0x910] sm:$0xff]  ;;  %v8800_v17 = vpack.c.bf16 %v4363_v44, %v4357_v21 }
 0x5c7   :  { %5001 = vmatprep.mubr.f32.mxu0 %v10462_v3  ;;  %8771 = vmatpush1.bf16.msra.mxu1 %v8770_v10  ;;  %v4318_v10 = vld [vmem:[#allocation14 + $0x7e0] sm:$0xff]  ;;  %v8802_v62 = vpack.c.bf16 %v4362_v27, %v4356_v36  ;;  %v4421_v27 = vld [vmem:[#allocation14 + $0xb18] sm:$0xff] }
 0x5c8   :  { %5285 = vmatprep.mubr.f32.mxu1 %v10462_v3  ;;  %8517 = vmatprep.subr.bf16.mxu0 %v8516_v38  ;;  %v4326_v38 = vld [vmem:[#allocation14 + $0x820] sm:$0xff]  ;;  %v8534_v61 = vpack.c.bf16 %v4324_v19, %v4318_v10  ;;  %v4368_v10 = vld [vmem:[#allocation14 + $0x970] sm:$0xff]  ;;  %v8804_v19 = vpack.c.bf16 %v4375_v29, %v4369_v63 }
 0x5c9   :  { %8773 = vmatprep.subr.bf16.mxu1 %v8772_v15  ;;  %v4339_v15 = vld [vmem:[#allocation14 + $0x888] sm:$0xff]  ;;  %v8790_v37 = vpack.c.bf16 %v4326_v38, %v4320_v35  ;;  %v4374_v35 = vld [vmem:[#allocation14 + $0x9a0] sm:$0xff]  ;;  %v4385_v38 = vld [vmem:[#allocation14 + $0x9f8] sm:$0xff] }
 0x5ca   :  { %8519 = vmatpush1.bf16.msra.mxu0 %v8518_v39  ;;  %v8536_v39 = vpack.c.bf16 %v4337_v4, %v4331_v40  ;;  %v8792_v48 = vpack.c.bf16 %v4339_v15, %v4333_v41  ;;  %v4381_v40 = vld [vmem:[#allocation14 + $0x9d8] sm:$0xff]  ;;  %v4387_v4 = vld [vmem:[#allocation14 + $0xa08] sm:$0xff]  ;;  %v8806_v15 = vpack.c.bf16 %v4374_v35, %v4368_v10  ;;  %v4410_v36 = vld [vmem:[#allocation14 + $0xac0] sm:$0xff] }
 0x5cb   :  { %8775 = vmatpush1.bf16.msra.mxu1 %v8774_v25  ;;  %8521 = vmatprep.subr.bf16.mxu0 %v8520_v46  ;;  %v4330_v25 = vld [vmem:[#allocation14 + $0x840] sm:$0xff]  ;;  %v4336_v46 = vld [vmem:[#allocation14 + $0x870] sm:$0xff]  ;;  %v4433_v35 = vld [vmem:[#allocation14 + $0xb78] sm:$0xff] }
 0x5cc   :  { %8777 = vmatprep.subr.bf16.mxu1 %v8776_v51  ;;  %v4343_v51 = vld [vmem:[#allocation14 + $0x8a8] sm:$0xff]  ;;  %v8538_v0 = vpack.c.bf16 %v4336_v46, %v4330_v25  ;;  %v4380_v25 = vld [vmem:[#allocation14 + $0x9d0] sm:$0xff]  ;;  %v8808_v46 = vpack.c.bf16 %v4387_v4, %v4381_v40  ;;  %v4422_v10 = vld [vmem:[#allocation14 + $0xb20] sm:$0xff] }
 0x5cd   :  { %v8810_v56 = vpack.c.bf16 %v4386_v47, %v4380_v25  ;;  %v4434_v25 = vld [vmem:[#allocation14 + $0xb80] sm:$0xff]  ;;  %v4445_v47 = vld [vmem:[#allocation14 + $0xbd8] sm:$0xff] }
 0x5ce   :  { %8523 = vmatpush1.bf16.msra.mxu0 %v8522_v52  ;;  %v8540_v52 = vpack.c.bf16 %v4349_v53, %v4343_v51  ;;  %v4393_v51 = vld [vmem:[#allocation14 + $0xa38] sm:$0xff]  ;;  %v4399_v53 = vld [vmem:[#allocation14 + $0xa68] sm:$0xff] }
 0x5cf   :  { %8779 = vmatpush1.bf16.msra.mxu1 %v8778_v42  ;;  %8525 = vmatprep.subr.bf16.mxu0 %v8524_v6  ;;  %v4342_v42 = vld [vmem:[#allocation14 + $0x8a0] sm:$0xff]  ;;  %v4348_v6 = vld [vmem:[#allocation14 + $0x8d0] sm:$0xff] }
 0x5d0   :  { %8781 = vmatprep.subr.bf16.mxu1 %v8780_v13  ;;  %v4355_v13 = vld [vmem:[#allocation14 + $0x908] sm:$0xff]  ;;  %v8542_v5 = vpack.c.bf16 %v4348_v6, %v4342_v42  ;;  %v4392_v42 = vld [vmem:[#allocation14 + $0xa30] sm:$0xff]  ;;  %v8812_v6 = vpack.c.bf16 %v4399_v53, %v4393_v51  ;;  %v10468_v53 = vld [vmem:[#allocation13] sm:$0xff] }
 0x5d1   :  { %v8814_v44 = vpack.c.bf16 %v4398_v7, %v4392_v42  ;;  %v4440_v42 = vld [vmem:[#allocation14 + $0xbb0] sm:$0xff]  ;;  %v4446_v7 = vld [vmem:[#allocation14 + $0xbe0] sm:$0xff] }
 0x5d2   :  { %8527 = vmatpush1.bf16.msra.mxu0 %v8526_v18  ;;  %v8544_v18 = vpack.c.bf16 %v4361_v16, %v4355_v13  ;;  %v4405_v13 = vld [vmem:[#allocation14 + $0xa98] sm:$0xff]  ;;  %v4411_v16 = vld [vmem:[#allocation14 + $0xac8] sm:$0xff] }
 0x5d3   :  { %8783 = vmatpush1.bf16.msra.mxu1 %v8782_v23  ;;  %8529 = vmatprep.subr.bf16.mxu0 %v8528_v24  ;;  %v4354_v23 = vld [vmem:[#allocation14 + $0x900] sm:$0xff]  ;;  %v4360_v24 = vld [vmem:[#allocation14 + $0x930] sm:$0xff] }
 0x5d4   :  { %8785 = vmatprep.subr.bf16.mxu1 %v8784_v20  ;;  %v4367_v20 = vld [vmem:[#allocation14 + $0x968] sm:$0xff]  ;;  %v8546_v31 = vpack.c.bf16 %v4360_v24, %v4354_v23  ;;  %v4404_v23 = vld [vmem:[#allocation14 + $0xa90] sm:$0xff]  ;;  %v8816_v24 = vpack.c.bf16 %v4411_v16, %v4405_v13  ;;  %v4453_v13 = vld [vmem:[#allocation14 + $0xc18] sm:$0xff] }
 0x5d5   :  { %v8818_v29 = vpack.c.bf16 %v4410_v36, %v4404_v23  ;;  %v4459_v16 = vld [vmem:[#allocation14 + $0xc48] sm:$0xff]  ;;  %v4456_v23 = vld [vmem:[#allocation14 + $0xc30] sm:$0xff] }
 0x5d6   :  { %8531 = vmatpush1.bf16.msra.mxu0 %v8530_v33  ;;  %v8548_v33 = vpack.c.bf16 %v4373_v26, %v4367_v20  ;;  %v4417_v20 = vld [vmem:[#allocation14 + $0xaf8] sm:$0xff]  ;;  %v4423_v26 = vld [vmem:[#allocation14 + $0xb28] sm:$0xff]  ;;  %v8832_v36 = vpack.c.bf16 %v4459_v16, %v4453_v13 }
 0x5d7   :  { %8787 = vmatpush1.bf16.msra.mxu1 %v8786_v32  ;;  %8533 = vmatprep.subr.bf16.mxu0 %v8532_v34  ;;  %v4366_v32 = vld [vmem:[#allocation14 + $0x960] sm:$0xff]  ;;  %v4372_v34 = vld [vmem:[#allocation14 + $0x990] sm:$0xff]  ;;  %v4501_v13 = vld [vmem:[#allocation14 + $0xd98] sm:$0xff] }
 0x5d8   :  { %8789 = vmatprep.subr.bf16.mxu1 %v8788_v12  ;;  %v4379_v12 = vld [vmem:[#allocation14 + $0x9c8] sm:$0xff]  ;;  %v8550_v41 = vpack.c.bf16 %v4372_v34, %v4366_v32  ;;  %v4416_v32 = vld [vmem:[#allocation14 + $0xaf0] sm:$0xff]  ;;  %v8820_v34 = vpack.c.bf16 %v4423_v26, %v4417_v20  ;;  %v4469_v20 = vld [vmem:[#allocation14 + $0xc98] sm:$0xff] }
 0x5d9   :  { %v8822_v4 = vpack.c.bf16 %v4422_v10, %v4416_v32  ;;  %v4465_v26 = vld [vmem:[#allocation14 + $0xc78] sm:$0xff]  ;;  %v4468_v32 = vld [vmem:[#allocation14 + $0xc90] sm:$0xff]  ;;  %v4507_v16 = vld [vmem:[#allocation14 + $0xdc8] sm:$0xff] }
 0x5da   :  { %8535 = vmatpush1.bf16.msra.mxu0 %v8534_v61  ;;  %v8552_v61 = vpack.c.bf16 %v4385_v38, %v4379_v12  ;;  %v4429_v12 = vld [vmem:[#allocation14 + $0xb58] sm:$0xff]  ;;  %v4435_v38 = vld [vmem:[#allocation14 + $0xb88] sm:$0xff] }
 0x5db   :  { %8791 = vmatpush1.bf16.msra.mxu1 %v8790_v37  ;;  %8537 = vmatprep.subr.bf16.mxu0 %v8536_v39  ;;  %v4378_v37 = vld [vmem:[#allocation14 + $0x9c0] sm:$0xff]  ;;  %v4384_v39 = vld [vmem:[#allocation14 + $0x9f0] sm:$0xff] }
 0x5dc   :  { %8793 = vmatprep.subr.bf16.mxu1 %v8792_v48  ;;  %v4391_v48 = vld [vmem:[#allocation14 + $0xa28] sm:$0xff]  ;;  %v8554_v55 = vpack.c.bf16 %v4384_v39, %v4378_v37  ;;  %v4428_v37 = vld [vmem:[#allocation14 + $0xb50] sm:$0xff]  ;;  %v8824_v39 = vpack.c.bf16 %v4435_v38, %v4429_v12  ;;  %v4481_v12 = vld [vmem:[#allocation14 + $0xcf8] sm:$0xff] }
 0x5dd   :  { %v4477_v38 = vld [vmem:[#allocation14 + $0xcd8] sm:$0xff] }
 0x5de   :  { %8539 = vmatpush1.bf16.msra.mxu0 %v8538_v0  ;;  %v8556_v0 = vpack.c.bf16 %v4397_v49, %v4391_v48  ;;  %v4441_v48 = vld [vmem:[#allocation14 + $0xbb8] sm:$0xff]  ;;  %v4447_v49 = vld [vmem:[#allocation14 + $0xbe8] sm:$0xff] }
 0x5df   :  { %8795 = vmatpush1.bf16.msra.mxu1 %v8794_v2  ;;  %8541 = vmatprep.subr.bf16.mxu0 %v8540_v52  ;;  %v4390_v2 = vld [vmem:[#allocation14 + $0xa20] sm:$0xff]  ;;  %v4396_v52 = vld [vmem:[#allocation14 + $0xa50] sm:$0xff] }
 0x5e0   :  { %8797 = vmatprep.subr.bf16.mxu1 %v8796_v8  ;;  %v4403_v8 = vld [vmem:[#allocation14 + $0xa88] sm:$0xff]  ;;  %v8558_v21 = vpack.c.bf16 %v4396_v52, %v4390_v2  ;;  %v4438_v2 = vld [vmem:[#allocation14 + $0xba0] sm:$0xff]  ;;  %v4444_v52 = vld [vmem:[#allocation14 + $0xbd0] sm:$0xff] }
 0x5e2   :  { %8543 = vmatpush1.bf16.msra.mxu0 %v8542_v5  ;;  %v8560_v5 = vpack.c.bf16 %v4409_v11, %v4403_v8  ;;  %v4451_v8 = vld [vmem:[#allocation14 + $0xc08] sm:$0xff]  ;;  %v4457_v11 = vld [vmem:[#allocation14 + $0xc38] sm:$0xff] }
 0x5e3   :  { %8799 = vmatpush1.bf16.msra.mxu1 %v8798_v9  ;;  %8545 = vmatprep.subr.bf16.mxu0 %v8544_v18  ;;  %v4402_v9 = vld [vmem:[#allocation14 + $0xa80] sm:$0xff]  ;;  %v4408_v18 = vld [vmem:[#allocation14 + $0xab0] sm:$0xff] }
 0x5e4   :  { %8801 = vmatprep.subr.bf16.mxu1 %v8800_v17  ;;  %v4415_v17 = vld [vmem:[#allocation14 + $0xae8] sm:$0xff]  ;;  %v8562_v63 = vpack.c.bf16 %v4408_v18, %v4402_v9  ;;  %v8576_v9 = vpack.c.bf16 %v4457_v11, %v4451_v8  ;;  %v4450_v18 = vld [vmem:[#allocation14 + $0xc00] sm:$0xff]  ;;  %v4505_v11 = vld [vmem:[#allocation14 + $0xdb8] sm:$0xff] }
 0x5e5   :  { %v4499_v8 = vld [vmem:[#allocation14 + $0xd88] sm:$0xff] }
 0x5e6   :  { %8547 = vmatpush1.bf16.msra.mxu0 %v8546_v31  ;;  %v8564_v31 = vpack.c.bf16 %v4421_v27, %v4415_v17  ;;  %v4458_v17 = vld [vmem:[#allocation14 + $0xc40] sm:$0xff]  ;;  %v4463_v27 = vld [vmem:[#allocation14 + $0xc68] sm:$0xff] }
 0x5e7   :  { %8803 = vmatpush1.bf16.msra.mxu1 %v8802_v62  ;;  %8549 = vmatprep.subr.bf16.mxu0 %v8548_v33  ;;  %v4414_v62 = vld [vmem:[#allocation14 + $0xae0] sm:$0xff]  ;;  %v4420_v33 = vld [vmem:[#allocation14 + $0xb10] sm:$0xff] }
 0x5e8   :  { %8805 = vmatprep.subr.bf16.mxu1 %v8804_v19  ;;  %v4427_v19 = vld [vmem:[#allocation14 + $0xb48] sm:$0xff]  ;;  %v8566_v40 = vpack.c.bf16 %v4420_v33, %v4414_v62  ;;  %v8580_v62 = vpack.c.bf16 %v4469_v20, %v4463_v27  ;;  %v4462_v33 = vld [vmem:[#allocation14 + $0xc60] sm:$0xff]  ;;  %v4517_v27 = vld [vmem:[#allocation14 + $0xe18] sm:$0xff] }
 0x5e9   :  { %v4513_v20 = vld [vmem:[#allocation14 + $0xdf8] sm:$0xff] }
 0x5ea   :  { %8551 = vmatpush1.bf16.msra.mxu0 %v8550_v41  ;;  %v8568_v41 = vpack.c.bf16 %v4433_v35, %v4427_v19  ;;  %v4470_v19 = vld [vmem:[#allocation14 + $0xca0] sm:$0xff]  ;;  %v4475_v35 = vld [vmem:[#allocation14 + $0xcc8] sm:$0xff] }
 0x5eb   :  { %8807 = vmatpush1.bf16.msra.mxu1 %v8806_v15  ;;  %8553 = vmatprep.subr.bf16.mxu0 %v8552_v61  ;;  %v4426_v15 = vld [vmem:[#allocation14 + $0xb40] sm:$0xff]  ;;  %v4432_v61 = vld [vmem:[#allocation14 + $0xb70] sm:$0xff] }
 0x5ec   :  { %8809 = vmatprep.subr.bf16.mxu1 %v8808_v46  ;;  %v4439_v46 = vld [vmem:[#allocation14 + $0xba8] sm:$0xff]  ;;  %v8570_v51 = vpack.c.bf16 %v4432_v61, %v4426_v15  ;;  %v8584_v15 = vpack.c.bf16 %v4481_v12, %v4475_v35  ;;  %v4474_v61 = vld [vmem:[#allocation14 + $0xcc0] sm:$0xff]  ;;  %v4529_v35 = vld [vmem:[#allocation14 + $0xe78] sm:$0xff] }
 0x5ed   :  { %v4525_v12 = vld [vmem:[#allocation14 + $0xe58] sm:$0xff] }
 0x5ee   :  { %8555 = vmatpush1.bf16.msra.mxu0 %v8554_v55  ;;  %v2893_v55 = vrot.slane %v10468_v53, %v10367_v57 }
 0x5ef   :  { %8811 = vmatpush1.bf16.msra.mxu1 %v8810_v56  ;;  %8557 = vmatprep.subr.bf16.mxu0 %v8556_v0  ;;  %v8826_v56 = vpack.c.bf16 %v4434_v25, %v4428_v37  ;;  %v8572_v0 = vpack.c.bf16 %v4445_v47, %v4439_v46  ;;  %v4480_v37 = vld [vmem:[#allocation14 + $0xcf0] sm:$0xff]  ;;  %v4482_v46 = vld [vmem:[#allocation14 + $0xd00] sm:$0xff]  ;;  %v4487_v47 = vld [vmem:[#allocation14 + $0xd28] sm:$0xff] }
 0x5f0   :  { %8813 = vmatprep.subr.bf16.mxu1 %v8812_v6  ;;  %v8828_v6 = vpack.c.bf16 %v4447_v49, %v4441_v48  ;;  %v4493_v48 = vld [vmem:[#allocation14 + $0xd58] sm:$0xff] }
 0x5f1   :  { %v4489_v49 = vld [vmem:[#allocation14 + $0xd38] sm:$0xff] }
 0x5f2   :  { %8559 = vmatpush1.bf16.msra.mxu0 %v8558_v21  ;;  %v8574_v21 = vpack.c.bf16 %v4444_v52, %v4438_v2  ;;  %v4486_v2 = vld [vmem:[#allocation14 + $0xd20] sm:$0xff]  ;;  %v4492_v52 = vld [vmem:[#allocation14 + $0xd50] sm:$0xff] }
 0x5f3   :  { %8815 = vmatpush1.bf16.msra.mxu1 %v8814_v44  ;;  %8561 = vmatprep.subr.bf16.mxu0 %v8560_v5  ;;  %v9514_v44 = vadd.f32 %v10437_v60, %v2893_v55  ;;  %v8830_v5 = vpack.c.bf16 %v4446_v7, %v4440_v42  ;;  %v8586_v55 = vpack.c.bf16 %v4480_v37, %v4474_v61  ;;  %v4488_v42 = vld [vmem:[#allocation14 + $0xd30] sm:$0xff]  ;;  %v4494_v7 = vld [vmem:[#allocation14 + $0xd60] sm:$0xff] }
 0x5f4   :  { %8817 = vmatprep.subr.bf16.mxu1 %v8816_v24  ;;  %v4452_v24 = vld [vmem:[#allocation14 + $0xc10] sm:$0xff] }
 0x5f5   :  { %v8834_v60 = vpack.c.bf16 %v4458_v17, %v4452_v24  ;;  %v8848_v24 = vpack.c.bf16 %v4507_v16, %v4501_v13  ;;  %v4511_v17 = vld [vmem:[#allocation14 + $0xde8] sm:$0xff]  ;;  %v4528_v61 = vld [vmem:[#allocation14 + $0xe70] sm:$0xff] }
 0x5f6   :  { %8563 = vmatpush1.bf16.msra.mxu0 %v8562_v63  ;;  %v4471_v63 = vld [vmem:[#allocation14 + $0xca8] sm:$0xff]  ;;  %v4524_v37 = vld [vmem:[#allocation14 + $0xe50] sm:$0xff] }
 0x5f7   :  { %8819 = vmatpush1.bf16.msra.mxu1 %v8818_v29  ;;  %8565 = vmatprep.subr.bf16.mxu0 %v8564_v31  ;;  %v8578_v29 = vpack.c.bf16 %v4456_v23, %v4450_v18  ;;  %v10473_v31 = vmax.f32 %v9514_v44, 0.0  ;;  %v8836_v10 = vpack.c.bf16 %v4471_v63, %v4465_v26  ;;  %v8846_v44 = vpack.c.bf16 %v4494_v7, %v4488_v42  ;;  %v4504_v18 = vld [vmem:[#allocation14 + $0xdb0] sm:$0xff]  ;;  %v4519_v26 = vld [vmem:[#allocation14 + $0xe28] sm:$0xff] }
 0x5f8   :  { %8821 = vmatprep.subr.bf16.mxu1 %v8820_v34  ;;  %v4464_v34 = vld [vmem:[#allocation14 + $0xc70] sm:$0xff]  ;;  %v4547_v7 = vld [vmem:[#allocation14 + $0xf08] sm:$0xff] }
 0x5f9   :  { %v4500_v23 = vld [vmem:[#allocation14 + $0xd90] sm:$0xff]  ;;  %v4555_v13 = vld [vmem:[#allocation14 + $0xf48] sm:$0xff] }
 0x5fa   :  { %8567 = vmatpush1.bf16.msra.mxu0 %v8566_v40  ;;  %v4483_v40 = vld [vmem:[#allocation14 + $0xd08] sm:$0xff] }
 0x5fb   :  { %8823 = vmatpush1.bf16.msra.mxu1 %v8822_v4  ;;  %8569 = vmatprep.subr.bf16.mxu0 %v8568_v41  ;;  %v8582_v4 = vpack.c.bf16 %v4468_v32, %v4462_v33  ;;  %v8838_v41 = vpack.c.bf16 %v4470_v19, %v4464_v34  ;;  %v8840_v25 = vpack.c.bf16 %v4483_v40, %v4477_v38  ;;  %v4516_v33 = vld [vmem:[#allocation14 + $0xe10] sm:$0xff]  ;;  %v4523_v19 = vld [vmem:[#allocation14 + $0xe48] sm:$0xff] }
 0x5fc   :  { %8825 = vmatprep.subr.bf16.mxu1 %v8824_v39  ;;  %v4476_v39 = vld [vmem:[#allocation14 + $0xcd0] sm:$0xff]  ;;  %v8852_v34 = vpack.c.bf16 %v4519_v26, %v4513_v20  ;;  %v4531_v38 = vld [vmem:[#allocation14 + $0xe88] sm:$0xff] }
 0x5fd   :  { %v4512_v32 = vld [vmem:[#allocation14 + $0xdf0] sm:$0xff]  ;;  %v4567_v20 = vld [vmem:[#allocation14 + $0xfa8] sm:$0xff] }
 0x5fe   :  { %8571 = vmatpush1.bf16.msra.mxu0 %v8570_v51  ;;  %v4495_v51 = vld [vmem:[#allocation14 + $0xd68] sm:$0xff] }
 0x5ff   :  { %8827 = vmatpush1.bf16.msra.mxu1 %v8826_v56  ;;  %8573 = vmatprep.subr.bf16.mxu0 %v8572_v0  ;;  %v8842_v56 = vpack.c.bf16 %v4482_v46, %v4476_v39  ;;  %v8588_v0 = vpack.c.bf16 %v4493_v48, %v4487_v47  ;;  %v8856_v39 = vpack.c.bf16 %v4531_v38, %v4525_v12  ;;  %v4535_v46 = vld [vmem:[#allocation14 + $0xea8] sm:$0xff]  ;;  %v4541_v47 = vld [vmem:[#allocation14 + $0xed8] sm:$0xff] }
 0x600   :  { %8829 = vmatprep.subr.bf16.mxu1 %v8828_v6  ;;  %v8844_v6 = vpack.c.bf16 %v4495_v51, %v4489_v49  ;;  %v4537_v48 = vld [vmem:[#allocation14 + $0xeb8] sm:$0xff]  ;;  %v4543_v49 = vld [vmem:[#allocation14 + $0xee8] sm:$0xff] }
 0x601   :  { %v8860_v42 = vpack.c.bf16 %v4543_v49, %v4537_v48  ;;  %v4579_v12 = vld [vmem:[#allocation14 + $0x1008] sm:$0xff] }
 0x602   :  { %8575 = vmatpush1.bf16.msra.mxu0 %v8574_v21  ;;  %v8590_v21 = vpack.c.bf16 %v4492_v52, %v4486_v2  ;;  %v4540_v2 = vld [vmem:[#allocation14 + $0xed0] sm:$0xff]  ;;  %v4591_v48 = vld [vmem:[#allocation14 + $0x1068] sm:$0xff] }
 0x603   :  { %8831 = vmatpush1.bf16.msra.mxu1 %v8830_v5  ;;  %8577 = vmatprep.subr.bf16.mxu0 %v8576_v9  ;;  %v8592_v5 = vpack.c.bf16 %v4505_v11, %v4499_v8  ;;  %v4498_v9 = vld [vmem:[#allocation14 + $0xd80] sm:$0xff]  ;;  %v4536_v52 = vld [vmem:[#allocation14 + $0xeb0] sm:$0xff]  ;;  %v4553_v8 = vld [vmem:[#allocation14 + $0xf38] sm:$0xff] }
 0x604   :  { %8833 = vmatprep.subr.bf16.mxu1 %v8832_v36  ;;  %v4506_v36 = vld [vmem:[#allocation14 + $0xdc0] sm:$0xff]  ;;  %v8594_v63 = vpack.c.bf16 %v4504_v18, %v4498_v9  ;;  %v4549_v11 = vld [vmem:[#allocation14 + $0xf18] sm:$0xff]  ;;  %v4552_v9 = vld [vmem:[#allocation14 + $0xf30] sm:$0xff] }
 0x605   :  { %5002 = vmatmul.mubr.f32.vlgmr.msra.gmra.mrb[16].mxu0 %v10473_v31  ;;  %v4548_v18 = vld [vmem:[#allocation14 + $0xf10] sm:$0xff] }
 0x606   :  { %5286 = vmatmul.mubr.f32.vlgmr.msra.gmra.mrb[16].mxu1 %v10473_v31  ;;  %8579 = vmatpush1.bf16.msra.mxu0 %v8578_v29  ;;  %v8850_v29 = vpack.c.bf16 %v4506_v36, %v4500_v23  ;;  %v8864_v23 = vpack.c.bf16 %v4555_v13, %v4549_v11  ;;  %v4559_v36 = vld [vmem:[#allocation14 + $0xf68] sm:$0xff] }
 0x607   :  { %8835 = vmatpush1.bf16.msra.mxu1 %v8834_v60  ;;  %8581 = vmatprep.subr.bf16.mxu0 %v8580_v62  ;;  %v8596_v60 = vpack.c.bf16 %v4517_v27, %v4511_v17  ;;  %v4510_v62 = vld [vmem:[#allocation14 + $0xde0] sm:$0xff]  ;;  %v4565_v17 = vld [vmem:[#allocation14 + $0xf98] sm:$0xff]  ;;  %v4603_v11 = vld [vmem:[#allocation14 + $0x10c8] sm:$0xff] }
 0x608   :  { %8837 = vmatprep.subr.bf16.mxu1 %v8836_v10  ;;  %v4518_v10 = vld [vmem:[#allocation14 + $0xe20] sm:$0xff]  ;;  %v8598_v40 = vpack.c.bf16 %v4516_v33, %v4510_v62  ;;  %v4561_v27 = vld [vmem:[#allocation14 + $0xf78] sm:$0xff]  ;;  %v4564_v62 = vld [vmem:[#allocation14 + $0xf90] sm:$0xff] }
 0x609   :  { %v4560_v33 = vld [vmem:[#allocation14 + $0xf70] sm:$0xff] }
 0x60a   :  { %8583 = vmatpush1.bf16.msra.mxu0 %v8582_v4  ;;  %v8854_v4 = vpack.c.bf16 %v4518_v10, %v4512_v32  ;;  %v8868_v32 = vpack.c.bf16 %v4567_v20, %v4561_v27  ;;  %v4571_v10 = vld [vmem:[#allocation14 + $0xfc8] sm:$0xff] }
 0x60b   :  { %8839 = vmatpush1.bf16.msra.mxu1 %v8838_v41  ;;  %8585 = vmatprep.subr.bf16.mxu0 %v8584_v15  ;;  %v8600_v41 = vpack.c.bf16 %v4529_v35, %v4523_v19  ;;  %v4522_v15 = vld [vmem:[#allocation14 + $0xe40] sm:$0xff]  ;;  %v4577_v19 = vld [vmem:[#allocation14 + $0xff8] sm:$0xff]  ;;  %v4615_v27 = vld [vmem:[#allocation14 + $0x1128] sm:$0xff] }
 0x60c   :  { %8841 = vmatprep.subr.bf16.mxu1 %v8840_v25  ;;  %v4530_v25 = vld [vmem:[#allocation14 + $0xe80] sm:$0xff]  ;;  %v8602_v51 = vpack.c.bf16 %v4528_v61, %v4522_v15  ;;  %v4573_v35 = vld [vmem:[#allocation14 + $0xfd8] sm:$0xff]  ;;  %v4576_v15 = vld [vmem:[#allocation14 + $0xff0] sm:$0xff] }
 0x60d   :  { %v4572_v61 = vld [vmem:[#allocation14 + $0xfd0] sm:$0xff] }
 0x60e   :  { %8587 = vmatpush1.bf16.msra.mxu0 %v8586_v55  ;;  %v8858_v55 = vpack.c.bf16 %v4530_v25, %v4524_v37  ;;  %v8872_v37 = vpack.c.bf16 %v4579_v12, %v4573_v35  ;;  %v4583_v25 = vld [vmem:[#allocation14 + $0x1028] sm:$0xff] }
 0x60f   :  { %8843 = vmatpush1.bf16.msra.mxu1 %v8842_v56  ;;  %8589 = vmatprep.subr.bf16.mxu0 %v8588_v0  ;;  %v8604_v56 = vpack.c.bf16 %v4541_v47, %v4535_v46  ;;  %v4534_v0 = vld [vmem:[#allocation14 + $0xea0] sm:$0xff]  ;;  %v4589_v46 = vld [vmem:[#allocation14 + $0x1058] sm:$0xff]  ;;  %v4627_v35 = vld [vmem:[#allocation14 + $0x1188] sm:$0xff] }
 0x610   :  { %8845 = vmatprep.subr.bf16.mxu1 %v8844_v6  ;;  %v4542_v6 = vld [vmem:[#allocation14 + $0xee0] sm:$0xff]  ;;  %v8606_v16 = vpack.c.bf16 %v4540_v2, %v4534_v0  ;;  %v4585_v47 = vld [vmem:[#allocation14 + $0x1038] sm:$0xff]  ;;  %v4588_v0 = vld [vmem:[#allocation14 + $0x1050] sm:$0xff] }
 0x611   :  { %v4584_v2 = vld [vmem:[#allocation14 + $0x1030] sm:$0xff] }
 0x612   :  { %8591 = vmatpush1.bf16.msra.mxu0 %v8590_v21  ;;  %v8862_v21 = vpack.c.bf16 %v4542_v6, %v4536_v52  ;;  %v8876_v52 = vpack.c.bf16 %v4591_v48, %v4585_v47  ;;  %v4595_v6 = vld [vmem:[#allocation14 + $0x1088] sm:$0xff] }
 0x613   :  { %8847 = vmatpush1.bf16.msra.mxu1 %v8846_v44  ;;  %8593 = vmatprep.subr.bf16.mxu0 %v8592_v5  ;;  %v8608_v44 = vpack.c.bf16 %v4553_v8, %v4547_v7  ;;  %v4546_v5 = vld [vmem:[#allocation14 + $0xf00] sm:$0xff]  ;;  %v4601_v7 = vld [vmem:[#allocation14 + $0x10b8] sm:$0xff]  ;;  %v4639_v47 = vld [vmem:[#allocation14 + $0x11e8] sm:$0xff] }
 0x614   :  { %8849 = vmatprep.subr.bf16.mxu1 %v8848_v24  ;;  %v4554_v24 = vld [vmem:[#allocation14 + $0xf40] sm:$0xff]  ;;  %v8610_v26 = vpack.c.bf16 %v4552_v9, %v4546_v5  ;;  %v4597_v8 = vld [vmem:[#allocation14 + $0x1098] sm:$0xff]  ;;  %v4600_v5 = vld [vmem:[#allocation14 + $0x10b0] sm:$0xff] }
 0x615   :  { %v4596_v9 = vld [vmem:[#allocation14 + $0x1090] sm:$0xff] }
 0x616   :  { %8595 = vmatpush1.bf16.msra.mxu0 %v8594_v63  ;;  %v8866_v63 = vpack.c.bf16 %v4554_v24, %v4548_v18  ;;  %v8880_v18 = vpack.c.bf16 %v4603_v11, %v4597_v8  ;;  %v4607_v24 = vld [vmem:[#allocation14 + $0x10e8] sm:$0xff] }
 0x617   :  { %8851 = vmatpush1.bf16.msra.mxu1 %v8850_v29  ;;  %8597 = vmatprep.subr.bf16.mxu0 %v8596_v60  ;;  %v8612_v29 = vpack.c.bf16 %v4565_v17, %v4559_v36  ;;  %v4558_v60 = vld [vmem:[#allocation14 + $0xf60] sm:$0xff]  ;;  %v4613_v36 = vld [vmem:[#allocation14 + $0x1118] sm:$0xff]  ;;  %v4651_v8 = vld [vmem:[#allocation14 + $0x1248] sm:$0xff] }
 0x618   :  { %8853 = vmatprep.subr.bf16.mxu1 %v8852_v34  ;;  %v4566_v34 = vld [vmem:[#allocation14 + $0xfa0] sm:$0xff]  ;;  %v8614_v38 = vpack.c.bf16 %v4564_v62, %v4558_v60  ;;  %v4609_v17 = vld [vmem:[#allocation14 + $0x10f8] sm:$0xff]  ;;  %v4612_v60 = vld [vmem:[#allocation14 + $0x1110] sm:$0xff] }
 0x619   :  { %v4608_v62 = vld [vmem:[#allocation14 + $0x10f0] sm:$0xff] }
 0x61a   :  { %8599 = vmatpush1.bf16.msra.mxu0 %v8598_v40  ;;  %v8870_v40 = vpack.c.bf16 %v4566_v34, %v4560_v33  ;;  %v8884_v33 = vpack.c.bf16 %v4615_v27, %v4609_v17  ;;  %v4619_v34 = vld [vmem:[#allocation14 + $0x1148] sm:$0xff]  ;;  %v4648_v27 = vld [vmem:[#allocation14 + $0x1230] sm:$0xff] }
 0x61b   :  { %8855 = vmatpush1.bf16.msra.mxu1 %v8854_v4  ;;  %8601 = vmatprep.subr.bf16.mxu0 %v8600_v41  ;;  %v8616_v4 = vpack.c.bf16 %v4577_v19, %v4571_v10  ;;  %v4570_v41 = vld [vmem:[#allocation14 + $0xfc0] sm:$0xff]  ;;  %v4625_v10 = vld [vmem:[#allocation14 + $0x1178] sm:$0xff] }
 0x61c   :  { %8857 = vmatprep.subr.bf16.mxu1 %v8856_v39  ;;  %v4578_v39 = vld [vmem:[#allocation14 + $0x1000] sm:$0xff]  ;;  %v8618_v49 = vpack.c.bf16 %v4576_v15, %v4570_v41  ;;  %v4621_v19 = vld [vmem:[#allocation14 + $0x1158] sm:$0xff]  ;;  %v4624_v41 = vld [vmem:[#allocation14 + $0x1170] sm:$0xff] }
 0x61d   :  { %v4620_v15 = vld [vmem:[#allocation14 + $0x1150] sm:$0xff] }
 0x61e   :  { %8603 = vmatpush1.bf16.msra.mxu0 %v8602_v51  ;;  %v8874_v51 = vpack.c.bf16 %v4578_v39, %v4572_v61  ;;  %v8888_v61 = vpack.c.bf16 %v4627_v35, %v4621_v19  ;;  %v4631_v39 = vld [vmem:[#allocation14 + $0x11a8] sm:$0xff]  ;;  %v4660_v35 = vld [vmem:[#allocation14 + $0x1290] sm:$0xff] }
 0x61f   :  { %8859 = vmatpush1.bf16.msra.mxu1 %v8858_v55  ;;  %8605 = vmatprep.subr.bf16.mxu0 %v8604_v56  ;;  %v8620_v55 = vpack.c.bf16 %v4589_v46, %v4583_v25  ;;  %v4582_v56 = vld [vmem:[#allocation14 + $0x1020] sm:$0xff]  ;;  %v4637_v25 = vld [vmem:[#allocation14 + $0x11d8] sm:$0xff] }
 0x620   :  { %8861 = vmatprep.subr.bf16.mxu1 %v8860_v42  ;;  %v4590_v42 = vld [vmem:[#allocation14 + $0x1060] sm:$0xff]  ;;  %v8622_v13 = vpack.c.bf16 %v4588_v0, %v4582_v56  ;;  %v4633_v46 = vld [vmem:[#allocation14 + $0x11b8] sm:$0xff]  ;;  %v4636_v56 = vld [vmem:[#allocation14 + $0x11d0] sm:$0xff] }
 0x621   :  { %v4632_v0 = vld [vmem:[#allocation14 + $0x11b0] sm:$0xff] }
 0x622   :  { %8607 = vmatpush1.bf16.msra.mxu0 %v8606_v16  ;;  %v8878_v16 = vpack.c.bf16 %v4590_v42, %v4584_v2  ;;  %v8892_v2 = vpack.c.bf16 %v4639_v47, %v4633_v46  ;;  %v4643_v42 = vld [vmem:[#allocation14 + $0x1208] sm:$0xff] }
 0x623   :  { %8863 = vmatpush1.bf16.msra.mxu1 %v8862_v21  ;;  %8609 = vmatprep.subr.bf16.mxu0 %v8608_v44  ;;  %v8624_v21 = vpack.c.bf16 %v4601_v7, %v4595_v6  ;;  %v4594_v44 = vld [vmem:[#allocation14 + $0x1080] sm:$0xff]  ;;  %v4649_v6 = vld [vmem:[#allocation14 + $0x1238] sm:$0xff] }
 0x624   :  { %8865 = vmatprep.subr.bf16.mxu1 %v8864_v23  ;;  %v4602_v23 = vld [vmem:[#allocation14 + $0x10c0] sm:$0xff]  ;;  %v8626_v20 = vpack.c.bf16 %v4600_v5, %v4594_v44  ;;  %v4645_v7 = vld [vmem:[#allocation14 + $0x1218] sm:$0xff]  ;;  %v2901_v44 = vrot.slane %v10468_v53, %v10392_v50  ;;  %v2905_v5 = vrot.slane %v10468_v53, %v10377_v54 }
 0x626   :  { %8611 = vmatpush1.bf16.msra.mxu0 %v8610_v26  ;;  %v8882_v26 = vpack.c.bf16 %v4602_v23, %v4596_v9  ;;  %v2913_v9 = vrot.slane %v10468_v53, %v1270_v58  ;;  %v4642_v23 = vld [vmem:[#allocation14 + $0x1200] sm:$0xff] }
 0x627   :  { %8867 = vmatpush1.bf16.msra.mxu1 %v8866_v63  ;;  %8613 = vmatprep.subr.bf16.mxu0 %v8612_v29  ;;  %v8628_v63 = vpack.c.bf16 %v4613_v36, %v4607_v24  ;;  %v4606_v29 = vld [vmem:[#allocation14 + $0x10e0] sm:$0xff]  ;;  %v8642_v19 = vpack.c.bf16 %v4648_v27, %v4642_v23  ;;  %v4693_v23 = vld [vmem:[#allocation14 + $0x1398] sm:$0xff] }
 0x628   :  { %8869 = vmatprep.subr.bf16.mxu1 %v8868_v32  ;;  %v4614_v32 = vld [vmem:[#allocation14 + $0x1120] sm:$0xff]  ;;  %v8630_v12 = vpack.c.bf16 %v4612_v60, %v4606_v29  ;;  %v4655_v60 = vld [vmem:[#allocation14 + $0x1268] sm:$0xff] }
 0x629   :  { %v4654_v53 = vld [vmem:[#allocation14 + $0x1260] sm:$0xff] }
 0x62a   :  { %8615 = vmatpush1.bf16.msra.mxu0 %v8614_v38  ;;  %v8886_v38 = vpack.c.bf16 %v4614_v32, %v4608_v62  ;;  %v4657_v32 = vld [vmem:[#allocation14 + $0x1278] sm:$0xff]  ;;  %v8646_v46 = vpack.c.bf16 %v4660_v35, %v4654_v53  ;;  %v4702_v35 = vld [vmem:[#allocation14 + $0x13e0] sm:$0xff] }
 0x62b   :  { %8871 = vmatpush1.bf16.msra.mxu1 %v8870_v40  ;;  %8617 = vmatprep.subr.bf16.mxu0 %v8616_v4  ;;  %v8632_v40 = vpack.c.bf16 %v4625_v10, %v4619_v34  ;;  %v4618_v4 = vld [vmem:[#allocation14 + $0x1140] sm:$0xff]  ;;  %v4663_v34 = vld [vmem:[#allocation14 + $0x12a8] sm:$0xff] }
 0x62c   :  { %8873 = vmatprep.subr.bf16.mxu1 %v8872_v37  ;;  %v4626_v37 = vld [vmem:[#allocation14 + $0x1180] sm:$0xff]  ;;  %v8634_v48 = vpack.c.bf16 %v4624_v41, %v4618_v4  ;;  %v4667_v4 = vld [vmem:[#allocation14 + $0x12c8] sm:$0xff] }
 0x62e   :  { %8619 = vmatpush1.bf16.msra.mxu0 %v8618_v49  ;;  %v8890_v49 = vpack.c.bf16 %v4626_v37, %v4620_v15  ;;  %v8900_v15 = vpack.c.bf16 %v4663_v34, %v4657_v32  ;;  %v4669_v37 = vld [vmem:[#allocation14 + $0x12d8] sm:$0xff] }
 0x62f   :  { %8875 = vmatpush1.bf16.msra.mxu1 %v8874_v51  ;;  %8621 = vmatprep.subr.bf16.mxu0 %v8620_v55  ;;  %v8636_v51 = vpack.c.bf16 %v4637_v25, %v4631_v39  ;;  %v4630_v55 = vld [vmem:[#allocation14 + $0x11a0] sm:$0xff]  ;;  %v4675_v39 = vld [vmem:[#allocation14 + $0x1308] sm:$0xff]  ;;  %v4709_v32 = vld [vmem:[#allocation14 + $0x1418] sm:$0xff] }
 0x630   :  { %8877 = vmatprep.subr.bf16.mxu1 %v8876_v52  ;;  %v4638_v52 = vld [vmem:[#allocation14 + $0x11e0] sm:$0xff]  ;;  %v8638_v11 = vpack.c.bf16 %v4636_v56, %v4630_v55  ;;  %v8904_v55 = vpack.c.bf16 %v4675_v39, %v4669_v37  ;;  %v4668_v56 = vld [vmem:[#allocation14 + $0x12d0] sm:$0xff]  ;;  %v4705_v34 = vld [vmem:[#allocation14 + $0x13f8] sm:$0xff] }
 0x631   :  { %v4721_v37 = vld [vmem:[#allocation14 + $0x1478] sm:$0xff] }
 0x632   :  { %8623 = vmatpush1.bf16.msra.mxu0 %v8622_v13  ;;  %v8894_v13 = vpack.c.bf16 %v4638_v52, %v4632_v0  ;;  %v4674_v0 = vld [vmem:[#allocation14 + $0x1300] sm:$0xff]  ;;  %v4685_v52 = vld [vmem:[#allocation14 + $0x1358] sm:$0xff] }
 0x633   :  { %8879 = vmatpush1.bf16.msra.mxu1 %v8878_v16  ;;  %8625 = vmatprep.subr.bf16.mxu0 %v8624_v21  ;;  %v8640_v16 = vpack.c.bf16 %v4649_v6, %v4643_v42  ;;  %v8896_v21 = vpack.c.bf16 %v4651_v8, %v4645_v7  ;;  %v4681_v42 = vld [vmem:[#allocation14 + $0x1338] sm:$0xff]  ;;  %v4687_v6 = vld [vmem:[#allocation14 + $0x1368] sm:$0xff]  ;;  %v8906_v8 = vpack.c.bf16 %v4674_v0, %v4668_v56  ;;  %v4716_v0 = vld [vmem:[#allocation14 + $0x1450] sm:$0xff] }
 0x634   :  { %8881 = vmatprep.subr.bf16.mxu1 %v8880_v18  ;;  %v4717_v39 = vld [vmem:[#allocation14 + $0x1458] sm:$0xff] }
 0x636   :  { %8627 = vmatpush1.bf16.msra.mxu0 %v8626_v20  ;;  %v4644_v20 = vld [vmem:[#allocation14 + $0x1210] sm:$0xff] }
 0x637   :  { %8883 = vmatpush1.bf16.msra.mxu1 %v8882_v26  ;;  %8629 = vmatprep.subr.bf16.mxu0 %v8628_v63  ;;  %v4650_v26 = vld [vmem:[#allocation14 + $0x1240] sm:$0xff] }
 0x638   :  { %8885 = vmatprep.subr.bf16.mxu1 %v8884_v33  ;;  %v4661_v33 = vld [vmem:[#allocation14 + $0x1298] sm:$0xff]  ;;  %v8898_v58 = vpack.c.bf16 %v4650_v26, %v4644_v20  ;;  %v4690_v20 = vld [vmem:[#allocation14 + $0x1380] sm:$0xff]  ;;  %v4696_v26 = vld [vmem:[#allocation14 + $0x13b0] sm:$0xff] }
 0x639   :  { %v8644_v41 = vpack.c.bf16 %v4661_v33, %v4655_v60  ;;  %v4692_v60 = vld [vmem:[#allocation14 + $0x1390] sm:$0xff]  ;;  %v4703_v33 = vld [vmem:[#allocation14 + $0x13e8] sm:$0xff] }
 0x63a   :  { %8631 = vmatpush1.bf16.msra.mxu0 %v8630_v12 }
 0x63b   :  { %8887 = vmatpush1.bf16.msra.mxu1 %v8886_v38  ;;  %8633 = vmatprep.subr.bf16.mxu0 %v8632_v40  ;;  %v4656_v38 = vld [vmem:[#allocation14 + $0x1270] sm:$0xff]  ;;  %v4662_v40 = vld [vmem:[#allocation14 + $0x12a0] sm:$0xff] }
 0x63c   :  { %8889 = vmatprep.subr.bf16.mxu1 %v8888_v61  ;;  %v4673_v61 = vld [vmem:[#allocation14 + $0x12f8] sm:$0xff]  ;;  %v8902_v47 = vpack.c.bf16 %v4662_v40, %v4656_v38  ;;  %v4708_v38 = vld [vmem:[#allocation14 + $0x1410] sm:$0xff]  ;;  %v8660_v40 = vpack.c.bf16 %v4709_v32, %v4703_v33  ;;  %v4746_v33 = vld [vmem:[#allocation14 + $0x1540] sm:$0xff] }
 0x63d   :  { %v4751_v32 = vld [vmem:[#allocation14 + $0x1568] sm:$0xff] }
 0x63e   :  { %8635 = vmatpush1.bf16.msra.mxu0 %v8634_v48  ;;  %v4666_v48 = vld [vmem:[#allocation14 + $0x12c0] sm:$0xff] }
 0x63f   :  { %8891 = vmatpush1.bf16.msra.mxu1 %v8890_v49  ;;  %8637 = vmatprep.subr.bf16.mxu0 %v8636_v51  ;;  %v4672_v49 = vld [vmem:[#allocation14 + $0x12f0] sm:$0xff]  ;;  %v8648_v51 = vpack.c.bf16 %v4673_v61, %v4667_v4  ;;  %v4715_v61 = vld [vmem:[#allocation14 + $0x1448] sm:$0xff] }
 0x640   :  { %8893 = vmatprep.subr.bf16.mxu1 %v8892_v2  ;;  %v4679_v2 = vld [vmem:[#allocation14 + $0x1328] sm:$0xff]  ;;  %v8650_v7 = vpack.c.bf16 %v4672_v49, %v4666_v48  ;;  %v4714_v49 = vld [vmem:[#allocation14 + $0x1440] sm:$0xff] }
 0x642   :  { %8639 = vmatpush1.bf16.msra.mxu0 %v8638_v11  ;;  %v4678_v11 = vld [vmem:[#allocation14 + $0x1320] sm:$0xff] }
 0x643   :  { %8895 = vmatpush1.bf16.msra.mxu1 %v8894_v13  ;;  %8641 = vmatprep.subr.bf16.mxu0 %v8640_v16  ;;  %v4684_v13 = vld [vmem:[#allocation14 + $0x1350] sm:$0xff]  ;;  %v8652_v16 = vpack.c.bf16 %v4685_v52, %v4679_v2  ;;  %v4722_v2 = vld [vmem:[#allocation14 + $0x1480] sm:$0xff]  ;;  %v4727_v52 = vld [vmem:[#allocation14 + $0x14a8] sm:$0xff] }
 0x644   :  { %8897 = vmatprep.subr.bf16.mxu1 %v8896_v21  ;;  %v8908_v21 = vpack.c.bf16 %v4687_v6, %v4681_v42  ;;  %v4733_v42 = vld [vmem:[#allocation14 + $0x14d8] sm:$0xff] }
 0x645   :  { %v4729_v6 = vld [vmem:[#allocation14 + $0x14b8] sm:$0xff] }
 0x658   :  { %v3769_v18 = vpop.f32.mrb[14].mxu0 }
 0x659   :  { %v9516_v24 = vadd.f32 %v3769_v18, %v2901_v44  ;;  %v10484_v36 = vpop.f32.mrb[14].mxu1  ;;  %v3771_v17 = vpop.f32.mrb[15].mxu0  ;;  %v4680_v44 = vld [vmem:[#allocation14 + $0x1330] sm:$0xff]  ;;  %v4697_v18 = vld [vmem:[#allocation14 + $0x13b8] sm:$0xff] }
 0x65a   :  { %v9517_v63 = vadd.f32 %v3771_v17, %v2905_v5  ;;  %v4055_v29 = vpop.f32.mrb[15].mxu1  ;;  %v4686_v5 = vld [vmem:[#allocation14 + $0x1360] sm:$0xff]  ;;  %v8654_v17 = vpack.c.bf16 %v4684_v13, %v4678_v11  ;;  %v8922_v11 = vpack.c.bf16 %v4722_v2, %v4716_v0  ;;  %v4764_v2 = vld [vmem:[#allocation14 + $0x15d0] sm:$0xff] }
 0x65b   :  { %v9519_v62 = vadd.f32 %v4055_v29, %v2913_v9  ;;  %v10488_v12 = vmax.f32 %v9516_v24, 0.0  ;;  %v4691_v9 = vld [vmem:[#allocation14 + $0x1388] sm:$0xff]  ;;  %v8910_v27 = vpack.c.bf16 %v4686_v5, %v4680_v44  ;;  %v4726_v13 = vld [vmem:[#allocation14 + $0x14a0] sm:$0xff]  ;;  %v4728_v5 = vld [vmem:[#allocation14 + $0x14b0] sm:$0xff] }
 0x65c   :  { %v10486_v10 = vmax.f32 %v9517_v63, 0.0  ;;  %v4699_v24 = vld [vmem:[#allocation14 + $0x13c8] sm:$0xff]  ;;  %v8656_v63 = vpack.c.bf16 %v4697_v18, %v4691_v9  ;;  %v4734_v9 = vld [vmem:[#allocation14 + $0x14e0] sm:$0xff] }
 0x65d   :  { %v10492_v25 = vmax.f32 %v9519_v62, 0.0  ;;  %v8912_v29 = vpack.c.bf16 %v4699_v24, %v4693_v23  ;;  %v4698_v62 = vld [vmem:[#allocation14 + $0x13c0] sm:$0xff]  ;;  %v4739_v18 = vld [vmem:[#allocation14 + $0x1508] sm:$0xff]  ;;  %v4745_v23 = vld [vmem:[#allocation14 + $0x1538] sm:$0xff] }
 0x65e   :  { %5072 = vmatprep.mubr.f32.mxu0 %v10486_v10  ;;  %5356 = vmatprep.mubr.f32.mxu1 %v10486_v10  ;;  %v8914_v53 = vpack.c.bf16 %v4698_v62, %v4692_v60  ;;  %v4741_v24 = vld [vmem:[#allocation14 + $0x1518] sm:$0xff]  ;;  %v4740_v62 = vld [vmem:[#allocation14 + $0x1510] sm:$0xff] }
 0x65f   :  { %5073 = vmatmul.mubr.f32.vlgmr.msra.gmra.mrb[16].mxu0 %v10488_v12  ;;  %5357 = vmatmul.mubr.f32.vlgmr.msra.gmra.mrb[16].mxu1 %v10488_v12 }
 0x660   :  { %8643 = vmatpush1.bf16.msra.mxu0 %v8642_v19  ;;  %8899 = vmatpush1.bf16.msra.mxu1 %v8898_v58  ;;  %v4711_v19 = vld [vmem:[#allocation14 + $0x1428] sm:$0xff]  ;;  %v8658_v58 = vpack.c.bf16 %v4696_v26, %v4690_v20  ;;  %v8926_v20 = vpack.c.bf16 %v4734_v9, %v4728_v5  ;;  %v4738_v26 = vld [vmem:[#allocation14 + $0x1500] sm:$0xff]  ;;  %v4776_v9 = vld [vmem:[#allocation14 + $0x1630] sm:$0xff] }
 0x661   :  { %5143 = vmatprep.mubr.f32.mxu0 %v10492_v25  ;;  %5427 = vmatprep.mubr.f32.mxu1 %v10492_v25  ;;  %v8916_v4 = vpack.c.bf16 %v4711_v19, %v4705_v34  ;;  %v4757_v34 = vld [vmem:[#allocation14 + $0x1598] sm:$0xff] }
 0x662   :  { %8645 = vmatprep.subr.bf16.mxu0 %v8644_v41  ;;  %8901 = vmatprep.subr.bf16.mxu1 %v8900_v15  ;;  %v4704_v41 = vld [vmem:[#allocation14 + $0x13f0] sm:$0xff]  ;;  %v4710_v15 = vld [vmem:[#allocation14 + $0x1420] sm:$0xff]  ;;  %v4753_v19 = vld [vmem:[#allocation14 + $0x1578] sm:$0xff] }
 0x663   :  { %v8918_v48 = vpack.c.bf16 %v4710_v15, %v4704_v41  ;;  %v4752_v15 = vld [vmem:[#allocation14 + $0x1570] sm:$0xff] }
 0x664   :  { %8647 = vmatpush1.bf16.msra.mxu0 %v8646_v46  ;;  %8903 = vmatpush1.bf16.msra.mxu1 %v8902_v47  ;;  %v4723_v46 = vld [vmem:[#allocation14 + $0x1488] sm:$0xff]  ;;  %v8662_v47 = vpack.c.bf16 %v4708_v38, %v4702_v35  ;;  %v8930_v35 = vpack.c.bf16 %v4746_v33, %v4740_v62  ;;  %v4750_v38 = vld [vmem:[#allocation14 + $0x1560] sm:$0xff]  ;;  %v4788_v33 = vld [vmem:[#allocation14 + $0x1690] sm:$0xff] }
 0x665   :  { %8649 = vmatprep.subr.bf16.mxu0 %v8648_v51  ;;  %8905 = vmatprep.subr.bf16.mxu1 %v8904_v55  ;;  %v4720_v51 = vld [vmem:[#allocation14 + $0x1470] sm:$0xff]  ;;  %v8664_v55 = vpack.c.bf16 %v4721_v37, %v4715_v61  ;;  %v8920_v56 = vpack.c.bf16 %v4723_v46, %v4717_v39  ;;  %v4758_v61 = vld [vmem:[#allocation14 + $0x15a0] sm:$0xff]  ;;  %v4763_v37 = vld [vmem:[#allocation14 + $0x15c8] sm:$0xff] }
 0x666   :  { %v4769_v39 = vld [vmem:[#allocation14 + $0x15f8] sm:$0xff] }
 0x667   :  { %v4765_v46 = vld [vmem:[#allocation14 + $0x15d8] sm:$0xff] }
 0x668   :  { %8651 = vmatpush1.bf16.msra.mxu0 %v8650_v7  ;;  %8907 = vmatpush1.bf16.msra.mxu1 %v8906_v8  ;;  %v4735_v7 = vld [vmem:[#allocation14 + $0x14e8] sm:$0xff]  ;;  %v8666_v8 = vpack.c.bf16 %v4720_v51, %v4714_v49  ;;  %v8934_v49 = vpack.c.bf16 %v4758_v61, %v4752_v15  ;;  %v4762_v51 = vld [vmem:[#allocation14 + $0x15c0] sm:$0xff]  ;;  %v4800_v61 = vld [vmem:[#allocation14 + $0x16f0] sm:$0xff] }
 0x669   :  { %8653 = vmatprep.subr.bf16.mxu0 %v8652_v16  ;;  %8909 = vmatprep.subr.bf16.mxu1 %v8908_v21  ;;  %v4732_v16 = vld [vmem:[#allocation14 + $0x14d0] sm:$0xff]  ;;  %v8668_v21 = vpack.c.bf16 %v4733_v42, %v4727_v52  ;;  %v8924_v44 = vpack.c.bf16 %v4735_v7, %v4729_v6  ;;  %v4770_v52 = vld [vmem:[#allocation14 + $0x1600] sm:$0xff]  ;;  %v4775_v42 = vld [vmem:[#allocation14 + $0x1628] sm:$0xff] }
 0x66a   :  { %v4781_v6 = vld [vmem:[#allocation14 + $0x1658] sm:$0xff] }
 0x66b   :  { %v4777_v7 = vld [vmem:[#allocation14 + $0x1638] sm:$0xff] }
 0x66c   :  { %8655 = vmatpush1.bf16.msra.mxu0 %v8654_v17  ;;  %8911 = vmatpush1.bf16.msra.mxu1 %v8910_v27  ;;  %v4747_v17 = vld [vmem:[#allocation14 + $0x1548] sm:$0xff]  ;;  %v8670_v27 = vpack.c.bf16 %v4732_v16, %v4726_v13  ;;  %v8938_v13 = vpack.c.bf16 %v4770_v52, %v4764_v2  ;;  %v4774_v16 = vld [vmem:[#allocation14 + $0x1620] sm:$0xff]  ;;  %v4812_v52 = vld [vmem:[#allocation14 + $0x1750] sm:$0xff] }
 0x66d   :  { %8657 = vmatprep.subr.bf16.mxu0 %v8656_v63  ;;  %8913 = vmatprep.subr.bf16.mxu1 %v8912_v29  ;;  %v4744_v63 = vld [vmem:[#allocation14 + $0x1530] sm:$0xff]  ;;  %v8672_v29 = vpack.c.bf16 %v4745_v23, %v4739_v18  ;;  %v8928_v60 = vpack.c.bf16 %v4747_v17, %v4741_v24  ;;  %v4782_v18 = vld [vmem:[#allocation14 + $0x1660] sm:$0xff]  ;;  %v4787_v23 = vld [vmem:[#allocation14 + $0x1688] sm:$0xff] }
 0x66e   :  { %v4793_v24 = vld [vmem:[#allocation14 + $0x16b8] sm:$0xff] }
 0x66f   :  { %v4789_v17 = vld [vmem:[#allocation14 + $0x1698] sm:$0xff] }
 0x670   :  { %8659 = vmatpush1.bf16.msra.mxu0 %v8658_v58  ;;  %8915 = vmatpush1.bf16.msra.mxu1 %v8914_v53  ;;  %v4759_v58 = vld [vmem:[#allocation14 + $0x15a8] sm:$0xff]  ;;  %v8674_v53 = vpack.c.bf16 %v4744_v63, %v4738_v26  ;;  %v8942_v26 = vpack.c.bf16 %v4782_v18, %v4776_v9  ;;  %v4786_v63 = vld [vmem:[#allocation14 + $0x1680] sm:$0xff] }
 0x671   :  { %8661 = vmatprep.subr.bf16.mxu0 %v8660_v40  ;;  %8917 = vmatprep.subr.bf16.mxu1 %v8916_v4  ;;  %v4756_v40 = vld [vmem:[#allocation14 + $0x1590] sm:$0xff]  ;;  %v8676_v4 = vpack.c.bf16 %v4757_v34, %v4751_v32  ;;  %v8932_v41 = vpack.c.bf16 %v4759_v58, %v4753_v19  ;;  %v4794_v32 = vld [vmem:[#allocation14 + $0x16c0] sm:$0xff]  ;;  %v4799_v34 = vld [vmem:[#allocation14 + $0x16e8] sm:$0xff] }
 0x672   :  { %v4805_v19 = vld [vmem:[#allocation14 + $0x1718] sm:$0xff] }
 0x673   :  { %v4801_v58 = vld [vmem:[#allocation14 + $0x16f8] sm:$0xff] }
 0x674   :  { %8663 = vmatpush1.bf16.msra.mxu0 %v8662_v47  ;;  %8919 = vmatpush1.bf16.msra.mxu1 %v8918_v48  ;;  %v4771_v47 = vld [vmem:[#allocation14 + $0x1608] sm:$0xff]  ;;  %v8678_v48 = vpack.c.bf16 %v4756_v40, %v4750_v38  ;;  %v8946_v38 = vpack.c.bf16 %v4794_v32, %v4788_v33  ;;  %v4798_v40 = vld [vmem:[#allocation14 + $0x16e0] sm:$0xff]  ;;  %v4076_v32 = vld [vmem:[#allocation14 + $0x50] sm:$0xff] }
 0x675   :  { %8665 = vmatprep.subr.bf16.mxu0 %v8664_v55  ;;  %8921 = vmatprep.subr.bf16.mxu1 %v8920_v56  ;;  %v4768_v55 = vld [vmem:[#allocation14 + $0x15f0] sm:$0xff]  ;;  %v8680_v56 = vpack.c.bf16 %v4769_v39, %v4763_v37  ;;  %v8936_v0 = vpack.c.bf16 %v4771_v47, %v4765_v46  ;;  %v4806_v37 = vld [vmem:[#allocation14 + $0x1720] sm:$0xff]  ;;  %v4811_v39 = vld [vmem:[#allocation14 + $0x1748] sm:$0xff] }
 0x676   :  { %v4817_v46 = vld [vmem:[#allocation14 + $0x1778] sm:$0xff]  ;;  %v4070_v33 = vld [vmem:[#allocation14 + $0x20] sm:$0xff] }
 0x677   :  { %v4813_v47 = vld [vmem:[#allocation14 + $0x1758] sm:$0xff] }
 0x678   :  { %8667 = vmatpush1.bf16.msra.mxu0 %v8666_v8  ;;  %8923 = vmatpush1.bf16.msra.mxu1 %v8922_v11  ;;  %v4783_v8 = vld [vmem:[#allocation14 + $0x1668] sm:$0xff]  ;;  %v8682_v11 = vpack.c.bf16 %v4768_v55, %v4762_v51  ;;  %v8950_v51 = vpack.c.bf16 %v4806_v37, %v4800_v61  ;;  %v4810_v55 = vld [vmem:[#allocation14 + $0x1740] sm:$0xff]  ;;  %v4088_v61 = vld [vmem:[#allocation14 + $0xb0] sm:$0xff] }
 0x679   :  { %8669 = vmatprep.subr.bf16.mxu0 %v8668_v21  ;;  %8925 = vmatprep.subr.bf16.mxu1 %v8924_v44  ;;  %v4780_v21 = vld [vmem:[#allocation14 + $0x1650] sm:$0xff]  ;;  %v8684_v44 = vpack.c.bf16 %v4781_v6, %v4775_v42  ;;  %v8940_v5 = vpack.c.bf16 %v4783_v8, %v4777_v7  ;;  %v4818_v42 = vld [vmem:[#allocation14 + $0x1780] sm:$0xff]  ;;  %v4823_v6 = vld [vmem:[#allocation14 + $0x17a8] sm:$0xff] }
 0x67a   :  { %v4829_v7 = vld [vmem:[#allocation14 + $0x17d8] sm:$0xff]  ;;  %v5748_v37 = vld [vmem:[#allocation17 + $0x60] sm:$0xff] }
 0x67b   :  { %v4825_v8 = vld [vmem:[#allocation14 + $0x17b8] sm:$0xff]  ;;  %v8700_v18 = vpack.c.bf16 %v4829_v7, %v4823_v6 }
 0x67c   :  { %8671 = vmatpush1.bf16.msra.mxu0 %v8670_v27  ;;  %8927 = vmatpush1.bf16.msra.mxu1 %v8926_v20  ;;  %v4795_v27 = vld [vmem:[#allocation14 + $0x16c8] sm:$0xff]  ;;  %v8686_v20 = vpack.c.bf16 %v4780_v21, %v4774_v16  ;;  %v8954_v16 = vpack.c.bf16 %v4818_v42, %v4812_v52  ;;  %v4822_v21 = vld [vmem:[#allocation14 + $0x17a0] sm:$0xff]  ;;  %v4100_v52 = vld [vmem:[#allocation14 + $0x110] sm:$0xff] }
 0x67d   :  { %8673 = vmatprep.subr.bf16.mxu0 %v8672_v29  ;;  %8929 = vmatprep.subr.bf16.mxu1 %v8928_v60  ;;  %v4792_v29 = vld [vmem:[#allocation14 + $0x16b0] sm:$0xff]  ;;  %v8688_v60 = vpack.c.bf16 %v4793_v24, %v4787_v23  ;;  %v8944_v62 = vpack.c.bf16 %v4795_v27, %v4789_v17  ;;  %v4830_v17 = vld [vmem:[#allocation14 + $0x17e0] sm:$0xff]  ;;  %v4071_v27 = vld [vmem:[#allocation14 + $0x28] sm:$0xff] }
 0x67e   :  { %v4824_v24 = vld [vmem:[#allocation14 + $0x17b0] sm:$0xff]  ;;  %v5760_v42 = vld [vmem:[#allocation17 + $0xc0] sm:$0xff] }
 0x67f   :  { %v5766_v7 = vld [vmem:[#allocation17 + $0xf0] sm:$0xff] }
 0x680   :  { %8675 = vmatpush1.bf16.msra.mxu0 %v8674_v53  ;;  %8931 = vmatpush1.bf16.msra.mxu1 %v8930_v35  ;;  %v4807_v53 = vld [vmem:[#allocation14 + $0x1728] sm:$0xff]  ;;  %v8690_v35 = vpack.c.bf16 %v4792_v29, %v4786_v63  ;;  %v5743_v63 = vld [vmem:[#allocation17 + $0x38] sm:$0xff] }
 0x681   :  { %8677 = vmatprep.subr.bf16.mxu0 %v8676_v4  ;;  %8933 = vmatprep.subr.bf16.mxu1 %v8932_v41  ;;  %v4804_v4 = vld [vmem:[#allocation14 + $0x1710] sm:$0xff]  ;;  %v8692_v41 = vpack.c.bf16 %v4805_v19, %v4799_v34  ;;  %v8948_v15 = vpack.c.bf16 %v4807_v53, %v4801_v58  ;;  %v5736_v34 = vld [vmem:[#allocation17] sm:$0xff]  ;;  %v4089_v53 = vld [vmem:[#allocation14 + $0xb8] sm:$0xff] }
 0x682   :  { %v5742_v19 = vld [vmem:[#allocation17 + $0x30] sm:$0xff]  ;;  %v4083_v58 = vld [vmem:[#allocation14 + $0x88] sm:$0xff] }
 0x684   :  { %8679 = vmatpush1.bf16.msra.mxu0 %v8678_v48  ;;  %8935 = vmatpush1.bf16.msra.mxu1 %v8934_v49  ;;  %v4819_v48 = vld [vmem:[#allocation14 + $0x1788] sm:$0xff]  ;;  %v8694_v49 = vpack.c.bf16 %v4804_v4, %v4798_v40  ;;  %v8962_v40 = vpack.c.bf16 %v4076_v32, %v4070_v33 }
 0x685   :  { %8681 = vmatprep.subr.bf16.mxu0 %v8680_v56  ;;  %8937 = vmatprep.subr.bf16.mxu1 %v8936_v0  ;;  %v4816_v56 = vld [vmem:[#allocation14 + $0x1770] sm:$0xff]  ;;  %v8696_v0 = vpack.c.bf16 %v4817_v46, %v4811_v39  ;;  %v8952_v2 = vpack.c.bf16 %v4819_v48, %v4813_v47  ;;  %v4095_v47 = vld [vmem:[#allocation14 + $0xe8] sm:$0xff]  ;;  %v4101_v48 = vld [vmem:[#allocation14 + $0x118] sm:$0xff] }
 0x686   :  { %v5754_v46 = vld [vmem:[#allocation17 + $0x90] sm:$0xff]  ;;  %v5784_v33 = vld [vmem:[#allocation17 + $0x180] sm:$0xff] }
 0x688   :  { %8683 = vmatpush1.bf16.msra.mxu0 %v8682_v11  ;;  %8939 = vmatpush1.bf16.msra.mxu1 %v8938_v13  ;;  %v4831_v11 = vld [vmem:[#allocation14 + $0x17e8] sm:$0xff]  ;;  %v8698_v13 = vpack.c.bf16 %v4816_v56, %v4810_v55  ;;  %v9222_v56 = vpack.c.bf16 %v5754_v46, %v5748_v37 }
 0x689   :  { %8685 = vmatprep.subr.bf16.mxu0 %v8684_v44  ;;  %8941 = vmatprep.subr.bf16.mxu1 %v8940_v5  ;;  %v4828_v44 = vld [vmem:[#allocation14 + $0x17d0] sm:$0xff]  ;;  %v9610_v5 = vld [vmem:[#allocation13] sm:$0xff]  ;;  %v8956_v23 = vpack.c.bf16 %v4831_v11, %v4825_v8  ;;  %v4107_v8 = vld [vmem:[#allocation14 + $0x148] sm:$0xff] }
 0x68a   :  { %v2909_v9 = vrot.slane %v9610_v5, %v1266_v22  ;;  %v8702_v29 = vpack.c.bf16 %v4828_v44, %v4822_v21  ;;  %v4113_v11 = vld [vmem:[#allocation14 + $0x178] sm:$0xff]  ;;  %v9226_v44 = vpack.c.bf16 %v5766_v7, %v5760_v42  ;;  %v4143_v46 = vld [vmem:[#allocation14 + $0x268] sm:$0xff] }
 0x68b   :  { %v5779_v21 = vld [vmem:[#allocation17 + $0x158] sm:$0xff]  ;;  %v8972_v5 = vpack.c.bf16 %v4113_v11, %v4107_v8  ;;  %v4155_v7 = vld [vmem:[#allocation14 + $0x2c8] sm:$0xff] }
 0x68c   :  { %8687 = vmatpush1.bf16.msra.mxu0 %v8686_v20  ;;  %8943 = vmatpush1.bf16.msra.mxu1 %v8942_v26  ;;  %v4077_v20 = vld [vmem:[#allocation14 + $0x58] sm:$0xff]  ;;  %v5737_v26 = vld [vmem:[#allocation17 + $0x8] sm:$0xff] }
 0x68d   :  { %8689 = vmatprep.subr.bf16.mxu0 %v8688_v60  ;;  %8945 = vmatprep.subr.bf16.mxu1 %v8944_v62  ;;  %v8958_v60 = vpack.c.bf16 %v4830_v17, %v4824_v24  ;;  %v9518_v62 = vadd.f32 %v10484_v36, %v2909_v9  ;;  %v8960_v43 = vpack.c.bf16 %v4077_v20, %v4071_v27  ;;  %v4106_v9 = vld [vmem:[#allocation14 + $0x140] sm:$0xff]  ;;  %v5778_v17 = vld [vmem:[#allocation17 + $0x150] sm:$0xff]  ;;  %v4119_v27 = vld [vmem:[#allocation14 + $0x1a8] sm:$0xff] }
 0x68e   :  { %v9216_v22 = vpack.c.bf16 %v5743_v63, %v5737_v26  ;;  %v9218_v36 = vpack.c.bf16 %v5742_v19, %v5736_v34  ;;  %v4125_v20 = vld [vmem:[#allocation14 + $0x1d8] sm:$0xff]  ;;  %v5785_v26 = vld [vmem:[#allocation17 + $0x188] sm:$0xff] }
 0x68f   :  { %v10501_v4 = vmax.f32 %v9518_v62, 0.0  ;;  %v5791_v63 = vld [vmem:[#allocation17 + $0x1b8] sm:$0xff]  ;;  %v8976_v62 = vpack.c.bf16 %v4125_v20, %v4119_v27  ;;  %v5790_v34 = vld [vmem:[#allocation17 + $0x1b0] sm:$0xff]  ;;  %v4131_v19 = vld [vmem:[#allocation14 + $0x208] sm:$0xff] }
 0x690   :  { %8691 = vmatpush1.bf16.msra.mxu0 %v8690_v35  ;;  %8947 = vmatpush1.bf16.msra.mxu1 %v8946_v38  ;;  %v5749_v35 = vld [vmem:[#allocation17 + $0x68] sm:$0xff]  ;;  %v5755_v38 = vld [vmem:[#allocation17 + $0x98] sm:$0xff]  ;;  %v9232_v32 = vpack.c.bf16 %v5791_v63, %v5785_v26 }
 0x691   :  { %8693 = vmatprep.subr.bf16.mxu0 %v8692_v41  ;;  %8949 = vmatprep.subr.bf16.mxu1 %v8948_v15  ;;  %v8964_v41 = vpack.c.bf16 %v4089_v53, %v4083_v58  ;;  %v4082_v15 = vld [vmem:[#allocation14 + $0x80] sm:$0xff]  ;;  %v9220_v39 = vpack.c.bf16 %v5755_v38, %v5749_v35  ;;  %v4137_v58 = vld [vmem:[#allocation14 + $0x238] sm:$0xff]  ;;  %v5797_v53 = vld [vmem:[#allocation17 + $0x1e8] sm:$0xff] }
 0x692   :  { %v8966_v55 = vpack.c.bf16 %v4088_v61, %v4082_v15  ;;  %v5803_v35 = vld [vmem:[#allocation17 + $0x218] sm:$0xff]  ;;  %v4136_v15 = vld [vmem:[#allocation14 + $0x230] sm:$0xff]  ;;  %v5796_v61 = vld [vmem:[#allocation17 + $0x1e0] sm:$0xff] }
 0x693   :  { %v9236_v37 = vpack.c.bf16 %v5803_v35, %v5797_v53  ;;  %v4161_v8 = vld [vmem:[#allocation14 + $0x2f8] sm:$0xff]  ;;  %v5821_v11 = vld [vmem:[#allocation17 + $0x2a8] sm:$0xff] }
 0x694   :  { %8695 = vmatpush1.bf16.msra.mxu0 %v8694_v49  ;;  %8951 = vmatpush1.bf16.msra.mxu1 %v8950_v51  ;;  %v5761_v49 = vld [vmem:[#allocation17 + $0xc8] sm:$0xff]  ;;  %v5767_v51 = vld [vmem:[#allocation17 + $0xf8] sm:$0xff] }
 0x695   :  { %8697 = vmatprep.subr.bf16.mxu0 %v8696_v0  ;;  %8953 = vmatprep.subr.bf16.mxu1 %v8952_v2  ;;  %v8968_v0 = vpack.c.bf16 %v4101_v48, %v4095_v47  ;;  %v4094_v2 = vld [vmem:[#allocation14 + $0xe0] sm:$0xff]  ;;  %v9224_v6 = vpack.c.bf16 %v5767_v51, %v5761_v49  ;;  %v4149_v47 = vld [vmem:[#allocation14 + $0x298] sm:$0xff]  ;;  %v5809_v48 = vld [vmem:[#allocation17 + $0x248] sm:$0xff] }
 0x696   :  { %v5815_v49 = vld [vmem:[#allocation17 + $0x278] sm:$0xff]  ;;  %v5833_v20 = vld [vmem:[#allocation17 + $0x308] sm:$0xff] }
 0x697   :  { %v9240_v42 = vpack.c.bf16 %v5815_v49, %v5809_v48  ;;  %v4173_v27 = vld [vmem:[#allocation14 + $0x358] sm:$0xff] }
 0x698   :  { %8699 = vmatpush1.bf16.msra.mxu0 %v8698_v13  ;;  %8955 = vmatpush1.bf16.msra.mxu1 %v8954_v16  ;;  %v10506_v13 = vld [vmem:[#allocation2 + $0x8] sm:$0xff]  ;;  %v5773_v16 = vld [vmem:[#allocation17 + $0x128] sm:$0xff] }
 0x699   :  { %8701 = vmatprep.subr.bf16.mxu0 %v8700_v18  ;;  %8957 = vmatprep.subr.bf16.mxu1 %v8956_v23  ;;  %v4112_v18 = vld [vmem:[#allocation14 + $0x170] sm:$0xff]  ;;  %v5772_v23 = vld [vmem:[#allocation17 + $0x120] sm:$0xff]  ;;  %v9228_v24 = vpack.c.bf16 %v5779_v21, %v5773_v16  ;;  %v5827_v16 = vld [vmem:[#allocation17 + $0x2d8] sm:$0xff] }
 0x69a   :  { %v5839_v26 = vld [vmem:[#allocation17 + $0x338] sm:$0xff] }
 0x69b   :  { %v5851_v53 = vld [vmem:[#allocation17 + $0x398] sm:$0xff] }
 0x69c   :  { %8703 = vmatpush1.bf16.msra.mxu0 %v8702_v29  ;;  %8959 = vmatpush1.bf16.msra.mxu1 %v8958_v60  ;;  %v8974_v29 = vpack.c.bf16 %v4112_v18, %v4106_v9  ;;  %v9230_v60 = vpack.c.bf16 %v5778_v17, %v5772_v23  ;;  %v4160_v9 = vld [vmem:[#allocation14 + $0x2f0] sm:$0xff]  ;;  %v5820_v18 = vld [vmem:[#allocation17 + $0x2a0] sm:$0xff]  ;;  %v9244_v23 = vpack.c.bf16 %v5827_v16, %v5821_v11  ;;  %v5863_v48 = vld [vmem:[#allocation17 + $0x3f8] sm:$0xff] }
 0x69d   :  { %8961 = vmatprep.subr.bf16.mxu0 %v8960_v43  ;;  %9217 = vmatprep.subr.bf16.mxu1 %v9216_v22  ;;  %v4118_v43 = vld [vmem:[#allocation14 + $0x1a0] sm:$0xff]  ;;  %v4124_v22 = vld [vmem:[#allocation14 + $0x1d0] sm:$0xff]  ;;  %v4167_v17 = vld [vmem:[#allocation14 + $0x328] sm:$0xff] }
 0x69e   :  { %v8978_v38 = vpack.c.bf16 %v4124_v22, %v4118_v43  ;;  %v4172_v43 = vld [vmem:[#allocation14 + $0x350] sm:$0xff]  ;;  %v5832_v22 = vld [vmem:[#allocation17 + $0x300] sm:$0xff]  ;;  %v5875_v11 = vld [vmem:[#allocation17 + $0x458] sm:$0xff] }
 0x69f   :  { %5144 = vmatmul.mubr.f32.vlgmr.msra.gmra.mrb[16].mxu0 %v10501_v4  ;;  %5428 = vmatmul.mubr.f32.vlgmr.msra.gmra.mrb[16].mxu1 %v10501_v4 }
 0x6a0   :  { %8963 = vmatpush1.bf16.msra.mxu0 %v8962_v40  ;;  %5498 = vmatprep.mubr.f32.mxu0 %v10448_v45  ;;  %v8970_v45 = vpack.c.bf16 %v4100_v52, %v4094_v2  ;;  %v9234_v40 = vpack.c.bf16 %v5790_v34, %v5784_v33  ;;  %v4148_v2 = vld [vmem:[#allocation14 + $0x290] sm:$0xff]  ;;  %v5808_v52 = vld [vmem:[#allocation17 + $0x240] sm:$0xff]  ;;  %v9248_v33 = vpack.c.bf16 %v5839_v26, %v5833_v20  ;;  %v5887_v20 = vld [vmem:[#allocation17 + $0x4b8] sm:$0xff] }
 0x6a1   :  { %9219 = vmatpush1.bf16.msra.mxu1 %v9218_v36  ;;  %8965 = vmatprep.subr.bf16.mxu0 %v8964_v41  ;;  %v8980_v36 = vpack.c.bf16 %v4137_v58, %v4131_v19  ;;  %v4130_v41 = vld [vmem:[#allocation14 + $0x200] sm:$0xff]  ;;  %v4179_v34 = vld [vmem:[#allocation14 + $0x388] sm:$0xff]  ;;  %v4185_v19 = vld [vmem:[#allocation14 + $0x3b8] sm:$0xff] }
 0x6a2   :  { %9221 = vmatprep.subr.bf16.mxu1 %v9220_v39  ;;  %6088 = vmatprep.mubr.f32.mxu1 %v10506_v13  ;;  %v5802_v39 = vld [vmem:[#allocation17 + $0x210] sm:$0xff]  ;;  %v8982_v51 = vpack.c.bf16 %v4136_v15, %v4130_v41  ;;  %v5845_v58 = vld [vmem:[#allocation17 + $0x368] sm:$0xff]  ;;  %v5844_v15 = vld [vmem:[#allocation17 + $0x360] sm:$0xff] }
 0x6a3   :  { %v4184_v41 = vld [vmem:[#allocation14 + $0x3b0] sm:$0xff] }
 0x6a4   :  { %8967 = vmatpush1.bf16.msra.mxu0 %v8966_v55  ;;  %v9238_v55 = vpack.c.bf16 %v5802_v39, %v5796_v61  ;;  %v9252_v61 = vpack.c.bf16 %v5851_v53, %v5845_v58  ;;  %v4191_v39 = vld [vmem:[#allocation14 + $0x3e8] sm:$0xff]  ;;  %v5899_v58 = vld [vmem:[#allocation17 + $0x518] sm:$0xff] }
 0x6a5   :  { %9223 = vmatpush1.bf16.msra.mxu1 %v9222_v56  ;;  %8969 = vmatprep.subr.bf16.mxu0 %v8968_v0  ;;  %v8984_v56 = vpack.c.bf16 %v4149_v47, %v4143_v46  ;;  %v4142_v0 = vld [vmem:[#allocation14 + $0x260] sm:$0xff]  ;;  %v4197_v46 = vld [vmem:[#allocation14 + $0x418] sm:$0xff]  ;;  %v5857_v47 = vld [vmem:[#allocation17 + $0x3c8] sm:$0xff] }
 0x6a6   :  { %9225 = vmatprep.subr.bf16.mxu1 %v9224_v6  ;;  %v5814_v6 = vld [vmem:[#allocation17 + $0x270] sm:$0xff]  ;;  %v8986_v21 = vpack.c.bf16 %v4148_v2, %v4142_v0  ;;  %v5856_v2 = vld [vmem:[#allocation17 + $0x3c0] sm:$0xff] }
 0x6a7   :  { %v4196_v0 = vld [vmem:[#allocation14 + $0x410] sm:$0xff] }
 0x6a8   :  { %8971 = vmatpush1.bf16.msra.mxu0 %v8970_v45  ;;  %v9242_v45 = vpack.c.bf16 %v5814_v6, %v5808_v52  ;;  %v9256_v52 = vpack.c.bf16 %v5863_v48, %v5857_v47  ;;  %v4203_v6 = vld [vmem:[#allocation14 + $0x448] sm:$0xff]  ;;  %v5911_v47 = vld [vmem:[#allocation17 + $0x578] sm:$0xff] }
 0x6a9   :  { %9227 = vmatpush1.bf16.msra.mxu1 %v9226_v44  ;;  %8973 = vmatprep.subr.bf16.mxu0 %v8972_v5  ;;  %v8988_v44 = vpack.c.bf16 %v4161_v8, %v4155_v7  ;;  %v4154_v5 = vld [vmem:[#allocation14 + $0x2c0] sm:$0xff]  ;;  %v4209_v7 = vld [vmem:[#allocation14 + $0x478] sm:$0xff]  ;;  %v5869_v8 = vld [vmem:[#allocation17 + $0x428] sm:$0xff] }
 0x6aa   :  { %9229 = vmatprep.subr.bf16.mxu1 %v9228_v24  ;;  %v5826_v24 = vld [vmem:[#allocation17 + $0x2d0] sm:$0xff]  ;;  %v8990_v63 = vpack.c.bf16 %v4160_v9, %v4154_v5  ;;  %v5868_v9 = vld [vmem:[#allocation17 + $0x420] sm:$0xff] }
 0x6ab   :  { %v4208_v5 = vld [vmem:[#allocation14 + $0x470] sm:$0xff] }
 0x6ac   :  { %8975 = vmatpush1.bf16.msra.mxu0 %v8974_v29  ;;  %v9246_v29 = vpack.c.bf16 %v5826_v24, %v5820_v18  ;;  %v9260_v18 = vpack.c.bf16 %v5875_v11, %v5869_v8  ;;  %v4215_v24 = vld [vmem:[#allocation14 + $0x4a8] sm:$0xff]  ;;  %v5923_v8 = vld [vmem:[#allocation17 + $0x5d8] sm:$0xff] }
 0x6ad   :  { %9231 = vmatpush1.bf16.msra.mxu1 %v9230_v60  ;;  %8977 = vmatprep.subr.bf16.mxu0 %v8976_v62  ;;  %v8992_v60 = vpack.c.bf16 %v4173_v27, %v4167_v17  ;;  %v4166_v62 = vld [vmem:[#allocation14 + $0x320] sm:$0xff]  ;;  %v4221_v17 = vld [vmem:[#allocation14 + $0x4d8] sm:$0xff]  ;;  %v5881_v27 = vld [vmem:[#allocation17 + $0x488] sm:$0xff] }
 0x6ae   :  { %9233 = vmatprep.subr.bf16.mxu1 %v9232_v32  ;;  %v5838_v32 = vld [vmem:[#allocation17 + $0x330] sm:$0xff]  ;;  %v8994_v35 = vpack.c.bf16 %v4172_v43, %v4166_v62  ;;  %v5880_v43 = vld [vmem:[#allocation17 + $0x480] sm:$0xff] }
 0x6af   :  { %v4220_v62 = vld [vmem:[#allocation14 + $0x4d0] sm:$0xff] }
 0x6b0   :  { %8979 = vmatpush1.bf16.msra.mxu0 %v8978_v38  ;;  %v9250_v38 = vpack.c.bf16 %v5838_v32, %v5832_v22  ;;  %v9264_v22 = vpack.c.bf16 %v5887_v20, %v5881_v27  ;;  %v4227_v32 = vld [vmem:[#allocation14 + $0x508] sm:$0xff]  ;;  %v5935_v27 = vld [vmem:[#allocation17 + $0x638] sm:$0xff] }
 0x6b1   :  { %9235 = vmatpush1.bf16.msra.mxu1 %v9234_v40  ;;  %8981 = vmatprep.subr.bf16.mxu0 %v8980_v36  ;;  %v8996_v40 = vpack.c.bf16 %v4185_v19, %v4179_v34  ;;  %v4178_v36 = vld [vmem:[#allocation14 + $0x380] sm:$0xff]  ;;  %v4233_v34 = vld [vmem:[#allocation14 + $0x538] sm:$0xff]  ;;  %v5893_v19 = vld [vmem:[#allocation17 + $0x4e8] sm:$0xff] }
 0x6b2   :  { %9237 = vmatprep.subr.bf16.mxu1 %v9236_v37  ;;  %v5850_v37 = vld [vmem:[#allocation17 + $0x390] sm:$0xff]  ;;  %v8998_v49 = vpack.c.bf16 %v4184_v41, %v4178_v36  ;;  %v5892_v41 = vld [vmem:[#allocation17 + $0x4e0] sm:$0xff] }
 0x6b3   :  { %v4232_v36 = vld [vmem:[#allocation14 + $0x530] sm:$0xff] }
 0x6b4   :  { %8983 = vmatpush1.bf16.msra.mxu0 %v8982_v51  ;;  %v9254_v51 = vpack.c.bf16 %v5850_v37, %v5844_v15  ;;  %v9268_v15 = vpack.c.bf16 %v5899_v58, %v5893_v19  ;;  %v4239_v37 = vld [vmem:[#allocation14 + $0x568] sm:$0xff]  ;;  %v5947_v58 = vld [vmem:[#allocation17 + $0x698] sm:$0xff] }
 0x6b5   :  { %9239 = vmatpush1.bf16.msra.mxu1 %v9238_v55  ;;  %8985 = vmatprep.subr.bf16.mxu0 %v8984_v56  ;;  %v9000_v55 = vpack.c.bf16 %v4197_v46, %v4191_v39  ;;  %v4190_v56 = vld [vmem:[#allocation14 + $0x3e0] sm:$0xff]  ;;  %v4245_v39 = vld [vmem:[#allocation14 + $0x598] sm:$0xff]  ;;  %v5905_v46 = vld [vmem:[#allocation17 + $0x548] sm:$0xff] }
 0x6b6   :  { %9241 = vmatprep.subr.bf16.mxu1 %v9240_v42  ;;  %v5862_v42 = vld [vmem:[#allocation17 + $0x3f0] sm:$0xff]  ;;  %v9002_v16 = vpack.c.bf16 %v4196_v0, %v4190_v56  ;;  %v5904_v0 = vld [vmem:[#allocation17 + $0x540] sm:$0xff]  ;;  %v5941_v19 = vld [vmem:[#allocation17 + $0x668] sm:$0xff] }
 0x6b7   :  { %v4244_v56 = vld [vmem:[#allocation14 + $0x590] sm:$0xff] }
 0x6b8   :  { %8987 = vmatpush1.bf16.msra.mxu0 %v8986_v21  ;;  %v9258_v21 = vpack.c.bf16 %v5862_v42, %v5856_v2  ;;  %v9272_v2 = vpack.c.bf16 %v5911_v47, %v5905_v46  ;;  %v4251_v42 = vld [vmem:[#allocation14 + $0x5c8] sm:$0xff]  ;;  %v5959_v47 = vld [vmem:[#allocation17 + $0x6f8] sm:$0xff] }
 0x6b9   :  { %9243 = vmatpush1.bf16.msra.mxu1 %v9242_v45  ;;  %8989 = vmatprep.subr.bf16.mxu0 %v8988_v44  ;;  %v9004_v45 = vpack.c.bf16 %v4209_v7, %v4203_v6  ;;  %v4202_v44 = vld [vmem:[#allocation14 + $0x440] sm:$0xff]  ;;  %v4257_v6 = vld [vmem:[#allocation14 + $0x5f8] sm:$0xff]  ;;  %v5917_v7 = vld [vmem:[#allocation17 + $0x5a8] sm:$0xff] }
 0x6ba   :  { %9245 = vmatprep.subr.bf16.mxu1 %v9244_v23  ;;  %v5874_v23 = vld [vmem:[#allocation17 + $0x450] sm:$0xff]  ;;  %v9006_v26 = vpack.c.bf16 %v4208_v5, %v4202_v44  ;;  %v5916_v5 = vld [vmem:[#allocation17 + $0x5a0] sm:$0xff]  ;;  %v5953_v46 = vld [vmem:[#allocation17 + $0x6c8] sm:$0xff] }
 0x6bb   :  { %v4256_v44 = vld [vmem:[#allocation14 + $0x5f0] sm:$0xff] }
 0x6bc   :  { %8991 = vmatpush1.bf16.msra.mxu0 %v8990_v63  ;;  %v9262_v63 = vpack.c.bf16 %v5874_v23, %v5868_v9  ;;  %v9276_v9 = vpack.c.bf16 %v5923_v8, %v5917_v7  ;;  %v4263_v23 = vld [vmem:[#allocation14 + $0x628] sm:$0xff]  ;;  %v5971_v7 = vld [vmem:[#allocation17 + $0x758] sm:$0xff] }
 0x6bd   :  { %9247 = vmatpush1.bf16.msra.mxu1 %v9246_v29  ;;  %8993 = vmatprep.subr.bf16.mxu0 %v8992_v60  ;;  %v9008_v29 = vpack.c.bf16 %v4221_v17, %v4215_v24  ;;  %v4214_v60 = vld [vmem:[#allocation14 + $0x4a0] sm:$0xff]  ;;  %v4269_v24 = vld [vmem:[#allocation14 + $0x658] sm:$0xff]  ;;  %v5929_v17 = vld [vmem:[#allocation17 + $0x608] sm:$0xff] }
 0x6be   :  { %9249 = vmatprep.subr.bf16.mxu1 %v9248_v33  ;;  %v5886_v33 = vld [vmem:[#allocation17 + $0x4b0] sm:$0xff]  ;;  %v9010_v53 = vpack.c.bf16 %v4220_v62, %v4214_v60  ;;  %v9280_v62 = vpack.c.bf16 %v5935_v27, %v5929_v17  ;;  %v5983_v17 = vld [vmem:[#allocation17 + $0x7b8] sm:$0xff] }
 0x6bf   :  { %v4268_v60 = vld [vmem:[#allocation14 + $0x650] sm:$0xff] }
 0x6c0   :  { %8995 = vmatpush1.bf16.msra.mxu0 %v8994_v35  ;;  %v9266_v35 = vpack.c.bf16 %v5886_v33, %v5880_v43  ;;  %v4275_v43 = vld [vmem:[#allocation14 + $0x688] sm:$0xff] }
 0x6c1   :  { %9251 = vmatpush1.bf16.msra.mxu1 %v9250_v38  ;;  %8997 = vmatprep.subr.bf16.mxu0 %v8996_v40  ;;  %v9012_v38 = vpack.c.bf16 %v4233_v34, %v4227_v32  ;;  %v4226_v40 = vld [vmem:[#allocation14 + $0x500] sm:$0xff]  ;;  %v5934_v32 = vld [vmem:[#allocation17 + $0x630] sm:$0xff] }
 0x6c2   :  { %9253 = vmatprep.subr.bf16.mxu1 %v9252_v61  ;;  %v5898_v61 = vld [vmem:[#allocation17 + $0x510] sm:$0xff]  ;;  %v9014_v48 = vpack.c.bf16 %v4232_v36, %v4226_v40  ;;  %v5928_v33 = vld [vmem:[#allocation17 + $0x600] sm:$0xff] }
 0x6c3   :  { %v9282_v40 = vpack.c.bf16 %v5934_v32, %v5928_v33  ;;  %v4287_v36 = vld [vmem:[#allocation14 + $0x6e8] sm:$0xff] }
 0x6c4   :  { %8999 = vmatpush1.bf16.msra.mxu0 %v8998_v49  ;;  %v9270_v49 = vpack.c.bf16 %v5898_v61, %v5892_v41  ;;  %v4293_v41 = vld [vmem:[#allocation14 + $0x718] sm:$0xff]  ;;  %v5940_v61 = vld [vmem:[#allocation17 + $0x660] sm:$0xff]  ;;  %v5989_v32 = vld [vmem:[#allocation17 + $0x7e8] sm:$0xff] }
 0x6c5   :  { %9255 = vmatpush1.bf16.msra.mxu1 %v9254_v51  ;;  %9001 = vmatprep.subr.bf16.mxu0 %v9000_v55  ;;  %v9016_v51 = vpack.c.bf16 %v4245_v39, %v4239_v37  ;;  %v4238_v55 = vld [vmem:[#allocation14 + $0x560] sm:$0xff]  ;;  %v5946_v37 = vld [vmem:[#allocation17 + $0x690] sm:$0xff] }
 0x6c6   :  { %9257 = vmatprep.subr.bf16.mxu1 %v9256_v52  ;;  %v5910_v52 = vld [vmem:[#allocation17 + $0x570] sm:$0xff]  ;;  %v9018_v11 = vpack.c.bf16 %v4244_v56, %v4238_v55  ;;  %v9286_v56 = vpack.c.bf16 %v5946_v37, %v5940_v61  ;;  %v6001_v37 = vld [vmem:[#allocation17 + $0x848] sm:$0xff] }
 0x6c7   :  { %v4292_v55 = vld [vmem:[#allocation14 + $0x710] sm:$0xff] }
 0x6c8   :  { %9003 = vmatpush1.bf16.msra.mxu0 %v9002_v16  ;;  %v9274_v16 = vpack.c.bf16 %v5910_v52, %v5904_v0  ;;  %v4305_v0 = vld [vmem:[#allocation14 + $0x778] sm:$0xff] }
 0x6c9   :  { %9259 = vmatpush1.bf16.msra.mxu1 %v9258_v21  ;;  %9005 = vmatprep.subr.bf16.mxu0 %v9004_v45  ;;  %v9020_v21 = vpack.c.bf16 %v4257_v6, %v4251_v42  ;;  %v4250_v45 = vld [vmem:[#allocation14 + $0x5c0] sm:$0xff]  ;;  %v5958_v52 = vld [vmem:[#allocation17 + $0x6f0] sm:$0xff]  ;;  %v5965_v6 = vld [vmem:[#allocation17 + $0x728] sm:$0xff] }
 0x6ca   :  { %9261 = vmatprep.subr.bf16.mxu1 %v9260_v18  ;;  %v5922_v18 = vld [vmem:[#allocation17 + $0x5d0] sm:$0xff]  ;;  %v9022_v20 = vpack.c.bf16 %v4256_v44, %v4250_v45  ;;  %v4311_v45 = vld [vmem:[#allocation14 + $0x7a8] sm:$0xff] }
 0x6cb   :  { %v4317_v44 = vld [vmem:[#allocation14 + $0x7d8] sm:$0xff] }
 0x6cc   :  { %9007 = vmatpush1.bf16.msra.mxu0 %v9006_v26  ;;  %v9278_v26 = vpack.c.bf16 %v5922_v18, %v5916_v5  ;;  %v9292_v5 = vpack.c.bf16 %v5971_v7, %v5965_v6  ;;  %v5970_v18 = vld [vmem:[#allocation17 + $0x750] sm:$0xff]  ;;  %v9040_v27 = vpack.c.bf16 %v4317_v44, %v4311_v45  ;;  %v4346_v7 = vld [vmem:[#allocation14 + $0x8c0] sm:$0xff] }
 0x6cd   :  { %9263 = vmatpush1.bf16.msra.mxu1 %v9262_v63  ;;  %9009 = vmatprep.subr.bf16.mxu0 %v9008_v29  ;;  %v9024_v63 = vpack.c.bf16 %v4269_v24, %v4263_v23  ;;  %v4262_v29 = vld [vmem:[#allocation14 + $0x620] sm:$0xff]  ;;  %v5977_v24 = vld [vmem:[#allocation17 + $0x788] sm:$0xff] }
 0x6ce   :  { %9265 = vmatprep.subr.bf16.mxu1 %v9264_v22  ;;  %v4281_v22 = vld [vmem:[#allocation14 + $0x6b8] sm:$0xff]  ;;  %v9026_v34 = vpack.c.bf16 %v4268_v60, %v4262_v29  ;;  %v4323_v29 = vld [vmem:[#allocation14 + $0x808] sm:$0xff] }
 0x6cf   :  { %v4329_v60 = vld [vmem:[#allocation14 + $0x838] sm:$0xff]  ;;  %v6012_v44 = vld [vmem:[#allocation17 + $0x8a0] sm:$0xff] }
 0x6d0   :  { %9011 = vmatpush1.bf16.msra.mxu0 %v9010_v53  ;;  %v9028_v53 = vpack.c.bf16 %v4281_v22, %v4275_v43  ;;  %v5976_v43 = vld [vmem:[#allocation17 + $0x780] sm:$0xff]  ;;  %v5982_v22 = vld [vmem:[#allocation17 + $0x7b0] sm:$0xff] }
 0x6d1   :  { %9267 = vmatpush1.bf16.msra.mxu1 %v9266_v35  ;;  %9013 = vmatprep.subr.bf16.mxu0 %v9012_v38  ;;  %v4274_v35 = vld [vmem:[#allocation14 + $0x680] sm:$0xff]  ;;  %v4280_v38 = vld [vmem:[#allocation14 + $0x6b0] sm:$0xff] }
 0x6d2   :  { %9269 = vmatprep.subr.bf16.mxu1 %v9268_v15  ;;  %v9284_v15 = vpack.c.bf16 %v5947_v58, %v5941_v19  ;;  %v9030_v39 = vpack.c.bf16 %v4280_v38, %v4274_v35  ;;  %v9044_v19 = vpack.c.bf16 %v4329_v60, %v4323_v29  ;;  %v4322_v58 = vld [vmem:[#allocation14 + $0x800] sm:$0xff]  ;;  %v9298_v35 = vpack.c.bf16 %v5982_v22, %v5976_v43  ;;  %v4335_v38 = vld [vmem:[#allocation14 + $0x868] sm:$0xff]  ;;  %v5738_v60 = vld [vmem:[#allocation17 + $0x10] sm:$0xff] }
 0x6d3   :  { %v5751_v22 = vld [vmem:[#allocation17 + $0x78] sm:$0xff] }
 0x6d4   :  { %9015 = vmatpush1.bf16.msra.mxu0 %v9014_v48  ;;  %v10511_v48 = vld [vmem:[#allocation2] sm:$0xff] }
 0x6d5   :  { %9271 = vmatpush1.bf16.msra.mxu1 %v9270_v49  ;;  %9017 = vmatprep.subr.bf16.mxu0 %v9016_v51  ;;  %v9032_v49 = vpack.c.bf16 %v4293_v41, %v4287_v36  ;;  %v4286_v51 = vld [vmem:[#allocation14 + $0x6e0] sm:$0xff] }
 0x6d6   :  { %9273 = vmatprep.subr.bf16.mxu1 %v9272_v2  ;;  %v9288_v2 = vpack.c.bf16 %v5959_v47, %v5953_v46  ;;  %v9034_v42 = vpack.c.bf16 %v4292_v55, %v4286_v51  ;;  %v5988_v41 = vld [vmem:[#allocation17 + $0x7e0] sm:$0xff] }
 0x6d7   :  { %v4334_v47 = vld [vmem:[#allocation14 + $0x860] sm:$0xff]  ;;  %v4347_v55 = vld [vmem:[#allocation14 + $0x8c8] sm:$0xff] }
 0x6d8   :  { %9019 = vmatpush1.bf16.msra.mxu0 %v9018_v11  ;;  %v4298_v11 = vld [vmem:[#allocation14 + $0x740] sm:$0xff] }
 0x6d9   :  { %9275 = vmatpush1.bf16.msra.mxu1 %v9274_v16  ;;  %9021 = vmatprep.subr.bf16.mxu0 %v9020_v21  ;;  %v4304_v16 = vld [vmem:[#allocation14 + $0x770] sm:$0xff] }
 0x6da   :  { %9277 = vmatprep.subr.bf16.mxu1 %v9276_v9  ;;  %v5964_v9 = vld [vmem:[#allocation17 + $0x720] sm:$0xff]  ;;  %v9038_v23 = vpack.c.bf16 %v4304_v16, %v4298_v11 }
 0x6db   :  { %v4359_v16 = vld [vmem:[#allocation14 + $0x928] sm:$0xff] }
 0x6dc   :  { %9023 = vmatpush1.bf16.msra.mxu0 %v9022_v20  ;;  %v4310_v20 = vld [vmem:[#allocation14 + $0x7a0] sm:$0xff] }
 0x6dd   :  { %9279 = vmatpush1.bf16.msra.mxu1 %v9278_v26  ;;  %9025 = vmatprep.subr.bf16.mxu0 %v9024_v63  ;;  %v4316_v26 = vld [vmem:[#allocation14 + $0x7d0] sm:$0xff]  ;;  %v9294_v63 = vpack.c.bf16 %v5970_v18, %v5964_v9  ;;  %v5739_v18 = vld [vmem:[#allocation17 + $0x18] sm:$0xff] }
 0x6de   :  { %9281 = vmatprep.subr.bf16.mxu1 %v9280_v62  ;;  %v9296_v62 = vpack.c.bf16 %v5983_v17, %v5977_v24  ;;  %v9042_v33 = vpack.c.bf16 %v4316_v26, %v4310_v20  ;;  %v4358_v17 = vld [vmem:[#allocation14 + $0x920] sm:$0xff]  ;;  %v4371_v26 = vld [vmem:[#allocation14 + $0x988] sm:$0xff] }
 0x6df   :  { %5499 = vmatmul.mubr.f32.vlgmr.msra.gmra.mrb[18].mxu0 %v10460_v59  ;;  %v4299_v59 = vld [vmem:[#allocation14 + $0x748] sm:$0xff] }
 0x6e0   :  { %9027 = vmatpush1.bf16.msra.mxu0 %v9026_v34  ;;  %5569 = vmatprep.mubr.f32.mxu0 %v10462_v3  ;;  %v5952_v3 = vld [vmem:[#allocation17 + $0x6c0] sm:$0xff]  ;;  %v9036_v8 = vpack.c.bf16 %v4305_v0, %v4299_v59  ;;  %v5995_v34 = vld [vmem:[#allocation17 + $0x818] sm:$0xff] }
 0x6e1   :  { %6089 = vmatmul.mubr.f32.vlgmr.msra.gmra.mrb[18].mxu1 %v10511_v48  ;;  %9029 = vmatprep.subr.bf16.mxu0 %v9028_v53  ;;  %v9290_v21 = vpack.c.bf16 %v5958_v52, %v5952_v3  ;;  %v4328_v53 = vld [vmem:[#allocation14 + $0x830] sm:$0xff]  ;;  %v9300_v36 = vpack.c.bf16 %v5995_v34, %v5989_v32  ;;  %v6000_v0 = vld [vmem:[#allocation17 + $0x840] sm:$0xff] }
 0x6e2   :  { %9283 = vmatpush1.bf16.msra.mxu1 %v9282_v40  ;;  %6159 = vmatprep.mubr.f32.mxu1 %v9916_v1  ;;  %v4341_v40 = vld [vmem:[#allocation14 + $0x898] sm:$0xff]  ;;  %v9046_v61 = vpack.c.bf16 %v4328_v53, %v4322_v58  ;;  %v6013_v52 = vld [vmem:[#allocation17 + $0x8a8] sm:$0xff]  ;;  %v4370_v34 = vld [vmem:[#allocation14 + $0x980] sm:$0xff] }
 0x6e3   :  { %9285 = vmatprep.subr.bf16.mxu1 %v9284_v15  ;;  %v5994_v15 = vld [vmem:[#allocation17 + $0x810] sm:$0xff]  ;;  %v9048_v46 = vpack.c.bf16 %v4341_v40, %v4335_v38  ;;  %v4383_v53 = vld [vmem:[#allocation14 + $0x9e8] sm:$0xff] }
 0x6e4   :  { %9031 = vmatpush1.bf16.msra.mxu0 %v9030_v39  ;;  %v6007_v39 = vld [vmem:[#allocation17 + $0x878] sm:$0xff]  ;;  %v9302_v51 = vpack.c.bf16 %v5994_v15, %v5988_v41  ;;  %v5750_v40 = vld [vmem:[#allocation17 + $0x70] sm:$0xff] }
 0x6e5   :  { %9033 = vmatprep.subr.bf16.mxu0 %v9032_v49  ;;  %v4340_v49 = vld [vmem:[#allocation14 + $0x890] sm:$0xff]  ;;  %v9304_v59 = vpack.c.bf16 %v6007_v39, %v6001_v37  ;;  %v5763_v15 = vld [vmem:[#allocation17 + $0xd8] sm:$0xff]  ;;  %v10515_v37 = vld [vmem:[#allocation2 + $0x10] sm:$0xff] }
 0x6e6   :  { %9287 = vmatpush1.bf16.msra.mxu1 %v9286_v56  ;;  %v4353_v56 = vld [vmem:[#allocation14 + $0x8f8] sm:$0xff]  ;;  %v9050_v3 = vpack.c.bf16 %v4340_v49, %v4334_v47  ;;  %v4388_v47 = vld [vmem:[#allocation14 + $0xa10] sm:$0xff] }
 0x6e7   :  { %9289 = vmatprep.subr.bf16.mxu1 %v9288_v2  ;;  %v6006_v2 = vld [vmem:[#allocation17 + $0x870] sm:$0xff]  ;;  %v9052_v6 = vpack.c.bf16 %v4353_v56, %v4347_v55 }
 0x6e8   :  { %9035 = vmatpush1.bf16.msra.mxu0 %v9034_v42  ;;  %v6019_v42 = vld [vmem:[#allocation17 + $0x8d8] sm:$0xff]  ;;  %v9306_v11 = vpack.c.bf16 %v6006_v2, %v6000_v0  ;;  %v5768_v0 = vld [vmem:[#allocation17 + $0x100] sm:$0xff] }
 0x6e9   :  { %9037 = vmatprep.subr.bf16.mxu0 %v9036_v8  ;;  %v4352_v8 = vld [vmem:[#allocation14 + $0x8f0] sm:$0xff]  ;;  %v9308_v45 = vpack.c.bf16 %v6019_v42, %v6013_v52  ;;  %v4401_v55 = vld [vmem:[#allocation14 + $0xa78] sm:$0xff] }
 0x6ea   :  { %9291 = vmatpush1.bf16.msra.mxu1 %v9290_v21  ;;  %v4365_v21 = vld [vmem:[#allocation14 + $0x958] sm:$0xff]  ;;  %v9054_v9 = vpack.c.bf16 %v4352_v8, %v4346_v7  ;;  %v5781_v52 = vld [vmem:[#allocation17 + $0x168] sm:$0xff] }
 0x6eb   :  { %9293 = vmatprep.subr.bf16.mxu1 %v9292_v5  ;;  %v6018_v5 = vld [vmem:[#allocation17 + $0x8d0] sm:$0xff]  ;;  %v9056_v24 = vpack.c.bf16 %v4365_v21, %v4359_v16 }
 0x6ec   :  { %9039 = vmatpush1.bf16.msra.mxu0 %v9038_v23  ;;  %v5745_v23 = vld [vmem:[#allocation17 + $0x48] sm:$0xff]  ;;  %v9310_v20 = vpack.c.bf16 %v6018_v5, %v6012_v44  ;;  %v4413_v16 = vld [vmem:[#allocation14 + $0xad8] sm:$0xff] }
 0x6ed   :  { %9041 = vmatprep.subr.bf16.mxu0 %v9040_v27  ;;  %v4364_v27 = vld [vmem:[#allocation14 + $0x950] sm:$0xff]  ;;  %v9312_v29 = vpack.c.bf16 %v5745_v23, %v5739_v18  ;;  %v5787_v5 = vld [vmem:[#allocation17 + $0x198] sm:$0xff] }
 0x6ee   :  { %9295 = vmatpush1.bf16.msra.mxu1 %v9294_v63  ;;  %v4377_v63 = vld [vmem:[#allocation14 + $0x9b8] sm:$0xff]  ;;  %v9058_v43 = vpack.c.bf16 %v4364_v27, %v4358_v17  ;;  %v4400_v7 = vld [vmem:[#allocation14 + $0xa70] sm:$0xff]  ;;  %v4406_v23 = vld [vmem:[#allocation14 + $0xaa0] sm:$0xff] }
 0x6ef   :  { %9297 = vmatprep.subr.bf16.mxu1 %v9296_v62  ;;  %v5744_v62 = vld [vmem:[#allocation17 + $0x40] sm:$0xff]  ;;  %v9060_v32 = vpack.c.bf16 %v4377_v63, %v4371_v26  ;;  %v5786_v63 = vld [vmem:[#allocation17 + $0x190] sm:$0xff] }
 0x6f0   :  { %9043 = vmatpush1.bf16.msra.mxu0 %v9042_v33  ;;  %v5757_v33 = vld [vmem:[#allocation17 + $0xa8] sm:$0xff]  ;;  %v9314_v58 = vpack.c.bf16 %v5744_v62, %v5738_v60  ;;  %v5799_v62 = vld [vmem:[#allocation17 + $0x1f8] sm:$0xff] }
 0x6f1   :  { %9045 = vmatprep.subr.bf16.mxu0 %v9044_v19  ;;  %v4376_v19 = vld [vmem:[#allocation14 + $0x9b0] sm:$0xff]  ;;  %v9316_v38 = vpack.c.bf16 %v5757_v33, %v5751_v22  ;;  %v4419_v27 = vld [vmem:[#allocation14 + $0xb08] sm:$0xff]  ;;  %v4418_v33 = vld [vmem:[#allocation14 + $0xb00] sm:$0xff] }
 0x6f2   :  { %9299 = vmatpush1.bf16.msra.mxu1 %v9298_v35  ;;  %v4389_v35 = vld [vmem:[#allocation14 + $0xa18] sm:$0xff]  ;;  %v9062_v41 = vpack.c.bf16 %v4376_v19, %v4370_v34  ;;  %v4431_v19 = vld [vmem:[#allocation14 + $0xb68] sm:$0xff] }
 0x6f3   :  { %9301 = vmatprep.subr.bf16.mxu1 %v9300_v36  ;;  %v5756_v36 = vld [vmem:[#allocation17 + $0xa0] sm:$0xff]  ;;  %v9064_v39 = vpack.c.bf16 %v4389_v35, %v4383_v53  ;;  %v5798_v35 = vld [vmem:[#allocation17 + $0x1f0] sm:$0xff] }
 0x6f4   :  { %9047 = vmatpush1.bf16.msra.mxu0 %v9046_v61  ;;  %v5769_v61 = vld [vmem:[#allocation17 + $0x108] sm:$0xff]  ;;  %v9318_v49 = vpack.c.bf16 %v5756_v36, %v5750_v40  ;;  %v5811_v36 = vld [vmem:[#allocation17 + $0x258] sm:$0xff] }
 0x6f5   :  { %9049 = vmatprep.subr.bf16.mxu0 %v9048_v46  ;;  %v4382_v46 = vld [vmem:[#allocation14 + $0x9e0] sm:$0xff]  ;;  %v9320_v56 = vpack.c.bf16 %v5769_v61, %v5763_v15 }
 0x6f6   :  { %9303 = vmatpush1.bf16.msra.mxu1 %v9302_v51  ;;  %v4395_v51 = vld [vmem:[#allocation14 + $0xa48] sm:$0xff]  ;;  %v9066_v2 = vpack.c.bf16 %v4388_v47, %v4382_v46  ;;  %v4430_v61 = vld [vmem:[#allocation14 + $0xb60] sm:$0xff] }
 0x6f7   :  { %9305 = vmatprep.subr.bf16.mxu1 %v9304_v59  ;;  %v5762_v59 = vld [vmem:[#allocation17 + $0xd0] sm:$0xff]  ;;  %v9068_v42 = vpack.c.bf16 %v4401_v55, %v4395_v51  ;;  %v4443_v47 = vld [vmem:[#allocation14 + $0xbc8] sm:$0xff] }
 0x6f8   :  { %9051 = vmatpush1.bf16.msra.mxu0 %v9050_v3  ;;  %v5775_v3 = vld [vmem:[#allocation17 + $0x138] sm:$0xff]  ;;  %v9322_v8 = vpack.c.bf16 %v5768_v0, %v5762_v59  ;;  %v5810_v55 = vld [vmem:[#allocation17 + $0x250] sm:$0xff] }
 0x6f9   :  { %9053 = vmatprep.subr.bf16.mxu0 %v9052_v6  ;;  %v4394_v6 = vld [vmem:[#allocation14 + $0xa40] sm:$0xff]  ;;  %v9324_v21 = vpack.c.bf16 %v5781_v52, %v5775_v3 }
 0x6fa   :  { %9307 = vmatpush1.bf16.msra.mxu1 %v9306_v11  ;;  %v4407_v11 = vld [vmem:[#allocation14 + $0xaa8] sm:$0xff]  ;;  %v9070_v44 = vpack.c.bf16 %v4400_v7, %v4394_v6  ;;  %v5823_v0 = vld [vmem:[#allocation17 + $0x2b8] sm:$0xff] }
 0x6fb   :  { %9309 = vmatprep.subr.bf16.mxu1 %v9308_v45  ;;  %v5774_v45 = vld [vmem:[#allocation17 + $0x130] sm:$0xff]  ;;  %v9072_v18 = vpack.c.bf16 %v4413_v16, %v4407_v11  ;;  %v4442_v52 = vld [vmem:[#allocation14 + $0xbc0] sm:$0xff]  ;;  %v4455_v7 = vld [vmem:[#allocation14 + $0xc28] sm:$0xff] }
 0x6fc   :  { %9055 = vmatpush1.bf16.msra.mxu0 %v9054_v9  ;;  %v5793_v9 = vld [vmem:[#allocation17 + $0x1c8] sm:$0xff]  ;;  %v5822_v16 = vld [vmem:[#allocation17 + $0x2b0] sm:$0xff] }
 0x6fd   :  { %9057 = vmatprep.subr.bf16.mxu0 %v9056_v24  ;;  %v4412_v24 = vld [vmem:[#allocation14 + $0xad0] sm:$0xff]  ;;  %v9328_v26 = vpack.c.bf16 %v5793_v9, %v5787_v5  ;;  %v4454_v9 = vld [vmem:[#allocation14 + $0xc20] sm:$0xff] }
 0x6fe   :  { %9311 = vmatpush1.bf16.msra.mxu1 %v9310_v20  ;;  %v4425_v20 = vld [vmem:[#allocation14 + $0xb38] sm:$0xff]  ;;  %v9074_v60 = vpack.c.bf16 %v4412_v24, %v4406_v23  ;;  %v4467_v24 = vld [vmem:[#allocation14 + $0xc88] sm:$0xff] }
 0x6ff   :  { %9313 = vmatprep.subr.bf16.mxu1 %v9312_v29  ;;  %v5792_v29 = vld [vmem:[#allocation17 + $0x1c0] sm:$0xff]  ;;  %v9076_v22 = vpack.c.bf16 %v4425_v20, %v4419_v27  ;;  %v5834_v20 = vld [vmem:[#allocation17 + $0x310] sm:$0xff] }
 0x700   :  { %9059 = vmatpush1.bf16.msra.mxu0 %v9058_v43  ;;  %v5805_v43 = vld [vmem:[#allocation17 + $0x228] sm:$0xff]  ;;  %v9330_v34 = vpack.c.bf16 %v5792_v29, %v5786_v63  ;;  %v5847_v29 = vld [vmem:[#allocation17 + $0x378] sm:$0xff] }
 0x701   :  { %6160 = vmatmul.mubr.f32.vlgmr.msra.gmra.mrb[18].mxu1 %v10515_v37  ;;  %9061 = vmatprep.subr.bf16.mxu0 %v9060_v32  ;;  %v4424_v32 = vld [vmem:[#allocation14 + $0xb30] sm:$0xff]  ;;  %v9332_v53 = vpack.c.bf16 %v5805_v43, %v5799_v62  ;;  %v4466_v43 = vld [vmem:[#allocation14 + $0xc80] sm:$0xff] }
 0x702   :  { %9315 = vmatpush1.bf16.msra.mxu1 %v9314_v58  ;;  %6230 = vmatprep.mubr.f32.mxu1 %v10506_v13  ;;  %v5780_v13 = vld [vmem:[#allocation17 + $0x160] sm:$0xff]  ;;  %v4437_v58 = vld [vmem:[#allocation14 + $0xb98] sm:$0xff]  ;;  %v9078_v40 = vpack.c.bf16 %v4424_v32, %v4418_v33 }
 0x703   :  { %9317 = vmatprep.subr.bf16.mxu1 %v9316_v38  ;;  %v9326_v17 = vpack.c.bf16 %v5780_v13, %v5774_v45  ;;  %v5804_v38 = vld [vmem:[#allocation17 + $0x220] sm:$0xff]  ;;  %v9080_v15 = vpack.c.bf16 %v4437_v58, %v4431_v19  ;;  %v5835_v13 = vld [vmem:[#allocation17 + $0x318] sm:$0xff]  ;;  %v5846_v58 = vld [vmem:[#allocation17 + $0x370] sm:$0xff] }
 0x704   :  { %9063 = vmatpush1.bf16.msra.mxu0 %v9062_v41  ;;  %v5817_v41 = vld [vmem:[#allocation17 + $0x288] sm:$0xff]  ;;  %v9334_v46 = vpack.c.bf16 %v5804_v38, %v5798_v35  ;;  %v5859_v38 = vld [vmem:[#allocation17 + $0x3d8] sm:$0xff] }
 0x705   :  { %9065 = vmatprep.subr.bf16.mxu0 %v9064_v39  ;;  %v4436_v39 = vld [vmem:[#allocation14 + $0xb90] sm:$0xff]  ;;  %v9336_v51 = vpack.c.bf16 %v5817_v41, %v5811_v36  ;;  %v4479_v32 = vld [vmem:[#allocation14 + $0xce8] sm:$0xff]  ;;  %v4478_v41 = vld [vmem:[#allocation14 + $0xce0] sm:$0xff] }
 0x706   :  { %9319 = vmatpush1.bf16.msra.mxu1 %v9318_v49  ;;  %v4449_v49 = vld [vmem:[#allocation14 + $0xbf8] sm:$0xff]  ;;  %v9082_v59 = vpack.c.bf16 %v4436_v39, %v4430_v61  ;;  %v4491_v39 = vld [vmem:[#allocation14 + $0xd48] sm:$0xff] }
 0x707   :  { %9321 = vmatprep.subr.bf16.mxu1 %v9320_v56  ;;  %v5816_v56 = vld [vmem:[#allocation17 + $0x280] sm:$0xff]  ;;  %v9084_v3 = vpack.c.bf16 %v4449_v49, %v4443_v47  ;;  %v5858_v47 = vld [vmem:[#allocation17 + $0x3d0] sm:$0xff] }
 0x708   :  { %9067 = vmatpush1.bf16.msra.mxu0 %v9066_v2  ;;  %v5829_v2 = vld [vmem:[#allocation17 + $0x2e8] sm:$0xff]  ;;  %v9338_v6 = vpack.c.bf16 %v5816_v56, %v5810_v55  ;;  %v5864_v49 = vld [vmem:[#allocation17 + $0x400] sm:$0xff]  ;;  %v5871_v55 = vld [vmem:[#allocation17 + $0x438] sm:$0xff] }
 0x709   :  { %9069 = vmatprep.subr.bf16.mxu0 %v9068_v42  ;;  %v4448_v42 = vld [vmem:[#allocation14 + $0xbf0] sm:$0xff]  ;;  %v9340_v11 = vpack.c.bf16 %v5829_v2, %v5823_v0  ;;  %v9354_v2 = vpack.c.bf16 %v5864_v49, %v5858_v47 }
 0x70a   :  { %9323 = vmatpush1.bf16.msra.mxu1 %v9322_v8  ;;  %v4461_v8 = vld [vmem:[#allocation14 + $0xc58] sm:$0xff]  ;;  %v9086_v45 = vpack.c.bf16 %v4448_v42, %v4442_v52  ;;  %v5877_v56 = vld [vmem:[#allocation17 + $0x468] sm:$0xff] }
 0x70b   :  { %9325 = vmatprep.subr.bf16.mxu1 %v9324_v21  ;;  %v5828_v21 = vld [vmem:[#allocation17 + $0x2e0] sm:$0xff]  ;;  %v9088_v5 = vpack.c.bf16 %v4461_v8, %v4455_v7  ;;  %v4496_v0 = vld [vmem:[#allocation14 + $0xd70] sm:$0xff]  ;;  %v4509_v52 = vld [vmem:[#allocation14 + $0xdd8] sm:$0xff]  ;;  %v9356_v42 = vpack.c.bf16 %v5877_v56, %v5871_v55 }
 0x70c   :  { %9071 = vmatpush1.bf16.msra.mxu0 %v9070_v44  ;;  %v5841_v44 = vld [vmem:[#allocation17 + $0x348] sm:$0xff]  ;;  %v9342_v23 = vpack.c.bf16 %v5828_v21, %v5822_v16  ;;  %v5876_v7 = vld [vmem:[#allocation17 + $0x460] sm:$0xff] }
 0x70d   :  { %9073 = vmatprep.subr.bf16.mxu0 %v9072_v18  ;;  %v4460_v18 = vld [vmem:[#allocation14 + $0xc50] sm:$0xff]  ;;  %v9344_v27 = vpack.c.bf16 %v5841_v44, %v5835_v13 }
 0x70e   :  { %9327 = vmatpush1.bf16.msra.mxu1 %v9326_v17  ;;  %v4473_v17 = vld [vmem:[#allocation14 + $0xcb8] sm:$0xff]  ;;  %v9090_v63 = vpack.c.bf16 %v4460_v18, %v4454_v9  ;;  %v5889_v16 = vld [vmem:[#allocation17 + $0x4c8] sm:$0xff] }
 0x70f   :  { %9329 = vmatprep.subr.bf16.mxu1 %v9328_v26  ;;  %v5840_v26 = vld [vmem:[#allocation17 + $0x340] sm:$0xff]  ;;  %v9092_v62 = vpack.c.bf16 %v4473_v17, %v4467_v24  ;;  %v4508_v13 = vld [vmem:[#allocation14 + $0xdd0] sm:$0xff]  ;;  %v4521_v9 = vld [vmem:[#allocation14 + $0xe38] sm:$0xff] }
 0x710   :  { %9075 = vmatpush1.bf16.msra.mxu0 %v9074_v60  ;;  %v5853_v60 = vld [vmem:[#allocation17 + $0x3a8] sm:$0xff]  ;;  %v9346_v33 = vpack.c.bf16 %v5840_v26, %v5834_v20  ;;  %v5888_v24 = vld [vmem:[#allocation17 + $0x4c0] sm:$0xff] }
 0x711   :  { %9077 = vmatprep.subr.bf16.mxu0 %v9076_v22  ;;  %v4472_v22 = vld [vmem:[#allocation14 + $0xcb0] sm:$0xff]  ;;  %v9348_v19 = vpack.c.bf16 %v5853_v60, %v5847_v29 }
 0x712   :  { %9331 = vmatpush1.bf16.msra.mxu1 %v9330_v34  ;;  %v4485_v34 = vld [vmem:[#allocation14 + $0xd18] sm:$0xff]  ;;  %v9094_v35 = vpack.c.bf16 %v4472_v22, %v4466_v43  ;;  %v5901_v20 = vld [vmem:[#allocation17 + $0x528] sm:$0xff] }
 0x713   :  { %9333 = vmatprep.subr.bf16.mxu1 %v9332_v53  ;;  %v5852_v53 = vld [vmem:[#allocation17 + $0x3a0] sm:$0xff]  ;;  %v9096_v36 = vpack.c.bf16 %v4485_v34, %v4479_v32  ;;  %v4520_v29 = vld [vmem:[#allocation14 + $0xe30] sm:$0xff]  ;;  %v4533_v43 = vld [vmem:[#allocation14 + $0xe98] sm:$0xff] }
 0x714   :  { %9079 = vmatpush1.bf16.msra.mxu0 %v9078_v40  ;;  %v5865_v40 = vld [vmem:[#allocation17 + $0x408] sm:$0xff]  ;;  %v9350_v61 = vpack.c.bf16 %v5852_v53, %v5846_v58  ;;  %v5900_v32 = vld [vmem:[#allocation17 + $0x520] sm:$0xff] }
 0x715   :  { %9081 = vmatprep.subr.bf16.mxu0 %v9080_v15  ;;  %v4484_v15 = vld [vmem:[#allocation14 + $0xd10] sm:$0xff] }
 0x716   :  { %9335 = vmatpush1.bf16.msra.mxu1 %v9334_v46  ;;  %v4497_v46 = vld [vmem:[#allocation14 + $0xd78] sm:$0xff]  ;;  %v5913_v58 = vld [vmem:[#allocation17 + $0x588] sm:$0xff] }
 0x717   :  { %9337 = vmatprep.subr.bf16.mxu1 %v9336_v51  ;;  %v9098_v51 = vpack.c.bf16 %v4484_v15, %v4478_v41  ;;  %v4545_v41 = vld [vmem:[#allocation14 + $0xef8] sm:$0xff]  ;;  %v5925_v47 = vld [vmem:[#allocation17 + $0x5e8] sm:$0xff] }
 0x718   :  { %9083 = vmatpush1.bf16.msra.mxu0 %v9082_v59  ;;  %v4490_v59 = vld [vmem:[#allocation14 + $0xd40] sm:$0xff]  ;;  %v4544_v55 = vld [vmem:[#allocation14 + $0xef0] sm:$0xff] }
 0x719   :  { %9085 = vmatprep.subr.bf16.mxu0 %v9084_v3  ;;  %v4503_v3 = vld [vmem:[#allocation14 + $0xda8] sm:$0xff]  ;;  %v9102_v8 = vpack.c.bf16 %v4496_v0, %v4490_v59  ;;  %v4557_v59 = vld [vmem:[#allocation14 + $0xf58] sm:$0xff] }
 0x71a   :  { %9339 = vmatpush1.bf16.msra.mxu1 %v9338_v6  ;;  %v5870_v6 = vld [vmem:[#allocation17 + $0x430] sm:$0xff]  ;;  %v9104_v21 = vpack.c.bf16 %v4509_v52, %v4503_v3  ;;  %v5924_v3 = vld [vmem:[#allocation17 + $0x5e0] sm:$0xff] }
 0x71b   :  { %9341 = vmatprep.subr.bf16.mxu1 %v9340_v11  ;;  %v5883_v11 = vld [vmem:[#allocation17 + $0x498] sm:$0xff]  ;;  %v9358_v44 = vpack.c.bf16 %v5876_v7, %v5870_v6  ;;  %v5937_v6 = vld [vmem:[#allocation17 + $0x648] sm:$0xff] }
 0x71c   :  { %9087 = vmatpush1.bf16.msra.mxu0 %v9086_v45  ;;  %v4502_v45 = vld [vmem:[#allocation14 + $0xda0] sm:$0xff]  ;;  %v9360_v18 = vpack.c.bf16 %v5889_v16, %v5883_v11  ;;  %v4556_v11 = vld [vmem:[#allocation14 + $0xf50] sm:$0xff] }
 0x71d   :  { %9089 = vmatprep.subr.bf16.mxu0 %v9088_v5  ;;  %v4515_v5 = vld [vmem:[#allocation14 + $0xe08] sm:$0xff]  ;;  %v9106_v17 = vpack.c.bf16 %v4508_v13, %v4502_v45  ;;  %v4569_v45 = vld [vmem:[#allocation14 + $0xfb8] sm:$0xff] }
 0x71e   :  { %9343 = vmatpush1.bf16.msra.mxu1 %v9342_v23  ;;  %v5882_v23 = vld [vmem:[#allocation17 + $0x490] sm:$0xff]  ;;  %v9108_v26 = vpack.c.bf16 %v4521_v9, %v4515_v5  ;;  %v5936_v5 = vld [vmem:[#allocation17 + $0x640] sm:$0xff] }
 0x71f   :  { %5570 = vmatmul.mubr.f32.vlgmr.msra.gmra.mrb[18].mxu0 %v10473_v31  ;;  %9345 = vmatprep.subr.bf16.mxu1 %v9344_v27  ;;  %v9352_v31 = vpack.c.bf16 %v5865_v40, %v5859_v38  ;;  %v5895_v27 = vld [vmem:[#allocation17 + $0x4f8] sm:$0xff]  ;;  %v9362_v60 = vpack.c.bf16 %v5888_v24, %v5882_v23  ;;  %v4532_v38 = vld [vmem:[#allocation14 + $0xe90] sm:$0xff] }
 0x720   :  { %9091 = vmatpush1.bf16.msra.mxu0 %v9090_v63  ;;  %5640 = vmatprep.mubr.f32.mxu0 %v10486_v10  ;;  %v9100_v10 = vpack.c.bf16 %v4497_v46, %v4491_v39  ;;  %v4514_v63 = vld [vmem:[#allocation14 + $0xe00] sm:$0xff]  ;;  %v9364_v22 = vpack.c.bf16 %v5901_v20, %v5895_v27  ;;  %v5949_v23 = vld [vmem:[#allocation17 + $0x6a8] sm:$0xff] }
 0x721   :  { %9093 = vmatprep.subr.bf16.mxu0 %v9092_v62  ;;  %v4527_v62 = vld [vmem:[#allocation14 + $0xe68] sm:$0xff]  ;;  %v9110_v34 = vpack.c.bf16 %v4520_v29, %v4514_v63  ;;  %v4568_v27 = vld [vmem:[#allocation14 + $0xfb0] sm:$0xff]  ;;  %v4581_v63 = vld [vmem:[#allocation14 + $0x1018] sm:$0xff] }
 0x722   :  { %9347 = vmatpush1.bf16.msra.mxu1 %v9346_v33  ;;  %v5894_v33 = vld [vmem:[#allocation17 + $0x4f0] sm:$0xff]  ;;  %v9112_v53 = vpack.c.bf16 %v4533_v43, %v4527_v62  ;;  %v5912_v39 = vld [vmem:[#allocation17 + $0x580] sm:$0xff] }
 0x723   :  { %9349 = vmatprep.subr.bf16.mxu1 %v9348_v19  ;;  %v5907_v19 = vld [vmem:[#allocation17 + $0x558] sm:$0xff]  ;;  %v9366_v40 = vpack.c.bf16 %v5900_v32, %v5894_v33  ;;  %v5948_v62 = vld [vmem:[#allocation17 + $0x6a0] sm:$0xff]  ;;  %v5961_v33 = vld [vmem:[#allocation17 + $0x708] sm:$0xff] }
 0x724   :  { %9095 = vmatpush1.bf16.msra.mxu0 %v9094_v35  ;;  %v4526_v35 = vld [vmem:[#allocation14 + $0xe60] sm:$0xff]  ;;  %v9368_v15 = vpack.c.bf16 %v5913_v58, %v5907_v19  ;;  %v4580_v19 = vld [vmem:[#allocation14 + $0x1010] sm:$0xff] }
 0x725   :  { %9097 = vmatprep.subr.bf16.mxu0 %v9096_v36  ;;  %v4539_v36 = vld [vmem:[#allocation14 + $0xec8] sm:$0xff]  ;;  %v9114_v46 = vpack.c.bf16 %v4532_v38, %v4526_v35  ;;  %v4593_v35 = vld [vmem:[#allocation14 + $0x1078] sm:$0xff] }
 0x726   :  { %9351 = vmatpush1.bf16.msra.mxu1 %v9350_v61  ;;  %v5906_v61 = vld [vmem:[#allocation17 + $0x550] sm:$0xff]  ;;  %v9116_v49 = vpack.c.bf16 %v4545_v41, %v4539_v36  ;;  %v5960_v36 = vld [vmem:[#allocation17 + $0x700] sm:$0xff] }
 0x727   :  { %9353 = vmatprep.subr.bf16.mxu1 %v9352_v31  ;;  %v5919_v31 = vld [vmem:[#allocation17 + $0x5b8] sm:$0xff]  ;;  %v9370_v56 = vpack.c.bf16 %v5912_v39, %v5906_v61  ;;  %v5973_v61 = vld [vmem:[#allocation17 + $0x768] sm:$0xff] }
 0x728   :  { %9099 = vmatpush1.bf16.msra.mxu0 %v9098_v51  ;;  %v4538_v51 = vld [vmem:[#allocation14 + $0xec0] sm:$0xff]  ;;  %v9372_v0 = vpack.c.bf16 %v5925_v47, %v5919_v31  ;;  %v4599_v47 = vld [vmem:[#allocation14 + $0x10a8] sm:$0xff] }
 0x729   :  { %9101 = vmatprep.subr.bf16.mxu0 %v9100_v10  ;;  %v4551_v10 = vld [vmem:[#allocation14 + $0xf28] sm:$0xff]  ;;  %v9118_v52 = vpack.c.bf16 %v4544_v55, %v4538_v51  ;;  %v4586_v39 = vld [vmem:[#allocation14 + $0x1040] sm:$0xff]  ;;  %v5966_v55 = vld [vmem:[#allocation17 + $0x730] sm:$0xff] }
 0x72a   :  { %9355 = vmatpush1.bf16.msra.mxu1 %v9354_v2  ;;  %v5918_v2 = vld [vmem:[#allocation17 + $0x5b0] sm:$0xff]  ;;  %v9120_v7 = vpack.c.bf16 %v4557_v59, %v4551_v10  ;;  %v5979_v59 = vld [vmem:[#allocation17 + $0x798] sm:$0xff] }
 0x72b   :  { %9357 = vmatprep.subr.bf16.mxu1 %v9356_v42  ;;  %v5931_v42 = vld [vmem:[#allocation17 + $0x618] sm:$0xff]  ;;  %v9374_v16 = vpack.c.bf16 %v5924_v3, %v5918_v2 }
 0x72c   :  { %9103 = vmatpush1.bf16.msra.mxu0 %v9102_v8  ;;  %v4550_v8 = vld [vmem:[#allocation14 + $0xf20] sm:$0xff]  ;;  %v9376_v13 = vpack.c.bf16 %v5937_v6, %v5931_v42  ;;  %v4611_v6 = vld [vmem:[#allocation14 + $0x1108] sm:$0xff] }
 0x72d   :  { %9105 = vmatprep.subr.bf16.mxu0 %v9104_v21  ;;  %v4563_v21 = vld [vmem:[#allocation14 + $0xf88] sm:$0xff]  ;;  %v9122_v9 = vpack.c.bf16 %v4556_v11, %v4550_v8  ;;  %v4598_v3 = vld [vmem:[#allocation14 + $0x10a0] sm:$0xff]  ;;  %v5978_v11 = vld [vmem:[#allocation17 + $0x790] sm:$0xff] }
 0x72e   :  { %9359 = vmatpush1.bf16.msra.mxu1 %v9358_v44  ;;  %v5930_v44 = vld [vmem:[#allocation17 + $0x610] sm:$0xff]  ;;  %v9124_v24 = vpack.c.bf16 %v4569_v45, %v4563_v21  ;;  %v5991_v45 = vld [vmem:[#allocation17 + $0x7f8] sm:$0xff] }
 0x72f   :  { %9361 = vmatprep.subr.bf16.mxu1 %v9360_v18  ;;  %v5943_v18 = vld [vmem:[#allocation17 + $0x678] sm:$0xff]  ;;  %v9378_v20 = vpack.c.bf16 %v5936_v5, %v5930_v44 }
 0x730   :  { %9107 = vmatpush1.bf16.msra.mxu0 %v9106_v17  ;;  %v4562_v17 = vld [vmem:[#allocation14 + $0xf80] sm:$0xff]  ;;  %v9380_v29 = vpack.c.bf16 %v5949_v23, %v5943_v18  ;;  %v4623_v23 = vld [vmem:[#allocation14 + $0x1168] sm:$0xff] }
 0x731   :  { %9109 = vmatprep.subr.bf16.mxu0 %v9108_v26  ;;  %v4575_v26 = vld [vmem:[#allocation14 + $0xfe8] sm:$0xff]  ;;  %v9126_v43 = vpack.c.bf16 %v4568_v27, %v4562_v17  ;;  %v4610_v5 = vld [vmem:[#allocation14 + $0x1100] sm:$0xff]  ;;  %v5990_v27 = vld [vmem:[#allocation17 + $0x7f0] sm:$0xff] }
 0x732   :  { %9363 = vmatpush1.bf16.msra.mxu1 %v9362_v60  ;;  %v5942_v60 = vld [vmem:[#allocation17 + $0x670] sm:$0xff]  ;;  %v9128_v32 = vpack.c.bf16 %v4581_v63, %v4575_v26  ;;  %v6003_v63 = vld [vmem:[#allocation17 + $0x858] sm:$0xff] }
 0x733   :  { %9365 = vmatprep.subr.bf16.mxu1 %v9364_v22  ;;  %v5955_v22 = vld [vmem:[#allocation17 + $0x6d8] sm:$0xff]  ;;  %v9382_v58 = vpack.c.bf16 %v5948_v62, %v5942_v60 }
 0x734   :  { %9111 = vmatpush1.bf16.msra.mxu0 %v9110_v34  ;;  %v4574_v34 = vld [vmem:[#allocation14 + $0xfe0] sm:$0xff]  ;;  %v9384_v38 = vpack.c.bf16 %v5961_v33, %v5955_v22  ;;  %v4635_v33 = vld [vmem:[#allocation14 + $0x11c8] sm:$0xff] }
 0x735   :  { %9113 = vmatprep.subr.bf16.mxu0 %v9112_v53  ;;  %v4587_v53 = vld [vmem:[#allocation14 + $0x1048] sm:$0xff]  ;;  %v9130_v41 = vpack.c.bf16 %v4580_v19, %v4574_v34  ;;  %v4622_v62 = vld [vmem:[#allocation14 + $0x1160] sm:$0xff]  ;;  %v6002_v19 = vld [vmem:[#allocation17 + $0x850] sm:$0xff] }
 0x736   :  { %9367 = vmatpush1.bf16.msra.mxu1 %v9366_v40  ;;  %v5954_v40 = vld [vmem:[#allocation17 + $0x6d0] sm:$0xff] }
 0x737   :  { %9369 = vmatprep.subr.bf16.mxu1 %v9368_v15  ;;  %v5967_v15 = vld [vmem:[#allocation17 + $0x738] sm:$0xff]  ;;  %v9386_v31 = vpack.c.bf16 %v5960_v36, %v5954_v40 }
 0x738   :  { %9115 = vmatpush1.bf16.msra.mxu0 %v9114_v46  ;;  %v4592_v46 = vld [vmem:[#allocation14 + $0x1070] sm:$0xff]  ;;  %v9388_v51 = vpack.c.bf16 %v5973_v61, %v5967_v15  ;;  %v4634_v36 = vld [vmem:[#allocation14 + $0x11c0] sm:$0xff]  ;;  %v4647_v61 = vld [vmem:[#allocation14 + $0x1228] sm:$0xff] }
 0x739   :  { %9117 = vmatprep.subr.bf16.mxu0 %v9116_v49  ;;  %v4605_v49 = vld [vmem:[#allocation14 + $0x10d8] sm:$0xff]  ;;  %v9134_v10 = vpack.c.bf16 %v4592_v46, %v4586_v39 }
 0x73a   :  { %9371 = vmatpush1.bf16.msra.mxu1 %v9370_v56  ;;  %v5972_v56 = vld [vmem:[#allocation17 + $0x760] sm:$0xff]  ;;  %v9136_v2 = vpack.c.bf16 %v4605_v49, %v4599_v47  ;;  %v6014_v46 = vld [vmem:[#allocation17 + $0x8b0] sm:$0xff]  ;;  %v5741_v49 = vld [vmem:[#allocation17 + $0x28] sm:$0xff] }
 0x73b   :  { %9373 = vmatprep.subr.bf16.mxu1 %v9372_v0  ;;  %v5985_v0 = vld [vmem:[#allocation17 + $0x7c8] sm:$0xff]  ;;  %v9390_v42 = vpack.c.bf16 %v5972_v56, %v5966_v55  ;;  %v4646_v56 = vld [vmem:[#allocation14 + $0x1220] sm:$0xff] }
 0x73c   :  { %9119 = vmatpush1.bf16.msra.mxu0 %v9118_v52  ;;  %v4604_v52 = vld [vmem:[#allocation14 + $0x10d0] sm:$0xff]  ;;  %v9392_v8 = vpack.c.bf16 %v5985_v0, %v5979_v59  ;;  %v4659_v0 = vld [vmem:[#allocation14 + $0x1288] sm:$0xff] }
 0x73d   :  { %9121 = vmatprep.subr.bf16.mxu0 %v9120_v7  ;;  %v4617_v7 = vld [vmem:[#allocation14 + $0x1138] sm:$0xff]  ;;  %v9138_v21 = vpack.c.bf16 %v4604_v52, %v4598_v3  ;;  %v5740_v52 = vld [vmem:[#allocation17 + $0x20] sm:$0xff] }
 0x73e   :  { %9375 = vmatpush1.bf16.msra.mxu1 %v9374_v16  ;;  %v5984_v16 = vld [vmem:[#allocation17 + $0x7c0] sm:$0xff]  ;;  %v9140_v44 = vpack.c.bf16 %v4617_v7, %v4611_v6  ;;  %v5753_v7 = vld [vmem:[#allocation17 + $0x88] sm:$0xff] }
 0x73f   :  { %9377 = vmatprep.subr.bf16.mxu1 %v9376_v13  ;;  %v5997_v13 = vld [vmem:[#allocation17 + $0x828] sm:$0xff]  ;;  %v9394_v18 = vpack.c.bf16 %v5984_v16, %v5978_v11  ;;  %v4658_v16 = vld [vmem:[#allocation14 + $0x1280] sm:$0xff] }
 0x740   :  { %9123 = vmatpush1.bf16.msra.mxu0 %v9122_v9  ;;  %v4616_v9 = vld [vmem:[#allocation14 + $0x1130] sm:$0xff]  ;;  %v9396_v17 = vpack.c.bf16 %v5997_v13, %v5991_v45  ;;  %v4671_v13 = vld [vmem:[#allocation14 + $0x12e8] sm:$0xff] }
 0x741   :  { %6231 = vmatmul.mubr.f32.vlgmr.msra.gmra.mrb[20].mxu1 %v10511_v48  ;;  %9125 = vmatprep.subr.bf16.mxu0 %v9124_v24  ;;  %v9132_v48 = vpack.c.bf16 %v4593_v35, %v4587_v53  ;;  %v4629_v24 = vld [vmem:[#allocation14 + $0x1198] sm:$0xff]  ;;  %v9142_v26 = vpack.c.bf16 %v4616_v9, %v4610_v5  ;;  %v5752_v9 = vld [vmem:[#allocation17 + $0x80] sm:$0xff] }
 0x742   :  { %9379 = vmatpush1.bf16.msra.mxu1 %v9378_v20  ;;  %6301 = vmatprep.mubr.f32.mxu1 %v9916_v1  ;;  %v5996_v20 = vld [vmem:[#allocation17 + $0x820] sm:$0xff]  ;;  %v9144_v60 = vpack.c.bf16 %v4629_v24, %v4623_v23  ;;  %v6015_v35 = vld [vmem:[#allocation17 + $0x8b8] sm:$0xff]  ;;  %v5765_v24 = vld [vmem:[#allocation17 + $0xe8] sm:$0xff] }
 0x743   :  { %9381 = vmatprep.subr.bf16.mxu1 %v9380_v29  ;;  %v6009_v29 = vld [vmem:[#allocation17 + $0x888] sm:$0xff]  ;;  %v9398_v22 = vpack.c.bf16 %v5996_v20, %v5990_v27  ;;  %v4670_v20 = vld [vmem:[#allocation14 + $0x12e0] sm:$0xff] }
 0x744   :  { %9127 = vmatpush1.bf16.msra.mxu0 %v9126_v43  ;;  %v4628_v43 = vld [vmem:[#allocation14 + $0x1190] sm:$0xff]  ;;  %v9400_v34 = vpack.c.bf16 %v6009_v29, %v6003_v63  ;;  %v4683_v29 = vld [vmem:[#allocation14 + $0x1348] sm:$0xff] }
 0x745   :  { %9129 = vmatprep.subr.bf16.mxu0 %v9128_v32  ;;  %v4641_v32 = vld [vmem:[#allocation14 + $0x11f8] sm:$0xff]  ;;  %v9146_v53 = vpack.c.bf16 %v4628_v43, %v4622_v62  ;;  %v5764_v43 = vld [vmem:[#allocation17 + $0xe0] sm:$0xff] }
 0x746   :  { %9383 = vmatpush1.bf16.msra.mxu1 %v9382_v58  ;;  %v6008_v58 = vld [vmem:[#allocation17 + $0x880] sm:$0xff]  ;;  %v9148_v40 = vpack.c.bf16 %v4641_v32, %v4635_v33  ;;  %v5777_v33 = vld [vmem:[#allocation17 + $0x148] sm:$0xff]  ;;  %v5783_v32 = vld [vmem:[#allocation17 + $0x178] sm:$0xff] }
 0x747   :  { %9385 = vmatprep.subr.bf16.mxu1 %v9384_v38  ;;  %v6021_v38 = vld [vmem:[#allocation17 + $0x8e8] sm:$0xff]  ;;  %v9402_v15 = vpack.c.bf16 %v6008_v58, %v6002_v19 }
 0x748   :  { %9131 = vmatpush1.bf16.msra.mxu0 %v9130_v41  ;;  %v4640_v41 = vld [vmem:[#allocation14 + $0x11f0] sm:$0xff]  ;;  %v9404_v39 = vpack.c.bf16 %v6021_v38, %v6015_v35  ;;  %v4701_v35 = vld [vmem:[#allocation14 + $0x13d8] sm:$0xff]  ;;  %v9420_v38 = vpack.c.bf16 %v5783_v32, %v5777_v33 }
 0x749   :  { %9133 = vmatprep.subr.bf16.mxu0 %v9132_v48  ;;  %v4653_v48 = vld [vmem:[#allocation14 + $0x1258] sm:$0xff]  ;;  %v9150_v47 = vpack.c.bf16 %v4640_v41, %v4634_v36  ;;  %v4688_v19 = vld [vmem:[#allocation14 + $0x1370] sm:$0xff] }
 0x74a   :  { %9387 = vmatpush1.bf16.msra.mxu1 %v9386_v31  ;;  %v6020_v31 = vld [vmem:[#allocation17 + $0x8e0] sm:$0xff]  ;;  %v9152_v55 = vpack.c.bf16 %v4653_v48, %v4647_v61  ;;  %v5782_v36 = vld [vmem:[#allocation17 + $0x170] sm:$0xff]  ;;  %v5795_v61 = vld [vmem:[#allocation17 + $0x1d8] sm:$0xff] }
 0x74b   :  { %9389 = vmatprep.subr.bf16.mxu1 %v9388_v51  ;;  %v5747_v51 = vld [vmem:[#allocation17 + $0x58] sm:$0xff]  ;;  %v9406_v59 = vpack.c.bf16 %v6020_v31, %v6014_v46  ;;  %v4700_v46 = vld [vmem:[#allocation14 + $0x13d0] sm:$0xff] }
 0x74c   :  { %9135 = vmatpush1.bf16.msra.mxu0 %v9134_v10  ;;  %v4652_v10 = vld [vmem:[#allocation14 + $0x1250] sm:$0xff]  ;;  %v9408_v3 = vpack.c.bf16 %v5747_v51, %v5741_v49  ;;  %v4713_v49 = vld [vmem:[#allocation14 + $0x1438] sm:$0xff] }
 0x74d   :  { %9137 = vmatprep.subr.bf16.mxu0 %v9136_v2  ;;  %v4665_v2 = vld [vmem:[#allocation14 + $0x12b8] sm:$0xff]  ;;  %v9154_v6 = vpack.c.bf16 %v4652_v10, %v4646_v56  ;;  %v4736_v33 = vld [vmem:[#allocation14 + $0x14f0] sm:$0xff] }
 0x74e   :  { %9391 = vmatpush1.bf16.msra.mxu1 %v9390_v42  ;;  %v5746_v42 = vld [vmem:[#allocation17 + $0x50] sm:$0xff]  ;;  %v9156_v11 = vpack.c.bf16 %v4665_v2, %v4659_v0  ;;  %v5807_v0 = vld [vmem:[#allocation17 + $0x238] sm:$0xff] }
 0x74f   :  { %9393 = vmatprep.subr.bf16.mxu1 %v9392_v8  ;;  %v5759_v8 = vld [vmem:[#allocation17 + $0xb8] sm:$0xff]  ;;  %v9410_v45 = vpack.c.bf16 %v5746_v42, %v5740_v52  ;;  %v5794_v56 = vld [vmem:[#allocation17 + $0x1d0] sm:$0xff] }
 0x750   :  { %9139 = vmatpush1.bf16.msra.mxu0 %v9138_v21  ;;  %v4664_v21 = vld [vmem:[#allocation14 + $0x12b0] sm:$0xff]  ;;  %v9412_v5 = vpack.c.bf16 %v5759_v8, %v5753_v7  ;;  %v4725_v7 = vld [vmem:[#allocation14 + $0x1498] sm:$0xff] }
 0x751   :  { %9141 = vmatprep.subr.bf16.mxu0 %v9140_v44  ;;  %v4677_v44 = vld [vmem:[#allocation14 + $0x1318] sm:$0xff]  ;;  %v9158_v23 = vpack.c.bf16 %v4664_v21, %v4658_v16  ;;  %v4712_v52 = vld [vmem:[#allocation14 + $0x1430] sm:$0xff] }
 0x752   :  { %9395 = vmatpush1.bf16.msra.mxu1 %v9394_v18  ;;  %v5758_v18 = vld [vmem:[#allocation17 + $0xb0] sm:$0xff]  ;;  %v9160_v27 = vpack.c.bf16 %v4677_v44, %v4671_v13  ;;  %v5819_v13 = vld [vmem:[#allocation17 + $0x298] sm:$0xff] }
 0x753   :  { %9397 = vmatprep.subr.bf16.mxu1 %v9396_v17  ;;  %v5771_v17 = vld [vmem:[#allocation17 + $0x118] sm:$0xff]  ;;  %v9414_v63 = vpack.c.bf16 %v5758_v18, %v5752_v9  ;;  %v5806_v16 = vld [vmem:[#allocation17 + $0x230] sm:$0xff] }
 0x754   :  { %9143 = vmatpush1.bf16.msra.mxu0 %v9142_v26  ;;  %v4676_v26 = vld [vmem:[#allocation14 + $0x1310] sm:$0xff]  ;;  %v9416_v62 = vpack.c.bf16 %v5771_v17, %v5765_v24  ;;  %v4731_v17 = vld [vmem:[#allocation14 + $0x14c8] sm:$0xff] }
 0x755   :  { %9145 = vmatprep.subr.bf16.mxu0 %v9144_v60  ;;  %v9614_v60 = vld [vmem:[#allocation2 + $0x8] sm:$0xff]  ;;  %v4724_v9 = vld [vmem:[#allocation14 + $0x1490] sm:$0xff] }
 0x756   :  { %9399 = vmatpush1.bf16.msra.mxu1 %v9398_v22  ;;  %v5770_v22 = vld [vmem:[#allocation17 + $0x110] sm:$0xff] }
 0x757   :  { %9401 = vmatprep.subr.bf16.mxu1 %v9400_v34  ;;  %v4682_v34 = vld [vmem:[#allocation14 + $0x1340] sm:$0xff]  ;;  %v9418_v58 = vpack.c.bf16 %v5770_v22, %v5764_v43 }
 0x758   :  { %9147 = vmatpush1.bf16.msra.mxu0 %v9146_v53  ;;  %v4695_v53 = vld [vmem:[#allocation14 + $0x13a8] sm:$0xff]  ;;  %v9166_v41 = vpack.c.bf16 %v4688_v19, %v4682_v34  ;;  %v5831_v43 = vld [vmem:[#allocation17 + $0x2f8] sm:$0xff] }
 0x759   :  { %9149 = vmatprep.subr.bf16.mxu0 %v9148_v40  ;;  %v5776_v40 = vld [vmem:[#allocation17 + $0x140] sm:$0xff]  ;;  %v9168_v48 = vpack.c.bf16 %v4701_v35, %v4695_v53  ;;  %v4749_v34 = vld [vmem:[#allocation14 + $0x1558] sm:$0xff] }
 0x75a   :  { %9403 = vmatpush1.bf16.msra.mxu1 %v9402_v15  ;;  %v5789_v15 = vld [vmem:[#allocation17 + $0x1a8] sm:$0xff]  ;;  %v9422_v31 = vpack.c.bf16 %v5782_v36, %v5776_v40  ;;  %v5830_v53 = vld [vmem:[#allocation17 + $0x2f0] sm:$0xff]  ;;  %v5843_v40 = vld [vmem:[#allocation17 + $0x358] sm:$0xff] }
 0x75b   :  { %9405 = vmatprep.subr.bf16.mxu1 %v9404_v39  ;;  %v4694_v39 = vld [vmem:[#allocation14 + $0x13a0] sm:$0xff]  ;;  %v9424_v51 = vpack.c.bf16 %v5795_v61, %v5789_v15  ;;  %v4748_v15 = vld [vmem:[#allocation14 + $0x1550] sm:$0xff] }
 0x75c   :  { %9151 = vmatpush1.bf16.msra.mxu0 %v9150_v47  ;;  %v4707_v47 = vld [vmem:[#allocation14 + $0x1408] sm:$0xff]  ;;  %v9170_v10 = vpack.c.bf16 %v4700_v46, %v4694_v39  ;;  %v4761_v39 = vld [vmem:[#allocation14 + $0x15b8] sm:$0xff] }
 0x75d   :  { %9153 = vmatprep.subr.bf16.mxu0 %v9152_v55  ;;  %v5788_v55 = vld [vmem:[#allocation17 + $0x1a0] sm:$0xff]  ;;  %v9172_v2 = vpack.c.bf16 %v4713_v49, %v4707_v47  ;;  %v5842_v47 = vld [vmem:[#allocation17 + $0x350] sm:$0xff] }
 0x75e   :  { %9407 = vmatpush1.bf16.msra.mxu1 %v9406_v59  ;;  %v5801_v59 = vld [vmem:[#allocation17 + $0x208] sm:$0xff]  ;;  %v9426_v42 = vpack.c.bf16 %v5794_v56, %v5788_v55  ;;  %v5855_v55 = vld [vmem:[#allocation17 + $0x3b8] sm:$0xff] }
 0x75f   :  { %5641 = vmatmul.mubr.f32.vlgmr.msra.gmra.mrb[18].mxu0 %v10488_v12  ;;  %9409 = vmatprep.subr.bf16.mxu1 %v9408_v3  ;;  %v4689_v12 = vld [vmem:[#allocation14 + $0x1378] sm:$0xff]  ;;  %v4706_v3 = vld [vmem:[#allocation14 + $0x1400] sm:$0xff]  ;;  %v9428_v8 = vpack.c.bf16 %v5807_v0, %v5801_v59  ;;  %v4760_v59 = vld [vmem:[#allocation14 + $0x15b0] sm:$0xff] }
 0x760   :  { %9155 = vmatpush1.bf16.msra.mxu0 %v9154_v6  ;;  %5711 = vmatprep.mubr.f32.mxu0 %v10492_v25  ;;  %v9162_v25 = vpack.c.bf16 %v4676_v26, %v4670_v20  ;;  %v4719_v6 = vld [vmem:[#allocation14 + $0x1468] sm:$0xff]  ;;  %v9174_v21 = vpack.c.bf16 %v4712_v52, %v4706_v3  ;;  %v4773_v3 = vld [vmem:[#allocation14 + $0x1618] sm:$0xff] }
 0x761   :  { %6302 = vmatmul.mubr.f32.vlgmr.msra.gmra.mrb[20].mxu1 %v10515_v37  ;;  %9157 = vmatprep.subr.bf16.mxu0 %v9156_v11  ;;  %v9164_v37 = vpack.c.bf16 %v4689_v12, %v4683_v29  ;;  %v5800_v11 = vld [vmem:[#allocation17 + $0x200] sm:$0xff]  ;;  %v9176_v44 = vpack.c.bf16 %v4725_v7, %v4719_v6  ;;  %v5818_v12 = vld [vmem:[#allocation17 + $0x290] sm:$0xff] }
 0x762   :  { %9411 = vmatpush1.bf16.msra.mxu1 %v9410_v45  ;;  %6372 = vmatprep.mubr.f32.mxu1 %v9614_v60  ;;  %v5813_v45 = vld [vmem:[#allocation17 + $0x268] sm:$0xff]  ;;  %v9430_v24 = vpack.c.bf16 %v5806_v16, %v5800_v11  ;;  %v5812_v29 = vld [vmem:[#allocation17 + $0x260] sm:$0xff]  ;;  %v5854_v6 = vld [vmem:[#allocation17 + $0x3b0] sm:$0xff] }
 0x763   :  { %9413 = vmatprep.subr.bf16.mxu1 %v9412_v5  ;;  %v4718_v5 = vld [vmem:[#allocation14 + $0x1460] sm:$0xff]  ;;  %v9434_v32 = vpack.c.bf16 %v5818_v12, %v5812_v29 }
 0x764   :  { %9159 = vmatpush1.bf16.msra.mxu0 %v9158_v23  ;;  %v9178_v60 = vpack.c.bf16 %v4724_v9, %v4718_v5  ;;  %v5867_v11 = vld [vmem:[#allocation17 + $0x418] sm:$0xff] }
 0x765   :  { %9161 = vmatprep.subr.bf16.mxu0 %v9160_v27  ;;  %v4737_v27 = vld [vmem:[#allocation14 + $0x14f8] sm:$0xff] }
 0x766   :  { %9415 = vmatpush1.bf16.msra.mxu1 %v9414_v63  ;;  %v9432_v63 = vpack.c.bf16 %v5819_v13, %v5813_v45  ;;  %v9180_v22 = vpack.c.bf16 %v4737_v27, %v4731_v17  ;;  %v4772_v45 = vld [vmem:[#allocation14 + $0x1610] sm:$0xff]  ;;  %v4785_v5 = vld [vmem:[#allocation14 + $0x1678] sm:$0xff] }
 0x767   :  { %9417 = vmatprep.subr.bf16.mxu1 %v9416_v62  ;;  %v5825_v62 = vld [vmem:[#allocation17 + $0x2c8] sm:$0xff]  ;;  %v5866_v17 = vld [vmem:[#allocation17 + $0x410] sm:$0xff]  ;;  %v5879_v29 = vld [vmem:[#allocation17 + $0x478] sm:$0xff] }
 0x768   :  { %9163 = vmatpush1.bf16.msra.mxu0 %v9162_v25  ;;  %v4730_v25 = vld [vmem:[#allocation14 + $0x14c0] sm:$0xff]  ;;  %v9436_v19 = vpack.c.bf16 %v5831_v43, %v5825_v62  ;;  %v4784_v62 = vld [vmem:[#allocation14 + $0x1670] sm:$0xff] }
 0x769   :  { %9165 = vmatprep.subr.bf16.mxu0 %v9164_v37  ;;  %v4743_v37 = vld [vmem:[#allocation14 + $0x1528] sm:$0xff]  ;;  %v9182_v35 = vpack.c.bf16 %v4736_v33, %v4730_v25  ;;  %v4797_v25 = vld [vmem:[#allocation14 + $0x16d8] sm:$0xff] }
 0x76a   :  { %9419 = vmatpush1.bf16.msra.mxu1 %v9418_v58  ;;  %v5824_v58 = vld [vmem:[#allocation17 + $0x2c0] sm:$0xff]  ;;  %v9184_v36 = vpack.c.bf16 %v4749_v34, %v4743_v37  ;;  %v5878_v37 = vld [vmem:[#allocation17 + $0x470] sm:$0xff] }
 0x76b   :  { %9421 = vmatprep.subr.bf16.mxu1 %v9420_v38  ;;  %v5837_v38 = vld [vmem:[#allocation17 + $0x328] sm:$0xff]  ;;  %v9438_v61 = vpack.c.bf16 %v5830_v53, %v5824_v58  ;;  %v5891_v58 = vld [vmem:[#allocation17 + $0x4d8] sm:$0xff] }
 0x76c   :  { %9167 = vmatpush1.bf16.msra.mxu0 %v9166_v41  ;;  %v4742_v41 = vld [vmem:[#allocation14 + $0x1520] sm:$0xff]  ;;  %v9440_v46 = vpack.c.bf16 %v5843_v40, %v5837_v38  ;;  %v4796_v38 = vld [vmem:[#allocation14 + $0x16d0] sm:$0xff] }
 0x76d   :  { %9169 = vmatprep.subr.bf16.mxu0 %v9168_v48  ;;  %v4755_v48 = vld [vmem:[#allocation14 + $0x1588] sm:$0xff]  ;;  %v9186_v49 = vpack.c.bf16 %v4748_v15, %v4742_v41  ;;  %v4809_v41 = vld [vmem:[#allocation14 + $0x1738] sm:$0xff] }
 0x76e   :  { %9423 = vmatpush1.bf16.msra.mxu1 %v9422_v31  ;;  %v5836_v31 = vld [vmem:[#allocation17 + $0x320] sm:$0xff]  ;;  %v9188_v56 = vpack.c.bf16 %v4761_v39, %v4755_v48  ;;  %v5890_v48 = vld [vmem:[#allocation17 + $0x4d0] sm:$0xff] }
 0x76f   :  { %9425 = vmatprep.subr.bf16.mxu1 %v9424_v51  ;;  %v5849_v51 = vld [vmem:[#allocation17 + $0x388] sm:$0xff]  ;;  %v9442_v0 = vpack.c.bf16 %v5842_v47, %v5836_v31  ;;  %v5903_v31 = vld [vmem:[#allocation17 + $0x538] sm:$0xff] }
 0x770   :  { %9171 = vmatpush1.bf16.msra.mxu0 %v9170_v10  ;;  %v4754_v10 = vld [vmem:[#allocation14 + $0x1580] sm:$0xff]  ;;  %v9444_v52 = vpack.c.bf16 %v5855_v55, %v5849_v51  ;;  %v4808_v51 = vld [vmem:[#allocation14 + $0x1730] sm:$0xff] }
 0x771   :  { %9173 = vmatprep.subr.bf16.mxu0 %v9172_v2  ;;  %v4767_v2 = vld [vmem:[#allocation14 + $0x15e8] sm:$0xff]  ;;  %v9190_v7 = vpack.c.bf16 %v4760_v59, %v4754_v10  ;;  %v4821_v10 = vld [vmem:[#allocation14 + $0x1798] sm:$0xff] }
 0x772   :  { %9427 = vmatpush1.bf16.msra.mxu1 %v9426_v42  ;;  %v10526_v18 = vpop.f32.mrb[16].mxu0  ;;  %v10528_v23 = vpop.f32.mrb[16].mxu1  ;;  %v5848_v42 = vld [vmem:[#allocation17 + $0x380] sm:$0xff]  ;;  %v9192_v16 = vpack.c.bf16 %v4773_v3, %v4767_v2  ;;  %v5902_v2 = vld [vmem:[#allocation17 + $0x530] sm:$0xff] }
 0x773   :  { %v10530_v20 = vpop.f32.mrb[17].mxu0  ;;  %v10532_v26 = vpop.f32.mrb[17].mxu1  ;;  %9429 = vmatprep.subr.bf16.mxu1 %v9428_v8  ;;  %v5861_v8 = vld [vmem:[#allocation17 + $0x3e8] sm:$0xff]  ;;  %v9446_v13 = vpack.c.bf16 %v5854_v6, %v5848_v42  ;;  %v5915_v42 = vld [vmem:[#allocation17 + $0x598] sm:$0xff] }
 0x774   :  { %9175 = vmatpush1.bf16.msra.mxu0 %v9174_v21  ;;  %v4766_v21 = vld [vmem:[#allocation14 + $0x15e0] sm:$0xff]  ;;  %v9448_v9 = vpack.c.bf16 %v5867_v11, %v5861_v8  ;;  %v4820_v8 = vld [vmem:[#allocation14 + $0x1790] sm:$0xff] }
 0x775   :  { %9177 = vmatprep.subr.bf16.mxu0 %v9176_v44  ;;  %v4779_v44 = vld [vmem:[#allocation14 + $0x1648] sm:$0xff]  ;;  %v9194_v27 = vpack.c.bf16 %v4772_v45, %v4766_v21  ;;  %v4833_v21 = vld [vmem:[#allocation14 + $0x17f8] sm:$0xff] }
 0x776   :  { %9431 = vmatpush1.bf16.msra.mxu1 %v9430_v24  ;;  %v5860_v24 = vld [vmem:[#allocation17 + $0x3e0] sm:$0xff]  ;;  %v9196_v12 = vpack.c.bf16 %v4785_v5, %v4779_v44  ;;  %v5914_v44 = vld [vmem:[#allocation17 + $0x590] sm:$0xff] }
 0x777   :  { %9433 = vmatprep.subr.bf16.mxu1 %v9432_v63  ;;  %v5873_v63 = vld [vmem:[#allocation17 + $0x448] sm:$0xff]  ;;  %v9450_v43 = vpack.c.bf16 %v5866_v17, %v5860_v24  ;;  %v5927_v24 = vld [vmem:[#allocation17 + $0x5f8] sm:$0xff] }
 0x778   :  { %9179 = vmatpush1.bf16.msra.mxu0 %v9178_v60  ;;  %v4778_v60 = vld [vmem:[#allocation14 + $0x1640] sm:$0xff]  ;;  %v9452_v33 = vpack.c.bf16 %v5879_v29, %v5873_v63  ;;  %v4832_v63 = vld [vmem:[#allocation14 + $0x17f0] sm:$0xff] }
 0x779   :  { %9181 = vmatprep.subr.bf16.mxu0 %v9180_v22  ;;  %v4791_v22 = vld [vmem:[#allocation14 + $0x16a8] sm:$0xff]  ;;  %v9198_v34 = vpack.c.bf16 %v4784_v62, %v4778_v60  ;;  %v5926_v62 = vld [vmem:[#allocation17 + $0x5f0] sm:$0xff] }
 0x77a   :  { %9435 = vmatpush1.bf16.msra.mxu1 %v9434_v32  ;;  %v5872_v32 = vld [vmem:[#allocation17 + $0x440] sm:$0xff]  ;;  %v9200_v53 = vpack.c.bf16 %v4797_v25, %v4791_v22  ;;  %v5933_v22 = vld [vmem:[#allocation17 + $0x628] sm:$0xff]  ;;  %v5939_v25 = vld [vmem:[#allocation17 + $0x658] sm:$0xff] }
 0x77b   :  { %9437 = vmatprep.subr.bf16.mxu1 %v9436_v19  ;;  %v5885_v19 = vld [vmem:[#allocation17 + $0x4a8] sm:$0xff]  ;;  %v9454_v40 = vpack.c.bf16 %v5878_v37, %v5872_v32  ;;  %v5920_v60 = vld [vmem:[#allocation17 + $0x5c0] sm:$0xff]  ;;  %v9472_v32 = vpack.c.bf16 %v5939_v25, %v5933_v22 }
 0x77c   :  { %9183 = vmatpush1.bf16.msra.mxu0 %v9182_v35  ;;  %v4790_v35 = vld [vmem:[#allocation14 + $0x16a0] sm:$0xff]  ;;  %v9456_v15 = vpack.c.bf16 %v5891_v58, %v5885_v19  ;;  %v5945_v19 = vld [vmem:[#allocation17 + $0x688] sm:$0xff] }
 0x77d   :  { %9185 = vmatprep.subr.bf16.mxu0 %v9184_v36  ;;  %v4803_v36 = vld [vmem:[#allocation14 + $0x1708] sm:$0xff]  ;;  %v9202_v39 = vpack.c.bf16 %v4796_v38, %v4790_v35  ;;  %v5951_v58 = vld [vmem:[#allocation17 + $0x6b8] sm:$0xff] }
 0x77e   :  { %9439 = vmatpush1.bf16.msra.mxu1 %v9438_v61  ;;  %v5884_v61 = vld [vmem:[#allocation17 + $0x4a0] sm:$0xff]  ;;  %v9204_v47 = vpack.c.bf16 %v4809_v41, %v4803_v36  ;;  %v9476_v35 = vpack.c.bf16 %v5951_v58, %v5945_v19  ;;  %v5957_v36 = vld [vmem:[#allocation17 + $0x6e8] sm:$0xff]  ;;  %v5963_v41 = vld [vmem:[#allocation17 + $0x718] sm:$0xff] }
 0x77f   :  { %9441 = vmatprep.subr.bf16.mxu1 %v9440_v46  ;;  %v5897_v46 = vld [vmem:[#allocation17 + $0x508] sm:$0xff]  ;;  %v9458_v55 = vpack.c.bf16 %v5890_v48, %v5884_v61  ;;  %v5932_v37 = vld [vmem:[#allocation17 + $0x620] sm:$0xff]  ;;  %v9480_v48 = vpack.c.bf16 %v5963_v41, %v5957_v36 }
 0x780   :  { %9187 = vmatpush1.bf16.msra.mxu0 %v9186_v49  ;;  %v4802_v49 = vld [vmem:[#allocation14 + $0x1700] sm:$0xff]  ;;  %v9460_v59 = vpack.c.bf16 %v5903_v31, %v5897_v46  ;;  %v5962_v46 = vld [vmem:[#allocation17 + $0x710] sm:$0xff]  ;;  %v5969_v31 = vld [vmem:[#allocation17 + $0x748] sm:$0xff] }
 0x781   :  { %9189 = vmatprep.subr.bf16.mxu0 %v9188_v56  ;;  %v4815_v56 = vld [vmem:[#allocation14 + $0x1768] sm:$0xff]  ;;  %v9206_v3 = vpack.c.bf16 %v4808_v51, %v4802_v49 }
 0x782   :  { %9443 = vmatpush1.bf16.msra.mxu1 %v9442_v0  ;;  %v5896_v0 = vld [vmem:[#allocation17 + $0x500] sm:$0xff]  ;;  %v9208_v6 = vpack.c.bf16 %v4821_v10, %v4815_v56  ;;  %v5981_v56 = vld [vmem:[#allocation17 + $0x7a8] sm:$0xff]  ;;  %v5987_v10 = vld [vmem:[#allocation17 + $0x7d8] sm:$0xff] }
 0x783   :  { %9445 = vmatprep.subr.bf16.mxu1 %v9444_v52  ;;  %v5909_v52 = vld [vmem:[#allocation17 + $0x568] sm:$0xff]  ;;  %v9462_v11 = vpack.c.bf16 %v5902_v2, %v5896_v0  ;;  %v5944_v38 = vld [vmem:[#allocation17 + $0x680] sm:$0xff]  ;;  %v9488_v0 = vpack.c.bf16 %v5987_v10, %v5981_v56 }
 0x784   :  { %9191 = vmatpush1.bf16.msra.mxu0 %v9190_v7  ;;  %v4814_v7 = vld [vmem:[#allocation14 + $0x1760] sm:$0xff]  ;;  %v9464_v45 = vpack.c.bf16 %v5915_v42, %v5909_v52 }
 0x785   :  { %9193 = vmatprep.subr.bf16.mxu0 %v9192_v16  ;;  %v4827_v16 = vld [vmem:[#allocation14 + $0x17c8] sm:$0xff]  ;;  %v9210_v5 = vpack.c.bf16 %v4820_v8, %v4814_v7  ;;  %v5999_v52 = vld [vmem:[#allocation17 + $0x838] sm:$0xff]  ;;  %v5998_v8 = vld [vmem:[#allocation17 + $0x830] sm:$0xff] }
 0x786   :  { %9447 = vmatpush1.bf16.msra.mxu1 %v9446_v13  ;;  %v5908_v13 = vld [vmem:[#allocation17 + $0x560] sm:$0xff]  ;;  %v9212_v17 = vpack.c.bf16 %v4833_v21, %v4827_v16  ;;  %v6011_v16 = vld [vmem:[#allocation17 + $0x898] sm:$0xff] }
 0x787   :  { %9449 = vmatprep.subr.bf16.mxu1 %v9448_v9  ;;  %v5921_v9 = vld [vmem:[#allocation17 + $0x5c8] sm:$0xff]  ;;  %v9466_v29 = vpack.c.bf16 %v5914_v44, %v5908_v13  ;;  %v5968_v51 = vld [vmem:[#allocation17 + $0x740] sm:$0xff]  ;;  %v6010_v44 = vld [vmem:[#allocation17 + $0x890] sm:$0xff] }
 0x788   :  { %9195 = vmatpush1.bf16.msra.mxu0 %v9194_v27  ;;  %v4826_v27 = vld [vmem:[#allocation14 + $0x17c0] sm:$0xff] }
 0x789   :  { %9197 = vmatprep.subr.bf16.mxu0 %v9196_v12  ;;  %v9468_v12 = vpack.c.bf16 %v5927_v24, %v5921_v9  ;;  %v5980_v2 = vld [vmem:[#allocation17 + $0x7a0] sm:$0xff]  ;;  %v6023_v9 = vld [vmem:[#allocation17 + $0x8f8] sm:$0xff] }
 0x78a   :  { %9451 = vmatpush1.bf16.msra.mxu1 %v9450_v43  ;;  %v9214_v43 = vpack.c.bf16 %v4832_v63, %v4826_v27  ;;  %v5992_v7 = vld [vmem:[#allocation17 + $0x800] sm:$0xff]  ;;  %v6022_v63 = vld [vmem:[#allocation17 + $0x8f0] sm:$0xff] }
 0x78b   :  { %9453 = vmatprep.subr.bf16.mxu1 %v9452_v33  ;;  %v9470_v33 = vpack.c.bf16 %v5926_v62, %v5920_v60  ;;  %v9494_v21 = vpack.c.bf16 %v5998_v8, %v5992_v7  ;;  %v6004_v13 = vld [vmem:[#allocation17 + $0x860] sm:$0xff]  ;;  %v4834_v60 = vld [vmem:[#allocation16] sm:$0x3f] }
 0x78c   :  { %9199 = vmatpush1.bf16.msra.mxu0 %v9198_v34  ;;  %v5938_v34 = vld [vmem:[#allocation17 + $0x650] sm:$0xff]  ;;  %v9498_v24 = vpack.c.bf16 %v6010_v44, %v6004_v13  ;;  %v6016_v27 = vld [vmem:[#allocation17 + $0x8c0] sm:$0xff]  ;;  %v4839_v62 = vrot.slane %v4834_v60, %v10336_v14 }
 0x78d   :  { %9201 = vmatprep.subr.bf16.mxu0 %v9200_v53  ;;  %v9474_v53 = vpack.c.bf16 %v5938_v34, %v5932_v37 }
 0x78e   :  { %9455 = vmatpush1.bf16.msra.mxu1 %v9454_v40  ;;  %v5950_v40 = vld [vmem:[#allocation17 + $0x6b0] sm:$0xff]  ;;  %v9520_v22 = vadd.f32 %v10526_v18, %v4839_v62 }
 0x78f   :  { %9457 = vmatprep.subr.bf16.mxu1 %v9456_v15  ;;  %v9615_v15 = vld [vmem:[#allocation2] sm:$0xff]  ;;  %v9478_v61 = vpack.c.bf16 %v5950_v40, %v5944_v38 }
 0x790   :  { %9203 = vmatpush1.bf16.msra.mxu0 %v9202_v39  ;;  %v5956_v39 = vld [vmem:[#allocation17 + $0x6e0] sm:$0xff]  ;;  %vm5718_vm1 = vcmp.ge.f32.partialorder %v9520_v22, 0.0 }
 0x791   :  { %9205 = vmatprep.subr.bf16.mxu0 %v9204_v47  ;;  %v5975_v47 = vld [vmem:[#allocation17 + $0x778] sm:$0xff] }
 0x792   :  { %9459 = vmatpush1.bf16.msra.mxu1 %v9458_v55  ;;  %v9484_v49 = vpack.c.bf16 %v5975_v47, %v5969_v31  ;;  %v5974_v55 = vld [vmem:[#allocation17 + $0x770] sm:$0xff] }
 0x793   :  { %9461 = vmatprep.subr.bf16.mxu1 %v9460_v59  ;;  %v9486_v59 = vpack.c.bf16 %v5974_v55, %v5968_v51 }
 0x794   :  { %9207 = vmatpush1.bf16.msra.mxu0 %v9206_v3  ;;  %v5993_v3 = vld [vmem:[#allocation17 + $0x808] sm:$0xff] }
 0x795   :  { %9209 = vmatprep.subr.bf16.mxu0 %v9208_v6  ;;  %v9492_v6 = vpack.c.bf16 %v5999_v52, %v5993_v3 }
 0x796   :  { %9463 = vmatpush1.bf16.msra.mxu1 %v9462_v11  ;;  %v6005_v11 = vld [vmem:[#allocation17 + $0x868] sm:$0xff] }
 0x797   :  { %9465 = vmatprep.subr.bf16.mxu1 %v9464_v45  ;;  %v9496_v45 = vpack.c.bf16 %v6011_v16, %v6005_v11 }
 0x798   :  { %9211 = vmatpush1.bf16.msra.mxu0 %v9210_v5  ;;  %v6017_v5 = vld [vmem:[#allocation17 + $0x8c8] sm:$0xff] }
 0x799   :  { %9213 = vmatprep.subr.bf16.mxu0 %v9212_v17  ;;  %v9500_v17 = vpack.c.bf16 %v6023_v9, %v6017_v5 }
 0x79a   :  { %9467 = vmatpush1.bf16.msra.mxu1 %v9466_v29  ;;  %v9502_v29 = vpack.c.bf16 %v6022_v63, %v6016_v27 }
 0x79b   :  { %9469 = vmatprep.subr.bf16.mxu1 %v9468_v12  ;;  %v9616_v12 = vld [vmem:[#allocation2 + $0x10] sm:$0xff] }
 0x79c   :  { %9215 = vmatpush1.bf16.msra.mxu0 %v9214_v43  ;;  %v4843_v43 = vrot.slane %v4834_v60, %v10341_v28 }
 0x79e   :  { %9471 = vmatpush1.bf16.msra.mxu1 %v9470_v33  ;;  %v9521_v25 = vadd.f32 %v10530_v20, %v4843_v43  ;;  %v5724_v33 = vmul.f32 0.01, %v9520_v22 }
 0x79f   :  { %5712 = vmatmul.mubr.f32.vlgmr.msra.gmra.mrb[18].mxu0 %v10501_v4  ;;  %9473 = vmatprep.subr.bf16.mxu1 %v9472_v32  ;;  %v9482_v4 = vpack.c.bf16 %v5962_v46, %v5956_v39  ;;  %v10540_v32 = vld [vmem:[#allocation19] sm:$0x3f]  ;;  %v4851_v39 = vrot.slane %v4834_v60, %v10344_v30 }
 0x7a0   :  { %v5725_v37 = vmul.f32 0.01, %v9521_v25  ;;  %vm5719_vm2 = vcmp.ge.f32.partialorder %v9521_v25, 0.0  ;;  %v6461_v34 = vrot.slane %v10540_v32, %v10336_v14  ;;  %v5730_v19 = vsel %vm5718_vm1, %v9520_v22, %v5724_v33 }
 0x7a1   :  { %6373 = vmatmul.mubr.f32.vlgmr.msra.gmra.mrb[22].mxu1 %v9615_v15  ;;  %v4847_v14 = vrot.slane %v4834_v60, %v10367_v57  ;;  %v9523_v46 = vadd.f32 %v10532_v26, %v4851_v39  ;;  %v6473_v55 = vrot.slane %v10540_v32, %v10344_v30  ;;  %v4859_v30 = vrot.slane %v4834_v60, %v10377_v54 }
 0x7a2   :  { %9475 = vmatpush1.bf16.msra.mxu1 %v9474_v53  ;;  %6443 = vmatprep.mubr.f32.mxu1 %v9916_v1  ;;  %v5986_v1 = vld [vmem:[#allocation17 + $0x7d0] sm:$0xff]  ;;  %v6465_v53 = vrot.slane %v10540_v32, %v10341_v28  ;;  %v5731_v38 = vsel %vm5719_vm2, %v9521_v25, %v5725_v37  ;;  %v6481_v44 = vrot.slane %v10540_v32, %v10377_v54 }
 0x7a3   :  { %9477 = vmatprep.subr.bf16.mxu1 %v9476_v35  ;;  %v9490_v42 = vpack.c.bf16 %v5986_v1, %v5980_v2  ;;  %v9522_v28 = vadd.f32 %v10528_v23, %v4847_v14  ;;  %v5727_v47 = vmul.f32 0.01, %v9523_v46  ;;  %vm5721_vm6 = vcmp.ge.f32.partialorder %v9523_v46, 0.0 }
 0x7a5   :  { %v5726_v31 = vmul.f32 0.01, %v9522_v28  ;;  %vm5720_vm5 = vcmp.ge.f32.partialorder %v9522_v28, 0.0  ;;  %v5733_v10 = vsel %vm5721_vm6, %v9523_v46, %v5727_v47 }
 0x7a6   :  { %9479 = vmatpush1.bf16.msra.mxu1 %v9478_v61 }
 0x7a7   :  { %9481 = vmatprep.subr.bf16.mxu1 %v9480_v48 }
 0x7aa   :  { %9483 = vmatpush1.bf16.msra.mxu1 %v9482_v4  ;;  %v6469_v4 = vrot.slane %v10540_v32, %v10367_v57 }
 0x7ab   :  { %9485 = vmatprep.subr.bf16.mxu1 %v9484_v49  ;;  %v5732_v49 = vsel %vm5720_vm5, %v9522_v28, %v5726_v31 }
 0x7ae   :  { %9487 = vmatpush1.bf16.msra.mxu1 %v9486_v59 }
 0x7af   :  { %9489 = vmatprep.subr.bf16.mxu1 %v9488_v0 }
 0x7b2   :  { %9491 = vmatpush1.bf16.msra.mxu1 %v9490_v42 }
 0x7b3   :  { %9493 = vmatprep.subr.bf16.mxu1 %v9492_v6  ;;  %v4855_v6 = vrot.slane %v4834_v60, %v10392_v50 }
 0x7b6   :  { %9495 = vmatpush1.bf16.msra.mxu1 %v9494_v21  ;;  %v6477_v21 = vrot.slane %v10540_v32, %v10392_v50 }
 0x7b7   :  { %9497 = vmatprep.subr.bf16.mxu1 %v9496_v45 }
 0x7ba   :  { %9499 = vmatpush1.bf16.msra.mxu1 %v9498_v24 }
 0x7bb   :  { %9501 = vmatprep.subr.bf16.mxu1 %v9500_v17 }
 0x7be   :  { %9503 = vmatpush1.bf16.msra.mxu1 %v9502_v29 }
 0x7c1   :  { %6444 = vmatmul.mubr.f32.vlgmr.msra.gmra.mrb[22].mxu1 %v9616_v12 }
 0x7d4   :  { %v6161_v58 = vpop.f32.mrb[18].mxu1 }
 0x7d5   :  { %v6450_v35 = vadd.f32 %v6161_v58, %v5730_v19  ;;  %v6163_v40 = vpop.f32.mrb[19].mxu1 }
 0x7d6   :  { %v6451_v18 = vadd.f32 %v6163_v40, %v5731_v38 }
 0x7d7   :  { %v6488_v36 = vadd.f32 %v6461_v34, %v6450_v35 }
 0x7d8   :  { %v6489_v20 = vadd.f32 %v6465_v53, %v6451_v18 }
 0x7d9   :  { %vm6494_vm3 = vcmp.ge.f32.partialorder %v6488_v36, 0.0  ;;  %v6500_v41 = vmul.f32 0.01, %v6488_v36 }
 0x7da   :  { %vm6495_vm4 = vcmp.ge.f32.partialorder %v6489_v20, 0.0  ;;  %v6501_v15 = vmul.f32 0.01, %v6489_v20 }
 0x7db   :  { %v6506_v61 = vsel %vm6494_vm3, %v6488_v36, %v6500_v41 }
 0x7dc   :  { %6512 = vst [vmem:[#allocation20] sm:$0xff] %v6506_v61  ;;  %v6507_v48 = vsel %vm6495_vm4, %v6489_v20, %v6501_v15 }
 0x7dd   :  { %6513 = vst [vmem:[#allocation20 + $0x8] sm:$0xff] %v6507_v48 }
 0x834   :  { %v6303_v51 = vpop.f32.mrb[20].mxu1 }
 0x835   :  { %v6452_v56 = vadd.f32 %v6303_v51, %v5732_v49  ;;  %v6305_v59 = vpop.f32.mrb[21].mxu1 }
 0x836   :  { %v6453_v0 = vadd.f32 %v6305_v59, %v5733_v10 }
 0x837   :  { %v6490_v2 = vadd.f32 %v6469_v4, %v6452_v56 }
 0x838   :  { %v6491_v23 = vadd.f32 %v6473_v55, %v6453_v0 }
 0x839   :  { %vm6496_vm7 = vcmp.ge.f32.partialorder %v6490_v2, 0.0  ;;  %v6502_v26 = vmul.f32 0.01, %v6490_v2 }
 0x83a   :  { %vm6497_vm8 = vcmp.ge.f32.partialorder %v6491_v23, 0.0  ;;  %v6503_v1 = vmul.f32 0.01, %v6491_v23 }
 0x83b   :  { %v6508_v3 = vsel %vm6496_vm7, %v6490_v2, %v6502_v26 }
 0x83c   :  { %6514 = vst [vmem:[#allocation20 + $0x10] sm:$0xff] %v6508_v3  ;;  %v6509_v52 = vsel %vm6497_vm8, %v6491_v23, %v6503_v1 }
 0x83d   :  { %6515 = vst [vmem:[#allocation20 + $0x18] sm:$0xff] %v6509_v52 }
 0x872   :  { %v5713_v57 = vpop.f32.mrb[18].mxu0 }
 0x873   :  { %v5715_v42 = vpop.f32.mrb[19].mxu0  ;;  %v9524_v7 = vadd.f32 %v5713_v57, %v4855_v6 }
 0x874   :  { %v9525_v8 = vadd.f32 %v5715_v42, %v4859_v30 }
 0x875   :  { %v5728_v11 = vmul.f32 0.01, %v9524_v7  ;;  %vm5722_vm9 = vcmp.ge.f32.partialorder %v9524_v7, 0.0 }
 0x876   :  { %v5729_v16 = vmul.f32 0.01, %v9525_v8  ;;  %vm5723_vm10 = vcmp.ge.f32.partialorder %v9525_v8, 0.0 }
 0x877   :  { %v5734_v45 = vsel %vm5722_vm9, %v9524_v7, %v5728_v11 }
 0x878   :  { %v5735_v9 = vsel %vm5723_vm10, %v9525_v8, %v5729_v16 }
 0x894   :  { %v6445_v13 = vpop.f32.mrb[22].mxu1 }
 0x895   :  { %v6454_v5 = vadd.f32 %v6445_v13, %v5734_v45  ;;  %v6447_v24 = vpop.f32.mrb[23].mxu1 }
 0x896   :  { %v6455_v17 = vadd.f32 %v6447_v24, %v5735_v9 }
 0x897   :  { %v6492_v27 = vadd.f32 %v6477_v21, %v6454_v5 }
 0x898   :  { %v6493_v63 = vadd.f32 %v6481_v44, %v6455_v17 }
 0x899   :  { %vm6498_vm11 = vcmp.ge.f32.partialorder %v6492_v27, 0.0  ;;  %v6504_v29 = vmul.f32 0.01, %v6492_v27 }
 0x89a   :  { %vm6499_vm12 = vcmp.ge.f32.partialorder %v6493_v63, 0.0  ;;  %v6505_v12 = vmul.f32 0.01, %v6493_v63 }
 0x89b   :  { %v6510_v60 = vsel %vm6498_vm11, %v6492_v27, %v6504_v29 }
 0x89c   :  { %6516 = vst [vmem:[#allocation20 + $0x20] sm:$0xff] %v6510_v60  ;;  %v6511_v50 = vsel %vm6499_vm12, %v6493_v63, %v6505_v12 }
 0x89d   :  { %6517 = vst [vmem:[#allocation20 + $0x28] sm:$0xff] %v6511_v50 }
 0x89e   :  { %9870 = shalt.err (!%p9867_p8)
}
 0x89f   :  { %s9871_s0 = scalar_lea.hbm %s10583_s11, 768 }
 0x8a0   :  { %p9872_p9 = scmp.ne.s32.totalorder %s10583_s11, %s9871_s0  ;;  %p9875_p10 = scmp.lt.u32.totalorder %s9871_s0, %s10583_s11 }
 0x8a2   :  { %p9877_p11 = pnand %p9875_p10, %p9872_p9 }
 0x8a4   :  { %9880 = shalt.err (!%p9877_p11)
}
 0x8a5   :  { %6527 = dma.vmem_to_hbm [thread:$0]  %s6525_s19, 768, %s10583_s11, [#allocation4]  }
 0x8a6   :  { %9893 = dma.done.wait [#allocation4], 768  }
 0x8a7   :  { %9894 = vsyncadd [#allocation4], 4294966528 }
 0x8a8   :  { %6531 = vsyncpa [#allocation3], 1 }
 0x8a9   :  { %6532 = vsyncpa [#allocation6], 1 }
 0x8aa   :  { %6533 = vsyncpa [#allocation9], 1 }
 0x8ab   :  { %6534 = vsyncpa [#allocation12], 1 }
 0x8ac   :  { %6535 = vsyncpa [#allocation15], 1 }
 0x8ad   :  { %6536 = vsyncpa [#allocation18], 1 }
 0x8ae   :  { %6537 = vsyncpa [#allocation4], 1 }

</bundles_post_ra>
